<compile_context>
chip_gen: v5e
topology: v5e:2x2
jax: 0.10.0
libtpu: 0.0.40
codegen_flags: <defaults>
</compile_context>

<pallas_src>
import functools
import math

import jax
import jax.numpy as jnp
from jax import lax
from jax.experimental import pallas as pl
from jax.experimental.pallas import tpu as pltpu


def _cdiv(a, b):
    return -(-a // b)


def _round_up(a, b):
    return _cdiv(a, b) * b


def _sublanes_per_vreg(itemsize):
    # (8,128) 32-bit vreg tile; sub-32-bit dtypes pack along sublanes.
    return max(8, 32 // itemsize)


def _vmem_capacity_bytes():
    try:
        cap = getattr(pltpu.get_tpu_info(), "vmem_capacity_bytes", None)
        if cap:
            return int(cap)
    except Exception:
        pass
    return 64 * 1024 * 1024  # conservative default (v7x per-TensorCore VMEM)


def _fold_rows_into_channels(m, num_units, group, itemsize):
    """Pick k (power of two dividing m) to view (m, C) as (m/k, k*C).

    Free row-major reshape; maxout with k*num_units units on the folded view is
    identical to the original.  Widens the output lane dim (>=128 lanes ->
    unmasked stores, dense writeback DMA) and widens narrow-C input rows.
    """
    k = 1
    c = num_units * group
    while True:
        nk = 2 * k
        if m % nk:
            break
        if num_units * nk > 512:            # keep the unit axis manageable
            break
        want_lanes = num_units * k < 128     # output rows not yet lane-dense
        want_bytes = c * k * itemsize < 2048  # input rows still narrow (<512 f32 lanes)
        if not (want_lanes or want_bytes):
            break
        if m // nk < 8 and not want_lanes:   # keep >=8 rows unless lanes needed
            break
        k = nk
    return k


def _pick_unit_chunk(num_units, group, rows_sub, itemsize):
    """Units per reduce chunk: lane-aligned (uc*group % 128 == 0) when possible,
    sized so the padded (rows_sub, uc, group) intermediate stays ~<=32 vregs."""
    spv = _sublanes_per_vreg(itemsize)
    lpu = _cdiv(group, 128)                  # lane-vregs per unit in the 3-D view
    budget = 32                              # target live vregs per reduce chunk
    q = budget // max(1, rows_sub * lpu)     # sublane-groups of units per chunk
    max_uc = spv * q if q >= 1 else 1
    if 0 < group < 128 and 128 % group == 0:
        al = 128 // group                    # units per exact 128-lane slice
        if al <= max_uc:
            uc = (max_uc // al) * al
        elif rows_sub * _cdiv(al, spv) * lpu <= 2 * budget:
            uc = al                          # favor lane-aligned slices
        else:
            uc = max_uc
    else:
        # group is a multiple of 128 (already aligned) or an odd size.
        # TODO(synk): for group >> 1024, additionally chunk the group axis with
        # a running max to bound the live operand; rare configuration.
        uc = max_uc
    return max(1, min(num_units, uc))


def _pick_block_rows(m_rows, bytes_per_row, rows_sub, vmem_cap):
    """Row-tile size: bytes-driven (~7-10 MiB in+out), multiple of rows_sub,
    and split into >=4 tiles when possible so v7x megacore gets both cores."""
    target = (10 * 2 ** 20) if vmem_cap >= 100 * 2 ** 20 else (7 * 2 ** 20)
    tm_budget = max(rows_sub, (target // max(1, bytes_per_row)) // rows_sub * rows_sub)
    tm_tiles = max(rows_sub, _round_up(_cdiv(m_rows, 4), rows_sub))
    tm_full = _round_up(m_rows, rows_sub)
    return max(rows_sub, min(tm_budget, tm_tiles, tm_full))


def _maxout_kernel(x_ref, o_ref, *, num_units, group, rows_sub, unit_chunk):
    """x_ref: (tm, num_units*group) VMEM tile; o_ref: (tm, num_units).

    Row-subtiled, lane-aligned-chunked reduce: each fori_loop step loads one
    sublane-group of rows per 128-lane unit chunk, reduces the tiny group axis,
    concatenates the chunk results and issues one full-width store.
    """
    n_sub = x_ref.shape[0] // rows_sub

    def body(j, carry):
        r0 = pl.multiple_of(j * rows_sub, rows_sub)
        pieces = []
        for u0 in range(0, num_units, unit_chunk):
            uc = min(unit_chunk, num_units - u0)
            xc = x_ref[pl.ds(r0, rows_sub), pl.ds(u0 * group, uc * group)]
            pieces.append(jnp.max(xc.reshape(rows_sub, uc, group), axis=-1))
        red = pieces[0] if len(pieces) == 1 else jnp.concatenate(pieces, axis=-1)
        o_ref[pl.ds(r0, rows_sub), :] = red
        return carry

    lax.fori_loop(0, n_sub, body, 0)


def maxout_pallas(x, num_units, axis=-1):
    """Pallas equivalent of rbi.models.activations.Maxout.forward."""
    ndim = x.ndim
    ax = axis % ndim
    num_channels = x.shape[ax]
    if num_channels % num_units:
        raise ValueError(
            "number of features({}) is not a multiple of num_units({})".format(
                num_channels, num_units))
    group = num_channels // num_units

    if group == 1:
        return x  # maxout over singleton groups is the identity: no HBM round trip

    if ax != ndim - 1:
        # TODO(synk): fuse the non-last-axis reduction into the kernel (sublane
        # reduce over a strided row window) instead of this transpose round trip.
        x = jnp.moveaxis(x, ax, -1)

    lead_shape = x.shape[:-1]
    m = math.prod(lead_shape) if lead_shape else 1
    if m == 0:
        out = jnp.zeros(lead_shape + (num_units,), x.dtype)
        return jnp.moveaxis(out, -1, ax) if ax != ndim - 1 else out

    itemsize = jnp.dtype(x.dtype).itemsize
    x2d = x.reshape(m, num_channels)

    # Free row->channel fold (same maxout with k*num_units units).
    k = _fold_rows_into_channels(m, num_units, group, itemsize)
    m_eff = m // k
    nu_eff = num_units * k
    c_eff = num_channels * k
    x2d = x2d.reshape(m_eff, c_eff)

    rows_sub = _sublanes_per_vreg(itemsize)
    unit_chunk = _pick_unit_chunk(nu_eff, group, rows_sub, itemsize)

    vmem_cap = _vmem_capacity_bytes()
    in_row_bytes = c_eff * itemsize
    out_row_bytes = _round_up(nu_eff, 128) * itemsize        # lane-padded VMEM row
    bytes_per_row = in_row_bytes + out_row_bytes
    tm = _pick_block_rows(m_eff, bytes_per_row, rows_sub, vmem_cap)
    grid = (pl.cdiv(m_eff, tm),)

    vmem_needed = 2 * tm * bytes_per_row + 16 * 2 ** 20       # double-buffered + slack
    vmem_limit = int(min(max(vmem_needed, 32 * 2 ** 20),
                         max(vmem_cap - 8 * 2 ** 20, vmem_needed)))

    kernel = functools.partial(
        _maxout_kernel, num_units=nu_eff, group=group,
        rows_sub=rows_sub, unit_chunk=unit_chunk)

    out2d = pl.pallas_call(
        kernel,
        out_shape=jax.ShapeDtypeStruct((m_eff, nu_eff), x.dtype),
        grid=grid,
        in_specs=[pl.BlockSpec((tm, c_eff), lambda i: (i, 0))],
        out_specs=pl.BlockSpec((tm, nu_eff), lambda i: (i, 0)),
        compiler_params=pltpu.CompilerParams(
            # Row tiles are independent -> shard across both TCs on v7x.
            dimension_semantics=("parallel",),
            vmem_limit_bytes=vmem_limit),
        cost_estimate=pl.CostEstimate(
            flops=m * max(num_channels - num_units, 0),
            transcendentals=0,
            bytes_accessed=(m * num_channels + m * num_units) * itemsize),
    )(x2d)

    out = out2d.reshape(*lead_shape, num_units)
    if ax != ndim - 1:
        out = jnp.moveaxis(out, -1, ax)
    return out


def _maxout_ref(x, num_units, axis=-1):
    """Pure-JAX reference mirroring the PyTorch maxout() semantics."""
    ndim = x.ndim
    ax = axis % ndim
    c = x.shape[ax]
    group = c // num_units
    new_shape = list(x.shape)
    new_shape[ax] = num_units
    new_shape.insert(ax + 1, group)
    return jnp.max(x.reshape(new_shape), axis=ax + 1)


if __name__ == "__main__":
    key = jax.random.PRNGKey(0)
    k1, k2, k3, k4 = jax.random.split(key, 4)

    # 1) Primary check: (batch, seq, hidden) feature tensor, maxout on last axis.
    B, S, H = 2, 8, 32
    num_units = 8  # group = 4
    x = jax.random.normal(k1, (B, S, H), dtype=jnp.float32)
    out = jax.block_until_ready(maxout_pallas(x, num_units, axis=-1))
    ref = _maxout_ref(x, num_units, axis=-1)
    assert out.shape == (B, S, num_units), out.shape
    assert out.dtype == x.dtype
    assert jnp.array_equal(out, ref), "mismatch vs reference (axis=-1)"

    # 2) bf16 with an odd row count: exercises the partial-last-row-tile path
    #    and the bf16 (16-sublane) alignment.
    x2 = jax.random.normal(k2, (3, 7, 32), dtype=jnp.bfloat16)
    out2 = jax.block_until_ready(maxout_pallas(x2, 8, axis=-1))
    ref2 = _maxout_ref(x2, 8, axis=-1)
    assert out2.shape == (3, 7, 8) and out2.dtype == jnp.bfloat16
    assert jnp.array_equal(out2, ref2), "mismatch vs reference (tiled bf16)"

    # 3) Non-last maxout axis (wrapper transpose fallback).
    x3 = jax.random.normal(k3, (2, 24, 5), dtype=jnp.float32)
    out3 = jax.block_until_ready(maxout_pallas(x3, 6, axis=1))
    ref3 = _maxout_ref(x3, 6, axis=1)
    assert out3.shape == (2, 6, 5)
    assert jnp.array_equal(out3, ref3), "mismatch vs reference (axis=1)"

    # 4) Exercises the lane-dense folded output, lane-aligned unit chunking with
    #    concat, and a multi-tile "parallel" grid.
    x4 = jax.random.normal(k4, (4, 64, 256), dtype=jnp.float32)
    out4 = jax.block_until_ready(maxout_pallas(x4, 64, axis=-1))
    ref4 = _maxout_ref(x4, 64, axis=-1)
    assert out4.shape == (4, 64, 64)
    assert jnp.array_equal(out4, ref4), "mismatch vs reference (chunked path)"

    # 5) group == 1 degenerate case short-circuits to the identity.
    x5 = x[..., :8]
    assert jnp.array_equal(maxout_pallas(x5, 8, axis=-1), x5)

    print("KERNEL_OK")
</pallas_src>

<mosaic_0001>
module attributes {stable_mosaic.version = 11 : i64} {
  func.func @_maxout_kernel(%arg0: i32, %arg1: memref<8x512xf32, #tpu.memory_space<vmem>>, %arg2: memref<8x128xf32, #tpu.memory_space<vmem>>) attributes {dimension_semantics = [#tpu.dimension_semantics<parallel>], iteration_bounds = array<i64: 1>, scalar_prefetch = 0 : i64, scratch_operands = 0 : i64, tpu.core_type = #tpu.core_type<tc>, window_params = [{transform_indices = @transform_0, window_bounds = array<i64: 8, 512>}, {transform_indices = @transform_1, window_bounds = array<i64: 8, 128>}]} {
    %c0_i32 = arith.constant 0 : i32
    %c8_i32 = arith.constant 8 : i32
    %0 = arith.muli %c0_i32, %c8_i32 : i32
    %1 = tpu.assume_multiple %0, 8 : i32
    %2 = arith.index_cast %1 : i32 to index
    %c0 = arith.constant 0 : index
    %3 = vector.load %arg1[%2, %c0] : memref<8x512xf32, #tpu.memory_space<vmem>>, vector<8x128xf32>
    %4 = vector.shape_cast %3 : vector<8x128xf32> to vector<8x32x4xf32>
    %cst = arith.constant dense<0xFF800000> : vector<8x32xf32>
    %5 = vector.multi_reduction <maximumf>, %4, %cst [2] : vector<8x32x4xf32> to vector<8x32xf32>
    %6 = arith.index_cast %1 : i32 to index
    %c128 = arith.constant 128 : index
    %7 = vector.load %arg1[%6, %c128] : memref<8x512xf32, #tpu.memory_space<vmem>>, vector<8x128xf32>
    %8 = vector.shape_cast %7 : vector<8x128xf32> to vector<8x32x4xf32>
    %cst_0 = arith.constant dense<0xFF800000> : vector<8x32xf32>
    %9 = vector.multi_reduction <maximumf>, %8, %cst_0 [2] : vector<8x32x4xf32> to vector<8x32xf32>
    %10 = arith.index_cast %1 : i32 to index
    %c256 = arith.constant 256 : index
    %11 = vector.load %arg1[%10, %c256] : memref<8x512xf32, #tpu.memory_space<vmem>>, vector<8x128xf32>
    %12 = vector.shape_cast %11 : vector<8x128xf32> to vector<8x32x4xf32>
    %cst_1 = arith.constant dense<0xFF800000> : vector<8x32xf32>
    %13 = vector.multi_reduction <maximumf>, %12, %cst_1 [2] : vector<8x32x4xf32> to vector<8x32xf32>
    %14 = arith.index_cast %1 : i32 to index
    %c384 = arith.constant 384 : index
    %15 = vector.load %arg1[%14, %c384] : memref<8x512xf32, #tpu.memory_space<vmem>>, vector<8x128xf32>
    %16 = vector.shape_cast %15 : vector<8x128xf32> to vector<8x32x4xf32>
    %cst_2 = arith.constant dense<0xFF800000> : vector<8x32xf32>
    %17 = vector.multi_reduction <maximumf>, %16, %cst_2 [2] : vector<8x32x4xf32> to vector<8x32xf32>
    %18 = tpu.concatenate %5, %9, %13, %17 in 1 : vector<8x32xf32>, vector<8x32xf32>, vector<8x32xf32>, vector<8x32xf32> -> vector<8x128xf32>
    %19 = arith.index_cast %1 : i32 to index
    %c0_3 = arith.constant 0 : index
    %20 = vector.load %arg2[%19, %c0_3] : memref<8x128xf32, #tpu.memory_space<vmem>>, vector<8x128xf32>
    tpu.vector_store %arg2[%19, %c0_3], %18 {strides = array<i32>} : memref<8x128xf32, #tpu.memory_space<vmem>>, vector<8x128xf32>,
    %c1_i32 = arith.constant 1 : i32
    return
  }
  func.func @transform_0(%arg0: i32) -> (i32, i32) {
    %c0_i32 = arith.constant 0 : i32
    %c0_i32_0 = arith.constant 0 : i32
    return %arg0, %c0_i32 : i32, i32
  }
  func.func @transform_1(%arg0: i32) -> (i32, i32) {
    %c0_i32 = arith.constant 0 : i32
    %c0_i32_0 = arith.constant 0 : i32
    return %arg0, %c0_i32 : i32, i32
  }
}

</mosaic_0001>

<bundles_post_ra>
// kernel: tpu_custom_call.1
= control target key start
LH: loop header
LB: loop body
LE: loop exit
PB: predicated region body
PF: predicated region fallthrough
CT: control target
= control target key end

     0   :  { %6 = vsyncpa [#allocation3], 0  ;;  %s9722_s0 = inlined_call_operand.hbm [shape: f32[1,512], index: 0, kind: input, shape index: {}]   ;;  %s9723_s1 = inlined_call_operand.hbm [shape: f32[1,128], index: 1, kind: output, shape index: {}]  }
   0x1   :  { %7 = vsyncpa [#allocation4], 0 }
   0x2   :  { %11 = vsyncadd [#allocation3], 448  ;;  %s12_s8 = sshll.u32 %s9722_s0, 4  ;;  %s4303_s9 = smov [#allocation2]   ;;  %s13_s8 = int_to_ptr.hbm [resolvable:$true] %s12_s8 }
   0x3   :  { %s14_s10 = sshll.u32 %s4303_s9, 4  ;;  %s4304_s11 = smov 64   ;;  %s15_s10 = int_to_ptr.vmem [resolvable:$true] %s14_s10 }
   0x4   :  { %s4305_s12 = smov 4  }
   0x5   :  { %20 = dma.hbm_to_vmem [thread:$0]  %s13_s8, 64, %s15_s10, [#allocation3], %s4304_s11, %s4304_s11, %s4305_s12  }
   0x6   :  { %4299 = dma.done.wait [#allocation3], 512  }
   0x7   :  { %4300 = vsyncadd [#allocation3], 4294966784  ;;  %v4353_v0 = vld [vmem:[#allocation2 + $0x10] sm:$0x1]  ;;  %v4355_v1 = vld [vmem:[#allocation2 + $0x8] sm:$0x1] }
   0x8   :  { %9745 = vst [vmem:[#allocation8_spill] sm:$0xff] %v4353_v0  ;;  %v4357_v2 = vld [vmem:[#allocation2] sm:$0x1]  ;;  %s4306_s13 = smov 124   ;;  %v4366_v3 = vld [vmem:[#allocation2 + $0x14] sm:$0x1] }
   0x9   :  { %51 = vrot.lane.b32.xlu2 %v4353_v0, %s4306_s13  ;;  %47 = vrot.lane.b32.xlu1 %v4355_v1, %s4306_s13  ;;  %539 = vst [vmem:[#allocation1] ss:$9 sm:$0xff] %v4357_v2  ;;  %v4368_v4 = vld [vmem:[#allocation2 + $0xc] sm:$0x1]  ;;  %v4370_v5 = vld [vmem:[#allocation2 + $0x4] sm:$0x1] }
   0xa   :  { %43 = vrot.lane.b32.xlu0 %v4357_v2, %s4306_s13  ;;  %9746 = vst [vmem:[#allocation9_spill] sm:$0xff] %v4366_v3  ;;  %v4378_v6 = vld [vmem:[#allocation2 + $0x1c] sm:$0x1]  ;;  %v4380_v7 = vld [vmem:[#allocation2 + $0x18] sm:$0x1]  ;;  %s4307_s0 = smov 120  }
   0xb   :  { %9747 = vst [vmem:[#allocation10_spill] sm:$0xff] %v4368_v4  ;;  %s4308_s14 = smov 116   ;;  %s4309_s15 = smov 112   ;;  %vm866_vm0 = vcmask 31744   ;;  %vm4121_vm1 = vcmask 917312   ;;  %vm4125_vm2 = vcmask 982912  }
   0xc   :  { %9748 = vst [vmem:[#allocation11_spill] sm:$0xff] %v4378_v6  ;;  %s4310_s16 = smov 108   ;;  %s4311_s17 = smov 104   ;;  %vm4129_vm3 = vcmask 1048512   ;;  %vm3864_vm4 = vcmask 1041409   ;;  %vm3805_vm5 = vcmask 130112  }
   0xd   :  { %9749 = vst [vmem:[#allocation12_spill] sm:$0xff] %v4380_v7  ;;  %s4312_s18 = smov 100   ;;  %s4313_s19 = smov 96   ;;  %vm3809_vm6 = vcmask 195712   ;;  %vm3813_vm7 = vcmask 261312   ;;  %vm3866_vm8 = vcmask 1042434  }
   0xe   :  { %s4314_s20 = smov 92   ;;  %s4315_s21 = smov 88   ;;  %vm3868_vm9 = vcmask 1043459   ;;  %vm3870_vm10 = vcmask 1044484   ;;  %vm3872_vm11 = vcmask 1045509   ;;  %vm3915_vm12 = vcmask 392512  }
   0xf   :  { %s4316_s22 = smov 84   ;;  %s4317_s23 = smov 80   ;;  %vm3874_vm13 = vcmask 1046534   ;;  %vm3919_vm14 = vcmask 458112   ;;  %vm3923_vm15 = vcmask 523712  }
  0x10   :  { %s4318_s24 = smov 76   ;;  %s4319_s25 = smov 72  }
  0x11   :  { %53 = vrot.lane.b32.xlu2 %v4366_v3, %s4306_s13  ;;  %49 = vrot.lane.b32.xlu1 %v4368_v4, %s4306_s13  ;;  %s4320_s26 = smov 68   ;;  %s4321_s27 = smov 60  }
  0x12   :  { %45 = vrot.lane.b32.xlu0 %v4370_v5, %s4306_s13  ;;  %s4322_s28 = smov 56   ;;  %s4323_s29 = smov 52  }
  0x13   :  { %s4324_s30 = smov 48   ;;  %s4325_s2 = smov 44  }
  0x14   :  { %s9738_s3 = smov 40   ;;  %s4327_s4 = smov 36  }
  0x15   :  { %s4328_s5 = smov 32   ;;  %s9731_s6 = smov 28  }
  0x16   :  { %s4330_s7 = smov 24   ;;  %s4331_s8 = smov 20  }
  0x17   :  { %s9724_s9 = smov 16   ;;  %s4333_s10 = smov 12  }
  0x19   :  { %57 = vrot.lane.b32.xlu1 %v4378_v6, %s4306_s13  ;;  %59 = vrot.lane.b32.xlu2 %v4357_v2, %s4307_s0 }
  0x1a   :  { %55 = vrot.lane.b32.xlu0 %v4380_v7, %s4306_s13 }
  0x21   :  { %63 = vrot.lane.b32.xlu1 %v4355_v1, %s4307_s0  ;;  %65 = vrot.lane.b32.xlu2 %v4368_v4, %s4307_s0 }
  0x22   :  { %61 = vrot.lane.b32.xlu0 %v4370_v5, %s4307_s0 }
  0x29   :  { %69 = vrot.lane.b32.xlu1 %v4366_v3, %s4307_s0  ;;  %71 = vrot.lane.b32.xlu2 %v4380_v7, %s4307_s0 }
  0x2a   :  { %67 = vrot.lane.b32.xlu0 %v4353_v0, %s4307_s0 }
  0x31   :  { %75 = vrot.lane.b32.xlu1 %v4357_v2, %s4308_s14  ;;  %77 = vrot.lane.b32.xlu2 %v4370_v5, %s4308_s14 }
  0x32   :  { %73 = vrot.lane.b32.xlu0 %v4378_v6, %s4307_s0 }
  0x39   :  { %81 = vrot.lane.b32.xlu1 %v4368_v4, %s4308_s14  ;;  %83 = vrot.lane.b32.xlu2 %v4353_v0, %s4308_s14 }
  0x3a   :  { %79 = vrot.lane.b32.xlu0 %v4355_v1, %s4308_s14 }
  0x41   :  { %87 = vrot.lane.b32.xlu1 %v4380_v7, %s4308_s14  ;;  %89 = vrot.lane.b32.xlu2 %v4378_v6, %s4308_s14 }
  0x42   :  { %85 = vrot.lane.b32.xlu0 %v4366_v3, %s4308_s14 }
  0x49   :  { %93 = vrot.lane.b32.xlu1 %v4370_v5, %s4309_s15  ;;  %95 = vrot.lane.b32.xlu2 %v4355_v1, %s4309_s15 }
  0x4a   :  { %91 = vrot.lane.b32.xlu0 %v4357_v2, %s4309_s15 }
  0x51   :  { %99 = vrot.lane.b32.xlu1 %v4353_v0, %s4309_s15  ;;  %101 = vrot.lane.b32.xlu2 %v4366_v3, %s4309_s15 }
  0x52   :  { %97 = vrot.lane.b32.xlu0 %v4368_v4, %s4309_s15 }
  0x59   :  { %105 = vrot.lane.b32.xlu1 %v4378_v6, %s4309_s15  ;;  %107 = vrot.lane.b32.xlu2 %v4357_v2, %s4310_s16 }
  0x5a   :  { %103 = vrot.lane.b32.xlu0 %v4380_v7, %s4309_s15 }
  0x61   :  { %111 = vrot.lane.b32.xlu1 %v4355_v1, %s4310_s16  ;;  %113 = vrot.lane.b32.xlu2 %v4368_v4, %s4310_s16 }
  0x62   :  { %109 = vrot.lane.b32.xlu0 %v4370_v5, %s4310_s16 }
  0x63   :  { %v4442_v8 = vpop.permute.xlu2 %51 }
  0x64   :  { %9750 = vst [vmem:[#allocation13_spill] sm:$0xff] %v4442_v8 }
  0x69   :  { %117 = vrot.lane.b32.xlu1 %v4366_v3, %s4310_s16  ;;  %119 = vrot.lane.b32.xlu2 %v4380_v7, %s4310_s16 }
  0x6a   :  { %115 = vrot.lane.b32.xlu0 %v4353_v0, %s4310_s16 }
  0x6b   :  { %v4450_v9 = vpop.permute.xlu2 %53 }
  0x6c   :  { %9751 = vst [vmem:[#allocation14_spill] sm:$0xff] %v4450_v9 }
  0x71   :  { %123 = vrot.lane.b32.xlu1 %v4357_v2, %s4311_s17  ;;  %125 = vrot.lane.b32.xlu2 %v4370_v5, %s4311_s17 }
  0x72   :  { %121 = vrot.lane.b32.xlu0 %v4378_v6, %s4310_s16 }
  0x73   :  { %v60_v10 = vpop.permute.xlu2 %59 }
  0x74   :  { %543 = vst [vmem:[#allocation1 + $0x2] ss:$9 sm:$0xff] %v60_v10 }
  0x79   :  { %129 = vrot.lane.b32.xlu1 %v4368_v4, %s4311_s17  ;;  %131 = vrot.lane.b32.xlu2 %v4353_v0, %s4311_s17 }
  0x7a   :  { %127 = vrot.lane.b32.xlu0 %v4355_v1, %s4311_s17 }
  0x7b   :  { %v4464_v11 = vpop.permute.xlu1 %47  ;;  %v4466_v12 = vpop.permute.xlu2 %65 }
  0x7c   :  { %9752 = vst [vmem:[#allocation15_spill] sm:$0xff] %v4466_v12  ;;  %v44_v13 = vpop.permute.xlu0 %43 }
  0x7d   :  { %541 = vst [vmem:[#allocation1 + $0x1] ss:$9 sm:$0xff] %v44_v13 }
  0x81   :  { %135 = vrot.lane.b32.xlu1 %v4380_v7, %s4311_s17  ;;  %137 = vrot.lane.b32.xlu2 %v4378_v6, %s4311_s17 }
  0x82   :  { %133 = vrot.lane.b32.xlu0 %v4366_v3, %s4311_s17 }
  0x83   :  { %v4474_v14 = vpop.permute.xlu1 %49  ;;  %v4476_v15 = vpop.permute.xlu2 %71 }
  0x84   :  { %9753 = vst [vmem:[#allocation16_spill] sm:$0xff] %v4474_v14  ;;  %v4478_v16 = vpop.permute.xlu0 %45 }
  0x85   :  { %9754 = vst [vmem:[#allocation17_spill] sm:$0xff] %v4476_v15 }
  0x89   :  { %141 = vrot.lane.b32.xlu1 %v4370_v5, %s4312_s18  ;;  %143 = vrot.lane.b32.xlu2 %v4355_v1, %s4312_s18 }
  0x8a   :  { %139 = vrot.lane.b32.xlu0 %v4357_v2, %s4312_s18 }
  0x8b   :  { %v4486_v17 = vpop.permute.xlu1 %57  ;;  %v4488_v18 = vpop.permute.xlu2 %77 }
  0x8c   :  { %9755 = vst [vmem:[#allocation18_spill] sm:$0xff] %v4486_v17  ;;  %v4490_v19 = vpop.permute.xlu0 %55 }
  0x8d   :  { %9756 = vst [vmem:[#allocation19_spill] sm:$0xff] %v4490_v19 }
  0x91   :  { %147 = vrot.lane.b32.xlu1 %v4353_v0, %s4312_s18  ;;  %149 = vrot.lane.b32.xlu2 %v4366_v3, %s4312_s18 }
  0x92   :  { %145 = vrot.lane.b32.xlu0 %v4368_v4, %s4312_s18 }
  0x93   :  { %v4498_v20 = vpop.permute.xlu1 %63  ;;  %v4500_v21 = vpop.permute.xlu2 %83 }
  0x94   :  { %9757 = vst [vmem:[#allocation20_spill] sm:$0xff] %v4500_v21  ;;  %v4502_v22 = vpop.permute.xlu0 %61 }
  0x99   :  { %153 = vrot.lane.b32.xlu1 %v4378_v6, %s4312_s18  ;;  %155 = vrot.lane.b32.xlu2 %v4357_v2, %s4313_s19 }
  0x9a   :  { %151 = vrot.lane.b32.xlu0 %v4380_v7, %s4312_s18 }
  0x9b   :  { %v4510_v23 = vpop.permute.xlu1 %69  ;;  %v4512_v24 = vpop.permute.xlu2 %89 }
  0x9c   :  { %9758 = vst [vmem:[#allocation21_spill] sm:$0xff] %v4510_v23  ;;  %v4514_v25 = vpop.permute.xlu0 %67 }
  0x9d   :  { %9759 = vst [vmem:[#allocation22_spill] sm:$0xff] %v4512_v24 }
  0x9e   :  { %9760 = vst [vmem:[#allocation23_spill] sm:$0xff] %v4514_v25 }
  0xa1   :  { %159 = vrot.lane.b32.xlu1 %v4355_v1, %s4313_s19  ;;  %161 = vrot.lane.b32.xlu2 %v4368_v4, %s4313_s19 }
  0xa2   :  { %157 = vrot.lane.b32.xlu0 %v4370_v5, %s4313_s19 }
  0xa3   :  { %v76_v26 = vpop.permute.xlu1 %75  ;;  %v4522_v27 = vpop.permute.xlu2 %95 }
  0xa4   :  { %545 = vst [vmem:[#allocation1 + $0x3] ss:$9 sm:$0xff] %v76_v26  ;;  %v4524_v28 = vpop.permute.xlu0 %73 }
  0xa5   :  { %9761 = vst [vmem:[#allocation24_spill] sm:$0xff] %v4524_v28 }
  0xa9   :  { %165 = vrot.lane.b32.xlu1 %v4366_v3, %s4313_s19  ;;  %167 = vrot.lane.b32.xlu2 %v4380_v7, %s4313_s19 }
  0xaa   :  { %163 = vrot.lane.b32.xlu0 %v4353_v0, %s4313_s19 }
  0xab   :  { %v4532_v29 = vpop.permute.xlu1 %81  ;;  %v4534_v30 = vpop.permute.xlu2 %101 }
  0xac   :  { %9762 = vst [vmem:[#allocation25_spill] sm:$0xff] %v4532_v29  ;;  %v4536_v31 = vpop.permute.xlu0 %79 }
  0xad   :  { %9763 = vst [vmem:[#allocation26_spill] sm:$0xff] %v4534_v30 }
  0xb1   :  { %171 = vrot.lane.b32.xlu1 %v4357_v2, %s4314_s20  ;;  %173 = vrot.lane.b32.xlu2 %v4370_v5, %s4314_s20 }
  0xb2   :  { %169 = vrot.lane.b32.xlu0 %v4378_v6, %s4313_s19 }
  0xb3   :  { %v4544_v32 = vpop.permute.xlu1 %87  ;;  %v108_v33 = vpop.permute.xlu2 %107 }
  0xb4   :  { %9764 = vst [vmem:[#allocation27_spill] sm:$0xff] %v4544_v32  ;;  %v4546_v34 = vpop.permute.xlu0 %85 }
  0xb5   :  { %9765 = vst [vmem:[#allocation28_spill] sm:$0xff] %v4546_v34 }
  0xb6   :  { %549 = vst [vmem:[#allocation1 + $0x5] ss:$9 sm:$0xff] %v108_v33 }
  0xb9   :  { %177 = vrot.lane.b32.xlu1 %v4368_v4, %s4314_s20  ;;  %179 = vrot.lane.b32.xlu2 %v4353_v0, %s4314_s20 }
  0xba   :  { %175 = vrot.lane.b32.xlu0 %v4355_v1, %s4314_s20 }
  0xbb   :  { %v4554_v35 = vpop.permute.xlu1 %93  ;;  %v4556_v36 = vpop.permute.xlu2 %113 }
  0xbc   :  { %9766 = vst [vmem:[#allocation29_spill] sm:$0xff] %v4556_v36  ;;  %v92_v37 = vpop.permute.xlu0 %91 }
  0xbd   :  { %547 = vst [vmem:[#allocation1 + $0x4] ss:$9 sm:$0xff] %v92_v37 }
  0xc1   :  { %183 = vrot.lane.b32.xlu1 %v4380_v7, %s4314_s20  ;;  %185 = vrot.lane.b32.xlu2 %v4378_v6, %s4314_s20 }
  0xc2   :  { %181 = vrot.lane.b32.xlu0 %v4366_v3, %s4314_s20 }
  0xc3   :  { %v4564_v38 = vpop.permute.xlu1 %99  ;;  %v4566_v39 = vpop.permute.xlu2 %119 }
  0xc4   :  { %9767 = vst [vmem:[#allocation30_spill] sm:$0xff] %v4564_v38  ;;  %v4568_v40 = vpop.permute.xlu0 %97 }
  0xc5   :  { %9768 = vst [vmem:[#allocation31_spill] sm:$0xff] %v4566_v39 }
  0xc6   :  { %9769 = vst [vmem:[#allocation32_spill] sm:$0xff] %v4568_v40 }
  0xc9   :  { %189 = vrot.lane.b32.xlu1 %v4370_v5, %s4315_s21  ;;  %191 = vrot.lane.b32.xlu2 %v4355_v1, %s4315_s21 }
  0xca   :  { %187 = vrot.lane.b32.xlu0 %v4357_v2, %s4315_s21 }
  0xcb   :  { %v4576_v41 = vpop.permute.xlu1 %105  ;;  %v4578_v42 = vpop.permute.xlu2 %125 }
  0xcc   :  { %9770 = vst [vmem:[#allocation33_spill] sm:$0xff] %v4576_v41  ;;  %v4580_v43 = vpop.permute.xlu0 %103 }
  0xcd   :  { %9771 = vst [vmem:[#allocation34_spill] sm:$0xff] %v4580_v43 }
  0xd1   :  { %195 = vrot.lane.b32.xlu1 %v4353_v0, %s4315_s21  ;;  %197 = vrot.lane.b32.xlu2 %v4366_v3, %s4315_s21 }
  0xd2   :  { %193 = vrot.lane.b32.xlu0 %v4368_v4, %s4315_s21 }
  0xd3   :  { %v4588_v44 = vpop.permute.xlu1 %111  ;;  %v4590_v45 = vpop.permute.xlu2 %131 }
  0xd4   :  { %9772 = vst [vmem:[#allocation35_spill] sm:$0xff] %v4590_v45  ;;  %v4592_v46 = vpop.permute.xlu0 %109 }
  0xd9   :  { %201 = vrot.lane.b32.xlu1 %v4378_v6, %s4315_s21  ;;  %203 = vrot.lane.b32.xlu2 %v4357_v2, %s4316_s22 }
  0xda   :  { %199 = vrot.lane.b32.xlu0 %v4380_v7, %s4315_s21 }
  0xdb   :  { %v4600_v47 = vpop.permute.xlu1 %117  ;;  %v4602_v48 = vpop.permute.xlu2 %137 }
  0xdc   :  { %9773 = vst [vmem:[#allocation36_spill] sm:$0xff] %v4600_v47  ;;  %v4604_v49 = vpop.permute.xlu0 %115 }
  0xdd   :  { %9774 = vst [vmem:[#allocation37_spill] sm:$0xff] %v4602_v48 }
  0xde   :  { %9775 = vst [vmem:[#allocation38_spill] sm:$0xff] %v4604_v49 }
  0xe1   :  { %207 = vrot.lane.b32.xlu1 %v4355_v1, %s4316_s22  ;;  %209 = vrot.lane.b32.xlu2 %v4368_v4, %s4316_s22 }
  0xe2   :  { %205 = vrot.lane.b32.xlu0 %v4370_v5, %s4316_s22 }
  0xe3   :  { %v124_v50 = vpop.permute.xlu1 %123  ;;  %v4612_v51 = vpop.permute.xlu2 %143 }
  0xe4   :  { %551 = vst [vmem:[#allocation1 + $0x6] ss:$9 sm:$0xff] %v124_v50  ;;  %v4614_v52 = vpop.permute.xlu0 %121 }
  0xe5   :  { %9776 = vst [vmem:[#allocation39_spill] sm:$0xff] %v4614_v52 }
  0xe9   :  { %213 = vrot.lane.b32.xlu1 %v4366_v3, %s4316_s22  ;;  %215 = vrot.lane.b32.xlu2 %v4380_v7, %s4316_s22 }
  0xea   :  { %211 = vrot.lane.b32.xlu0 %v4353_v0, %s4316_s22 }
  0xeb   :  { %v4622_v53 = vpop.permute.xlu1 %129  ;;  %v4624_v54 = vpop.permute.xlu2 %149 }
  0xec   :  { %9777 = vst [vmem:[#allocation40_spill] sm:$0xff] %v4622_v53  ;;  %v4626_v55 = vpop.permute.xlu0 %127 }
  0xed   :  { %9778 = vst [vmem:[#allocation41_spill] sm:$0xff] %v4624_v54 }
  0xf1   :  { %219 = vrot.lane.b32.xlu1 %v4357_v2, %s4317_s23  ;;  %221 = vrot.lane.b32.xlu2 %v4370_v5, %s4317_s23 }
  0xf2   :  { %217 = vrot.lane.b32.xlu0 %v4378_v6, %s4316_s22 }
  0xf3   :  { %v4634_v56 = vpop.permute.xlu1 %135  ;;  %v156_v57 = vpop.permute.xlu2 %155 }
  0xf4   :  { %9779 = vst [vmem:[#allocation42_spill] sm:$0xff] %v4634_v56  ;;  %v4636_v58 = vpop.permute.xlu0 %133 }
  0xf5   :  { %9780 = vst [vmem:[#allocation43_spill] sm:$0xff] %v4636_v58 }
  0xf9   :  { %225 = vrot.lane.b32.xlu1 %v4368_v4, %s4317_s23  ;;  %227 = vrot.lane.b32.xlu2 %v4353_v0, %s4317_s23 }
  0xfa   :  { %223 = vrot.lane.b32.xlu0 %v4355_v1, %s4317_s23 }
  0xfb   :  { %v4644_v59 = vpop.permute.xlu1 %141  ;;  %v4646_v60 = vpop.permute.xlu2 %161 }
  0xfc   :  { %9781 = vst [vmem:[#allocation44_spill] sm:$0xff] %v4646_v60  ;;  %v140_v61 = vpop.permute.xlu0 %139 }
  0xfd   :  { %553 = vst [vmem:[#allocation1 + $0x7] ss:$9 sm:$0xff] %v140_v61 }
 0x101   :  { %231 = vrot.lane.b32.xlu1 %v4380_v7, %s4317_s23  ;;  %233 = vrot.lane.b32.xlu2 %v4378_v6, %s4317_s23 }
 0x102   :  { %229 = vrot.lane.b32.xlu0 %v4366_v3, %s4317_s23 }
 0x103   :  { %v4654_v62 = vpop.permute.xlu1 %147  ;;  %v4656_v63 = vpop.permute.xlu2 %167 }
 0x104   :  { %9782 = vst [vmem:[#allocation45_spill] sm:$0xff] %v4654_v62  ;;  %v4658_v10 = vld [vmem:[#allocation1] sm:$0xff]  ;;  %v4660_v13 = vpop.permute.xlu0 %145 }
 0x105   :  { %9783 = vst [vmem:[#allocation46_spill] sm:$0xff] %v4656_v63 }
 0x106   :  { %9784 = vst [vmem:[#allocation47_spill] sm:$0xff] %v4660_v13 }
 0x107   :  { %555 = vst [vmem:[#allocation1] ss:$9 sm:$0xff] %v156_v57 }
 0x109   :  { %237 = vrot.lane.b32.xlu1 %v4370_v5, %s4318_s24  ;;  %239 = vrot.lane.b32.xlu2 %v4355_v1, %s4318_s24 }
 0x10a   :  { %235 = vrot.lane.b32.xlu0 %v4357_v2, %s4318_s24 }
 0x10b   :  { %v4668_v26 = vpop.permute.xlu1 %153  ;;  %v4670_v33 = vpop.permute.xlu2 %173 }
 0x10c   :  { %9785 = vst [vmem:[#allocation48_spill] sm:$0xff] %v4668_v26  ;;  %v4672_v37 = vpop.permute.xlu0 %151 }
 0x10d   :  { %9786 = vst [vmem:[#allocation49_spill] sm:$0xff] %v4672_v37 }
 0x111   :  { %243 = vrot.lane.b32.xlu1 %v4353_v0, %s4318_s24  ;;  %245 = vrot.lane.b32.xlu2 %v4366_v3, %s4318_s24 }
 0x112   :  { %241 = vrot.lane.b32.xlu0 %v4368_v4, %s4318_s24 }
 0x113   :  { %v4680_v50 = vpop.permute.xlu1 %159  ;;  %v4682_v57 = vpop.permute.xlu2 %179 }
 0x114   :  { %9787 = vst [vmem:[#allocation50_spill] sm:$0xff] %v4682_v57  ;;  %v4684_v61 = vpop.permute.xlu0 %157 }
 0x119   :  { %249 = vrot.lane.b32.xlu1 %v4378_v6, %s4318_s24  ;;  %251 = vrot.lane.b32.xlu2 %v4357_v2, %s4319_s25 }
 0x11a   :  { %247 = vrot.lane.b32.xlu0 %v4380_v7, %s4318_s24 }
 0x11b   :  { %v4692_v26 = vpop.permute.xlu1 %165  ;;  %v4694_v48 = vpop.permute.xlu2 %185 }
 0x11c   :  { %9788 = vst [vmem:[#allocation51_spill] sm:$0xff] %v4692_v26  ;;  %v4696_v52 = vpop.permute.xlu0 %163 }
 0x11d   :  { %9789 = vst [vmem:[#allocation52_spill] sm:$0xff] %v4694_v48 }
 0x11e   :  { %9790 = vst [vmem:[#allocation53_spill] sm:$0xff] %v4696_v52 }
 0x121   :  { %255 = vrot.lane.b32.xlu1 %v4355_v1, %s4319_s25  ;;  %257 = vrot.lane.b32.xlu2 %v4368_v4, %s4319_s25 }
 0x122   :  { %253 = vrot.lane.b32.xlu0 %v4370_v5, %s4319_s25 }
 0x123   :  { %v172_v41 = vpop.permute.xlu1 %171  ;;  %v4704_v24 = vpop.permute.xlu2 %191 }
 0x124   :  { %556 = vst [vmem:[#allocation1 + $0x1] ss:$9 sm:$0xff] %v172_v41  ;;  %v4706_v28 = vpop.permute.xlu0 %169 }
 0x125   :  { %9791 = vst [vmem:[#allocation54_spill] sm:$0xff] %v4706_v28 }
 0x129   :  { %261 = vrot.lane.b32.xlu1 %v4366_v3, %s4319_s25  ;;  %263 = vrot.lane.b32.xlu2 %v4380_v7, %s4319_s25 }
 0x12a   :  { %259 = vrot.lane.b32.xlu0 %v4353_v0, %s4319_s25 }
 0x12b   :  { %v4714_v48 = vpop.permute.xlu1 %177  ;;  %v4716_v17 = vpop.permute.xlu2 %197 }
 0x12c   :  { %9792 = vst [vmem:[#allocation55_spill] sm:$0xff] %v4714_v48  ;;  %v4718_v63 = vpop.permute.xlu0 %175 }
 0x12d   :  { %9793 = vst [vmem:[#allocation56_spill] sm:$0xff] %v4716_v17 }
 0x131   :  { %267 = vrot.lane.b32.xlu1 %v4357_v2, %s4320_s26  ;;  %269 = vrot.lane.b32.xlu2 %v4370_v5, %s4320_s26 }
 0x132   :  { %265 = vrot.lane.b32.xlu0 %v4378_v6, %s4319_s25 }
 0x133   :  { %v4726_v41 = vpop.permute.xlu1 %183  ;;  %v204_v28 = vpop.permute.xlu2 %203 }
 0x134   :  { %9794 = vst [vmem:[#allocation57_spill] sm:$0xff] %v4726_v41  ;;  %v4728_v37 = vpop.permute.xlu0 %181 }
 0x135   :  { %9795 = vst [vmem:[#allocation58_spill] sm:$0xff] %v4728_v37 }
 0x136   :  { %558 = vst [vmem:[#allocation1 + $0x3] ss:$9 sm:$0xff] %v204_v28 }
 0x139   :  { %273 = vrot.lane.b32.xlu1 %v4368_v4, %s4320_s26  ;;  %275 = vrot.lane.b32.xlu2 %v4353_v0, %s4320_s26 }
 0x13a   :  { %271 = vrot.lane.b32.xlu0 %v4355_v1, %s4320_s26 }
 0x13b   :  { %v4736_v56 = vpop.permute.xlu1 %189  ;;  %v4738_v39 = vpop.permute.xlu2 %209 }
 0x13c   :  { %9796 = vst [vmem:[#allocation59_spill] sm:$0xff] %v4738_v39  ;;  %v188_v43 = vpop.permute.xlu0 %187 }
 0x13d   :  { %557 = vst [vmem:[#allocation1 + $0x2] ss:$9 sm:$0xff] %v188_v43 }
 0x141   :  { %279 = vrot.lane.b32.xlu1 %v4380_v7, %s4320_s26  ;;  %281 = vrot.lane.b32.xlu2 %v4378_v6, %s4320_s26 }
 0x142   :  { %277 = vrot.lane.b32.xlu0 %v4366_v3, %s4320_s26 }
 0x143   :  { %v4746_v28 = vpop.permute.xlu1 %195  ;;  %v4748_v41 = vpop.permute.xlu2 %215 }
 0x144   :  { %9797 = vst [vmem:[#allocation60_spill] sm:$0xff] %v4746_v28  ;;  %v4750_v32 = vpop.permute.xlu0 %193 }
 0x145   :  { %9798 = vst [vmem:[#allocation61_spill] sm:$0xff] %v4748_v41 }
 0x146   :  { %9799 = vst [vmem:[#allocation62_spill] sm:$0xff] %v4750_v32 }
 0x149   :  { %285 = vrot.lane.b32.xlu1 %v4370_v5, %s4304_s11  ;;  %287 = vrot.lane.b32.xlu2 %v4355_v1, %s4304_s11 }
 0x14a   :  { %283 = vrot.lane.b32.xlu0 %v4357_v2, %s4304_s11 }
 0x14b   :  { %v4758_v43 = vpop.permute.xlu1 %201  ;;  %v4760_v15 = vpop.permute.xlu2 %221 }
 0x14c   :  { %9800 = vst [vmem:[#allocation63_spill] sm:$0xff] %v4758_v43  ;;  %v4762_v19 = vpop.permute.xlu0 %199 }
 0x14d   :  { %9801 = vst [vmem:[#allocation64_spill] sm:$0xff] %v4762_v19 }
 0x151   :  { %291 = vrot.lane.b32.xlu1 %v4353_v0, %s4304_s11  ;;  %293 = vrot.lane.b32.xlu2 %v4366_v3, %s4304_s11 }
 0x152   :  { %289 = vrot.lane.b32.xlu0 %v4368_v4, %s4304_s11 }
 0x153   :  { %v4770_v41 = vpop.permute.xlu1 %207  ;;  %v4772_v17 = vpop.permute.xlu2 %227 }
 0x154   :  { %9802 = vst [vmem:[#allocation65_spill] sm:$0xff] %v4772_v17  ;;  %v4774_v37 = vpop.permute.xlu0 %205 }
 0x159   :  { %297 = vrot.lane.b32.xlu1 %v4378_v6, %s4304_s11  ;;  %299 = vrot.lane.b32.xlu2 %v4357_v2, %s4321_s27 }
 0x15a   :  { %295 = vrot.lane.b32.xlu0 %v4380_v7, %s4304_s11 }
 0x15b   :  { %v4782_v43 = vpop.permute.xlu1 %213  ;;  %v4784_v19 = vpop.permute.xlu2 %233 }
 0x15c   :  { %9803 = vst [vmem:[#allocation66_spill] sm:$0xff] %v4782_v43  ;;  %v4786_v26 = vpop.permute.xlu0 %211 }
 0x15d   :  { %9804 = vst [vmem:[#allocation67_spill] sm:$0xff] %v4784_v19 }
 0x15e   :  { %9805 = vst [vmem:[#allocation68_spill] sm:$0xff] %v4786_v26 }
 0x161   :  { %303 = vrot.lane.b32.xlu1 %v4355_v1, %s4321_s27  ;;  %305 = vrot.lane.b32.xlu2 %v4368_v4, %s4321_s27 }
 0x162   :  { %301 = vrot.lane.b32.xlu0 %v4370_v5, %s4321_s27 }
 0x163   :  { %v220_v54 = vpop.permute.xlu1 %219  ;;  %v4794_v58 = vpop.permute.xlu2 %239 }
 0x164   :  { %559 = vst [vmem:[#allocation1 + $0x4] ss:$9 sm:$0xff] %v220_v54  ;;  %v4796_v47 = vpop.permute.xlu0 %217 }
 0x165   :  { %9806 = vst [vmem:[#allocation69_spill] sm:$0xff] %v4796_v47 }
 0x169   :  { %309 = vrot.lane.b32.xlu1 %v4366_v3, %s4321_s27  ;;  %311 = vrot.lane.b32.xlu2 %v4380_v7, %s4321_s27 }
 0x16a   :  { %307 = vrot.lane.b32.xlu0 %v4353_v0, %s4321_s27 }
 0x16b   :  { %v4804_v19 = vpop.permute.xlu1 %225  ;;  %v4806_v43 = vpop.permute.xlu2 %245 }
 0x16c   :  { %9807 = vst [vmem:[#allocation70_spill] sm:$0xff] %v4804_v19  ;;  %v4808_v30 = vpop.permute.xlu0 %223 }
 0x16d   :  { %9808 = vst [vmem:[#allocation71_spill] sm:$0xff] %v4806_v43 }
 0x171   :  { %315 = vrot.lane.b32.xlu1 %v4357_v2, %s4322_s28  ;;  %317 = vrot.lane.b32.xlu2 %v4370_v5, %s4322_s28 }
 0x172   :  { %313 = vrot.lane.b32.xlu0 %v4378_v6, %s4321_s27 }
 0x173   :  { %v4816_v54 = vpop.permute.xlu1 %231  ;;  %v252_v47 = vpop.permute.xlu2 %251 }
 0x174   :  { %9809 = vst [vmem:[#allocation72_spill] sm:$0xff] %v4816_v54  ;;  %v4818_v34 = vpop.permute.xlu0 %229 }
 0x175   :  { %9810 = vst [vmem:[#allocation73_spill] sm:$0xff] %v4818_v34 }
 0x176   :  { %561 = vst [vmem:[#allocation1 + $0x6] ss:$9 sm:$0xff] %v252_v47 }
 0x179   :  { %321 = vrot.lane.b32.xlu1 %v4368_v4, %s4322_s28  ;;  %323 = vrot.lane.b32.xlu2 %v4353_v0, %s4322_s28 }
 0x17a   :  { %319 = vrot.lane.b32.xlu0 %v4355_v1, %s4322_s28 }
 0x17b   :  { %v4826_v43 = vpop.permute.xlu1 %237  ;;  %v4828_v23 = vpop.permute.xlu2 %257 }
 0x17c   :  { %9811 = vst [vmem:[#allocation74_spill] sm:$0xff] %v4828_v23  ;;  %v236_v9 = vpop.permute.xlu0 %235 }
 0x17d   :  { %560 = vst [vmem:[#allocation1 + $0x5] ss:$9 sm:$0xff] %v236_v9 }
 0x181   :  { %327 = vrot.lane.b32.xlu1 %v4380_v7, %s4322_s28  ;;  %329 = vrot.lane.b32.xlu2 %v4378_v6, %s4322_s28 }
 0x182   :  { %325 = vrot.lane.b32.xlu0 %v4366_v3, %s4322_s28 }
 0x183   :  { %v4836_v47 = vpop.permute.xlu1 %243  ;;  %v4838_v54 = vpop.permute.xlu2 %263 }
 0x184   :  { %9812 = vst [vmem:[#allocation75_spill] sm:$0xff] %v4836_v47  ;;  %v4840_v34 = vpop.permute.xlu0 %241 }
 0x185   :  { %9813 = vst [vmem:[#allocation76_spill] sm:$0xff] %v4838_v54 }
 0x186   :  { %9814 = vst [vmem:[#allocation77_spill] sm:$0xff] %v4840_v34 }
 0x189   :  { %333 = vrot.lane.b32.xlu1 %v4370_v5, %s4323_s29  ;;  %335 = vrot.lane.b32.xlu2 %v4355_v1, %s4323_s29 }
 0x18a   :  { %331 = vrot.lane.b32.xlu0 %v4357_v2, %s4323_s29 }
 0x18b   :  { %v4848_v9 = vpop.permute.xlu1 %249  ;;  %v4850_v17 = vpop.permute.xlu2 %269 }
 0x18c   :  { %9815 = vst [vmem:[#allocation78_spill] sm:$0xff] %v4848_v9  ;;  %v4852_v26 = vpop.permute.xlu0 %247 }
 0x18d   :  { %9816 = vst [vmem:[#allocation79_spill] sm:$0xff] %v4852_v26 }
 0x191   :  { %339 = vrot.lane.b32.xlu1 %v4353_v0, %s4323_s29  ;;  %341 = vrot.lane.b32.xlu2 %v4366_v3, %s4323_s29 }
 0x192   :  { %337 = vrot.lane.b32.xlu0 %v4368_v4, %s4323_s29 }
 0x193   :  { %v4860_v54 = vpop.permute.xlu1 %255  ;;  %v4862_v47 = vpop.permute.xlu2 %275 }
 0x194   :  { %9817 = vst [vmem:[#allocation80_spill] sm:$0xff] %v4862_v47  ;;  %v4864_v28 = vpop.permute.xlu0 %253 }
 0x199   :  { %345 = vrot.lane.b32.xlu1 %v4378_v6, %s4323_s29  ;;  %347 = vrot.lane.b32.xlu2 %v4357_v2, %s4324_s30 }
 0x19a   :  { %343 = vrot.lane.b32.xlu0 %v4380_v7, %s4323_s29 }
 0x19b   :  { %v4872_v9 = vpop.permute.xlu1 %261  ;;  %v4874_v26 = vpop.permute.xlu2 %281 }
 0x19c   :  { %9818 = vst [vmem:[#allocation81_spill] sm:$0xff] %v4872_v9  ;;  %v4876_v57 = vpop.permute.xlu0 %259 }
 0x19d   :  { %9819 = vst [vmem:[#allocation82_spill] sm:$0xff] %v4874_v26 }
 0x19e   :  { %9820 = vst [vmem:[#allocation83_spill] sm:$0xff] %v4876_v57 }
 0x1a1   :  { %351 = vrot.lane.b32.xlu1 %v4355_v1, %s4324_s30  ;;  %353 = vrot.lane.b32.xlu2 %v4368_v4, %s4324_s30 }
 0x1a2   :  { %349 = vrot.lane.b32.xlu0 %v4370_v5, %s4324_s30 }
 0x1a3   :  { %v268_v47 = vpop.permute.xlu1 %267  ;;  %v4884_v52 = vpop.permute.xlu2 %287 }
 0x1a4   :  { %562 = vst [vmem:[#allocation1 + $0x7] ss:$9 sm:$0xff] %v268_v47  ;;  %v4886_v62 = vpop.permute.xlu0 %265 }
 0x1a5   :  { %9821 = vst [vmem:[#allocation84_spill] sm:$0xff] %v4886_v62 }
 0x1a9   :  { %357 = vrot.lane.b32.xlu1 %v4366_v3, %s4324_s30  ;;  %359 = vrot.lane.b32.xlu2 %v4380_v7, %s4324_s30 }
 0x1aa   :  { %355 = vrot.lane.b32.xlu0 %v4353_v0, %s4324_s30 }
 0x1ab   :  { %v4894_v26 = vpop.permute.xlu2 %293  ;;  %v4896_v9 = vpop.permute.xlu1 %273  ;;  %v4906_v47 = vld [vmem:[#allocation1] sm:$0xff] }
 0x1ac   :  { %9822 = vst [vmem:[#allocation85_spill] sm:$0xff] %v4894_v26  ;;  %v4898_v57 = vpop.permute.xlu0 %271 }
 0x1ad   :  { %9823 = vst [vmem:[#allocation86_spill] sm:$0xff] %v4896_v9 }
 0x1b1   :  { %363 = vrot.lane.b32.xlu1 %v4357_v2, %s4325_s2  ;;  %365 = vrot.lane.b32.xlu2 %v4370_v5, %s4325_s2 }
 0x1b2   :  { %361 = vrot.lane.b32.xlu0 %v4378_v6, %s4324_s30 }
 0x1b3   :  { %v300_v62 = vpop.permute.xlu2 %299  ;;  %v4908_v45 = vpop.permute.xlu1 %279 }
 0x1b4   :  { %9824 = vst [vmem:[#allocation87_spill] sm:$0xff] %v4908_v45  ;;  %v4910_v26 = vpop.permute.xlu0 %277 }
 0x1b5   :  { %9825 = vst [vmem:[#allocation88_spill] sm:$0xff] %v4910_v26 }
 0x1b6   :  { %565 = vst [vmem:[#allocation1 + $0x1] ss:$9 sm:$0xff] %v300_v62 }
 0x1b9   :  { %369 = vrot.lane.b32.xlu1 %v4368_v4, %s4325_s2  ;;  %371 = vrot.lane.b32.xlu2 %v4353_v0, %s4325_s2 }
 0x1ba   :  { %367 = vrot.lane.b32.xlu0 %v4355_v1, %s4325_s2 }
 0x1bb   :  { %v4918_v49 = vpop.permute.xlu2 %305  ;;  %v4920_v38 = vpop.permute.xlu1 %285 }
 0x1bc   :  { %9826 = vst [vmem:[#allocation89_spill] sm:$0xff] %v4918_v49  ;;  %v284_v21 = vpop.permute.xlu0 %283 }
 0x1bd   :  { %564 = vst [vmem:[#allocation1] ss:$9 sm:$0xff] %v284_v21 }
 0x1c1   :  { %375 = vrot.lane.b32.xlu1 %v4380_v7, %s4325_s2  ;;  %377 = vrot.lane.b32.xlu2 %v4378_v6, %s4325_s2 }
 0x1c2   :  { %373 = vrot.lane.b32.xlu0 %v4366_v3, %s4325_s2 }
 0x1c3   :  { %v4928_v62 = vpop.permute.xlu2 %311  ;;  %v4930_v45 = vpop.permute.xlu1 %291 }
 0x1c4   :  { %9827 = vst [vmem:[#allocation90_spill] sm:$0xff] %v4928_v62  ;;  %v4932_v26 = vpop.permute.xlu0 %289 }
 0x1c5   :  { %9828 = vst [vmem:[#allocation91_spill] sm:$0xff] %v4930_v45 }
 0x1c6   :  { %9829 = vst [vmem:[#allocation92_spill] sm:$0xff] %v4932_v26 }
 0x1c9   :  { %381 = vrot.lane.b32.xlu1 %v4370_v5, %s9738_s3  ;;  %383 = vrot.lane.b32.xlu2 %v4355_v1, %s9738_s3 }
 0x1ca   :  { %379 = vrot.lane.b32.xlu0 %v4357_v2, %s9738_s3 }
 0x1cb   :  { %v4940_v21 = vpop.permute.xlu2 %317  ;;  %v4942_v25 = vpop.permute.xlu1 %297 }
 0x1cc   :  { %9830 = vst [vmem:[#allocation93_spill] sm:$0xff] %v4942_v25  ;;  %v4944_v8 = vpop.permute.xlu0 %295 }
 0x1cd   :  { %9831 = vst [vmem:[#allocation94_spill] sm:$0xff] %v4944_v8 }
 0x1d1   :  { %387 = vrot.lane.b32.xlu1 %v4353_v0, %s9738_s3  ;;  %389 = vrot.lane.b32.xlu2 %v4366_v3, %s9738_s3 }
 0x1d2   :  { %385 = vrot.lane.b32.xlu0 %v4368_v4, %s9738_s3 }
 0x1d3   :  { %v4952_v62 = vpop.permute.xlu2 %323  ;;  %v4954_v45 = vpop.permute.xlu1 %303 }
 0x1d4   :  { %9832 = vst [vmem:[#allocation95_spill] sm:$0xff] %v4952_v62  ;;  %v4956_v49 = vpop.permute.xlu0 %301 }
 0x1d9   :  { %393 = vrot.lane.b32.xlu1 %v4378_v6, %s9738_s3  ;;  %395 = vrot.lane.b32.xlu2 %v4357_v2, %s4327_s4 }
 0x1da   :  { %391 = vrot.lane.b32.xlu0 %v4380_v7, %s9738_s3 }
 0x1db   :  { %v4964_v25 = vpop.permute.xlu2 %329  ;;  %v4966_v8 = vpop.permute.xlu1 %309 }
 0x1dc   :  { %9833 = vst [vmem:[#allocation96_spill] sm:$0xff] %v4964_v25  ;;  %v4968_v26 = vpop.permute.xlu0 %307 }
 0x1dd   :  { %9834 = vst [vmem:[#allocation97_spill] sm:$0xff] %v4966_v8 }
 0x1de   :  { %9835 = vst [vmem:[#allocation98_spill] sm:$0xff] %v4968_v26 }
 0x1e1   :  { %399 = vrot.lane.b32.xlu1 %v4355_v1, %s4327_s4  ;;  %401 = vrot.lane.b32.xlu2 %v4368_v4, %s4327_s4 }
 0x1e2   :  { %397 = vrot.lane.b32.xlu0 %v4370_v5, %s4327_s4 }
 0x1e3   :  { %v4976_v62 = vpop.permute.xlu2 %335  ;;  %v316_v9 = vpop.permute.xlu1 %315 }
 0x1e4   :  { %v4978_v23 = vpop.permute.xlu0 %313  ;;  %566 = vst [vmem:[#allocation1 + $0x2] ss:$9 sm:$0xff] %v316_v9 }
 0x1e5   :  { %9836 = vst [vmem:[#allocation99_spill] sm:$0xff] %v4978_v23 }
 0x1e9   :  { %405 = vrot.lane.b32.xlu1 %v4366_v3, %s4327_s4  ;;  %407 = vrot.lane.b32.xlu2 %v4380_v7, %s4327_s4 }
 0x1ea   :  { %403 = vrot.lane.b32.xlu0 %v4353_v0, %s4327_s4 }
 0x1eb   :  { %v4986_v25 = vpop.permute.xlu2 %341  ;;  %v4988_v8 = vpop.permute.xlu1 %321 }
 0x1ec   :  { %9837 = vst [vmem:[#allocation100_spill] sm:$0xff] %v4986_v25  ;;  %v4990_v26 = vpop.permute.xlu0 %319 }
 0x1ed   :  { %9838 = vst [vmem:[#allocation101_spill] sm:$0xff] %v4988_v8 }
 0x1f1   :  { %411 = vrot.lane.b32.xlu1 %v4357_v2, %s4328_s5  ;;  %413 = vrot.lane.b32.xlu2 %v4370_v5, %s4328_s5 }
 0x1f2   :  { %409 = vrot.lane.b32.xlu0 %v4378_v6, %s4327_s4 }
 0x1f3   :  { %v348_v9 = vpop.permute.xlu2 %347  ;;  %v4998_v23 = vpop.permute.xlu1 %327 }
 0x1f4   :  { %9839 = vst [vmem:[#allocation102_spill] sm:$0xff] %v4998_v23  ;;  %v5000_v34 = vpop.permute.xlu0 %325 }
 0x1f5   :  { %9840 = vst [vmem:[#allocation103_spill] sm:$0xff] %v5000_v34 }
 0x1f6   :  { %568 = vst [vmem:[#allocation1 + $0x4] ss:$9 sm:$0xff] %v348_v9 }
 0x1f9   :  { %417 = vrot.lane.b32.xlu1 %v4368_v4, %s4328_s5  ;;  %419 = vrot.lane.b32.xlu2 %v4353_v0, %s4328_s5 }
 0x1fa   :  { %415 = vrot.lane.b32.xlu0 %v4355_v1, %s4328_s5 }
 0x1fb   :  { %v5008_v25 = vpop.permute.xlu2 %353  ;;  %v5010_v8 = vpop.permute.xlu1 %333 }
 0x1fc   :  { %9841 = vst [vmem:[#allocation104_spill] sm:$0xff] %v5008_v25  ;;  %v332_v19 = vpop.permute.xlu0 %331 }
 0x1fd   :  { %567 = vst [vmem:[#allocation1 + $0x3] ss:$9 sm:$0xff] %v332_v19 }
 0x201   :  { %423 = vrot.lane.b32.xlu1 %v4380_v7, %s4328_s5  ;;  %425 = vrot.lane.b32.xlu2 %v4378_v6, %s4328_s5 }
 0x202   :  { %421 = vrot.lane.b32.xlu0 %v4366_v3, %s4328_s5 }
 0x203   :  { %v5018_v9 = vpop.permute.xlu2 %359  ;;  %v5020_v23 = vpop.permute.xlu1 %339 }
 0x204   :  { %9842 = vst [vmem:[#allocation105_spill] sm:$0xff] %v5018_v9  ;;  %v5022_v34 = vpop.permute.xlu0 %337 }
 0x205   :  { %9843 = vst [vmem:[#allocation106_spill] sm:$0xff] %v5020_v23 }
 0x206   :  { %9844 = vst [vmem:[#allocation107_spill] sm:$0xff] %v5022_v34 }
 0x209   :  { %429 = vrot.lane.b32.xlu1 %v4370_v5, %s9731_s6  ;;  %431 = vrot.lane.b32.xlu2 %v4355_v1, %s9731_s6 }
 0x20a   :  { %427 = vrot.lane.b32.xlu0 %v4357_v2, %s9731_s6 }
 0x20b   :  { %v5030_v19 = vpop.permute.xlu2 %365  ;;  %v5032_v25 = vpop.permute.xlu1 %345 }
 0x20c   :  { %9845 = vst [vmem:[#allocation108_spill] sm:$0xff] %v5032_v25  ;;  %v5034_v39 = vpop.permute.xlu0 %343 }
 0x20d   :  { %9846 = vst [vmem:[#allocation109_spill] sm:$0xff] %v5034_v39 }
 0x211   :  { %435 = vrot.lane.b32.xlu1 %v4353_v0, %s9731_s6  ;;  %437 = vrot.lane.b32.xlu2 %v4366_v3, %s9731_s6 }
 0x212   :  { %433 = vrot.lane.b32.xlu0 %v4368_v4, %s9731_s6 }
 0x213   :  { %v5042_v9 = vpop.permute.xlu2 %371  ;;  %v5044_v23 = vpop.permute.xlu1 %351 }
 0x214   :  { %9847 = vst [vmem:[#allocation110_spill] sm:$0xff] %v5042_v9  ;;  %v5046_v34 = vpop.permute.xlu0 %349 }
 0x219   :  { %441 = vrot.lane.b32.xlu1 %v4378_v6, %s9731_s6  ;;  %443 = vrot.lane.b32.xlu2 %v4357_v2, %s4330_s7 }
 0x21a   :  { %439 = vrot.lane.b32.xlu0 %v4380_v7, %s9731_s6 }
 0x21b   :  { %v5054_v25 = vpop.permute.xlu2 %377  ;;  %v5056_v39 = vpop.permute.xlu1 %357 }
 0x21c   :  { %9848 = vst [vmem:[#allocation111_spill] sm:$0xff] %v5054_v25  ;;  %v5058_v32 = vpop.permute.xlu0 %355 }
 0x21d   :  { %9849 = vst [vmem:[#allocation112_spill] sm:$0xff] %v5056_v39 }
 0x21e   :  { %9850 = vst [vmem:[#allocation113_spill] sm:$0xff] %v5058_v32 }
 0x221   :  { %447 = vrot.lane.b32.xlu1 %v4355_v1, %s4330_s7  ;;  %449 = vrot.lane.b32.xlu2 %v4368_v4, %s4330_s7 }
 0x222   :  { %445 = vrot.lane.b32.xlu0 %v4370_v5, %s4330_s7 }
 0x223   :  { %v5066_v9 = vpop.permute.xlu2 %383  ;;  %v364_v48 = vpop.permute.xlu1 %363 }
 0x224   :  { %v5068_v60 = vpop.permute.xlu0 %361  ;;  %569 = vst [vmem:[#allocation1 + $0x5] ss:$9 sm:$0xff] %v364_v48 }
 0x225   :  { %9851 = vst [vmem:[#allocation114_spill] sm:$0xff] %v5068_v60 }
 0x229   :  { %453 = vrot.lane.b32.xlu1 %v4366_v3, %s4330_s7  ;;  %455 = vrot.lane.b32.xlu2 %v4380_v7, %s4330_s7 }
 0x22a   :  { %451 = vrot.lane.b32.xlu0 %v4353_v0, %s4330_s7 }
 0x22b   :  { %v5076_v25 = vpop.permute.xlu2 %389  ;;  %v5078_v39 = vpop.permute.xlu1 %369 }
 0x22c   :  { %9852 = vst [vmem:[#allocation115_spill] sm:$0xff] %v5076_v25  ;;  %v5080_v32 = vpop.permute.xlu0 %367 }
 0x22d   :  { %9853 = vst [vmem:[#allocation116_spill] sm:$0xff] %v5078_v39 }
 0x231   :  { %459 = vrot.lane.b32.xlu1 %v4357_v2, %s4331_s8  ;;  %461 = vrot.lane.b32.xlu2 %v4370_v5, %s4331_s8 }
 0x232   :  { %457 = vrot.lane.b32.xlu0 %v4378_v6, %s4330_s7 }
 0x233   :  { %v396_v48 = vpop.permute.xlu2 %395  ;;  %v5088_v60 = vpop.permute.xlu1 %375 }
 0x234   :  { %9854 = vst [vmem:[#allocation117_spill] sm:$0xff] %v5088_v60  ;;  %v5090_v13 = vpop.permute.xlu0 %373 }
 0x235   :  { %9855 = vst [vmem:[#allocation118_spill] sm:$0xff] %v5090_v13 }
 0x236   :  { %571 = vst [vmem:[#allocation1 + $0x7] ss:$9 sm:$0xff] %v396_v48 }
 0x239   :  { %465 = vrot.lane.b32.xlu1 %v4368_v4, %s4331_s8  ;;  %467 = vrot.lane.b32.xlu2 %v4353_v0, %s4331_s8 }
 0x23a   :  { %463 = vrot.lane.b32.xlu0 %v4355_v1, %s4331_s8 }
 0x23b   :  { %v5098_v25 = vpop.permute.xlu1 %381  ;;  %v5130_v53 = vpop.permute.xlu2 %401 }
 0x23c   :  { %v380_v39 = vpop.permute.xlu0 %379  ;;  %9861 = vst [vmem:[#allocation124_spill] sm:$0xff] %v5130_v53 }
 0x23d   :  { %570 = vst [vmem:[#allocation1 + $0x6] ss:$9 sm:$0xff] %v380_v39 }
 0x241   :  { %471 = vrot.lane.b32.xlu1 %v4380_v7, %s4331_s8  ;;  %473 = vrot.lane.b32.xlu2 %v4378_v6, %s4331_s8 }
 0x242   :  { %469 = vrot.lane.b32.xlu0 %v4366_v3, %s4331_s8 }
 0x243   :  { %v5106_v48 = vpop.permute.xlu1 %387  ;;  %v5142_v36 = vpop.permute.xlu2 %407 }
 0x244   :  { %9856 = vst [vmem:[#allocation119_spill] sm:$0xff] %v5106_v48  ;;  %v5108_v60 = vpop.permute.xlu0 %385  ;;  %v5150_v53 = vld [vmem:[#allocation1] sm:$0xff] }
 0x245   :  { %9857 = vst [vmem:[#allocation120_spill] sm:$0xff] %v5108_v60 }
 0x246   :  { %9864 = vst [vmem:[#allocation127_spill] sm:$0xff] %v5142_v36 }
 0x249   :  { %477 = vrot.lane.b32.xlu1 %v4370_v5, %s9724_s9  ;;  %479 = vrot.lane.b32.xlu2 %v4355_v1, %s9724_s9 }
 0x24a   :  { %475 = vrot.lane.b32.xlu0 %v4357_v2, %s9724_s9 }
 0x24b   :  { %v5116_v39 = vpop.permute.xlu1 %393 }
 0x24c   :  { %9858 = vst [vmem:[#allocation121_spill] sm:$0xff] %v5116_v39  ;;  %v5118_v13 = vpop.permute.xlu0 %391 }
 0x24d   :  { %9859 = vst [vmem:[#allocation122_spill] sm:$0xff] %v5118_v13 }
 0x251   :  { %483 = vrot.lane.b32.xlu1 %v4353_v0, %s9724_s9  ;;  %485 = vrot.lane.b32.xlu2 %v4366_v3, %s9724_s9 }
 0x252   :  { %481 = vrot.lane.b32.xlu0 %v4368_v4, %s9724_s9 }
 0x253   :  { %v5126_v48 = vpop.permute.xlu1 %399 }
 0x254   :  { %9860 = vst [vmem:[#allocation123_spill] sm:$0xff] %v5126_v48  ;;  %v5128_v60 = vpop.permute.xlu0 %397 }
 0x259   :  { %489 = vrot.lane.b32.xlu1 %v4378_v6, %s9724_s9  ;;  %491 = vrot.lane.b32.xlu2 %v4357_v2, %s4333_s10 }
 0x25a   :  { %487 = vrot.lane.b32.xlu0 %v4380_v7, %s9724_s9  ;;  %s4334_s9 = smov 8  }
 0x25b   :  { %v5138_v39 = vpop.permute.xlu1 %405 }
 0x25c   :  { %9862 = vst [vmem:[#allocation125_spill] sm:$0xff] %v5138_v39  ;;  %v5140_v13 = vpop.permute.xlu0 %403  ;;  %v5154_v39 = vpop.permute.xlu2 %413 }
 0x25d   :  { %9863 = vst [vmem:[#allocation126_spill] sm:$0xff] %v5140_v13 }
 0x261   :  { %495 = vrot.lane.b32.xlu1 %v4355_v1, %s4333_s10  ;;  %497 = vrot.lane.b32.xlu2 %v4368_v4, %s4333_s10 }
 0x262   :  { %493 = vrot.lane.b32.xlu0 %v4370_v5, %s4333_s10 }
 0x263   :  { %v412_v40 = vpop.permute.xlu1 %411 }
 0x264   :  { %v5152_v29 = vpop.permute.xlu0 %409  ;;  %573 = vst [vmem:[#allocation1] ss:$9 sm:$0xff] %v412_v40  ;;  %v5166_v12 = vpop.permute.xlu2 %419 }
 0x265   :  { %9865 = vst [vmem:[#allocation128_spill] sm:$0xff] %v5152_v29 }
 0x266   :  { %9868 = vst [vmem:[#allocation131_spill] sm:$0xff] %v5166_v12 }
 0x269   :  { %501 = vrot.lane.b32.xlu1 %v4366_v3, %s4333_s10  ;;  %503 = vrot.lane.b32.xlu2 %v4380_v7, %s4333_s10 }
 0x26a   :  { %499 = vrot.lane.b32.xlu0 %v4353_v0, %s4333_s10 }
 0x26b   :  { %v5162_v36 = vpop.permute.xlu1 %417 }
 0x26c   :  { %9866 = vst [vmem:[#allocation129_spill] sm:$0xff] %v5162_v36  ;;  %v5164_v13 = vpop.permute.xlu0 %415  ;;  %v5178_v14 = vpop.permute.xlu2 %425 }
 0x26d   :  { %9867 = vst [vmem:[#allocation130_spill] sm:$0xff] %v5164_v13 }
 0x26e   :  { %9871 = vst [vmem:[#allocation134_spill] sm:$0xff] %v5178_v14 }
 0x271   :  { %507 = vrot.lane.b32.xlu1 %v4357_v2, %s4334_s9  ;;  %509 = vrot.lane.b32.xlu2 %v4370_v5, %s4334_s9 }
 0x272   :  { %505 = vrot.lane.b32.xlu0 %v4378_v6, %s4333_s10 }
 0x273   :  { %v5174_v40 = vpop.permute.xlu1 %423 }
 0x274   :  { %9869 = vst [vmem:[#allocation132_spill] sm:$0xff] %v5174_v40  ;;  %v5176_v29 = vpop.permute.xlu0 %421  ;;  %v5188_v13 = vpop.permute.xlu2 %431 }
 0x275   :  { %9870 = vst [vmem:[#allocation133_spill] sm:$0xff] %v5176_v29 }
 0x276   :  { %9872 = vst [vmem:[#allocation135_spill] sm:$0xff] %v5188_v13 }
 0x279   :  { %513 = vrot.lane.b32.xlu1 %v4368_v4, %s4334_s9  ;;  %515 = vrot.lane.b32.xlu2 %v4353_v0, %s4334_s9 }
 0x27a   :  { %511 = vrot.lane.b32.xlu0 %v4355_v1, %s4334_s9 }
 0x27b   :  { %v5186_v12 = vpop.permute.xlu1 %429 }
 0x27c   :  { %v428_v36 = vpop.permute.xlu0 %427  ;;  %v5200_v29 = vpop.permute.xlu2 %437 }
 0x27d   :  { %574 = vst [vmem:[#allocation1 + $0x1] ss:$9 sm:$0xff] %v428_v36 }
 0x27e   :  { %9875 = vst [vmem:[#allocation138_spill] sm:$0xff] %v5200_v29 }
 0x281   :  { %519 = vrot.lane.b32.xlu1 %v4380_v7, %s4334_s9  ;;  %521 = vrot.lane.b32.xlu2 %v4378_v6, %s4334_s9 }
 0x282   :  { %517 = vrot.lane.b32.xlu0 %v4366_v3, %s4334_s9 }
 0x283   :  { %v5196_v14 = vpop.permute.xlu1 %435 }
 0x284   :  { %9873 = vst [vmem:[#allocation136_spill] sm:$0xff] %v5196_v14  ;;  %v5198_v40 = vpop.permute.xlu0 %433  ;;  %v444_v48 = vpop.permute.xlu2 %443 }
 0x285   :  { %9874 = vst [vmem:[#allocation137_spill] sm:$0xff] %v5198_v40 }
 0x286   :  { %575 = vst [vmem:[#allocation1 + $0x2] ss:$9 sm:$0xff] %v444_v48 }
 0x289   :  { %525 = vrot.lane.b32.xlu1 %v4370_v5, %s4305_s12  ;;  %527 = vrot.lane.b32.xlu2 %v4355_v1, %s4305_s12 }
 0x28a   :  { %523 = vrot.lane.b32.xlu0 %v4357_v2, %s4305_s12 }
 0x28b   :  { %v5208_v36 = vpop.permute.xlu1 %441 }
 0x28c   :  { %9876 = vst [vmem:[#allocation139_spill] sm:$0xff] %v5208_v36  ;;  %v5210_v13 = vpop.permute.xlu0 %439  ;;  %v5222_v2 = vpop.permute.xlu2 %449 }
 0x28d   :  { %9877 = vst [vmem:[#allocation140_spill] sm:$0xff] %v5210_v13 }
 0x28e   :  { %9879 = vst [vmem:[#allocation142_spill] sm:$0xff] %v5222_v2 }
 0x291   :  { %531 = vrot.lane.b32.xlu1 %v4353_v0, %s4305_s12  ;;  %533 = vrot.lane.b32.xlu2 %v4366_v3, %s4305_s12 }
 0x292   :  { %529 = vrot.lane.b32.xlu0 %v4368_v4, %s4305_s12 }
 0x293   :  { %v5218_v29 = vpop.permute.xlu1 %447 }
 0x294   :  { %9878 = vst [vmem:[#allocation141_spill] sm:$0xff] %v5218_v29  ;;  %v5220_v14 = vpop.permute.xlu0 %445  ;;  %v5232_v13 = vpop.permute.xlu2 %455 }
 0x295   :  { %9882 = vst [vmem:[#allocation145_spill] sm:$0xff] %v5232_v13  ;;  %v867_v13 = vsel %vm866_vm0, %v4658_v10, -inf }
 0x299   :  { %537 = vrot.lane.b32.xlu1 %v4378_v6, %s4305_s12 }
 0x29a   :  { %535 = vrot.lane.b32.xlu0 %v4380_v7, %s4305_s12 }
 0x29b   :  { %v5228_v48 = vpop.permute.xlu1 %453 }
 0x29c   :  { %9880 = vst [vmem:[#allocation143_spill] sm:$0xff] %v5228_v48  ;;  %v5230_v36 = vpop.permute.xlu0 %451  ;;  %v5236_v40 = vpop.permute.xlu2 %461 }
 0x29d   :  { %9881 = vst [vmem:[#allocation144_spill] sm:$0xff] %v5230_v36 }
 0x2a3   :  { %v460_v3 = vpop.permute.xlu1 %459 }
 0x2a4   :  { %v5234_v0 = vpop.permute.xlu0 %457  ;;  %576 = vst [vmem:[#allocation1 + $0x3] ss:$9 sm:$0xff] %v460_v3  ;;  %v5242_v6 = vpop.permute.xlu2 %467 }
 0x2a5   :  { %9883 = vst [vmem:[#allocation146_spill] sm:$0xff] %v5234_v0 }
 0x2a6   :  { %9886 = vst [vmem:[#allocation149_spill] sm:$0xff] %v5242_v6  ;;  %v873_v6 = vsel %vm866_vm0, %v5150_v53, -inf }
 0x2ab   :  { %v5238_v4 = vpop.permute.xlu1 %465 }
 0x2ac   :  { %9884 = vst [vmem:[#allocation147_spill] sm:$0xff] %v5238_v4  ;;  %v5240_v2 = vpop.permute.xlu0 %463  ;;  %v5248_v48 = vpop.permute.xlu2 %473 }
 0x2ad   :  { %9885 = vst [vmem:[#allocation148_spill] sm:$0xff] %v5240_v2 }
 0x2ae   :  { %9889 = vst [vmem:[#allocation152_spill] sm:$0xff] %v5248_v48 }
 0x2b3   :  { %v5244_v29 = vpop.permute.xlu1 %471 }
 0x2b4   :  { %9887 = vst [vmem:[#allocation150_spill] sm:$0xff] %v5244_v29  ;;  %v5246_v7 = vpop.permute.xlu0 %469  ;;  %v5254_v36 = vpop.permute.xlu2 %479  ;;  %v870_v29 = vsel %vm866_vm0, %v4906_v47, -inf }
 0x2b5   :  { %9888 = vst [vmem:[#allocation151_spill] sm:$0xff] %v5246_v7 }
 0x2b6   :  { %9890 = vst [vmem:[#allocation153_spill] sm:$0xff] %v5254_v36 }
 0x2ba   :  { %868 = vmax.xlane.f32.xlu2 %v867_v13 }
 0x2bb   :  { %v5252_v3 = vpop.permute.xlu1 %477 }
 0x2bc   :  { %v476_v0 = vpop.permute.xlu0 %475  ;;  %v5264_v10 = vpop.permute.xlu2 %485 }
 0x2bd   :  { %577 = vst [vmem:[#allocation1 + $0x4] ss:$9 sm:$0xff] %v476_v0 }
 0x2be   :  { %9892 = vst [vmem:[#allocation155_spill] sm:$0xff] %v5264_v10 }
 0x2c3   :  { %874 = vmax.xlane.f32.xlu1 %v873_v6  ;;  %v5260_v7 = vpop.permute.xlu1 %483 }
 0x2c4   :  { %9891 = vst [vmem:[#allocation154_spill] sm:$0xff] %v5260_v7  ;;  %v5262_v48 = vpop.permute.xlu0 %481  ;;  %871 = vmax.xlane.f32.xlu0 %v870_v29  ;;  %v492_v0 = vpop.permute.xlu2 %491 }
 0x2c5   :  { %578 = vst [vmem:[#allocation1 + $0x5] ss:$9 sm:$0xff] %v492_v0 }
 0x2cb   :  { %v5266_v13 = vpop.permute.xlu1 %489 }
 0x2cc   :  { %9893 = vst [vmem:[#allocation156_spill] sm:$0xff] %v5266_v13  ;;  %v5268_v4 = vpop.permute.xlu0 %487 }
 0x2cd   :  { %9894 = vst [vmem:[#allocation157_spill] sm:$0xff] %v5268_v4 }
 0x2d3   :  { %v5270_v36 = vpop.permute.xlu1 %495 }
 0x2d4   :  { %v494_v53 = vpop.permute.xlu0 %493 }
 0x2db   :  { %v5272_v2 = vpop.permute.xlu1 %501 }
 0x2dc   :  { %v5274_v47 = vpop.permute.xlu0 %499 }
 0x2e3   :  { %v508_v6 = vpop.permute.xlu1 %507 }
 0x2e4   :  { %v5276_v7 = vpop.permute.xlu0 %505  ;;  %579 = vst [vmem:[#allocation1 + $0x6] ss:$9 sm:$0xff] %v508_v6  ;;  %v9926_v6 = vld [vmem:[#allocation137_spill] sm:$0xff] }
 0x2ec   :  { %v5278_v29 = vpop.permute.xlu0 %511 }
 0x2f4   :  { %v5280_v10 = vpop.permute.xlu0 %517 }
 0x2fc   :  { %v524_v13 = vpop.permute.xlu0 %523 }
 0x2fd   :  { %580 = vst [vmem:[#allocation1 + $0x7] ss:$9 sm:$0xff] %v524_v13 }
 0x304   :  { %v581_v4 = vld [vmem:[#allocation1] sm:$0xff] }
 0x305   :  { %582 = vst [vmem:[#allocation1] ss:$9 sm:$0xff] %v4370_v5  ;;  %v876_v0 = vsel %vm866_vm0, %v581_v4, -inf  ;;  %v5300_v5 = vpop.permute.xlu2 %497 }
 0x306   :  { %583 = vst [vmem:[#allocation1 + $0x1] ss:$9 sm:$0xff] %v4478_v16  ;;  %877 = vmax.xlane.f32.xlu2 %v876_v0  ;;  %v9928_v0 = vld [vmem:[#allocation147_spill] sm:$0xff] }
 0x307   :  { %584 = vst [vmem:[#allocation1 + $0x2] ss:$9 sm:$0xff] %v4502_v22 }
 0x308   :  { %585 = vst [vmem:[#allocation1 + $0x3] ss:$9 sm:$0xff] %v4488_v18  ;;  %v5302_v18 = vpop.permute.xlu1 %513 }
 0x309   :  { %586 = vst [vmem:[#allocation1 + $0x4] ss:$9 sm:$0xff] %v4554_v35 }
 0x30a   :  { %587 = vst [vmem:[#allocation1 + $0x5] ss:$9 sm:$0xff] %v4592_v46  ;;  %v9901_v46 = vld [vmem:[#allocation10_spill] sm:$0xff] }
 0x30b   :  { %588 = vst [vmem:[#allocation1 + $0x6] ss:$9 sm:$0xff] %v4578_v42  ;;  %v9898_v42 = vld [vmem:[#allocation141_spill] sm:$0xff] }
 0x30c   :  { %589 = vst [vmem:[#allocation1 + $0x7] ss:$9 sm:$0xff] %v4644_v59  ;;  %v9908_v59 = vld [vmem:[#allocation47_spill] sm:$0xff] }
 0x313   :  { %v590_v13 = vld [vmem:[#allocation1] sm:$0xff] }
 0x314   :  { %591 = vst [vmem:[#allocation1] ss:$9 sm:$0xff] %v4684_v61  ;;  %v879_v4 = vsel %vm866_vm0, %v590_v13, -inf  ;;  %v9915_v61 = vld [vmem:[#allocation74_spill] sm:$0xff]  ;;  %v530_v13 = vpop.permute.xlu0 %529 }
 0x315   :  { %592 = vst [vmem:[#allocation1 + $0x1] ss:$9 sm:$0xff] %v4670_v33  ;;  %880 = vmax.xlane.f32.xlu2 %v879_v4  ;;  %v9911_v33 = vld [vmem:[#allocation62_spill] sm:$0xff] }
 0x316   :  { %593 = vst [vmem:[#allocation1 + $0x2] ss:$9 sm:$0xff] %v4736_v56  ;;  %v9906_v56 = vld [vmem:[#allocation29_spill] sm:$0xff] }
 0x317   :  { %594 = vst [vmem:[#allocation1 + $0x3] ss:$9 sm:$0xff] %v4774_v37  ;;  %v9912_v37 = vld [vmem:[#allocation59_spill] sm:$0xff] }
 0x318   :  { %595 = vst [vmem:[#allocation1 + $0x4] ss:$9 sm:$0xff] %v4760_v15  ;;  %v5310_v15 = vpop.permute.xlu2 %503 }
 0x319   :  { %596 = vst [vmem:[#allocation1 + $0x5] ss:$9 sm:$0xff] %v4826_v43 }
 0x31a   :  { %597 = vst [vmem:[#allocation1 + $0x6] ss:$9 sm:$0xff] %v4864_v28 }
 0x31b   :  { %598 = vst [vmem:[#allocation1 + $0x7] ss:$9 sm:$0xff] %v4850_v17  ;;  %v5315_v17 = vpop.permute.xlu1 %519 }
 0x320   :  { %v510_v35 = vpop.permute.xlu2 %509 }
 0x322   :  { %v599_v16 = vld [vmem:[#allocation1] sm:$0xff] }
 0x323   :  { %600 = vst [vmem:[#allocation1] ss:$9 sm:$0xff] %v4920_v38  ;;  %v882_v22 = vsel %vm866_vm0, %v599_v16, -inf  ;;  %v9929_v16 = vld [vmem:[#allocation8_spill] sm:$0xff] }
 0x324   :  { %601 = vst [vmem:[#allocation1 + $0x1] ss:$9 sm:$0xff] %v4956_v49  ;;  %883 = vmax.xlane.f32.xlu0 %v882_v22  ;;  %v9902_v49 = vld [vmem:[#allocation16_spill] sm:$0xff]  ;;  %v9930_v22 = vld [vmem:[#allocation13_spill] sm:$0xff] }
 0x325   :  { %602 = vst [vmem:[#allocation1 + $0x2] ss:$9 sm:$0xff] %v4940_v21  ;;  %v9919_v21 = vld [vmem:[#allocation101_spill] sm:$0xff] }
 0x326   :  { %603 = vst [vmem:[#allocation1 + $0x3] ss:$9 sm:$0xff] %v5010_v8  ;;  %v526_v8 = vpop.permute.xlu1 %525 }
 0x327   :  { %604 = vst [vmem:[#allocation1 + $0x4] ss:$9 sm:$0xff] %v5046_v34  ;;  %v9897_v34 = vld [vmem:[#allocation135_spill] sm:$0xff] }
 0x328   :  { %605 = vst [vmem:[#allocation1 + $0x5] ss:$9 sm:$0xff] %v5030_v19  ;;  %v9921_v19 = vld [vmem:[#allocation104_spill] sm:$0xff] }
 0x329   :  { %606 = vst [vmem:[#allocation1 + $0x6] ss:$9 sm:$0xff] %v5098_v25 }
 0x32a   :  { %607 = vst [vmem:[#allocation1 + $0x7] ss:$9 sm:$0xff] %v5128_v60 }
 0x331   :  { %v608_v38 = vld [vmem:[#allocation1] sm:$0xff] }
 0x332   :  { %615 = vst [vmem:[#allocation1 + $0x6] ss:$9 sm:$0xff] %v510_v35  ;;  %v9931_v35 = vld [vmem:[#allocation23_spill] sm:$0xff] }
 0x333   :  { %609 = vst [vmem:[#allocation1] ss:$9 sm:$0xff] %v5154_v39  ;;  %v9922_v39 = vld [vmem:[#allocation116_spill] sm:$0xff] }
 0x334   :  { %610 = vst [vmem:[#allocation1 + $0x1] ss:$9 sm:$0xff] %v5186_v12  ;;  %v885_v12 = vsel %vm866_vm0, %v608_v38, -inf  ;;  %v9932_v38 = vld [vmem:[#allocation20_spill] sm:$0xff] }
 0x335   :  { %611 = vst [vmem:[#allocation1 + $0x2] ss:$9 sm:$0xff] %v5220_v14  ;;  %886 = vmax.xlane.f32.xlu1 %v885_v12  ;;  %v9937_v12 = vld [vmem:[#allocation53_spill] sm:$0xff] }
 0x336   :  { %612 = vst [vmem:[#allocation1 + $0x3] ss:$9 sm:$0xff] %v5236_v40  ;;  %v9923_v40 = vld [vmem:[#allocation120_spill] sm:$0xff] }
 0x337   :  { %613 = vst [vmem:[#allocation1 + $0x4] ss:$9 sm:$0xff] %v5252_v3 }
 0x338   :  { %614 = vst [vmem:[#allocation1 + $0x5] ss:$9 sm:$0xff] %v494_v53  ;;  %v9925_v53 = vld [vmem:[#allocation129_spill] sm:$0xff] }
 0x339   :  { %616 = vst [vmem:[#allocation1 + $0x7] ss:$9 sm:$0xff] %v526_v8  ;;  %v9933_v8 = vld [vmem:[#allocation30_spill] sm:$0xff] }
 0x340   :  { %v617_v25 = vld [vmem:[#allocation1] sm:$0xff] }
 0x341   :  { %618 = vst [vmem:[#allocation1] ss:$9 sm:$0xff] %v4355_v1  ;;  %v888_v1 = vsel %vm866_vm0, %v617_v25, -inf  ;;  %v9934_v25 = vld [vmem:[#allocation38_spill] sm:$0xff] }
 0x342   :  { %619 = vst [vmem:[#allocation1 + $0x1] ss:$9 sm:$0xff] %v4464_v11  ;;  %889 = vmax.xlane.f32.xlu2 %v888_v1  ;;  %v9939_v1 = vld [vmem:[#allocation60_spill] sm:$0xff] }
 0x343   :  { %620 = vst [vmem:[#allocation1 + $0x2] ss:$9 sm:$0xff] %v4498_v20  ;;  %v5343_v20 = vpop.permute.xlu2 %515 }
 0x344   :  { %621 = vst [vmem:[#allocation1 + $0x3] ss:$9 sm:$0xff] %v4536_v31  ;;  %v9896_v31 = vld [vmem:[#allocation130_spill] sm:$0xff] }
 0x345   :  { %622 = vst [vmem:[#allocation1 + $0x4] ss:$9 sm:$0xff] %v4522_v27 }
 0x346   :  { %623 = vst [vmem:[#allocation1 + $0x5] ss:$9 sm:$0xff] %v4588_v44  ;;  %v9899_v44 = vld [vmem:[#allocation148_spill] sm:$0xff] }
 0x347   :  { %624 = vst [vmem:[#allocation1 + $0x6] ss:$9 sm:$0xff] %v4626_v55  ;;  %v9905_v55 = vld [vmem:[#allocation32_spill] sm:$0xff] }
 0x348   :  { %625 = vst [vmem:[#allocation1 + $0x7] ss:$9 sm:$0xff] %v4612_v51  ;;  %v9903_v51 = vld [vmem:[#allocation15_spill] sm:$0xff] }
 0x34b   :  { %v5352_v27 = vpop.permute.xlu2 %521 }
 0x34f   :  { %v626_v14 = vld [vmem:[#allocation1] sm:$0xff] }
 0x350   :  { %627 = vst [vmem:[#allocation1] ss:$9 sm:$0xff] %v4680_v50  ;;  %v9913_v50 = vld [vmem:[#allocation70_spill] sm:$0xff]  ;;  %v891_v28 = vsel %vm866_vm0, %v626_v14, -inf }
 0x351   :  { %628 = vst [vmem:[#allocation1 + $0x1] ss:$9 sm:$0xff] %v4718_v63  ;;  %v9909_v63 = vld [vmem:[#allocation44_spill] sm:$0xff]  ;;  %892 = vmax.xlane.f32.xlu0 %v891_v28  ;;  %v9938_v14 = vld [vmem:[#allocation50_spill] sm:$0xff] }
 0x352   :  { %629 = vst [vmem:[#allocation1 + $0x2] ss:$9 sm:$0xff] %v4704_v24  ;;  %v9895_v24 = vld [vmem:[#allocation123_spill] sm:$0xff] }
 0x353   :  { %630 = vst [vmem:[#allocation1 + $0x3] ss:$9 sm:$0xff] %v4770_v41  ;;  %v9916_v41 = vld [vmem:[#allocation86_spill] sm:$0xff] }
 0x354   :  { %631 = vst [vmem:[#allocation1 + $0x4] ss:$9 sm:$0xff] %v4808_v30 }
 0x355   :  { %632 = vst [vmem:[#allocation1 + $0x5] ss:$9 sm:$0xff] %v4794_v58  ;;  %v9907_v58 = vld [vmem:[#allocation40_spill] sm:$0xff] }
 0x356   :  { %633 = vst [vmem:[#allocation1 + $0x6] ss:$9 sm:$0xff] %v4860_v54  ;;  %v9917_v54 = vld [vmem:[#allocation92_spill] sm:$0xff] }
 0x357   :  { %634 = vst [vmem:[#allocation1 + $0x7] ss:$9 sm:$0xff] %v4898_v57  ;;  %v9914_v57 = vld [vmem:[#allocation77_spill] sm:$0xff] }
 0x35e   :  { %v5340_v11 = vld [vmem:[#allocation1] sm:$0xff] }
 0x35f   :  { %636 = vst [vmem:[#allocation1] ss:$9 sm:$0xff] %v4884_v52  ;;  %v9904_v52 = vld [vmem:[#allocation25_spill] sm:$0xff] }
 0x360   :  { %637 = vst [vmem:[#allocation1 + $0x1] ss:$9 sm:$0xff] %v4954_v45  ;;  %v9900_v45 = vld [vmem:[#allocation153_spill] sm:$0xff] }
 0x361   :  { %638 = vst [vmem:[#allocation1 + $0x2] ss:$9 sm:$0xff] %v4990_v26  ;;  %v9910_v26 = vld [vmem:[#allocation55_spill] sm:$0xff] }
 0x362   :  { %639 = vst [vmem:[#allocation1 + $0x3] ss:$9 sm:$0xff] %v4976_v62  ;;  %v9918_v62 = vld [vmem:[#allocation89_spill] sm:$0xff] }
 0x363   :  { %640 = vst [vmem:[#allocation1 + $0x4] ss:$9 sm:$0xff] %v5044_v23  ;;  %v528_v23 = vpop.permute.xlu2 %527 }
 0x364   :  { %641 = vst [vmem:[#allocation1 + $0x5] ss:$9 sm:$0xff] %v5080_v32 }
 0x365   :  { %642 = vst [vmem:[#allocation1 + $0x6] ss:$9 sm:$0xff] %v5066_v9  ;;  %v9920_v9 = vld [vmem:[#allocation107_spill] sm:$0xff] }
 0x366   :  { %643 = vst [vmem:[#allocation1 + $0x7] ss:$9 sm:$0xff] %v9895_v24  ;;  %v9940_v24 = vld [vmem:[#allocation68_spill] sm:$0xff] }
 0x36d   :  { %v5354_v30 = vld [vmem:[#allocation1] sm:$0xff] }
 0x36e   :  { %645 = vst [vmem:[#allocation1] ss:$9 sm:$0xff] %v9896_v31  ;;  %v9941_v31 = vld [vmem:[#allocation65_spill] sm:$0xff] }
 0x36f   :  { %646 = vst [vmem:[#allocation1 + $0x1] ss:$9 sm:$0xff] %v9897_v34  ;;  %v9942_v34 = vld [vmem:[#allocation75_spill] sm:$0xff] }
 0x370   :  { %647 = vst [vmem:[#allocation1 + $0x2] ss:$9 sm:$0xff] %v9898_v42  ;;  %v9943_v42 = vld [vmem:[#allocation83_spill] sm:$0xff] }
 0x371   :  { %648 = vst [vmem:[#allocation1 + $0x3] ss:$9 sm:$0xff] %v9899_v44  ;;  %v9944_v44 = vld [vmem:[#allocation80_spill] sm:$0xff] }
 0x372   :  { %649 = vst [vmem:[#allocation1 + $0x4] ss:$9 sm:$0xff] %v9900_v45 }
 0x373   :  { %650 = vst [vmem:[#allocation1 + $0x5] ss:$9 sm:$0xff] %v5270_v36  ;;  %v9924_v36 = vld [vmem:[#allocation124_spill] sm:$0xff] }
 0x374   :  { %651 = vst [vmem:[#allocation1 + $0x6] ss:$9 sm:$0xff] %v5278_v29  ;;  %v9927_v29 = vld [vmem:[#allocation142_spill] sm:$0xff] }
 0x375   :  { %652 = vst [vmem:[#allocation1 + $0x7] ss:$9 sm:$0xff] %v528_v23  ;;  %v9945_v23 = vld [vmem:[#allocation91_spill] sm:$0xff] }
 0x37c   :  { %v5363_v32 = vld [vmem:[#allocation1] sm:$0xff] }
 0x37d   :  { %654 = vst [vmem:[#allocation1] ss:$9 sm:$0xff] %v9901_v46  ;;  %v9946_v46 = vld [vmem:[#allocation98_spill] sm:$0xff] }
 0x37e   :  { %655 = vst [vmem:[#allocation1 + $0x1] ss:$9 sm:$0xff] %v9902_v49  ;;  %v9947_v49 = vld [vmem:[#allocation95_spill] sm:$0xff] }
 0x37f   :  { %656 = vst [vmem:[#allocation1 + $0x2] ss:$9 sm:$0xff] %v9903_v51  ;;  %v894_v51 = vsel %vm866_vm0, %v5340_v11, -inf  ;;  %v9955_v11 = vld [vmem:[#allocation144_spill] sm:$0xff] }
 0x380   :  { %657 = vst [vmem:[#allocation1 + $0x3] ss:$9 sm:$0xff] %v9904_v52  ;;  %v9948_v52 = vld [vmem:[#allocation106_spill] sm:$0xff]  ;;  %895 = vmax.xlane.f32.xlu1 %v894_v51  ;;  %v9987_v51 = vld [vmem:[#allocation12_spill] sm:$0xff] }
 0x381   :  { %658 = vst [vmem:[#allocation1 + $0x4] ss:$9 sm:$0xff] %v9905_v55  ;;  %v9949_v55 = vld [vmem:[#allocation113_spill] sm:$0xff] }
 0x382   :  { %659 = vst [vmem:[#allocation1 + $0x5] ss:$9 sm:$0xff] %v9906_v56  ;;  %v9950_v56 = vld [vmem:[#allocation110_spill] sm:$0xff] }
 0x383   :  { %660 = vst [vmem:[#allocation1 + $0x6] ss:$9 sm:$0xff] %v9907_v58  ;;  %v9951_v58 = vld [vmem:[#allocation119_spill] sm:$0xff] }
 0x384   :  { %661 = vst [vmem:[#allocation1 + $0x7] ss:$9 sm:$0xff] %v9908_v59  ;;  %v9952_v59 = vld [vmem:[#allocation126_spill] sm:$0xff] }
 0x38b   :  { %v5373_v60 = vld [vmem:[#allocation1] sm:$0xff] }
 0x38c   :  { %663 = vst [vmem:[#allocation1] ss:$9 sm:$0xff] %v9909_v63  ;;  %v897_v63 = vsel %vm866_vm0, %v5354_v30, -inf  ;;  %v903_v30 = vsel %vm866_vm0, %v5373_v60, -inf  ;;  %v9965_v60 = vld [vmem:[#allocation41_spill] sm:$0xff] }
 0x38d   :  { %664 = vst [vmem:[#allocation1 + $0x1] ss:$9 sm:$0xff] %v9910_v26  ;;  %898 = vmax.xlane.f32.xlu2 %v897_v63  ;;  %904 = vmax.xlane.f32.xlu1 %v903_v30  ;;  %v9994_v63 = vld [vmem:[#allocation49_spill] sm:$0xff]  ;;  %v10000_v30 = vld [vmem:[#allocation79_spill] sm:$0xff] }
 0x38e   :  { %665 = vst [vmem:[#allocation1 + $0x2] ss:$9 sm:$0xff] %v9911_v33  ;;  %v9953_v33 = vld [vmem:[#allocation131_spill] sm:$0xff] }
 0x38f   :  { %666 = vst [vmem:[#allocation1 + $0x3] ss:$9 sm:$0xff] %v9912_v37  ;;  %v9954_v37 = vld [vmem:[#allocation136_spill] sm:$0xff] }
 0x390   :  { %667 = vst [vmem:[#allocation1 + $0x4] ss:$9 sm:$0xff] %v9913_v50  ;;  %v9956_v50 = vld [vmem:[#allocation149_spill] sm:$0xff] }
 0x391   :  { %668 = vst [vmem:[#allocation1 + $0x5] ss:$9 sm:$0xff] %v9914_v57  ;;  %v900_v57 = vsel %vm866_vm0, %v5363_v32, -inf  ;;  %v9961_v32 = vld [vmem:[#allocation28_spill] sm:$0xff] }
 0x392   :  { %669 = vst [vmem:[#allocation1 + $0x6] ss:$9 sm:$0xff] %v9915_v61  ;;  %v9957_v61 = vld [vmem:[#allocation154_spill] sm:$0xff]  ;;  %901 = vmax.xlane.f32.xlu0 %v900_v57  ;;  %v9997_v57 = vld [vmem:[#allocation64_spill] sm:$0xff] }
 0x393   :  { %670 = vst [vmem:[#allocation1 + $0x7] ss:$9 sm:$0xff] %v9916_v41  ;;  %v532_v41 = vpop.permute.xlu1 %531 }
 0x39a   :  { %v5384_v43 = vld [vmem:[#allocation1] sm:$0xff] }
 0x39b   :  { %672 = vst [vmem:[#allocation1] ss:$9 sm:$0xff] %v9917_v54  ;;  %v9958_v54 = vld [vmem:[#allocation9_spill] sm:$0xff] }
 0x39c   :  { %673 = vst [vmem:[#allocation1 + $0x1] ss:$9 sm:$0xff] %v9918_v62  ;;  %v9959_v62 = vld [vmem:[#allocation14_spill] sm:$0xff] }
 0x39d   :  { %674 = vst [vmem:[#allocation1 + $0x2] ss:$9 sm:$0xff] %v9919_v21  ;;  %v9960_v21 = vld [vmem:[#allocation21_spill] sm:$0xff] }
 0x39e   :  { %675 = vst [vmem:[#allocation1 + $0x3] ss:$9 sm:$0xff] %v9920_v9  ;;  %v9962_v9 = vld [vmem:[#allocation26_spill] sm:$0xff] }
 0x39f   :  { %676 = vst [vmem:[#allocation1 + $0x4] ss:$9 sm:$0xff] %v9921_v19  ;;  %v9964_v19 = vld [vmem:[#allocation43_spill] sm:$0xff] }
 0x3a0   :  { %677 = vst [vmem:[#allocation1 + $0x5] ss:$9 sm:$0xff] %v9922_v39 }
 0x3a1   :  { %678 = vst [vmem:[#allocation1 + $0x6] ss:$9 sm:$0xff] %v9923_v40 }
 0x3a2   :  { %679 = vst [vmem:[#allocation1 + $0x7] ss:$9 sm:$0xff] %v9924_v36  ;;  %v9966_v36 = vld [vmem:[#allocation51_spill] sm:$0xff] }
 0x3a9   :  { %v5394_v3 = vld [vmem:[#allocation1] sm:$0xff] }
 0x3aa   :  { %681 = vst [vmem:[#allocation1] ss:$9 sm:$0xff] %v9925_v53  ;;  %v909_v39 = vsel %vm866_vm0, %v5394_v3, -inf  ;;  %v9967_v53 = vld [vmem:[#allocation58_spill] sm:$0xff]  ;;  %v9973_v3 = vld [vmem:[#allocation88_spill] sm:$0xff] }
 0x3ab   :  { %682 = vst [vmem:[#allocation1 + $0x1] ss:$9 sm:$0xff] %v9926_v6  ;;  %910 = vmax.xlane.f32.xlu0 %v909_v39  ;;  %v9968_v6 = vld [vmem:[#allocation56_spill] sm:$0xff]  ;;  %v10008_v39 = vld [vmem:[#allocation117_spill] sm:$0xff] }
 0x3ac   :  { %683 = vst [vmem:[#allocation1 + $0x2] ss:$9 sm:$0xff] %v9927_v29  ;;  %v9969_v29 = vld [vmem:[#allocation66_spill] sm:$0xff] }
 0x3ad   :  { %684 = vst [vmem:[#allocation1 + $0x3] ss:$9 sm:$0xff] %v9928_v0  ;;  %v9971_v0 = vld [vmem:[#allocation71_spill] sm:$0xff] }
 0x3ae   :  { %685 = vst [vmem:[#allocation1 + $0x4] ss:$9 sm:$0xff] %v5262_v48  ;;  %v9935_v48 = vld [vmem:[#allocation35_spill] sm:$0xff] }
 0x3af   :  { %686 = vst [vmem:[#allocation1 + $0x5] ss:$9 sm:$0xff] %v5300_v5  ;;  %v9936_v5 = vld [vmem:[#allocation45_spill] sm:$0xff] }
 0x3b0   :  { %687 = vst [vmem:[#allocation1 + $0x6] ss:$9 sm:$0xff] %v5302_v18 }
 0x3b1   :  { %688 = vst [vmem:[#allocation1 + $0x7] ss:$9 sm:$0xff] %v530_v13 }
 0x3b8   :  { %v5403_v4 = vld [vmem:[#allocation1] sm:$0xff] }
 0x3b9   :  { %690 = vst [vmem:[#allocation1] ss:$9 sm:$0xff] %v9929_v16  ;;  %v912_v13 = vsel %vm866_vm0, %v5403_v4, -inf  ;;  %v9972_v16 = vld [vmem:[#allocation81_spill] sm:$0xff]  ;;  %v9979_v4 = vld [vmem:[#allocation118_spill] sm:$0xff] }
 0x3ba   :  { %691 = vst [vmem:[#allocation1 + $0x1] ss:$9 sm:$0xff] %v9930_v22  ;;  %913 = vmax.xlane.f32.xlu1 %v912_v13  ;;  %v10014_v13 = vld [vmem:[#allocation150_spill] sm:$0xff] }
 0x3bb   :  { %692 = vst [vmem:[#allocation1 + $0x2] ss:$9 sm:$0xff] %v9931_v35 }
 0x3bc   :  { %693 = vst [vmem:[#allocation1 + $0x3] ss:$9 sm:$0xff] %v9932_v38  ;;  %v9974_v38 = vld [vmem:[#allocation85_spill] sm:$0xff] }
 0x3bd   :  { %694 = vst [vmem:[#allocation1 + $0x4] ss:$9 sm:$0xff] %v9933_v8  ;;  %v9975_v8 = vld [vmem:[#allocation97_spill] sm:$0xff] }
 0x3be   :  { %695 = vst [vmem:[#allocation1 + $0x5] ss:$9 sm:$0xff] %v9934_v25  ;;  %v9976_v25 = vld [vmem:[#allocation103_spill] sm:$0xff] }
 0x3bf   :  { %696 = vst [vmem:[#allocation1 + $0x6] ss:$9 sm:$0xff] %v9935_v48  ;;  %v9977_v48 = vld [vmem:[#allocation100_spill] sm:$0xff] }
 0x3c0   :  { %697 = vst [vmem:[#allocation1 + $0x7] ss:$9 sm:$0xff] %v9936_v5  ;;  %v9978_v5 = vld [vmem:[#allocation112_spill] sm:$0xff] }
 0x3c7   :  { %v698_v18 = vld [vmem:[#allocation1] sm:$0xff] }
 0x3c8   :  { %699 = vst [vmem:[#allocation1] ss:$9 sm:$0xff] %v9937_v12  ;;  %v915_v22 = vsel %vm866_vm0, %v698_v18, -inf  ;;  %v9980_v12 = vld [vmem:[#allocation115_spill] sm:$0xff] }
 0x3c9   :  { %700 = vst [vmem:[#allocation1 + $0x1] ss:$9 sm:$0xff] %v9938_v14 }
 0x3ca   :  { %701 = vst [vmem:[#allocation1 + $0x2] ss:$9 sm:$0xff] %v9939_v1  ;;  %v9981_v1 = vld [vmem:[#allocation125_spill] sm:$0xff] }
 0x3cb   :  { %702 = vst [vmem:[#allocation1 + $0x3] ss:$9 sm:$0xff] %v9940_v24 }
 0x3cc   :  { %703 = vst [vmem:[#allocation1 + $0x4] ss:$9 sm:$0xff] %v9941_v31  ;;  %v9982_v31 = vld [vmem:[#allocation133_spill] sm:$0xff] }
 0x3cd   :  { %704 = vst [vmem:[#allocation1 + $0x5] ss:$9 sm:$0xff] %v9942_v34  ;;  %v9983_v34 = vld [vmem:[#allocation138_spill] sm:$0xff] }
 0x3ce   :  { %705 = vst [vmem:[#allocation1 + $0x6] ss:$9 sm:$0xff] %v9943_v42  ;;  %v9984_v42 = vld [vmem:[#allocation143_spill] sm:$0xff] }
 0x3cf   :  { %706 = vst [vmem:[#allocation1 + $0x7] ss:$9 sm:$0xff] %v9944_v44  ;;  %v9985_v44 = vld [vmem:[#allocation151_spill] sm:$0xff] }
 0x3d6   :  { %v707_v45 = vld [vmem:[#allocation1] sm:$0xff] }
 0x3d7   :  { %708 = vst [vmem:[#allocation1] ss:$9 sm:$0xff] %v9945_v23  ;;  %v918_v14 = vsel %vm866_vm0, %v707_v45, -inf  ;;  %v9986_v23 = vld [vmem:[#allocation155_spill] sm:$0xff]  ;;  %v534_v45 = vpop.permute.xlu2 %533 }
 0x3d8   :  { %709 = vst [vmem:[#allocation1 + $0x1] ss:$9 sm:$0xff] %v9946_v46  ;;  %919 = vmax.xlane.f32.xlu0 %v918_v14 }
 0x3d9   :  { %710 = vst [vmem:[#allocation1 + $0x2] ss:$9 sm:$0xff] %v9947_v49 }
 0x3da   :  { %711 = vst [vmem:[#allocation1 + $0x3] ss:$9 sm:$0xff] %v9948_v52 }
 0x3db   :  { %712 = vst [vmem:[#allocation1 + $0x4] ss:$9 sm:$0xff] %v9949_v55  ;;  %v9988_v55 = vld [vmem:[#allocation19_spill] sm:$0xff] }
 0x3dc   :  { %713 = vst [vmem:[#allocation1 + $0x5] ss:$9 sm:$0xff] %v9950_v56  ;;  %v9989_v56 = vld [vmem:[#allocation17_spill] sm:$0xff] }
 0x3dd   :  { %714 = vst [vmem:[#allocation1 + $0x6] ss:$9 sm:$0xff] %v9951_v58  ;;  %v9990_v58 = vld [vmem:[#allocation27_spill] sm:$0xff] }
 0x3de   :  { %715 = vst [vmem:[#allocation1 + $0x7] ss:$9 sm:$0xff] %v9952_v59  ;;  %v9992_v59 = vld [vmem:[#allocation31_spill] sm:$0xff] }
 0x3e5   :  { %v716_v26 = vld [vmem:[#allocation1] sm:$0xff] }
 0x3e6   :  { %717 = vst [vmem:[#allocation1] ss:$9 sm:$0xff] %v9953_v33  ;;  %v921_v24 = vsel %vm866_vm0, %v716_v26, -inf }
 0x3e7   :  { %718 = vst [vmem:[#allocation1 + $0x1] ss:$9 sm:$0xff] %v9954_v37  ;;  %922 = vmax.xlane.f32.xlu1 %v921_v24  ;;  %v9995_v37 = vld [vmem:[#allocation46_spill] sm:$0xff]  ;;  %v10025_v24 = vld [vmem:[#allocation52_spill] sm:$0xff] }
 0x3e8   :  { %719 = vst [vmem:[#allocation1 + $0x2] ss:$9 sm:$0xff] %v9955_v11  ;;  %v9996_v11 = vld [vmem:[#allocation57_spill] sm:$0xff] }
 0x3e9   :  { %720 = vst [vmem:[#allocation1 + $0x3] ss:$9 sm:$0xff] %v9956_v50 }
 0x3ea   :  { %721 = vst [vmem:[#allocation1 + $0x4] ss:$9 sm:$0xff] %v9957_v61  ;;  %v9998_v61 = vld [vmem:[#allocation61_spill] sm:$0xff] }
 0x3eb   :  { %722 = vst [vmem:[#allocation1 + $0x5] ss:$9 sm:$0xff] %v5274_v47  ;;  %v906_v47 = vsel %vm866_vm0, %v5384_v43, -inf  ;;  %v9970_v43 = vld [vmem:[#allocation73_spill] sm:$0xff] }
 0x3ec   :  { %723 = vst [vmem:[#allocation1 + $0x6] ss:$9 sm:$0xff] %v5343_v20  ;;  %v9963_v20 = vld [vmem:[#allocation36_spill] sm:$0xff]  ;;  %907 = vmax.xlane.f32.xlu2 %v906_v47  ;;  %v10005_v47 = vld [vmem:[#allocation102_spill] sm:$0xff] }
 0x3ed   :  { %724 = vst [vmem:[#allocation1 + $0x7] ss:$9 sm:$0xff] %v532_v41  ;;  %v9999_v41 = vld [vmem:[#allocation72_spill] sm:$0xff] }
 0x3f4   :  { %v725_v28 = vld [vmem:[#allocation1] sm:$0xff]  ;;  %916 = vmax.xlane.f32.xlu2 %v915_v22  ;;  %v536_v22 = vpop.permute.xlu0 %535 }
 0x3f5   :  { %726 = vst [vmem:[#allocation1] ss:$9 sm:$0xff] %v9958_v54  ;;  %v924_v46 = vsel %vm866_vm0, %v725_v28, -inf  ;;  %v10001_v28 = vld [vmem:[#allocation76_spill] sm:$0xff]  ;;  %v10002_v54 = vld [vmem:[#allocation87_spill] sm:$0xff] }
 0x3f6   :  { %727 = vst [vmem:[#allocation1 + $0x1] ss:$9 sm:$0xff] %v9959_v62 }
 0x3f7   :  { %728 = vst [vmem:[#allocation1 + $0x2] ss:$9 sm:$0xff] %v9960_v21 }
 0x3f8   :  { %729 = vst [vmem:[#allocation1 + $0x3] ss:$9 sm:$0xff] %v9961_v32  ;;  %v10003_v32 = vld [vmem:[#allocation94_spill] sm:$0xff] }
 0x3f9   :  { %730 = vst [vmem:[#allocation1 + $0x4] ss:$9 sm:$0xff] %v9962_v9  ;;  %v10004_v9 = vld [vmem:[#allocation90_spill] sm:$0xff] }
 0x3fa   :  { %731 = vst [vmem:[#allocation1 + $0x5] ss:$9 sm:$0xff] %v9963_v20 }
 0x3fb   :  { %732 = vst [vmem:[#allocation1 + $0x6] ss:$9 sm:$0xff] %v9964_v19  ;;  %v10006_v19 = vld [vmem:[#allocation109_spill] sm:$0xff] }
 0x3fc   :  { %733 = vst [vmem:[#allocation1 + $0x7] ss:$9 sm:$0xff] %v9965_v60  ;;  %925 = vmax.xlane.f32.xlu2 %v924_v46  ;;  %v10007_v60 = vld [vmem:[#allocation105_spill] sm:$0xff] }
 0x403   :  { %v734_v40 = vld [vmem:[#allocation1] sm:$0xff] }
 0x404   :  { %735 = vst [vmem:[#allocation1] ss:$9 sm:$0xff] %v9966_v36  ;;  %v927_v52 = vsel %vm866_vm0, %v734_v40, -inf  ;;  %v10009_v40 = vld [vmem:[#allocation122_spill] sm:$0xff]  ;;  %v10010_v36 = vld [vmem:[#allocation127_spill] sm:$0xff] }
 0x405   :  { %736 = vst [vmem:[#allocation1 + $0x1] ss:$9 sm:$0xff] %v9967_v53  ;;  %928 = vmax.xlane.f32.xlu0 %v927_v52  ;;  %v10033_v52 = vld [vmem:[#allocation99_spill] sm:$0xff] }
 0x406   :  { %737 = vst [vmem:[#allocation1 + $0x2] ss:$9 sm:$0xff] %v9968_v6 }
 0x407   :  { %738 = vst [vmem:[#allocation1 + $0x3] ss:$9 sm:$0xff] %v9969_v29  ;;  %v10011_v29 = vld [vmem:[#allocation132_spill] sm:$0xff] }
 0x408   :  { %739 = vst [vmem:[#allocation1 + $0x4] ss:$9 sm:$0xff] %v9970_v43  ;;  %v10012_v43 = vld [vmem:[#allocation140_spill] sm:$0xff] }
 0x409   :  { %740 = vst [vmem:[#allocation1 + $0x5] ss:$9 sm:$0xff] %v9971_v0  ;;  %v10013_v0 = vld [vmem:[#allocation145_spill] sm:$0xff] }
 0x40a   :  { %741 = vst [vmem:[#allocation1 + $0x6] ss:$9 sm:$0xff] %v9972_v16 }
 0x40b   :  { %742 = vst [vmem:[#allocation1 + $0x7] ss:$9 sm:$0xff] %v9973_v3  ;;  %v10015_v3 = vld [vmem:[#allocation157_spill] sm:$0xff] }
 0x412   :  { %v743_v35 = vld [vmem:[#allocation1] sm:$0xff] }
 0x413   :  { %744 = vst [vmem:[#allocation1] ss:$9 sm:$0xff] %v9974_v38  ;;  %v930_v26 = vsel %vm866_vm0, %v743_v35, -inf  ;;  %v10016_v38 = vld [vmem:[#allocation11_spill] sm:$0xff] }
 0x414   :  { %745 = vst [vmem:[#allocation1 + $0x1] ss:$9 sm:$0xff] %v9975_v8  ;;  %931 = vmax.xlane.f32.xlu1 %v930_v26  ;;  %v10040_v26 = vld [vmem:[#allocation134_spill] sm:$0xff] }
 0x415   :  { %746 = vst [vmem:[#allocation1 + $0x2] ss:$9 sm:$0xff] %v9976_v25  ;;  %v10017_v25 = vld [vmem:[#allocation18_spill] sm:$0xff] }
 0x416   :  { %747 = vst [vmem:[#allocation1 + $0x3] ss:$9 sm:$0xff] %v9977_v48  ;;  %v10018_v48 = vld [vmem:[#allocation24_spill] sm:$0xff] }
 0x417   :  { %748 = vst [vmem:[#allocation1 + $0x4] ss:$9 sm:$0xff] %v9978_v5  ;;  %v10019_v5 = vld [vmem:[#allocation22_spill] sm:$0xff] }
 0x418   :  { %749 = vst [vmem:[#allocation1 + $0x5] ss:$9 sm:$0xff] %v9979_v4  ;;  %v10020_v4 = vld [vmem:[#allocation33_spill] sm:$0xff] }
 0x419   :  { %750 = vst [vmem:[#allocation1 + $0x6] ss:$9 sm:$0xff] %v9980_v12  ;;  %v10021_v12 = vld [vmem:[#allocation39_spill] sm:$0xff] }
 0x41a   :  { %751 = vst [vmem:[#allocation1 + $0x7] ss:$9 sm:$0xff] %v9981_v1  ;;  %v10024_v1 = vld [vmem:[#allocation54_spill] sm:$0xff] }
 0x421   :  { %v752_v18 = vld [vmem:[#allocation1] sm:$0xff] }
 0x422   :  { %753 = vst [vmem:[#allocation1] ss:$9 sm:$0xff] %v9982_v31  ;;  %v933_v50 = vsel %vm866_vm0, %v752_v18, -inf  ;;  %v10026_v31 = vld [vmem:[#allocation63_spill] sm:$0xff] }
 0x423   :  { %754 = vst [vmem:[#allocation1 + $0x1] ss:$9 sm:$0xff] %v9983_v34  ;;  %934 = vmax.xlane.f32.xlu2 %v933_v50  ;;  %v10027_v34 = vld [vmem:[#allocation69_spill] sm:$0xff]  ;;  %v10043_v50 = vld [vmem:[#allocation152_spill] sm:$0xff] }
 0x424   :  { %755 = vst [vmem:[#allocation1 + $0x2] ss:$9 sm:$0xff] %v9984_v42  ;;  %v10028_v42 = vld [vmem:[#allocation67_spill] sm:$0xff] }
 0x425   :  { %756 = vst [vmem:[#allocation1 + $0x3] ss:$9 sm:$0xff] %v9985_v44  ;;  %v10029_v44 = vld [vmem:[#allocation78_spill] sm:$0xff] }
 0x426   :  { %757 = vst [vmem:[#allocation1 + $0x4] ss:$9 sm:$0xff] %v9986_v23  ;;  %v10030_v23 = vld [vmem:[#allocation84_spill] sm:$0xff] }
 0x427   :  { %758 = vst [vmem:[#allocation1 + $0x5] ss:$9 sm:$0xff] %v5272_v2  ;;  %v9991_v2 = vld [vmem:[#allocation34_spill] sm:$0xff] }
 0x428   :  { %759 = vst [vmem:[#allocation1 + $0x6] ss:$9 sm:$0xff] %v5280_v10  ;;  %v9993_v10 = vld [vmem:[#allocation42_spill] sm:$0xff] }
 0x429   :  { %760 = vst [vmem:[#allocation1 + $0x7] ss:$9 sm:$0xff] %v534_v45  ;;  %v10031_v45 = vld [vmem:[#allocation82_spill] sm:$0xff] }
 0x430   :  { %v761_v49 = vld [vmem:[#allocation1] sm:$0xff] }
 0x431   :  { %762 = vst [vmem:[#allocation1] ss:$9 sm:$0xff] %v9987_v51  ;;  %v936_v62 = vsel %vm866_vm0, %v761_v49, -inf  ;;  %v10032_v49 = vld [vmem:[#allocation93_spill] sm:$0xff] }
 0x432   :  { %763 = vst [vmem:[#allocation1 + $0x1] ss:$9 sm:$0xff] %v9988_v55  ;;  %937 = vmax.xlane.f32.xlu0 %v936_v62  ;;  %v10034_v55 = vld [vmem:[#allocation96_spill] sm:$0xff]  ;;  %v5568_v62 = vld [vmem:[#allocation2 + $0x15] sm:$0x1] }
 0x433   :  { %764 = vst [vmem:[#allocation1 + $0x2] ss:$9 sm:$0xff] %v9989_v56  ;;  %v10035_v56 = vld [vmem:[#allocation108_spill] sm:$0xff] }
 0x434   :  { %765 = vst [vmem:[#allocation1 + $0x3] ss:$9 sm:$0xff] %v9990_v58  ;;  %v10036_v58 = vld [vmem:[#allocation114_spill] sm:$0xff] }
 0x435   :  { %766 = vst [vmem:[#allocation1 + $0x4] ss:$9 sm:$0xff] %v9991_v2  ;;  %v10037_v2 = vld [vmem:[#allocation111_spill] sm:$0xff] }
 0x436   :  { %767 = vst [vmem:[#allocation1 + $0x5] ss:$9 sm:$0xff] %v9992_v59  ;;  %v10038_v59 = vld [vmem:[#allocation121_spill] sm:$0xff] }
 0x437   :  { %768 = vst [vmem:[#allocation1 + $0x6] ss:$9 sm:$0xff] %v9993_v10  ;;  %v10039_v10 = vld [vmem:[#allocation128_spill] sm:$0xff] }
 0x438   :  { %769 = vst [vmem:[#allocation1 + $0x7] ss:$9 sm:$0xff] %v9994_v63 }
 0x439   :  { %10045 = vst [vmem:[#allocation123_spill] sm:$0xff] %v5568_v62 }
 0x43f   :  { %v770_v33 = vld [vmem:[#allocation1] sm:$0xff] }
 0x440   :  { %771 = vst [vmem:[#allocation1] ss:$9 sm:$0xff] %v9995_v37  ;;  %v939_v20 = vsel %vm866_vm0, %v770_v33, -inf  ;;  %v10041_v37 = vld [vmem:[#allocation139_spill] sm:$0xff] }
 0x441   :  { %772 = vst [vmem:[#allocation1 + $0x1] ss:$9 sm:$0xff] %v9996_v11  ;;  %940 = vmax.xlane.f32.xlu1 %v939_v20  ;;  %v10042_v11 = vld [vmem:[#allocation146_spill] sm:$0xff] }
 0x442   :  { %773 = vst [vmem:[#allocation1 + $0x2] ss:$9 sm:$0xff] %v9997_v57  ;;  %v5555_v57 = vld [vmem:[#allocation2 + $0x1] sm:$0x1]  ;;  %v5596_v20 = vld [vmem:[#allocation2 + $0x19] sm:$0x1] }
 0x443   :  { %774 = vst [vmem:[#allocation1 + $0x3] ss:$9 sm:$0xff] %v9998_v61  ;;  %v10044_v61 = vld [vmem:[#allocation156_spill] sm:$0xff] }
 0x444   :  { %775 = vst [vmem:[#allocation1 + $0x4] ss:$9 sm:$0xff] %v9999_v41  ;;  %v538_v41 = vpop.permute.xlu1 %537 }
 0x445   :  { %776 = vst [vmem:[#allocation1 + $0x5] ss:$9 sm:$0xff] %v10000_v30  ;;  %v5562_v30 = vld [vmem:[#allocation2 + $0xd] sm:$0x1] }
 0x446   :  { %777 = vst [vmem:[#allocation1 + $0x6] ss:$9 sm:$0xff] %v10001_v28 }
 0x447   :  { %778 = vst [vmem:[#allocation1 + $0x7] ss:$9 sm:$0xff] %v10002_v54 }
 0x448   :  { %10050 = vst [vmem:[#allocation153_spill] sm:$0xff] %v5596_v20 }
 0x44e   :  { %v779_v21 = vld [vmem:[#allocation1] sm:$0xff] }
 0x44f   :  { %780 = vst [vmem:[#allocation1] ss:$9 sm:$0xff] %v10003_v32  ;;  %v942_v53 = vsel %vm866_vm0, %v779_v21, -inf  ;;  %v5582_v21 = vld [vmem:[#allocation2 + $0x9] sm:$0x1] }
 0x450   :  { %781 = vst [vmem:[#allocation1 + $0x1] ss:$9 sm:$0xff] %v10004_v9  ;;  %943 = vmax.xlane.f32.xlu2 %v942_v53  ;;  %v5586_v32 = vld [vmem:[#allocation2 + $0x1d] sm:$0x1]  ;;  %v5588_v9 = vpop.xlane.xlu0 %871 }
 0x451   :  { %782 = vst [vmem:[#allocation1 + $0x2] ss:$9 sm:$0xff] %v10005_v47  ;;  %v5592_v47 = vpop.xlane.xlu2 %868 }
 0x452   :  { %783 = vst [vmem:[#allocation1 + $0x3] ss:$9 sm:$0xff] %v10006_v19 }
 0x453   :  { %784 = vst [vmem:[#allocation1 + $0x4] ss:$9 sm:$0xff] %v10007_v60 }
 0x454   :  { %785 = vst [vmem:[#allocation1 + $0x5] ss:$9 sm:$0xff] %v10008_v39 }
 0x455   :  { %786 = vst [vmem:[#allocation1 + $0x6] ss:$9 sm:$0xff] %v10009_v40 }
 0x456   :  { %787 = vst [vmem:[#allocation1 + $0x7] ss:$9 sm:$0xff] %v10010_v36  ;;  %v5618_v36 = vpop.xlane.xlu1 %874 }
 0x457   :  { %10047 = vst [vmem:[#allocation135_spill] sm:$0xff] %v5586_v32 }
 0x458   :  { %10048 = vst [vmem:[#allocation141_spill] sm:$0xff] %v5588_v9  ;;  %v5600_v19 = vpop.xlane.xlu0 %883 }
 0x459   :  { %10049 = vst [vmem:[#allocation148_spill] sm:$0xff] %v5592_v47  ;;  %v5604_v60 = vpop.xlane.xlu2 %877 }
 0x45a   :  { %10051 = vst [vmem:[#allocation10_spill] sm:$0xff] %v5600_v19 }
 0x45b   :  { %10052 = vst [vmem:[#allocation16_spill] sm:$0xff] %v5604_v60 }
 0x45c   :  { %10055 = vst [vmem:[#allocation32_spill] sm:$0xff] %v5618_v36 }
 0x45d   :  { %v788_v6 = vld [vmem:[#allocation1] sm:$0xff] }
 0x45e   :  { %789 = vst [vmem:[#allocation1] ss:$9 sm:$0xff] %v10011_v29  ;;  %v945_v16 = vsel %vm866_vm0, %v788_v6, -inf  ;;  %v5630_v29 = vpop.xlane.xlu1 %886 }
 0x45f   :  { %790 = vst [vmem:[#allocation1 + $0x1] ss:$9 sm:$0xff] %v10012_v43  ;;  %946 = vmax.xlane.f32.xlu0 %v945_v16 }
 0x460   :  { %791 = vst [vmem:[#allocation1 + $0x2] ss:$9 sm:$0xff] %v10013_v0  ;;  %v5610_v39 = vpop.xlane.xlu0 %892 }
 0x461   :  { %792 = vst [vmem:[#allocation1 + $0x3] ss:$9 sm:$0xff] %v10014_v13  ;;  %v5616_v40 = vpop.xlane.xlu2 %880 }
 0x462   :  { %793 = vst [vmem:[#allocation1 + $0x4] ss:$9 sm:$0xff] %v10015_v3 }
 0x463   :  { %794 = vst [vmem:[#allocation1 + $0x5] ss:$9 sm:$0xff] %v5310_v15  ;;  %v10022_v15 = vld [vmem:[#allocation37_spill] sm:$0xff] }
 0x464   :  { %795 = vst [vmem:[#allocation1 + $0x6] ss:$9 sm:$0xff] %v5315_v17  ;;  %v10023_v17 = vld [vmem:[#allocation48_spill] sm:$0xff] }
 0x465   :  { %796 = vst [vmem:[#allocation1 + $0x7] ss:$9 sm:$0xff] %v536_v22 }
 0x466   :  { %10053 = vst [vmem:[#allocation15_spill] sm:$0xff] %v5610_v39  ;;  %v5642_v13 = vpop.xlane.xlu1 %895 }
 0x467   :  { %10054 = vst [vmem:[#allocation25_spill] sm:$0xff] %v5616_v40 }
 0x468   :  { %v5622_v53 = vpop.xlane.xlu0 %901  ;;  %10058 = vst [vmem:[#allocation47_spill] sm:$0xff] %v5630_v29 }
 0x469   :  { %10056 = vst [vmem:[#allocation29_spill] sm:$0xff] %v5622_v53  ;;  %v5628_v6 = vpop.xlane.xlu2 %889 }
 0x46a   :  { %10057 = vst [vmem:[#allocation40_spill] sm:$0xff] %v5628_v6 }
 0x46b   :  { %10061 = vst [vmem:[#allocation62_spill] sm:$0xff] %v5642_v13 }
 0x46c   :  { %v797_v35 = vld [vmem:[#allocation1] sm:$0xff] }
 0x46d   :  { %798 = vst [vmem:[#allocation1] ss:$9 sm:$0xff] %v10016_v38  ;;  %v948_v8 = vsel %vm866_vm0, %v797_v35, -inf }
 0x46e   :  { %799 = vst [vmem:[#allocation1 + $0x1] ss:$9 sm:$0xff] %v10017_v25  ;;  %949 = vmax.xlane.f32.xlu1 %v948_v8  ;;  %v5654_v22 = vpop.xlane.xlu1 %904 }
 0x46f   :  { %800 = vst [vmem:[#allocation1 + $0x2] ss:$9 sm:$0xff] %v10018_v48 }
 0x470   :  { %801 = vst [vmem:[#allocation1 + $0x3] ss:$9 sm:$0xff] %v10019_v5  ;;  %v5634_v43 = vpop.xlane.xlu0 %910 }
 0x471   :  { %802 = vst [vmem:[#allocation1 + $0x4] ss:$9 sm:$0xff] %v10020_v4  ;;  %v5640_v0 = vpop.xlane.xlu2 %898 }
 0x472   :  { %803 = vst [vmem:[#allocation1 + $0x5] ss:$9 sm:$0xff] %v10021_v12 }
 0x473   :  { %804 = vst [vmem:[#allocation1 + $0x6] ss:$9 sm:$0xff] %v10022_v15 }
 0x474   :  { %805 = vst [vmem:[#allocation1 + $0x7] ss:$9 sm:$0xff] %v10023_v17 }
 0x475   :  { %10059 = vst [vmem:[#allocation44_spill] sm:$0xff] %v5634_v43 }
 0x476   :  { %10060 = vst [vmem:[#allocation55_spill] sm:$0xff] %v5640_v0  ;;  %v5666_v8 = vpop.xlane.xlu1 %913 }
 0x477   :  { %10064 = vst [vmem:[#allocation77_spill] sm:$0xff] %v5654_v22 }
 0x478   :  { %v5646_v16 = vpop.xlane.xlu0 %919  ;;  %10067 = vst [vmem:[#allocation92_spill] sm:$0xff] %v5666_v8 }
 0x479   :  { %10062 = vst [vmem:[#allocation59_spill] sm:$0xff] %v5646_v16  ;;  %v5652_v3 = vpop.xlane.xlu2 %907 }
 0x47a   :  { %10063 = vst [vmem:[#allocation70_spill] sm:$0xff] %v5652_v3 }
 0x47b   :  { %v806_v14 = vld [vmem:[#allocation1] sm:$0xff] }
 0x47c   :  { %807 = vst [vmem:[#allocation1] ss:$9 sm:$0xff] %v10024_v1  ;;  %v951_v18 = vsel %vm866_vm0, %v806_v14, -inf }
 0x47d   :  { %808 = vst [vmem:[#allocation1 + $0x1] ss:$9 sm:$0xff] %v10025_v24  ;;  %952 = vmax.xlane.f32.xlu2 %v951_v18 }
 0x47e   :  { %809 = vst [vmem:[#allocation1 + $0x2] ss:$9 sm:$0xff] %v10026_v31  ;;  %v5678_v5 = vpop.xlane.xlu1 %922 }
 0x47f   :  { %810 = vst [vmem:[#allocation1 + $0x3] ss:$9 sm:$0xff] %v10027_v34 }
 0x480   :  { %811 = vst [vmem:[#allocation1 + $0x4] ss:$9 sm:$0xff] %v10028_v42  ;;  %v5658_v35 = vpop.xlane.xlu0 %928 }
 0x481   :  { %812 = vst [vmem:[#allocation1 + $0x5] ss:$9 sm:$0xff] %v10029_v44  ;;  %v5664_v38 = vpop.xlane.xlu2 %916 }
 0x482   :  { %813 = vst [vmem:[#allocation1 + $0x6] ss:$9 sm:$0xff] %v10030_v23 }
 0x483   :  { %814 = vst [vmem:[#allocation1 + $0x7] ss:$9 sm:$0xff] %v10031_v45 }
 0x484   :  { %10065 = vst [vmem:[#allocation74_spill] sm:$0xff] %v5658_v35 }
 0x485   :  { %10066 = vst [vmem:[#allocation86_spill] sm:$0xff] %v5664_v38 }
 0x486   :  { %10070 = vst [vmem:[#allocation107_spill] sm:$0xff] %v5678_v5 }
 0x487   :  { %v5690_v15 = vpop.xlane.xlu1 %931 }
 0x488   :  { %10073 = vst [vmem:[#allocation120_spill] sm:$0xff] %v5690_v15 }
 0x489   :  { %v5676_v48 = vpop.xlane.xlu2 %925 }
 0x48a   :  { %v815_v46 = vld [vmem:[#allocation1] sm:$0xff]  ;;  %10069 = vst [vmem:[#allocation101_spill] sm:$0xff] %v5676_v48 }
 0x48b   :  { %816 = vst [vmem:[#allocation1] ss:$9 sm:$0xff] %v10032_v49  ;;  %v954_v51 = vsel %vm866_vm0, %v815_v46, -inf }
 0x48c   :  { %817 = vst [vmem:[#allocation1 + $0x1] ss:$9 sm:$0xff] %v10033_v52  ;;  %955 = vmax.xlane.f32.xlu0 %v954_v51 }
 0x48d   :  { %818 = vst [vmem:[#allocation1 + $0x2] ss:$9 sm:$0xff] %v10034_v55 }
 0x48e   :  { %819 = vst [vmem:[#allocation1 + $0x3] ss:$9 sm:$0xff] %v10035_v56 }
 0x48f   :  { %820 = vst [vmem:[#allocation1 + $0x4] ss:$9 sm:$0xff] %v10036_v58 }
 0x490   :  { %821 = vst [vmem:[#allocation1 + $0x5] ss:$9 sm:$0xff] %v10037_v2 }
 0x491   :  { %822 = vst [vmem:[#allocation1 + $0x6] ss:$9 sm:$0xff] %v10038_v59 }
 0x492   :  { %823 = vst [vmem:[#allocation1 + $0x7] ss:$9 sm:$0xff] %v10039_v10 }
 0x496   :  { %v5688_v12 = vpop.xlane.xlu2 %934 }
 0x497   :  { %10072 = vst [vmem:[#allocation116_spill] sm:$0xff] %v5688_v12 }
 0x499   :  { %v824_v63 = vld [vmem:[#allocation1] sm:$0xff] }
 0x49a   :  { %825 = vst [vmem:[#allocation1] ss:$9 sm:$0xff] %v10040_v26  ;;  %v957_v33 = vsel %vm866_vm0, %v824_v63, -inf }
 0x49b   :  { %826 = vst [vmem:[#allocation1 + $0x1] ss:$9 sm:$0xff] %v10041_v37  ;;  %958 = vmax.xlane.f32.xlu1 %v957_v33 }
 0x49c   :  { %827 = vst [vmem:[#allocation1 + $0x2] ss:$9 sm:$0xff] %v10042_v11 }
 0x49d   :  { %828 = vst [vmem:[#allocation1 + $0x3] ss:$9 sm:$0xff] %v10043_v50 }
 0x49e   :  { %829 = vst [vmem:[#allocation1 + $0x4] ss:$9 sm:$0xff] %v10044_v61 }
 0x49f   :  { %830 = vst [vmem:[#allocation1 + $0x5] ss:$9 sm:$0xff] %v5276_v7  ;;  %v5572_v7 = vld [vmem:[#allocation2 + $0x5] sm:$0x1] }
 0x4a0   :  { %831 = vst [vmem:[#allocation1 + $0x6] ss:$9 sm:$0xff] %v5352_v27  ;;  %979 = vrot.lane.b32.xlu0 %v5555_v57, %s4306_s13  ;;  %v5578_v27 = vld [vmem:[#allocation2 + $0x11] sm:$0x1] }
 0x4a1   :  { %832 = vst [vmem:[#allocation1 + $0x7] ss:$9 sm:$0xff] %v538_v41 }
 0x4a2   :  { %10046 = vst [vmem:[#allocation130_spill] sm:$0xff] %v5578_v27 }
 0x4a5   :  { %v5670_v25 = vpop.xlane.xlu0 %937 }
 0x4a6   :  { %10068 = vst [vmem:[#allocation89_spill] sm:$0xff] %v5670_v25 }
 0x4a8   :  { %v833_v28 = vld [vmem:[#allocation1] sm:$0xff]  ;;  %985 = vrot.lane.b32.xlu0 %v5562_v30, %s4306_s13 }
 0x4a9   :  { %v960_v54 = vsel %vm866_vm0, %v833_v28, -inf  ;;  %1475 = vst [vmem:[#allocation1] ss:$9 sm:$0xff] %v5555_v57 }
 0x4aa   :  { %961 = vmax.xlane.f32.xlu2 %v960_v54 }
 0x4b0   :  { %989 = vrot.lane.b32.xlu0 %v5568_v62, %s4306_s13 }
 0x4b4   :  { %981 = vrot.lane.b32.xlu1 %v5572_v7, %s4306_s13  ;;  %v5702_v1 = vpop.xlane.xlu1 %940 }
 0x4b5   :  { %10076 = vst [vmem:[#allocation137_spill] sm:$0xff] %v5702_v1 }
 0x4b8   :  { %995 = vrot.lane.b32.xlu0 %v5555_v57, %s4307_s0 }
 0x4bc   :  { %987 = vrot.lane.b32.xlu1 %v5578_v27, %s4306_s13 }
 0x4c0   :  { %1001 = vrot.lane.b32.xlu0 %v5562_v30, %s4307_s0 }
 0x4c2   :  { %983 = vrot.lane.b32.xlu2 %v5582_v21, %s4306_s13 }
 0x4c3   :  { %v5700_v14 = vpop.xlane.xlu2 %943 }
 0x4c4   :  { %993 = vrot.lane.b32.xlu1 %v5586_v32, %s4306_s13  ;;  %10075 = vst [vmem:[#allocation129_spill] sm:$0xff] %v5700_v14 }
 0x4c8   :  { %1007 = vrot.lane.b32.xlu0 %v5596_v20, %s4307_s0 }
 0x4ca   :  { %991 = vrot.lane.b32.xlu2 %v5596_v20, %s4306_s13 }
 0x4cc   :  { %999 = vrot.lane.b32.xlu1 %v5582_v21, %s4307_s0 }
 0x4d0   :  { %1013 = vrot.lane.b32.xlu0 %v5572_v7, %s4308_s14 }
 0x4d2   :  { %997 = vrot.lane.b32.xlu2 %v5572_v7, %s4307_s0  ;;  %v5682_v4 = vpop.xlane.xlu0 %946 }
 0x4d3   :  { %10071 = vst [vmem:[#allocation104_spill] sm:$0xff] %v5682_v4 }
 0x4d4   :  { %1005 = vrot.lane.b32.xlu1 %v5568_v62, %s4307_s0 }
 0x4d8   :  { %1019 = vrot.lane.b32.xlu0 %v5578_v27, %s4308_s14 }
 0x4da   :  { %1003 = vrot.lane.b32.xlu2 %v5578_v27, %s4307_s0 }
 0x4dc   :  { %1011 = vrot.lane.b32.xlu1 %v5555_v57, %s4308_s14 }
 0x4e0   :  { %1025 = vrot.lane.b32.xlu0 %v5586_v32, %s4308_s14 }
 0x4e1   :  { %v5712_v31 = vpop.xlane.xlu1 %949 }
 0x4e2   :  { %1009 = vrot.lane.b32.xlu2 %v5586_v32, %s4307_s0  ;;  %10078 = vst [vmem:[#allocation147_spill] sm:$0xff] %v5712_v31 }
 0x4e4   :  { %1017 = vrot.lane.b32.xlu1 %v5562_v30, %s4308_s14 }
 0x4e8   :  { %1031 = vrot.lane.b32.xlu0 %v5582_v21, %s4309_s15 }
 0x4ea   :  { %1015 = vrot.lane.b32.xlu2 %v5582_v21, %s4308_s14 }
 0x4ec   :  { %1023 = vrot.lane.b32.xlu1 %v5596_v20, %s4308_s14 }
 0x4f0   :  { %1037 = vrot.lane.b32.xlu0 %v5568_v62, %s4309_s15  ;;  %v5710_v24 = vpop.xlane.xlu2 %952 }
 0x4f1   :  { %10077 = vst [vmem:[#allocation142_spill] sm:$0xff] %v5710_v24 }
 0x4f2   :  { %1021 = vrot.lane.b32.xlu2 %v5568_v62, %s4308_s14 }
 0x4f4   :  { %1029 = vrot.lane.b32.xlu1 %v5572_v7, %s4309_s15 }
 0x4f8   :  { %1043 = vrot.lane.b32.xlu0 %v5555_v57, %s4310_s16 }
 0x4fa   :  { %1027 = vrot.lane.b32.xlu2 %v5555_v57, %s4309_s15 }
 0x4fc   :  { %1035 = vrot.lane.b32.xlu1 %v5578_v27, %s4309_s15 }
 0x4ff   :  { %v5696_v17 = vpop.xlane.xlu0 %955 }
 0x500   :  { %1049 = vrot.lane.b32.xlu0 %v5562_v30, %s4310_s16  ;;  %10074 = vst [vmem:[#allocation124_spill] sm:$0xff] %v5696_v17 }
 0x502   :  { %1033 = vrot.lane.b32.xlu2 %v5562_v30, %s4309_s15 }
 0x504   :  { %1041 = vrot.lane.b32.xlu1 %v5586_v32, %s4309_s15 }
 0x508   :  { %1055 = vrot.lane.b32.xlu0 %v5596_v20, %s4310_s16 }
 0x50a   :  { %1039 = vrot.lane.b32.xlu2 %v5596_v20, %s4309_s15 }
 0x50c   :  { %1047 = vrot.lane.b32.xlu1 %v5582_v21, %s4310_s16 }
 0x50e   :  { %v5724_v44 = vpop.xlane.xlu1 %958 }
 0x50f   :  { %10081 = vst [vmem:[#allocation23_spill] sm:$0xff] %v5724_v44 }
 0x510   :  { %1061 = vrot.lane.b32.xlu0 %v5572_v7, %s4311_s17 }
 0x512   :  { %1045 = vrot.lane.b32.xlu2 %v5572_v7, %s4310_s16  ;;  %v980_v18 = vpop.permute.xlu0 %979 }
 0x513   :  { %1477 = vst [vmem:[#allocation1 + $0x1] ss:$9 sm:$0xff] %v980_v18 }
 0x514   :  { %1053 = vrot.lane.b32.xlu1 %v5568_v62, %s4310_s16 }
 0x518   :  { %1067 = vrot.lane.b32.xlu0 %v5578_v27, %s4311_s17 }
 0x51a   :  { %1051 = vrot.lane.b32.xlu2 %v5578_v27, %s4310_s16  ;;  %v5718_v34 = vpop.permute.xlu0 %985 }
 0x51b   :  { %10079 = vst [vmem:[#allocation8_spill] sm:$0xff] %v5718_v34 }
 0x51c   :  { %1059 = vrot.lane.b32.xlu1 %v5555_v57, %s4311_s17 }
 0x51d   :  { %v5722_v42 = vpop.xlane.xlu2 %961 }
 0x51e   :  { %10080 = vst [vmem:[#allocation13_spill] sm:$0xff] %v5722_v42 }
 0x520   :  { %1073 = vrot.lane.b32.xlu0 %v5586_v32, %s4311_s17 }
 0x522   :  { %1057 = vrot.lane.b32.xlu2 %v5586_v32, %s4310_s16  ;;  %v5730_v23 = vpop.permute.xlu0 %989 }
 0x523   :  { %10082 = vst [vmem:[#allocation20_spill] sm:$0xff] %v5730_v23 }
 0x524   :  { %1065 = vrot.lane.b32.xlu1 %v5562_v30, %s4311_s17 }
 0x525   :  { %v5734_v45 = vpop.permute.xlu2 %983 }
 0x526   :  { %v5736_v46 = vpop.permute.xlu1 %981 }
 0x528   :  { %1079 = vrot.lane.b32.xlu0 %v5582_v21, %s4312_s18 }
 0x52a   :  { %1063 = vrot.lane.b32.xlu2 %v5582_v21, %s4311_s17  ;;  %v996_v49 = vpop.permute.xlu0 %995 }
 0x52b   :  { %1479 = vst [vmem:[#allocation1 + $0x2] ss:$9 sm:$0xff] %v996_v49 }
 0x52c   :  { %1071 = vrot.lane.b32.xlu1 %v5596_v20, %s4311_s17 }
 0x52d   :  { %v5744_v51 = vpop.permute.xlu2 %991 }
 0x52e   :  { %10083 = vst [vmem:[#allocation30_spill] sm:$0xff] %v5744_v51  ;;  %v5746_v52 = vpop.permute.xlu1 %987 }
 0x52f   :  { %10084 = vst [vmem:[#allocation38_spill] sm:$0xff] %v5746_v52 }
 0x530   :  { %1085 = vrot.lane.b32.xlu0 %v5568_v62, %s4312_s18 }
 0x532   :  { %1069 = vrot.lane.b32.xlu2 %v5568_v62, %s4311_s17  ;;  %v5752_v55 = vpop.permute.xlu0 %1001 }
 0x533   :  { %10085 = vst [vmem:[#allocation35_spill] sm:$0xff] %v5752_v55 }
 0x534   :  { %1077 = vrot.lane.b32.xlu1 %v5572_v7, %s4312_s18 }
 0x535   :  { %v5756_v56 = vpop.permute.xlu2 %997 }
 0x536   :  { %v5758_v58 = vpop.permute.xlu1 %993 }
 0x537   :  { %10086 = vst [vmem:[#allocation45_spill] sm:$0xff] %v5758_v58 }
 0x538   :  { %1091 = vrot.lane.b32.xlu0 %v5555_v57, %s4313_s19 }
 0x53a   :  { %1075 = vrot.lane.b32.xlu2 %v5555_v57, %s4312_s18  ;;  %v5764_v2 = vpop.permute.xlu0 %1007 }
 0x53b   :  { %10087 = vst [vmem:[#allocation53_spill] sm:$0xff] %v5764_v2 }
 0x53c   :  { %1083 = vrot.lane.b32.xlu1 %v5578_v27, %s4312_s18 }
 0x53d   :  { %v5768_v59 = vpop.permute.xlu2 %1003 }
 0x53e   :  { %10088 = vst [vmem:[#allocation50_spill] sm:$0xff] %v5768_v59  ;;  %v5770_v10 = vpop.permute.xlu1 %999 }
 0x540   :  { %1097 = vrot.lane.b32.xlu0 %v5562_v30, %s4313_s19 }
 0x542   :  { %1081 = vrot.lane.b32.xlu2 %v5562_v30, %s4312_s18  ;;  %v5776_v63 = vpop.permute.xlu0 %1013 }
 0x544   :  { %1089 = vrot.lane.b32.xlu1 %v5586_v32, %s4312_s18 }
 0x545   :  { %v5780_v26 = vpop.permute.xlu2 %1009 }
 0x546   :  { %10089 = vst [vmem:[#allocation60_spill] sm:$0xff] %v5780_v26  ;;  %v5782_v33 = vpop.permute.xlu1 %1005 }
 0x547   :  { %10090 = vst [vmem:[#allocation68_spill] sm:$0xff] %v5782_v33 }
 0x548   :  { %1103 = vrot.lane.b32.xlu0 %v5596_v20, %s4313_s19 }
 0x54a   :  { %1087 = vrot.lane.b32.xlu2 %v5596_v20, %s4312_s18  ;;  %v5788_v37 = vpop.permute.xlu0 %1019 }
 0x54b   :  { %10091 = vst [vmem:[#allocation65_spill] sm:$0xff] %v5788_v37 }
 0x54c   :  { %1095 = vrot.lane.b32.xlu1 %v5582_v21, %s4313_s19 }
 0x54d   :  { %v5792_v11 = vpop.permute.xlu2 %1015 }
 0x54e   :  { %v1012_v50 = vpop.permute.xlu1 %1011 }
 0x54f   :  { %1481 = vst [vmem:[#allocation1 + $0x3] ss:$9 sm:$0xff] %v1012_v50 }
 0x550   :  { %1109 = vrot.lane.b32.xlu0 %v5572_v7, %s4314_s20 }
 0x552   :  { %1093 = vrot.lane.b32.xlu2 %v5572_v7, %s4313_s19  ;;  %v5798_v61 = vpop.permute.xlu0 %1025 }
 0x553   :  { %10092 = vst [vmem:[#allocation75_spill] sm:$0xff] %v5798_v61 }
 0x554   :  { %1101 = vrot.lane.b32.xlu1 %v5568_v62, %s4313_s19 }
 0x555   :  { %v5802_v41 = vpop.permute.xlu2 %1021 }
 0x556   :  { %10093 = vst [vmem:[#allocation83_spill] sm:$0xff] %v5802_v41  ;;  %v5804_v28 = vpop.permute.xlu1 %1017 }
 0x557   :  { %10094 = vst [vmem:[#allocation80_spill] sm:$0xff] %v5804_v28 }
 0x558   :  { %1115 = vrot.lane.b32.xlu0 %v5578_v27, %s4314_s20 }
 0x55a   :  { %1099 = vrot.lane.b32.xlu2 %v5578_v27, %s4313_s19  ;;  %v5810_v54 = vpop.permute.xlu0 %1031 }
 0x55c   :  { %1107 = vrot.lane.b32.xlu1 %v5555_v57, %s4314_s20 }
 0x55d   :  { %v1028_v18 = vpop.permute.xlu2 %1027 }
 0x55e   :  { %1483 = vst [vmem:[#allocation1 + $0x4] ss:$9 sm:$0xff] %v1028_v18  ;;  %v5814_v49 = vpop.permute.xlu1 %1023 }
 0x55f   :  { %10095 = vst [vmem:[#allocation91_spill] sm:$0xff] %v5814_v49 }
 0x560   :  { %1121 = vrot.lane.b32.xlu0 %v5586_v32, %s4314_s20 }
 0x562   :  { %1105 = vrot.lane.b32.xlu2 %v5586_v32, %s4313_s19  ;;  %v5820_v50 = vpop.permute.xlu0 %1037 }
 0x563   :  { %10096 = vst [vmem:[#allocation98_spill] sm:$0xff] %v5820_v50 }
 0x564   :  { %1113 = vrot.lane.b32.xlu1 %v5562_v30, %s4314_s20 }
 0x565   :  { %v5824_v42 = vpop.permute.xlu2 %1033 }
 0x566   :  { %10097 = vst [vmem:[#allocation95_spill] sm:$0xff] %v5824_v42  ;;  %v5826_v24 = vpop.permute.xlu1 %1029 }
 0x568   :  { %1127 = vrot.lane.b32.xlu0 %v5582_v21, %s4315_s21 }
 0x56a   :  { %1111 = vrot.lane.b32.xlu2 %v5582_v21, %s4314_s20  ;;  %v1044_v18 = vpop.permute.xlu0 %1043 }
 0x56b   :  { %1485 = vst [vmem:[#allocation1 + $0x5] ss:$9 sm:$0xff] %v1044_v18 }
 0x56c   :  { %1119 = vrot.lane.b32.xlu1 %v5596_v20, %s4314_s20 }
 0x56d   :  { %v5834_v44 = vpop.permute.xlu2 %1039 }
 0x56e   :  { %10098 = vst [vmem:[#allocation106_spill] sm:$0xff] %v5834_v44  ;;  %v5836_v17 = vpop.permute.xlu1 %1035 }
 0x56f   :  { %10099 = vst [vmem:[#allocation113_spill] sm:$0xff] %v5836_v17 }
 0x570   :  { %1133 = vrot.lane.b32.xlu0 %v5568_v62, %s4315_s21 }
 0x572   :  { %1117 = vrot.lane.b32.xlu2 %v5568_v62, %s4314_s20  ;;  %v5842_v31 = vpop.permute.xlu0 %1049 }
 0x573   :  { %10100 = vst [vmem:[#allocation110_spill] sm:$0xff] %v5842_v31 }
 0x574   :  { %1125 = vrot.lane.b32.xlu1 %v5572_v7, %s4315_s21 }
 0x575   :  { %v5846_v1 = vpop.permute.xlu2 %1045 }
 0x576   :  { %v5848_v18 = vpop.permute.xlu1 %1041 }
 0x577   :  { %10101 = vst [vmem:[#allocation119_spill] sm:$0xff] %v5848_v18 }
 0x578   :  { %1139 = vrot.lane.b32.xlu0 %v5555_v57, %s4316_s22 }
 0x57a   :  { %1123 = vrot.lane.b32.xlu2 %v5555_v57, %s4315_s21  ;;  %v5854_v4 = vpop.permute.xlu0 %1055 }
 0x57b   :  { %10102 = vst [vmem:[#allocation126_spill] sm:$0xff] %v5854_v4 }
 0x57c   :  { %1131 = vrot.lane.b32.xlu1 %v5578_v27, %s4315_s21 }
 0x57d   :  { %v5858_v14 = vpop.permute.xlu2 %1051 }
 0x57e   :  { %10103 = vst [vmem:[#allocation131_spill] sm:$0xff] %v5858_v14  ;;  %v5860_v25 = vpop.permute.xlu1 %1047 }
 0x580   :  { %1145 = vrot.lane.b32.xlu0 %v5562_v30, %s4316_s22 }
 0x582   :  { %1129 = vrot.lane.b32.xlu2 %v5562_v30, %s4315_s21  ;;  %v5866_v35 = vpop.permute.xlu0 %1061 }
 0x584   :  { %1137 = vrot.lane.b32.xlu1 %v5586_v32, %s4315_s21 }
 0x585   :  { %v5870_v12 = vpop.permute.xlu2 %1057 }
 0x586   :  { %10104 = vst [vmem:[#allocation136_spill] sm:$0xff] %v5870_v12  ;;  %v5872_v48 = vpop.permute.xlu1 %1053 }
 0x587   :  { %10105 = vst [vmem:[#allocation144_spill] sm:$0xff] %v5872_v48 }
 0x588   :  { %1151 = vrot.lane.b32.xlu0 %v5596_v20, %s4316_s22 }
 0x58a   :  { %1135 = vrot.lane.b32.xlu2 %v5596_v20, %s4315_s21  ;;  %v5878_v38 = vpop.permute.xlu0 %1067 }
 0x58b   :  { %10106 = vst [vmem:[#allocation149_spill] sm:$0xff] %v5878_v38 }
 0x58c   :  { %1143 = vrot.lane.b32.xlu1 %v5582_v21, %s4316_s22 }
 0x58d   :  { %v5882_v15 = vpop.permute.xlu2 %1063 }
 0x58e   :  { %v1060_v5 = vpop.permute.xlu1 %1059 }
 0x58f   :  { %1487 = vst [vmem:[#allocation1 + $0x6] ss:$9 sm:$0xff] %v1060_v5 }
 0x590   :  { %1157 = vrot.lane.b32.xlu0 %v5572_v7, %s4317_s23 }
 0x592   :  { %1141 = vrot.lane.b32.xlu2 %v5572_v7, %s4316_s22  ;;  %v5888_v16 = vpop.permute.xlu0 %1073 }
 0x593   :  { %10107 = vst [vmem:[#allocation154_spill] sm:$0xff] %v5888_v16 }
 0x594   :  { %1149 = vrot.lane.b32.xlu1 %v5568_v62, %s4316_s22 }
 0x595   :  { %v5892_v8 = vpop.permute.xlu2 %1069 }
 0x596   :  { %10108 = vst [vmem:[#allocation9_spill] sm:$0xff] %v5892_v8  ;;  %v5894_v22 = vpop.permute.xlu1 %1065 }
 0x597   :  { %10109 = vst [vmem:[#allocation14_spill] sm:$0xff] %v5894_v22 }
 0x598   :  { %1163 = vrot.lane.b32.xlu0 %v5578_v27, %s4317_s23 }
 0x59a   :  { %1147 = vrot.lane.b32.xlu2 %v5578_v27, %s4316_s22  ;;  %v5900_v5 = vpop.permute.xlu0 %1079 }
 0x59c   :  { %1155 = vrot.lane.b32.xlu1 %v5555_v57, %s4317_s23 }
 0x59d   :  { %v1076_v43 = vpop.permute.xlu2 %1075 }
 0x59e   :  { %1489 = vst [vmem:[#allocation1 + $0x7] ss:$9 sm:$0xff] %v1076_v43  ;;  %v5904_v3 = vpop.permute.xlu1 %1071 }
 0x59f   :  { %10110 = vst [vmem:[#allocation21_spill] sm:$0xff] %v5904_v3 }
 0x5a0   :  { %1169 = vrot.lane.b32.xlu0 %v5586_v32, %s4317_s23 }
 0x5a2   :  { %1153 = vrot.lane.b32.xlu2 %v5586_v32, %s4316_s22  ;;  %v5910_v53 = vpop.permute.xlu0 %1085 }
 0x5a3   :  { %10111 = vst [vmem:[#allocation28_spill] sm:$0xff] %v5910_v53 }
 0x5a4   :  { %1161 = vrot.lane.b32.xlu1 %v5562_v30, %s4317_s23 }
 0x5a5   :  { %v5914_v39 = vpop.permute.xlu2 %1081  ;;  %v5920_v43 = vld [vmem:[#allocation1] sm:$0xff] }
 0x5a6   :  { %10112 = vst [vmem:[#allocation26_spill] sm:$0xff] %v5914_v39  ;;  %v5916_v0 = vpop.permute.xlu1 %1077 }
 0x5a8   :  { %1175 = vrot.lane.b32.xlu0 %v5582_v21, %s4318_s24 }
 0x5aa   :  { %1159 = vrot.lane.b32.xlu2 %v5582_v21, %s4317_s23  ;;  %v1092_v60 = vpop.permute.xlu0 %1091 }
 0x5ab   :  { %1491 = vst [vmem:[#allocation1] ss:$9 sm:$0xff] %v1092_v60 }
 0x5ac   :  { %1167 = vrot.lane.b32.xlu1 %v5596_v20, %s4317_s23 }
 0x5ad   :  { %v5926_v13 = vpop.permute.xlu2 %1087 }
 0x5ae   :  { %10113 = vst [vmem:[#allocation36_spill] sm:$0xff] %v5926_v13  ;;  %v5928_v6 = vpop.permute.xlu1 %1083 }
 0x5af   :  { %10114 = vst [vmem:[#allocation43_spill] sm:$0xff] %v5928_v6 }
 0x5b0   :  { %1181 = vrot.lane.b32.xlu0 %v5568_v62, %s4318_s24 }
 0x5b2   :  { %1165 = vrot.lane.b32.xlu2 %v5568_v62, %s4317_s23  ;;  %v5934_v40 = vpop.permute.xlu0 %1097 }
 0x5b3   :  { %10115 = vst [vmem:[#allocation41_spill] sm:$0xff] %v5934_v40 }
 0x5b4   :  { %1173 = vrot.lane.b32.xlu1 %v5572_v7, %s4318_s24 }
 0x5b5   :  { %v5938_v36 = vpop.permute.xlu2 %1093 }
 0x5b6   :  { %v5940_v60 = vpop.permute.xlu1 %1089 }
 0x5b7   :  { %10116 = vst [vmem:[#allocation51_spill] sm:$0xff] %v5940_v60 }
 0x5b8   :  { %1187 = vrot.lane.b32.xlu0 %v5555_v57, %s4319_s25 }
 0x5ba   :  { %1171 = vrot.lane.b32.xlu2 %v5555_v57, %s4318_s24  ;;  %v5946_v29 = vpop.permute.xlu0 %1103 }
 0x5bb   :  { %10117 = vst [vmem:[#allocation58_spill] sm:$0xff] %v5946_v29 }
 0x5bc   :  { %1179 = vrot.lane.b32.xlu1 %v5578_v27, %s4318_s24 }
 0x5bd   :  { %v5950_v47 = vpop.permute.xlu2 %1099 }
 0x5be   :  { %10118 = vst [vmem:[#allocation56_spill] sm:$0xff] %v5950_v47  ;;  %v5952_v19 = vpop.permute.xlu1 %1095 }
 0x5c0   :  { %1193 = vrot.lane.b32.xlu0 %v5562_v30, %s4319_s25 }
 0x5c2   :  { %1177 = vrot.lane.b32.xlu2 %v5562_v30, %s4318_s24  ;;  %v5958_v9 = vpop.permute.xlu0 %1109 }
 0x5c4   :  { %1185 = vrot.lane.b32.xlu1 %v5586_v32, %s4318_s24 }
 0x5c5   :  { %v5962_v60 = vpop.permute.xlu2 %1105 }
 0x5c6   :  { %10119 = vst [vmem:[#allocation66_spill] sm:$0xff] %v5962_v60  ;;  %v5964_v16 = vpop.permute.xlu1 %1101 }
 0x5c7   :  { %10120 = vst [vmem:[#allocation73_spill] sm:$0xff] %v5964_v16 }
 0x5c8   :  { %1199 = vrot.lane.b32.xlu0 %v5596_v20, %s4319_s25 }
 0x5ca   :  { %1183 = vrot.lane.b32.xlu2 %v5596_v20, %s4318_s24  ;;  %v5970_v12 = vpop.permute.xlu0 %1115 }
 0x5cb   :  { %10121 = vst [vmem:[#allocation71_spill] sm:$0xff] %v5970_v12 }
 0x5cc   :  { %1191 = vrot.lane.b32.xlu1 %v5582_v21, %s4319_s25 }
 0x5cd   :  { %v5974_v18 = vpop.permute.xlu2 %1111 }
 0x5ce   :  { %v1108_v61 = vpop.permute.xlu1 %1107 }
 0x5cf   :  { %1492 = vst [vmem:[#allocation1 + $0x1] ss:$9 sm:$0xff] %v1108_v61 }
 0x5d0   :  { %1205 = vrot.lane.b32.xlu0 %v5572_v7, %s4320_s26 }
 0x5d2   :  { %1189 = vrot.lane.b32.xlu2 %v5572_v7, %s4319_s25  ;;  %v5980_v60 = vpop.permute.xlu0 %1121 }
 0x5d3   :  { %10122 = vst [vmem:[#allocation81_spill] sm:$0xff] %v5980_v60 }
 0x5d4   :  { %1197 = vrot.lane.b32.xlu1 %v5568_v62, %s4319_s25 }
 0x5d5   :  { %v5984_v26 = vpop.permute.xlu2 %1117 }
 0x5d6   :  { %10123 = vst [vmem:[#allocation88_spill] sm:$0xff] %v5984_v26  ;;  %v5986_v58 = vpop.permute.xlu1 %1113 }
 0x5d7   :  { %10124 = vst [vmem:[#allocation85_spill] sm:$0xff] %v5986_v58 }
 0x5d8   :  { %1211 = vrot.lane.b32.xlu0 %v5578_v27, %s4320_s26 }
 0x5da   :  { %1195 = vrot.lane.b32.xlu2 %v5578_v27, %s4319_s25  ;;  %v5992_v61 = vpop.permute.xlu0 %1127 }
 0x5dc   :  { %1203 = vrot.lane.b32.xlu1 %v5555_v57, %s4320_s26 }
 0x5dd   :  { %v1124_v29 = vpop.permute.xlu2 %1123 }
 0x5de   :  { %1493 = vst [vmem:[#allocation1 + $0x2] ss:$9 sm:$0xff] %v1124_v29  ;;  %v5996_v60 = vpop.permute.xlu1 %1119 }
 0x5df   :  { %10125 = vst [vmem:[#allocation97_spill] sm:$0xff] %v5996_v60 }
 0x5e0   :  { %1217 = vrot.lane.b32.xlu0 %v5586_v32, %s4320_s26 }
 0x5e2   :  { %1201 = vrot.lane.b32.xlu2 %v5586_v32, %s4319_s25  ;;  %v6002_v13 = vpop.permute.xlu0 %1133 }
 0x5e3   :  { %10126 = vst [vmem:[#allocation103_spill] sm:$0xff] %v6002_v13 }
 0x5e4   :  { %1209 = vrot.lane.b32.xlu1 %v5562_v30, %s4320_s26 }
 0x5e5   :  { %v6006_v3 = vpop.permute.xlu2 %1129 }
 0x5e6   :  { %10127 = vst [vmem:[#allocation100_spill] sm:$0xff] %v6006_v3  ;;  %v6008_v4 = vpop.permute.xlu1 %1125 }
 0x5e8   :  { %1223 = vrot.lane.b32.xlu0 %v5582_v21, %s4304_s11 }
 0x5ea   :  { %1207 = vrot.lane.b32.xlu2 %v5582_v21, %s4320_s26  ;;  %v1140_v29 = vpop.permute.xlu0 %1139 }
 0x5eb   :  { %1494 = vst [vmem:[#allocation1 + $0x3] ss:$9 sm:$0xff] %v1140_v29 }
 0x5ec   :  { %1215 = vrot.lane.b32.xlu1 %v5596_v20, %s4320_s26 }
 0x5ed   :  { %v6016_v60 = vpop.permute.xlu2 %1135 }
 0x5ee   :  { %10128 = vst [vmem:[#allocation112_spill] sm:$0xff] %v6016_v60  ;;  %v6018_v44 = vpop.permute.xlu1 %1131 }
 0x5ef   :  { %10129 = vst [vmem:[#allocation118_spill] sm:$0xff] %v6018_v44 }
 0x5f0   :  { %1229 = vrot.lane.b32.xlu0 %v5568_v62, %s4304_s11 }
 0x5f2   :  { %1213 = vrot.lane.b32.xlu2 %v5568_v62, %s4320_s26  ;;  %v6024_v49 = vpop.permute.xlu0 %1145 }
 0x5f3   :  { %10130 = vst [vmem:[#allocation115_spill] sm:$0xff] %v6024_v49 }
 0x5f4   :  { %1221 = vrot.lane.b32.xlu1 %v5572_v7, %s4304_s11 }
 0x5f5   :  { %v6028_v2 = vpop.permute.xlu2 %1141 }
 0x5f6   :  { %v6030_v29 = vpop.permute.xlu1 %1137 }
 0x5f7   :  { %10131 = vst [vmem:[#allocation125_spill] sm:$0xff] %v6030_v29 }
 0x5f8   :  { %1235 = vrot.lane.b32.xlu0 %v5555_v57, %s4321_s27 }
 0x5fa   :  { %1219 = vrot.lane.b32.xlu2 %v5555_v57, %s4304_s11  ;;  %v6036_v60 = vpop.permute.xlu0 %1151 }
 0x5fb   :  { %10132 = vst [vmem:[#allocation133_spill] sm:$0xff] %v6036_v60 }
 0x5fc   :  { %1227 = vrot.lane.b32.xlu1 %v5578_v27, %s4304_s11 }
 0x5fd   :  { %v6040_v51 = vpop.permute.xlu2 %1147 }
 0x5fe   :  { %10133 = vst [vmem:[#allocation138_spill] sm:$0xff] %v6040_v51  ;;  %v6042_v13 = vpop.permute.xlu1 %1143 }
 0x600   :  { %1241 = vrot.lane.b32.xlu0 %v5562_v30, %s4321_s27 }
 0x602   :  { %1225 = vrot.lane.b32.xlu2 %v5562_v30, %s4304_s11  ;;  %v6048_v29 = vpop.permute.xlu0 %1157 }
 0x604   :  { %1233 = vrot.lane.b32.xlu1 %v5586_v32, %s4304_s11 }
 0x605   :  { %v6052_v26 = vpop.permute.xlu2 %1153 }
 0x606   :  { %10134 = vst [vmem:[#allocation143_spill] sm:$0xff] %v6052_v26  ;;  %v6054_v60 = vpop.permute.xlu1 %1149 }
 0x607   :  { %10135 = vst [vmem:[#allocation151_spill] sm:$0xff] %v6054_v60 }
 0x608   :  { %1247 = vrot.lane.b32.xlu0 %v5596_v20, %s4321_s27 }
 0x60a   :  { %1231 = vrot.lane.b32.xlu2 %v5596_v20, %s4304_s11  ;;  %v6060_v16 = vpop.permute.xlu0 %1163 }
 0x60b   :  { %10136 = vst [vmem:[#allocation155_spill] sm:$0xff] %v6060_v16 }
 0x60c   :  { %1239 = vrot.lane.b32.xlu1 %v5582_v21, %s4321_s27 }
 0x60d   :  { %v6064_v53 = vpop.permute.xlu2 %1159 }
 0x60e   :  { %v1156_v8 = vpop.permute.xlu1 %1155 }
 0x60f   :  { %1495 = vst [vmem:[#allocation1 + $0x4] ss:$9 sm:$0xff] %v1156_v8 }
 0x610   :  { %1253 = vrot.lane.b32.xlu0 %v5572_v7, %s4322_s28 }
 0x612   :  { %1237 = vrot.lane.b32.xlu2 %v5572_v7, %s4321_s27  ;;  %v6070_v26 = vpop.permute.xlu0 %1169 }
 0x613   :  { %10137 = vst [vmem:[#allocation12_spill] sm:$0xff] %v6070_v26 }
 0x614   :  { %1245 = vrot.lane.b32.xlu1 %v5568_v62, %s4321_s27 }
 0x615   :  { %v6074_v60 = vpop.permute.xlu2 %1165 }
 0x616   :  { %10138 = vst [vmem:[#allocation19_spill] sm:$0xff] %v6074_v60  ;;  %v6076_v48 = vpop.permute.xlu1 %1161 }
 0x617   :  { %10139 = vst [vmem:[#allocation17_spill] sm:$0xff] %v6076_v48 }
 0x618   :  { %1259 = vrot.lane.b32.xlu0 %v5578_v27, %s4322_s28 }
 0x61a   :  { %1243 = vrot.lane.b32.xlu2 %v5578_v27, %s4321_s27  ;;  %v6082_v8 = vpop.permute.xlu0 %1175 }
 0x61c   :  { %1251 = vrot.lane.b32.xlu1 %v5555_v57, %s4322_s28 }
 0x61d   :  { %v1172_v50 = vpop.permute.xlu2 %1171 }
 0x61e   :  { %1496 = vst [vmem:[#allocation1 + $0x5] ss:$9 sm:$0xff] %v1172_v50  ;;  %v6086_v26 = vpop.permute.xlu1 %1167 }
 0x61f   :  { %10140 = vst [vmem:[#allocation27_spill] sm:$0xff] %v6086_v26 }
 0x620   :  { %1265 = vrot.lane.b32.xlu0 %v5586_v32, %s4322_s28 }
 0x622   :  { %1249 = vrot.lane.b32.xlu2 %v5586_v32, %s4321_s27  ;;  %v6092_v60 = vpop.permute.xlu0 %1181 }
 0x623   :  { %10141 = vst [vmem:[#allocation34_spill] sm:$0xff] %v6092_v60 }
 0x624   :  { %1257 = vrot.lane.b32.xlu1 %v5562_v30, %s4322_s28 }
 0x625   :  { %v6096_v41 = vpop.permute.xlu2 %1177 }
 0x626   :  { %10142 = vst [vmem:[#allocation31_spill] sm:$0xff] %v6096_v41  ;;  %v6098_v33 = vpop.permute.xlu1 %1173 }
 0x628   :  { %1271 = vrot.lane.b32.xlu0 %v5582_v21, %s4323_s29 }
 0x62a   :  { %1255 = vrot.lane.b32.xlu2 %v5582_v21, %s4322_s28  ;;  %v1188_v50 = vpop.permute.xlu0 %1187 }
 0x62b   :  { %1497 = vst [vmem:[#allocation1 + $0x6] ss:$9 sm:$0xff] %v1188_v50 }
 0x62c   :  { %1263 = vrot.lane.b32.xlu1 %v5596_v20, %s4322_s28 }
 0x62d   :  { %v6106_v26 = vpop.permute.xlu2 %1183 }
 0x62e   :  { %10143 = vst [vmem:[#allocation42_spill] sm:$0xff] %v6106_v26  ;;  %v6108_v60 = vpop.permute.xlu1 %1179 }
 0x62f   :  { %10144 = vst [vmem:[#allocation49_spill] sm:$0xff] %v6108_v60 }
 0x630   :  { %1277 = vrot.lane.b32.xlu0 %v5568_v62, %s4323_s29 }
 0x632   :  { %1261 = vrot.lane.b32.xlu2 %v5568_v62, %s4322_s28  ;;  %v6114_v23 = vpop.permute.xlu0 %1193 }
 0x633   :  { %10145 = vst [vmem:[#allocation46_spill] sm:$0xff] %v6114_v23 }
 0x634   :  { %1269 = vrot.lane.b32.xlu1 %v5572_v7, %s4323_s29 }
 0x635   :  { %v6118_v16 = vpop.permute.xlu2 %1189 }
 0x636   :  { %v6120_v50 = vpop.permute.xlu1 %1185 }
 0x637   :  { %10146 = vst [vmem:[#allocation57_spill] sm:$0xff] %v6120_v50 }
 0x638   :  { %1283 = vrot.lane.b32.xlu0 %v5555_v57, %s4324_s30 }
 0x63a   :  { %1267 = vrot.lane.b32.xlu2 %v5555_v57, %s4323_s29  ;;  %v6126_v26 = vpop.permute.xlu0 %1199 }
 0x63b   :  { %10147 = vst [vmem:[#allocation64_spill] sm:$0xff] %v6126_v26 }
 0x63c   :  { %1275 = vrot.lane.b32.xlu1 %v5578_v27, %s4323_s29 }
 0x63d   :  { %v6130_v60 = vpop.permute.xlu2 %1195 }
 0x63e   :  { %10148 = vst [vmem:[#allocation61_spill] sm:$0xff] %v6130_v60  ;;  %v6132_v51 = vpop.permute.xlu1 %1191 }
 0x640   :  { %1289 = vrot.lane.b32.xlu0 %v5562_v30, %s4324_s30 }
 0x642   :  { %1273 = vrot.lane.b32.xlu2 %v5562_v30, %s4323_s29  ;;  %v6138_v50 = vpop.permute.xlu0 %1205 }
 0x644   :  { %1281 = vrot.lane.b32.xlu1 %v5586_v32, %s4323_s29 }
 0x645   :  { %v6142_v44 = vpop.permute.xlu2 %1201 }
 0x646   :  { %10149 = vst [vmem:[#allocation72_spill] sm:$0xff] %v6142_v44  ;;  %v6144_v26 = vpop.permute.xlu1 %1197 }
 0x647   :  { %10150 = vst [vmem:[#allocation79_spill] sm:$0xff] %v6144_v26 }
 0x648   :  { %1295 = vrot.lane.b32.xlu0 %v5596_v20, %s4324_s30 }
 0x64a   :  { %1279 = vrot.lane.b32.xlu2 %v5596_v20, %s4323_s29  ;;  %v6150_v60 = vpop.permute.xlu0 %1211 }
 0x64b   :  { %10151 = vst [vmem:[#allocation76_spill] sm:$0xff] %v6150_v60 }
 0x64c   :  { %1287 = vrot.lane.b32.xlu1 %v5582_v21, %s4324_s30 }
 0x64d   :  { %v6154_v12 = vpop.permute.xlu2 %1207 }
 0x64e   :  { %v1204_v47 = vpop.permute.xlu1 %1203 }
 0x64f   :  { %1498 = vst [vmem:[#allocation1 + $0x7] ss:$9 sm:$0xff] %v1204_v47 }
 0x650   :  { %1301 = vrot.lane.b32.xlu0 %v5572_v7, %s4325_s2 }
 0x652   :  { %1285 = vrot.lane.b32.xlu2 %v5572_v7, %s4324_s30  ;;  %v6160_v44 = vpop.permute.xlu0 %1217 }
 0x653   :  { %10152 = vst [vmem:[#allocation87_spill] sm:$0xff] %v6160_v44 }
 0x654   :  { %1293 = vrot.lane.b32.xlu1 %v5568_v62, %s4324_s30 }
 0x655   :  { %v6164_v26 = vpop.permute.xlu2 %1213 }
 0x656   :  { %10153 = vst [vmem:[#allocation94_spill] sm:$0xff] %v6164_v26  ;;  %v6166_v60 = vpop.permute.xlu1 %1209  ;;  %v6174_v6 = vld [vmem:[#allocation1] sm:$0xff] }
 0x657   :  { %10154 = vst [vmem:[#allocation90_spill] sm:$0xff] %v6166_v60 }
 0x658   :  { %1307 = vrot.lane.b32.xlu0 %v5578_v27, %s4325_s2 }
 0x65a   :  { %1291 = vrot.lane.b32.xlu2 %v5578_v27, %s4324_s30  ;;  %v6172_v47 = vpop.permute.xlu0 %1223 }
 0x65c   :  { %1299 = vrot.lane.b32.xlu1 %v5555_v57, %s4325_s2 }
 0x65d   :  { %v1220_v44 = vpop.permute.xlu2 %1219 }
 0x65e   :  { %1500 = vst [vmem:[#allocation1] ss:$9 sm:$0xff] %v1220_v44  ;;  %v6178_v38 = vpop.permute.xlu1 %1215 }
 0x65f   :  { %10155 = vst [vmem:[#allocation102_spill] sm:$0xff] %v6178_v38 }
 0x660   :  { %1313 = vrot.lane.b32.xlu0 %v5586_v32, %s4325_s2 }
 0x662   :  { %1297 = vrot.lane.b32.xlu2 %v5586_v32, %s4324_s30  ;;  %v6184_v26 = vpop.permute.xlu0 %1229 }
 0x663   :  { %10156 = vst [vmem:[#allocation109_spill] sm:$0xff] %v6184_v26 }
 0x664   :  { %1305 = vrot.lane.b32.xlu1 %v5562_v30, %s4325_s2 }
 0x665   :  { %v6188_v14 = vpop.permute.xlu2 %1225 }
 0x666   :  { %10157 = vst [vmem:[#allocation105_spill] sm:$0xff] %v6188_v14  ;;  %v6190_v17 = vpop.permute.xlu1 %1221 }
 0x668   :  { %1319 = vrot.lane.b32.xlu0 %v5582_v21, %s9738_s3 }
 0x66a   :  { %1303 = vrot.lane.b32.xlu2 %v5582_v21, %s4325_s2  ;;  %v1236_v44 = vpop.permute.xlu0 %1235 }
 0x66b   :  { %1501 = vst [vmem:[#allocation1 + $0x1] ss:$9 sm:$0xff] %v1236_v44 }
 0x66c   :  { %1311 = vrot.lane.b32.xlu1 %v5596_v20, %s4325_s2 }
 0x66d   :  { %v6198_v38 = vpop.permute.xlu2 %1231 }
 0x66e   :  { %10158 = vst [vmem:[#allocation117_spill] sm:$0xff] %v6198_v38  ;;  %v6200_v26 = vpop.permute.xlu1 %1227 }
 0x66f   :  { %10159 = vst [vmem:[#allocation122_spill] sm:$0xff] %v6200_v26 }
 0x670   :  { %1325 = vrot.lane.b32.xlu0 %v5568_v62, %s9738_s3 }
 0x672   :  { %1309 = vrot.lane.b32.xlu2 %v5568_v62, %s4325_s2  ;;  %v6206_v37 = vpop.permute.xlu0 %1241 }
 0x673   :  { %10160 = vst [vmem:[#allocation127_spill] sm:$0xff] %v6206_v37 }
 0x674   :  { %1317 = vrot.lane.b32.xlu1 %v5572_v7, %s9738_s3 }
 0x675   :  { %v6210_v59 = vpop.permute.xlu2 %1237 }
 0x676   :  { %v6212_v44 = vpop.permute.xlu1 %1233 }
 0x677   :  { %10161 = vst [vmem:[#allocation132_spill] sm:$0xff] %v6212_v44 }
 0x678   :  { %1331 = vrot.lane.b32.xlu0 %v5555_v57, %s4327_s4 }
 0x67a   :  { %1315 = vrot.lane.b32.xlu2 %v5555_v57, %s9738_s3  ;;  %v6218_v38 = vpop.permute.xlu0 %1247 }
 0x67b   :  { %10162 = vst [vmem:[#allocation140_spill] sm:$0xff] %v6218_v38 }
 0x67c   :  { %1323 = vrot.lane.b32.xlu1 %v5578_v27, %s9738_s3 }
 0x67d   :  { %v6222_v26 = vpop.permute.xlu2 %1243 }
 0x67e   :  { %10163 = vst [vmem:[#allocation145_spill] sm:$0xff] %v6222_v26  ;;  %v6224_v52 = vpop.permute.xlu1 %1239 }
 0x680   :  { %1337 = vrot.lane.b32.xlu0 %v5562_v30, %s4327_s4 }
 0x682   :  { %1321 = vrot.lane.b32.xlu2 %v5562_v30, %s9738_s3  ;;  %v6230_v44 = vpop.permute.xlu0 %1253 }
 0x684   :  { %1329 = vrot.lane.b32.xlu1 %v5586_v32, %s9738_s3 }
 0x685   :  { %v6234_v37 = vpop.permute.xlu2 %1249 }
 0x686   :  { %10164 = vst [vmem:[#allocation150_spill] sm:$0xff] %v6234_v37  ;;  %v6236_v38 = vpop.permute.xlu1 %1245 }
 0x687   :  { %10165 = vst [vmem:[#allocation157_spill] sm:$0xff] %v6236_v38 }
 0x688   :  { %1343 = vrot.lane.b32.xlu0 %v5596_v20, %s4327_s4 }
 0x68a   :  { %1327 = vrot.lane.b32.xlu2 %v5596_v20, %s9738_s3  ;;  %v6242_v26 = vpop.permute.xlu0 %1259 }
 0x68b   :  { %10166 = vst [vmem:[#allocation11_spill] sm:$0xff] %v6242_v26 }
 0x68c   :  { %1335 = vrot.lane.b32.xlu1 %v5582_v21, %s4327_s4 }
 0x68d   :  { %v6246_v14 = vpop.permute.xlu2 %1255 }
 0x68e   :  { %v1252_v60 = vpop.permute.xlu1 %1251 }
 0x68f   :  { %1502 = vst [vmem:[#allocation1 + $0x2] ss:$9 sm:$0xff] %v1252_v60 }
 0x690   :  { %1349 = vrot.lane.b32.xlu0 %v5572_v7, %s4328_s5 }
 0x692   :  { %1333 = vrot.lane.b32.xlu2 %v5572_v7, %s4327_s4  ;;  %v6252_v37 = vpop.permute.xlu0 %1265 }
 0x693   :  { %10167 = vst [vmem:[#allocation18_spill] sm:$0xff] %v6252_v37 }
 0x694   :  { %1341 = vrot.lane.b32.xlu1 %v5568_v62, %s4327_s4 }
 0x695   :  { %v6256_v38 = vpop.permute.xlu2 %1261 }
 0x696   :  { %10168 = vst [vmem:[#allocation24_spill] sm:$0xff] %v6256_v38  ;;  %v6258_v26 = vpop.permute.xlu1 %1257 }
 0x697   :  { %10169 = vst [vmem:[#allocation22_spill] sm:$0xff] %v6258_v26 }
 0x698   :  { %1355 = vrot.lane.b32.xlu0 %v5578_v27, %s4328_s5 }
 0x69a   :  { %1339 = vrot.lane.b32.xlu2 %v5578_v27, %s4327_s4  ;;  %v6264_v60 = vpop.permute.xlu0 %1271 }
 0x69c   :  { %1347 = vrot.lane.b32.xlu1 %v5555_v57, %s4328_s5 }
 0x69d   :  { %v1268_v23 = vpop.permute.xlu2 %1267 }
 0x69e   :  { %1503 = vst [vmem:[#allocation1 + $0x3] ss:$9 sm:$0xff] %v1268_v23  ;;  %v6268_v37 = vpop.permute.xlu1 %1263 }
 0x69f   :  { %10170 = vst [vmem:[#allocation33_spill] sm:$0xff] %v6268_v37 }
 0x6a0   :  { %1361 = vrot.lane.b32.xlu0 %v5586_v32, %s4328_s5 }
 0x6a2   :  { %1345 = vrot.lane.b32.xlu2 %v5586_v32, %s4327_s4  ;;  %v6274_v38 = vpop.permute.xlu0 %1277 }
 0x6a3   :  { %10171 = vst [vmem:[#allocation39_spill] sm:$0xff] %v6274_v38 }
 0x6a4   :  { %1353 = vrot.lane.b32.xlu1 %v5562_v30, %s4328_s5 }
 0x6a5   :  { %v6278_v26 = vpop.permute.xlu2 %1273 }
 0x6a6   :  { %10172 = vst [vmem:[#allocation37_spill] sm:$0xff] %v6278_v26  ;;  %v6280_v41 = vpop.permute.xlu1 %1269 }
 0x6a8   :  { %1367 = vrot.lane.b32.xlu0 %v5582_v21, %s9731_s6 }
 0x6aa   :  { %1351 = vrot.lane.b32.xlu2 %v5582_v21, %s4328_s5  ;;  %v1284_v23 = vpop.permute.xlu0 %1283 }
 0x6ab   :  { %1504 = vst [vmem:[#allocation1 + $0x4] ss:$9 sm:$0xff] %v1284_v23 }
 0x6ac   :  { %1359 = vrot.lane.b32.xlu1 %v5596_v20, %s4328_s5 }
 0x6ad   :  { %v6288_v37 = vpop.permute.xlu2 %1279 }
 0x6ae   :  { %10173 = vst [vmem:[#allocation48_spill] sm:$0xff] %v6288_v37  ;;  %v6290_v38 = vpop.permute.xlu1 %1275 }
 0x6af   :  { %10174 = vst [vmem:[#allocation54_spill] sm:$0xff] %v6290_v38 }
 0x6b0   :  { %1373 = vrot.lane.b32.xlu0 %v5568_v62, %s9731_s6 }
 0x6b2   :  { %1357 = vrot.lane.b32.xlu2 %v5568_v62, %s4328_s5  ;;  %v6296_v26 = vpop.permute.xlu0 %1289 }
 0x6b3   :  { %10175 = vst [vmem:[#allocation52_spill] sm:$0xff] %v6296_v26 }
 0x6b4   :  { %1365 = vrot.lane.b32.xlu1 %v5572_v7, %s9731_s6 }
 0x6b5   :  { %v6300_v48 = vpop.permute.xlu2 %1285 }
 0x6b6   :  { %v6302_v23 = vpop.permute.xlu1 %1281 }
 0x6b7   :  { %10176 = vst [vmem:[#allocation63_spill] sm:$0xff] %v6302_v23 }
 0x6b8   :  { %1379 = vrot.lane.b32.xlu0 %v5555_v57, %s4330_s7 }
 0x6ba   :  { %1363 = vrot.lane.b32.xlu2 %v5555_v57, %s9731_s6  ;;  %v6308_v37 = vpop.permute.xlu0 %1295 }
 0x6bb   :  { %10177 = vst [vmem:[#allocation69_spill] sm:$0xff] %v6308_v37 }
 0x6bc   :  { %1371 = vrot.lane.b32.xlu1 %v5578_v27, %s9731_s6 }
 0x6bd   :  { %v6312_v38 = vpop.permute.xlu2 %1291 }
 0x6be   :  { %10178 = vst [vmem:[#allocation67_spill] sm:$0xff] %v6312_v38  ;;  %v6314_v26 = vpop.permute.xlu1 %1287 }
 0x6c0   :  { %1385 = vrot.lane.b32.xlu0 %v5562_v30, %s4330_s7 }
 0x6c2   :  { %1369 = vrot.lane.b32.xlu2 %v5562_v30, %s9731_s6  ;;  %v6320_v23 = vpop.permute.xlu0 %1301 }
 0x6c4   :  { %1377 = vrot.lane.b32.xlu1 %v5586_v32, %s9731_s6 }
 0x6c5   :  { %v6324_v49 = vpop.permute.xlu2 %1297 }
 0x6c6   :  { %10179 = vst [vmem:[#allocation78_spill] sm:$0xff] %v6324_v49  ;;  %v6326_v37 = vpop.permute.xlu1 %1293 }
 0x6c7   :  { %10180 = vst [vmem:[#allocation84_spill] sm:$0xff] %v6326_v37 }
 0x6c8   :  { %1391 = vrot.lane.b32.xlu0 %v5596_v20, %s4330_s7 }
 0x6ca   :  { %1375 = vrot.lane.b32.xlu2 %v5596_v20, %s9731_s6  ;;  %v6332_v38 = vpop.permute.xlu0 %1307  ;;  %s10188_s6 = smov 16  }
 0x6cb   :  { %10181 = vst [vmem:[#allocation82_spill] sm:$0xff] %v6332_v38 }
 0x6cc   :  { %1383 = vrot.lane.b32.xlu1 %v5582_v21, %s4330_s7 }
 0x6cd   :  { %v6336_v3 = vpop.permute.xlu2 %1303 }
 0x6ce   :  { %v1300_v58 = vpop.permute.xlu1 %1299 }
 0x6cf   :  { %1505 = vst [vmem:[#allocation1 + $0x5] ss:$9 sm:$0xff] %v1300_v58 }
 0x6d0   :  { %1397 = vrot.lane.b32.xlu0 %v5572_v7, %s4331_s8 }
 0x6d2   :  { %1381 = vrot.lane.b32.xlu2 %v5572_v7, %s4330_s7  ;;  %v6342_v49 = vpop.permute.xlu0 %1313 }
 0x6d3   :  { %10182 = vst [vmem:[#allocation93_spill] sm:$0xff] %v6342_v49 }
 0x6d4   :  { %1389 = vrot.lane.b32.xlu1 %v5568_v62, %s4330_s7 }
 0x6d5   :  { %v6346_v37 = vpop.permute.xlu2 %1309 }
 0x6d6   :  { %10183 = vst [vmem:[#allocation99_spill] sm:$0xff] %v6346_v37  ;;  %v6348_v38 = vpop.permute.xlu1 %1305 }
 0x6d7   :  { %10184 = vst [vmem:[#allocation96_spill] sm:$0xff] %v6348_v38 }
 0x6d8   :  { %1403 = vrot.lane.b32.xlu0 %v5578_v27, %s4331_s8 }
 0x6da   :  { %1387 = vrot.lane.b32.xlu2 %v5578_v27, %s4330_s7  ;;  %v6354_v58 = vpop.permute.xlu0 %1319 }
 0x6dc   :  { %1395 = vrot.lane.b32.xlu1 %v5555_v57, %s4331_s8 }
 0x6dd   :  { %v1316_v40 = vpop.permute.xlu2 %1315 }
 0x6de   :  { %1506 = vst [vmem:[#allocation1 + $0x6] ss:$9 sm:$0xff] %v1316_v40  ;;  %v6358_v49 = vpop.permute.xlu1 %1311 }
 0x6df   :  { %10185 = vst [vmem:[#allocation108_spill] sm:$0xff] %v6358_v49 }
 0x6e0   :  { %1409 = vrot.lane.b32.xlu0 %v5586_v32, %s4331_s8 }
 0x6e2   :  { %1393 = vrot.lane.b32.xlu2 %v5586_v32, %s4330_s7  ;;  %v6364_v37 = vpop.permute.xlu0 %1325 }
 0x6e3   :  { %10186 = vst [vmem:[#allocation114_spill] sm:$0xff] %v6364_v37 }
 0x6e4   :  { %1401 = vrot.lane.b32.xlu1 %v5562_v30, %s4331_s8 }
 0x6e5   :  { %v6368_v38 = vpop.permute.xlu2 %1321 }
 0x6e6   :  { %10187 = vst [vmem:[#allocation111_spill] sm:$0xff] %v6368_v38  ;;  %v6370_v39 = vpop.permute.xlu1 %1317 }
 0x6e8   :  { %1415 = vrot.lane.b32.xlu0 %v5582_v21, %s10188_s6 }
 0x6ea   :  { %1399 = vrot.lane.b32.xlu2 %v5582_v21, %s4331_s8  ;;  %v1332_v40 = vpop.permute.xlu0 %1331 }
 0x6eb   :  { %1507 = vst [vmem:[#allocation1 + $0x7] ss:$9 sm:$0xff] %v1332_v40 }
 0x6ec   :  { %1407 = vrot.lane.b32.xlu1 %v5596_v20, %s4331_s8 }
 0x6ed   :  { %v6378_v49 = vpop.permute.xlu2 %1327 }
 0x6ee   :  { %10189 = vst [vmem:[#allocation121_spill] sm:$0xff] %v6378_v49  ;;  %v6380_v37 = vpop.permute.xlu1 %1323 }
 0x6ef   :  { %10190 = vst [vmem:[#allocation128_spill] sm:$0xff] %v6380_v37 }
 0x6f0   :  { %1421 = vrot.lane.b32.xlu0 %v5568_v62, %s10188_s6 }
 0x6f2   :  { %1405 = vrot.lane.b32.xlu2 %v5568_v62, %s4331_s8 }
 0x6f4   :  { %1413 = vrot.lane.b32.xlu1 %v5572_v7, %s10188_s6 }
 0x6f5   :  { %v6388_v38 = vpop.permute.xlu2 %1333 }
 0x6f6   :  { %v6390_v22 = vpop.permute.xlu1 %1329 }
 0x6f7   :  { %10191 = vst [vmem:[#allocation134_spill] sm:$0xff] %v6390_v22  ;;  %v6406_v22 = vpop.permute.xlu0 %1337 }
 0x6f8   :  { %1427 = vrot.lane.b32.xlu0 %v5555_v57, %s4333_s10  ;;  %10194 = vst [vmem:[#allocation152_spill] sm:$0xff] %v6406_v22  ;;  %v6424_v22 = vld [vmem:[#allocation1] sm:$0xff] }
 0x6fa   :  { %1411 = vrot.lane.b32.xlu2 %v5555_v57, %s10188_s6 }
 0x6fc   :  { %1419 = vrot.lane.b32.xlu1 %v5578_v27, %s10188_s6 }
 0x6fd   :  { %v6398_v40 = vpop.permute.xlu2 %1339 }
 0x6fe   :  { %10192 = vst [vmem:[#allocation139_spill] sm:$0xff] %v6398_v40  ;;  %v6400_v49 = vpop.permute.xlu1 %1335 }
 0x6ff   :  { %10193 = vst [vmem:[#allocation146_spill] sm:$0xff] %v6400_v49  ;;  %v6418_v40 = vpop.permute.xlu0 %1343 }
 0x700   :  { %1433 = vrot.lane.b32.xlu0 %v5562_v30, %s4333_s10  ;;  %10197 = vst [vmem:[#allocation159_spill] sm:$0xff] %v6418_v40 }
 0x702   :  { %1417 = vrot.lane.b32.xlu2 %v5562_v30, %s10188_s6 }
 0x704   :  { %1425 = vrot.lane.b32.xlu1 %v5586_v32, %s10188_s6 }
 0x705   :  { %v6410_v37 = vpop.permute.xlu2 %1345 }
 0x706   :  { %10195 = vst [vmem:[#allocation156_spill] sm:$0xff] %v6410_v37  ;;  %v6412_v31 = vpop.permute.xlu1 %1341 }
 0x707   :  { %10196 = vst [vmem:[#allocation158_spill] sm:$0xff] %v6412_v31  ;;  %v6430_v37 = vpop.permute.xlu0 %1349 }
 0x708   :  { %1439 = vrot.lane.b32.xlu0 %v5596_v20, %s4333_s10 }
 0x70a   :  { %1423 = vrot.lane.b32.xlu2 %v5596_v20, %s10188_s6 }
 0x70c   :  { %1431 = vrot.lane.b32.xlu1 %v5582_v21, %s4333_s10 }
 0x70d   :  { %v6422_v42 = vpop.permute.xlu2 %1351 }
 0x70e   :  { %10198 = vst [vmem:[#allocation160_spill] sm:$0xff] %v6422_v42  ;;  %v1348_v28 = vpop.permute.xlu1 %1347 }
 0x70f   :  { %1509 = vst [vmem:[#allocation1] ss:$9 sm:$0xff] %v1348_v28  ;;  %v6442_v28 = vpop.permute.xlu0 %1355 }
 0x710   :  { %1445 = vrot.lane.b32.xlu0 %v5572_v7, %s4334_s9  ;;  %10201 = vst [vmem:[#allocation163_spill] sm:$0xff] %v6442_v28 }
 0x712   :  { %1429 = vrot.lane.b32.xlu2 %v5572_v7, %s4333_s10 }
 0x714   :  { %1437 = vrot.lane.b32.xlu1 %v5568_v62, %s4333_s10 }
 0x715   :  { %v6434_v40 = vpop.permute.xlu2 %1357 }
 0x716   :  { %10199 = vst [vmem:[#allocation161_spill] sm:$0xff] %v6434_v40  ;;  %v6436_v31 = vpop.permute.xlu1 %1353 }
 0x717   :  { %10200 = vst [vmem:[#allocation162_spill] sm:$0xff] %v6436_v31  ;;  %v6452_v40 = vpop.permute.xlu0 %1361 }
 0x718   :  { %1451 = vrot.lane.b32.xlu0 %v5578_v27, %s4334_s9  ;;  %10203 = vst [vmem:[#allocation165_spill] sm:$0xff] %v6452_v40 }
 0x71a   :  { %1435 = vrot.lane.b32.xlu2 %v5578_v27, %s4333_s10 }
 0x71c   :  { %1443 = vrot.lane.b32.xlu1 %v5555_v57, %s4334_s9 }
 0x71d   :  { %v1364_v55 = vpop.permute.xlu2 %1363 }
 0x71e   :  { %1510 = vst [vmem:[#allocation1 + $0x1] ss:$9 sm:$0xff] %v1364_v55  ;;  %v6446_v34 = vpop.permute.xlu1 %1359 }
 0x71f   :  { %10202 = vst [vmem:[#allocation164_spill] sm:$0xff] %v6446_v34  ;;  %v6464_v55 = vpop.permute.xlu0 %1367 }
 0x720   :  { %1457 = vrot.lane.b32.xlu0 %v5586_v32, %s4334_s9  ;;  %10205 = vst [vmem:[#allocation167_spill] sm:$0xff] %v6464_v55 }
 0x722   :  { %1441 = vrot.lane.b32.xlu2 %v5586_v32, %s4333_s10 }
 0x724   :  { %1449 = vrot.lane.b32.xlu1 %v5562_v30, %s4334_s9 }
 0x725   :  { %v6456_v31 = vpop.permute.xlu2 %1369 }
 0x726   :  { %10204 = vst [vmem:[#allocation166_spill] sm:$0xff] %v6456_v31  ;;  %v6458_v28 = vpop.permute.xlu1 %1365 }
 0x727   :  { %v6476_v30 = vpop.permute.xlu0 %1373 }
 0x728   :  { %1463 = vrot.lane.b32.xlu0 %v5582_v21, %s4305_s12  ;;  %10208 = vst [vmem:[#allocation170_spill] sm:$0xff] %v6476_v30  ;;  %v6492_v30 = vld [vmem:[#allocation2 + $0xd] sm:$0x1] }
 0x729   :  { %10212 = vst [vmem:[#allocation174_spill] sm:$0xff] %v6492_v30 }
 0x72a   :  { %1447 = vrot.lane.b32.xlu2 %v5582_v21, %s4334_s9 }
 0x72c   :  { %1455 = vrot.lane.b32.xlu1 %v5596_v20, %s4334_s9 }
 0x72d   :  { %v6468_v34 = vpop.permute.xlu2 %1375 }
 0x72e   :  { %10206 = vst [vmem:[#allocation168_spill] sm:$0xff] %v6468_v34  ;;  %v6470_v40 = vpop.permute.xlu1 %1371 }
 0x72f   :  { %10207 = vst [vmem:[#allocation169_spill] sm:$0xff] %v6470_v40  ;;  %v1380_v34 = vpop.permute.xlu0 %1379 }
 0x730   :  { %1469 = vrot.lane.b32.xlu0 %v5568_v62, %s4305_s12  ;;  %1511 = vst [vmem:[#allocation1 + $0x2] ss:$9 sm:$0xff] %v1380_v34 }
 0x732   :  { %1453 = vrot.lane.b32.xlu2 %v5568_v62, %s4334_s9 }
 0x734   :  { %1461 = vrot.lane.b32.xlu1 %v5572_v7, %s4305_s12 }
 0x735   :  { %v6480_v31 = vpop.permute.xlu2 %1381 }
 0x736   :  { %v6482_v55 = vpop.permute.xlu1 %1377 }
 0x737   :  { %10209 = vst [vmem:[#allocation171_spill] sm:$0xff] %v6482_v55  ;;  %v6496_v42 = vpop.permute.xlu0 %1385 }
 0x738   :  { %10213 = vst [vmem:[#allocation175_spill] sm:$0xff] %v6496_v42 }
 0x73a   :  { %1459 = vrot.lane.b32.xlu2 %v5555_v57, %s4305_s12 }
 0x73c   :  { %1467 = vrot.lane.b32.xlu1 %v5578_v27, %s4305_s12 }
 0x73d   :  { %v6488_v40 = vpop.permute.xlu2 %1387 }
 0x73e   :  { %10210 = vst [vmem:[#allocation172_spill] sm:$0xff] %v6488_v40  ;;  %v6490_v62 = vpop.permute.xlu1 %1383 }
 0x73f   :  { %10211 = vst [vmem:[#allocation173_spill] sm:$0xff] %v6490_v62  ;;  %v6506_v55 = vpop.permute.xlu0 %1391 }
 0x740   :  { %10216 = vst [vmem:[#allocation178_spill] sm:$0xff] %v6506_v55 }
 0x742   :  { %1465 = vrot.lane.b32.xlu2 %v6492_v30, %s4305_s12 }
 0x744   :  { %1473 = vrot.lane.b32.xlu1 %v5586_v32, %s4305_s12 }
 0x745   :  { %v6500_v57 = vpop.permute.xlu2 %1393 }
 0x746   :  { %10214 = vst [vmem:[#allocation176_spill] sm:$0xff] %v6500_v57  ;;  %v6502_v34 = vpop.permute.xlu1 %1389  ;;  %v1802_v57 = vsel %vm866_vm0, %v5920_v43, -inf  ;;  %v1808_v43 = vsel %vm866_vm0, %v6424_v22, -inf }
 0x747   :  { %10215 = vst [vmem:[#allocation177_spill] sm:$0xff] %v6502_v34  ;;  %v6510_v62 = vpop.permute.xlu0 %1397 }
 0x74a   :  { %1471 = vrot.lane.b32.xlu2 %v5596_v20, %s4305_s12 }
 0x74d   :  { %v6508_v40 = vpop.permute.xlu2 %1399 }
 0x74e   :  { %10217 = vst [vmem:[#allocation179_spill] sm:$0xff] %v6508_v40  ;;  %v1396_v27 = vpop.permute.xlu1 %1395 }
 0x74f   :  { %1512 = vst [vmem:[#allocation1 + $0x3] ss:$9 sm:$0xff] %v1396_v27  ;;  %v6518_v32 = vpop.permute.xlu0 %1403 }
 0x750   :  { %10220 = vst [vmem:[#allocation182_spill] sm:$0xff] %v6518_v32 }
 0x755   :  { %v6512_v30 = vpop.permute.xlu2 %1405 }
 0x756   :  { %10218 = vst [vmem:[#allocation180_spill] sm:$0xff] %v6512_v30  ;;  %v6514_v42 = vpop.permute.xlu1 %1401 }
 0x757   :  { %10219 = vst [vmem:[#allocation181_spill] sm:$0xff] %v6514_v42  ;;  %v6522_v55 = vpop.permute.xlu0 %1409 }
 0x758   :  { %10222 = vst [vmem:[#allocation184_spill] sm:$0xff] %v6522_v55 }
 0x75a   :  { %1803 = vmax.xlane.f32.xlu0 %v1802_v57 }
 0x75d   :  { %v1412_v34 = vpop.permute.xlu2 %1411 }
 0x75e   :  { %1513 = vst [vmem:[#allocation1 + $0x4] ss:$9 sm:$0xff] %v1412_v34  ;;  %v6520_v20 = vpop.permute.xlu1 %1407  ;;  %v1805_v34 = vsel %vm866_vm0, %v6174_v6, -inf }
 0x75f   :  { %10221 = vst [vmem:[#allocation183_spill] sm:$0xff] %v6520_v20  ;;  %v6528_v49 = vpop.permute.xlu0 %1415 }
 0x760   :  { %10224 = vst [vmem:[#allocation186_spill] sm:$0xff] %v6528_v49 }
 0x765   :  { %v6524_v40 = vpop.permute.xlu2 %1417 }
 0x766   :  { %10223 = vst [vmem:[#allocation185_spill] sm:$0xff] %v6524_v40  ;;  %v6526_v27 = vpop.permute.xlu1 %1413 }
 0x767   :  { %v6538_v20 = vpop.permute.xlu0 %1421 }
 0x768   :  { %10227 = vst [vmem:[#allocation189_spill] sm:$0xff] %v6538_v20 }
 0x76d   :  { %v6530_v30 = vpop.permute.xlu2 %1423 }
 0x76e   :  { %10225 = vst [vmem:[#allocation187_spill] sm:$0xff] %v6530_v30  ;;  %1809 = vmax.xlane.f32.xlu1 %v1808_v43  ;;  %v6534_v57 = vpop.permute.xlu1 %1419 }
 0x76f   :  { %10226 = vst [vmem:[#allocation188_spill] sm:$0xff] %v6534_v57  ;;  %v1428_v40 = vpop.permute.xlu0 %1427 }
 0x770   :  { %1514 = vst [vmem:[#allocation1 + $0x5] ss:$9 sm:$0xff] %v1428_v40 }
 0x773   :  { %1806 = vmax.xlane.f32.xlu2 %v1805_v34 }
 0x775   :  { %v1430_v55 = vpop.permute.xlu2 %1429 }
 0x776   :  { %v6540_v32 = vpop.permute.xlu1 %1425 }
 0x77d   :  { %v6542_v42 = vpop.permute.xlu2 %1435 }
 0x77e   :  { %v6544_v30 = vpop.permute.xlu1 %1431 }
 0x785   :  { %v6546_v49 = vpop.permute.xlu2 %1441 }
 0x786   :  { %v6548_v22 = vpop.permute.xlu1 %1437 }
 0x78d   :  { %v6550_v43 = vpop.permute.xlu2 %1447 }
 0x78e   :  { %v1444_v57 = vpop.permute.xlu1 %1443 }
 0x78f   :  { %1515 = vst [vmem:[#allocation1 + $0x6] ss:$9 sm:$0xff] %v1444_v57 }
 0x795   :  { %v6552_v6 = vpop.permute.xlu2 %1453 }
 0x79d   :  { %v1460_v34 = vpop.permute.xlu2 %1459 }
 0x79e   :  { %1516 = vst [vmem:[#allocation1 + $0x7] ss:$9 sm:$0xff] %v1460_v34  ;;  %v10259_v34 = vld [vmem:[#allocation166_spill] sm:$0xff] }
 0x7a5   :  { %v1517_v20 = vld [vmem:[#allocation1] sm:$0xff] }
 0x7a6   :  { %1518 = vst [vmem:[#allocation1] ss:$9 sm:$0xff] %v5572_v7  ;;  %v1811_v40 = vsel %vm866_vm0, %v1517_v20, -inf  ;;  %v6572_v20 = vpop.permute.xlu0 %1433 }
 0x7a7   :  { %1519 = vst [vmem:[#allocation1 + $0x1] ss:$9 sm:$0xff] %v5736_v46  ;;  %1812 = vmax.xlane.f32.xlu0 %v1811_v40  ;;  %v10260_v40 = vld [vmem:[#allocation175_spill] sm:$0xff] }
 0x7a8   :  { %1520 = vst [vmem:[#allocation1 + $0x2] ss:$9 sm:$0xff] %v5756_v56 }
 0x7a9   :  { %1521 = vst [vmem:[#allocation1 + $0x3] ss:$9 sm:$0xff] %v5776_v63  ;;  %v10239_v63 = vld [vmem:[#allocation110_spill] sm:$0xff] }
 0x7aa   :  { %1522 = vst [vmem:[#allocation1 + $0x4] ss:$9 sm:$0xff] %v5826_v24  ;;  %v10230_v24 = vld [vmem:[#allocation167_spill] sm:$0xff] }
 0x7ab   :  { %1523 = vst [vmem:[#allocation1 + $0x5] ss:$9 sm:$0xff] %v5846_v1 }
 0x7ac   :  { %1524 = vst [vmem:[#allocation1 + $0x6] ss:$9 sm:$0xff] %v5866_v35 }
 0x7ad   :  { %1525 = vst [vmem:[#allocation1 + $0x7] ss:$9 sm:$0xff] %v5916_v0  ;;  %v6574_v0 = vpop.permute.xlu1 %1449 }
 0x7b4   :  { %v1526_v57 = vld [vmem:[#allocation1] sm:$0xff] }
 0x7b5   :  { %1527 = vst [vmem:[#allocation1] ss:$9 sm:$0xff] %v5938_v36  ;;  %v1814_v7 = vsel %vm866_vm0, %v1526_v57, -inf  ;;  %v6587_v35 = vpop.permute.xlu1 %1455  ;;  %v10261_v57 = vld [vmem:[#allocation181_spill] sm:$0xff] }
 0x7b6   :  { %1528 = vst [vmem:[#allocation1 + $0x1] ss:$9 sm:$0xff] %v5958_v9  ;;  %1815 = vmax.xlane.f32.xlu2 %v1814_v7  ;;  %v10262_v7 = vld [vmem:[#allocation185_spill] sm:$0xff] }
 0x7b7   :  { %1529 = vst [vmem:[#allocation1 + $0x2] ss:$9 sm:$0xff] %v6008_v4 }
 0x7b8   :  { %1530 = vst [vmem:[#allocation1 + $0x3] ss:$9 sm:$0xff] %v6028_v2  ;;  %v10236_v2 = vld [vmem:[#allocation35_spill] sm:$0xff] }
 0x7b9   :  { %1531 = vst [vmem:[#allocation1 + $0x4] ss:$9 sm:$0xff] %v6048_v29  ;;  %v10248_v29 = vld [vmem:[#allocation46_spill] sm:$0xff] }
 0x7ba   :  { %1532 = vst [vmem:[#allocation1 + $0x5] ss:$9 sm:$0xff] %v6098_v33  ;;  %v10241_v33 = vld [vmem:[#allocation26_spill] sm:$0xff] }
 0x7bb   :  { %1533 = vst [vmem:[#allocation1 + $0x6] ss:$9 sm:$0xff] %v6118_v16  ;;  %v6582_v16 = vpop.permute.xlu0 %1439 }
 0x7bc   :  { %1534 = vst [vmem:[#allocation1 + $0x7] ss:$9 sm:$0xff] %v6138_v50 }
 0x7c3   :  { %v1535_v36 = vld [vmem:[#allocation1] sm:$0xff]  ;;  %v1446_v4 = vpop.permute.xlu0 %1445 }
 0x7c4   :  { %1536 = vst [vmem:[#allocation1] ss:$9 sm:$0xff] %v6190_v17  ;;  %v1817_v9 = vsel %vm866_vm0, %v1535_v36, -inf  ;;  %v1466_v36 = vpop.permute.xlu2 %1465 }
 0x7c5   :  { %1537 = vst [vmem:[#allocation1 + $0x1] ss:$9 sm:$0xff] %v6210_v59  ;;  %1818 = vmax.xlane.f32.xlu1 %v1817_v9  ;;  %v10237_v59 = vld [vmem:[#allocation80_spill] sm:$0xff] }
 0x7c6   :  { %1538 = vst [vmem:[#allocation1 + $0x2] ss:$9 sm:$0xff] %v6230_v44  ;;  %v10251_v44 = vld [vmem:[#allocation127_spill] sm:$0xff] }
 0x7c7   :  { %1539 = vst [vmem:[#allocation1 + $0x3] ss:$9 sm:$0xff] %v6280_v41  ;;  %v10243_v41 = vld [vmem:[#allocation85_spill] sm:$0xff] }
 0x7c8   :  { %1540 = vst [vmem:[#allocation1 + $0x4] ss:$9 sm:$0xff] %v6300_v48  ;;  %v1462_v48 = vpop.permute.xlu1 %1461 }
 0x7c9   :  { %1541 = vst [vmem:[#allocation1 + $0x5] ss:$9 sm:$0xff] %v6320_v23  ;;  %v10253_v23 = vld [vmem:[#allocation37_spill] sm:$0xff] }
 0x7ca   :  { %1542 = vst [vmem:[#allocation1 + $0x6] ss:$9 sm:$0xff] %v6370_v39 }
 0x7cb   :  { %1543 = vst [vmem:[#allocation1 + $0x7] ss:$9 sm:$0xff] %v6388_v38 }
 0x7d2   :  { %v1544_v17 = vld [vmem:[#allocation1] sm:$0xff] }
 0x7d3   :  { %1551 = vst [vmem:[#allocation1 + $0x6] ss:$9 sm:$0xff] %v1446_v4  ;;  %v1820_v1 = vsel %vm866_vm0, %v1544_v17, -inf  ;;  %v10263_v4 = vld [vmem:[#allocation130_spill] sm:$0xff] }
 0x7d4   :  { %1545 = vst [vmem:[#allocation1] ss:$9 sm:$0xff] %v6430_v37  ;;  %1821 = vmax.xlane.f32.xlu0 %v1820_v1  ;;  %v10264_v17 = vld [vmem:[#allocation38_spill] sm:$0xff] }
 0x7d5   :  { %1546 = vst [vmem:[#allocation1 + $0x1] ss:$9 sm:$0xff] %v6458_v28  ;;  %v10255_v28 = vld [vmem:[#allocation96_spill] sm:$0xff]  ;;  %v10265_v1 = vld [vmem:[#allocation50_spill] sm:$0xff] }
 0x7d6   :  { %1547 = vst [vmem:[#allocation1 + $0x2] ss:$9 sm:$0xff] %v6480_v31  ;;  %v10231_v31 = vld [vmem:[#allocation173_spill] sm:$0xff] }
 0x7d7   :  { %1548 = vst [vmem:[#allocation1 + $0x3] ss:$9 sm:$0xff] %v6510_v62 }
 0x7d8   :  { %1549 = vst [vmem:[#allocation1 + $0x4] ss:$9 sm:$0xff] %v6526_v27 }
 0x7d9   :  { %1550 = vst [vmem:[#allocation1 + $0x5] ss:$9 sm:$0xff] %v1430_v55  ;;  %v10256_v55 = vld [vmem:[#allocation111_spill] sm:$0xff] }
 0x7da   :  { %1552 = vst [vmem:[#allocation1 + $0x7] ss:$9 sm:$0xff] %v1462_v48  ;;  %v10266_v48 = vld [vmem:[#allocation65_spill] sm:$0xff] }
 0x7e1   :  { %v1553_v39 = vld [vmem:[#allocation1] sm:$0xff] }
 0x7e2   :  { %1554 = vst [vmem:[#allocation1] ss:$9 sm:$0xff] %v5582_v21  ;;  %v1823_v38 = vsel %vm866_vm0, %v1553_v39, -inf  ;;  %v10267_v39 = vld [vmem:[#allocation113_spill] sm:$0xff] }
 0x7e3   :  { %1555 = vst [vmem:[#allocation1 + $0x1] ss:$9 sm:$0xff] %v5734_v45  ;;  %1824 = vmax.xlane.f32.xlu2 %v1823_v38  ;;  %v10233_v45 = vld [vmem:[#allocation186_spill] sm:$0xff]  ;;  %v10268_v38 = vld [vmem:[#allocation131_spill] sm:$0xff] }
 0x7e4   :  { %1556 = vst [vmem:[#allocation1 + $0x2] ss:$9 sm:$0xff] %v5770_v10  ;;  %v10238_v10 = vld [vmem:[#allocation95_spill] sm:$0xff] }
 0x7e5   :  { %1557 = vst [vmem:[#allocation1 + $0x3] ss:$9 sm:$0xff] %v5792_v11  ;;  %v10242_v11 = vld [vmem:[#allocation41_spill] sm:$0xff] }
 0x7e6   :  { %1558 = vst [vmem:[#allocation1 + $0x4] ss:$9 sm:$0xff] %v5810_v54  ;;  %v10244_v54 = vld [vmem:[#allocation100_spill] sm:$0xff] }
 0x7e7   :  { %1559 = vst [vmem:[#allocation1 + $0x5] ss:$9 sm:$0xff] %v5860_v25 }
 0x7e8   :  { %1560 = vst [vmem:[#allocation1 + $0x6] ss:$9 sm:$0xff] %v5882_v15  ;;  %v10229_v15 = vld [vmem:[#allocation160_spill] sm:$0xff] }
 0x7e9   :  { %1561 = vst [vmem:[#allocation1 + $0x7] ss:$9 sm:$0xff] %v5900_v5  ;;  %v10246_v5 = vld [vmem:[#allocation17_spill] sm:$0xff] }
 0x7f0   :  { %v1562_v62 = vld [vmem:[#allocation1] sm:$0xff] }
 0x7f1   :  { %1563 = vst [vmem:[#allocation1] ss:$9 sm:$0xff] %v5952_v19  ;;  %v1826_v21 = vsel %vm866_vm0, %v1562_v62, -inf  ;;  %v6614_v19 = vpop.permute.xlu0 %1451  ;;  %v10269_v62 = vld [vmem:[#allocation149_spill] sm:$0xff] }
 0x7f2   :  { %1564 = vst [vmem:[#allocation1 + $0x1] ss:$9 sm:$0xff] %v5974_v18  ;;  %1827 = vmax.xlane.f32.xlu1 %v1826_v21  ;;  %v10245_v18 = vld [vmem:[#allocation115_spill] sm:$0xff]  ;;  %v10271_v21 = vld [vmem:[#allocation56_spill] sm:$0xff] }
 0x7f3   :  { %1565 = vst [vmem:[#allocation1 + $0x2] ss:$9 sm:$0xff] %v5992_v61  ;;  %v10247_v61 = vld [vmem:[#allocation31_spill] sm:$0xff] }
 0x7f4   :  { %1566 = vst [vmem:[#allocation1 + $0x3] ss:$9 sm:$0xff] %v6042_v13 }
 0x7f5   :  { %1567 = vst [vmem:[#allocation1 + $0x4] ss:$9 sm:$0xff] %v6064_v53  ;;  %v10228_v53 = vld [vmem:[#allocation146_spill] sm:$0xff] }
 0x7f6   :  { %1568 = vst [vmem:[#allocation1 + $0x5] ss:$9 sm:$0xff] %v6082_v8  ;;  %v10249_v8 = vld [vmem:[#allocation90_spill] sm:$0xff] }
 0x7f7   :  { %1569 = vst [vmem:[#allocation1 + $0x6] ss:$9 sm:$0xff] %v6132_v51  ;;  %v10234_v51 = vld [vmem:[#allocation174_spill] sm:$0xff] }
 0x7f8   :  { %1570 = vst [vmem:[#allocation1 + $0x7] ss:$9 sm:$0xff] %v6154_v12 }
 0x7f9   :  { %v6623_v13 = vpop.permute.xlu0 %1457 }
 0x7ff   :  { %v1571_v25 = vld [vmem:[#allocation1] sm:$0xff] }
 0x800   :  { %1572 = vst [vmem:[#allocation1] ss:$9 sm:$0xff] %v6172_v47  ;;  %v1829_v56 = vsel %vm866_vm0, %v1571_v25, -inf  ;;  %v10250_v47 = vld [vmem:[#allocation105_spill] sm:$0xff]  ;;  %v10272_v25 = vld [vmem:[#allocation71_spill] sm:$0xff] }
 0x801   :  { %1573 = vst [vmem:[#allocation1 + $0x1] ss:$9 sm:$0xff] %v6224_v52  ;;  %v10235_v52 = vld [vmem:[#allocation8_spill] sm:$0xff]  ;;  %1830 = vmax.xlane.f32.xlu0 %v1829_v56  ;;  %v10281_v56 = vld [vmem:[#allocation11_spill] sm:$0xff] }
 0x802   :  { %1574 = vst [vmem:[#allocation1 + $0x2] ss:$9 sm:$0xff] %v6246_v14  ;;  %v10232_v14 = vld [vmem:[#allocation179_spill] sm:$0xff] }
 0x803   :  { %1575 = vst [vmem:[#allocation1 + $0x3] ss:$9 sm:$0xff] %v6264_v60  ;;  %v10252_v60 = vld [vmem:[#allocation22_spill] sm:$0xff] }
 0x804   :  { %1576 = vst [vmem:[#allocation1 + $0x4] ss:$9 sm:$0xff] %v6314_v26  ;;  %v10240_v26 = vld [vmem:[#allocation14_spill] sm:$0xff] }
 0x805   :  { %1577 = vst [vmem:[#allocation1 + $0x5] ss:$9 sm:$0xff] %v6336_v3  ;;  %v1464_v3 = vpop.permute.xlu0 %1463 }
 0x806   :  { %1578 = vst [vmem:[#allocation1 + $0x6] ss:$9 sm:$0xff] %v6354_v58  ;;  %v10254_v58 = vld [vmem:[#allocation52_spill] sm:$0xff] }
 0x807   :  { %1579 = vst [vmem:[#allocation1 + $0x7] ss:$9 sm:$0xff] %v10228_v53  ;;  %v10273_v53 = vld [vmem:[#allocation118_spill] sm:$0xff] }
 0x80e   :  { %v6625_v12 = vld [vmem:[#allocation1] sm:$0xff] }
 0x80f   :  { %1581 = vst [vmem:[#allocation1] ss:$9 sm:$0xff] %v10229_v15  ;;  %v10274_v15 = vld [vmem:[#allocation138_spill] sm:$0xff] }
 0x810   :  { %1582 = vst [vmem:[#allocation1 + $0x1] ss:$9 sm:$0xff] %v10230_v24  ;;  %v10275_v24 = vld [vmem:[#allocation155_spill] sm:$0xff] }
 0x811   :  { %1583 = vst [vmem:[#allocation1 + $0x2] ss:$9 sm:$0xff] %v10231_v31  ;;  %v10276_v31 = vld [vmem:[#allocation49_spill] sm:$0xff] }
 0x812   :  { %1584 = vst [vmem:[#allocation1 + $0x3] ss:$9 sm:$0xff] %v10232_v14  ;;  %v10277_v14 = vld [vmem:[#allocation61_spill] sm:$0xff] }
 0x813   :  { %1585 = vst [vmem:[#allocation1 + $0x4] ss:$9 sm:$0xff] %v10233_v45  ;;  %v10278_v45 = vld [vmem:[#allocation76_spill] sm:$0xff] }
 0x814   :  { %1586 = vst [vmem:[#allocation1 + $0x5] ss:$9 sm:$0xff] %v6544_v30  ;;  %v10257_v30 = vld [vmem:[#allocation152_spill] sm:$0xff] }
 0x815   :  { %1587 = vst [vmem:[#allocation1 + $0x6] ss:$9 sm:$0xff] %v6550_v43  ;;  %v10258_v43 = vld [vmem:[#allocation162_spill] sm:$0xff] }
 0x816   :  { %1588 = vst [vmem:[#allocation1 + $0x7] ss:$9 sm:$0xff] %v1464_v3 }
 0x81d   :  { %v6634_v46 = vld [vmem:[#allocation1] sm:$0xff] }
 0x81e   :  { %1590 = vst [vmem:[#allocation1] ss:$9 sm:$0xff] %v10234_v51  ;;  %v10279_v51 = vld [vmem:[#allocation122_spill] sm:$0xff] }
 0x81f   :  { %1591 = vst [vmem:[#allocation1 + $0x1] ss:$9 sm:$0xff] %v10235_v52  ;;  %v10280_v52 = vld [vmem:[#allocation145_spill] sm:$0xff] }
 0x820   :  { %1592 = vst [vmem:[#allocation1 + $0x2] ss:$9 sm:$0xff] %v10236_v2  ;;  %v10282_v2 = vld [vmem:[#allocation54_spill] sm:$0xff] }
 0x821   :  { %1593 = vst [vmem:[#allocation1 + $0x3] ss:$9 sm:$0xff] %v10237_v59  ;;  %v1832_v59 = vsel %vm866_vm0, %v6625_v12, -inf  ;;  %v1835_v12 = vsel %vm866_vm0, %v6634_v46, -inf  ;;  %v10295_v46 = vld [vmem:[#allocation83_spill] sm:$0xff] }
 0x822   :  { %1594 = vst [vmem:[#allocation1 + $0x4] ss:$9 sm:$0xff] %v10238_v10  ;;  %v10283_v10 = vld [vmem:[#allocation67_spill] sm:$0xff]  ;;  %1833 = vmax.xlane.f32.xlu2 %v1832_v59  ;;  %1836 = vmax.xlane.f32.xlu1 %v1835_v12 }
 0x823   :  { %1595 = vst [vmem:[#allocation1 + $0x5] ss:$9 sm:$0xff] %v10239_v63  ;;  %v10284_v63 = vld [vmem:[#allocation82_spill] sm:$0xff] }
 0x824   :  { %1596 = vst [vmem:[#allocation1 + $0x6] ss:$9 sm:$0xff] %v10240_v26  ;;  %v10285_v26 = vld [vmem:[#allocation128_spill] sm:$0xff] }
 0x825   :  { %1597 = vst [vmem:[#allocation1 + $0x7] ss:$9 sm:$0xff] %v10241_v33  ;;  %v10286_v33 = vld [vmem:[#allocation139_spill] sm:$0xff] }
 0x82c   :  { %v6645_v37 = vld [vmem:[#allocation1] sm:$0xff] }
 0x82d   :  { %1599 = vst [vmem:[#allocation1] ss:$9 sm:$0xff] %v10242_v11 }
 0x82e   :  { %1600 = vst [vmem:[#allocation1 + $0x1] ss:$9 sm:$0xff] %v10243_v41  ;;  %v10287_v41 = vld [vmem:[#allocation163_spill] sm:$0xff] }
 0x82f   :  { %1601 = vst [vmem:[#allocation1 + $0x2] ss:$9 sm:$0xff] %v10244_v54  ;;  %v10288_v54 = vld [vmem:[#allocation169_spill] sm:$0xff] }
 0x830   :  { %1602 = vst [vmem:[#allocation1 + $0x3] ss:$9 sm:$0xff] %v10245_v18  ;;  %v10289_v18 = vld [vmem:[#allocation172_spill] sm:$0xff] }
 0x831   :  { %1603 = vst [vmem:[#allocation1 + $0x4] ss:$9 sm:$0xff] %v10246_v5  ;;  %v10290_v5 = vld [vmem:[#allocation182_spill] sm:$0xff] }
 0x832   :  { %1604 = vst [vmem:[#allocation1 + $0x5] ss:$9 sm:$0xff] %v10247_v61  ;;  %v10291_v61 = vld [vmem:[#allocation188_spill] sm:$0xff] }
 0x833   :  { %1605 = vst [vmem:[#allocation1 + $0x6] ss:$9 sm:$0xff] %v10248_v29  ;;  %v1468_v29 = vpop.permute.xlu1 %1467 }
 0x834   :  { %1606 = vst [vmem:[#allocation1 + $0x7] ss:$9 sm:$0xff] %v10249_v8  ;;  %v1838_v8 = vsel %vm866_vm0, %v6645_v37, -inf  ;;  %v10299_v37 = vld [vmem:[#allocation28_spill] sm:$0xff] }
 0x835   :  { %1839 = vmax.xlane.f32.xlu0 %v1838_v8  ;;  %v10333_v8 = vld [vmem:[#allocation27_spill] sm:$0xff] }
 0x83b   :  { %v6655_v50 = vld [vmem:[#allocation1] sm:$0xff] }
 0x83c   :  { %1608 = vst [vmem:[#allocation1] ss:$9 sm:$0xff] %v10250_v47 }
 0x83d   :  { %1609 = vst [vmem:[#allocation1 + $0x1] ss:$9 sm:$0xff] %v10251_v44  ;;  %v10292_v44 = vld [vmem:[#allocation123_spill] sm:$0xff] }
 0x83e   :  { %1610 = vst [vmem:[#allocation1 + $0x2] ss:$9 sm:$0xff] %v10252_v60  ;;  %v10293_v60 = vld [vmem:[#allocation20_spill] sm:$0xff] }
 0x83f   :  { %1611 = vst [vmem:[#allocation1 + $0x3] ss:$9 sm:$0xff] %v10253_v23  ;;  %v10294_v23 = vld [vmem:[#allocation68_spill] sm:$0xff] }
 0x840   :  { %1612 = vst [vmem:[#allocation1 + $0x4] ss:$9 sm:$0xff] %v10254_v58  ;;  %v10296_v58 = vld [vmem:[#allocation98_spill] sm:$0xff] }
 0x841   :  { %1613 = vst [vmem:[#allocation1 + $0x5] ss:$9 sm:$0xff] %v10255_v28  ;;  %v10298_v28 = vld [vmem:[#allocation9_spill] sm:$0xff] }
 0x842   :  { %1614 = vst [vmem:[#allocation1 + $0x6] ss:$9 sm:$0xff] %v10256_v55 }
 0x843   :  { %1615 = vst [vmem:[#allocation1 + $0x7] ss:$9 sm:$0xff] %v10257_v30 }
 0x84a   :  { %v6665_v27 = vld [vmem:[#allocation1] sm:$0xff] }
 0x84b   :  { %1617 = vst [vmem:[#allocation1] ss:$9 sm:$0xff] %v10258_v43  ;;  %v1844_v55 = vsel %vm866_vm0, %v6665_v27, -inf  ;;  %v10300_v43 = vld [vmem:[#allocation73_spill] sm:$0xff]  ;;  %v10307_v27 = vld [vmem:[#allocation94_spill] sm:$0xff] }
 0x84c   :  { %1618 = vst [vmem:[#allocation1 + $0x1] ss:$9 sm:$0xff] %v10259_v34  ;;  %1845 = vmax.xlane.f32.xlu1 %v1844_v55  ;;  %v10301_v34 = vld [vmem:[#allocation88_spill] sm:$0xff]  ;;  %v10341_v55 = vld [vmem:[#allocation69_spill] sm:$0xff] }
 0x84d   :  { %1619 = vst [vmem:[#allocation1 + $0x2] ss:$9 sm:$0xff] %v10260_v40  ;;  %v10302_v40 = vld [vmem:[#allocation103_spill] sm:$0xff] }
 0x84e   :  { %1620 = vst [vmem:[#allocation1 + $0x3] ss:$9 sm:$0xff] %v10261_v57  ;;  %v10303_v57 = vld [vmem:[#allocation151_spill] sm:$0xff] }
 0x84f   :  { %1621 = vst [vmem:[#allocation1 + $0x4] ss:$9 sm:$0xff] %v10262_v7  ;;  %v10305_v7 = vld [vmem:[#allocation34_spill] sm:$0xff] }
 0x850   :  { %1622 = vst [vmem:[#allocation1 + $0x5] ss:$9 sm:$0xff] %v6572_v20  ;;  %v10270_v20 = vld [vmem:[#allocation43_spill] sm:$0xff] }
 0x851   :  { %1623 = vst [vmem:[#allocation1 + $0x6] ss:$9 sm:$0xff] %v6574_v0 }
 0x852   :  { %1624 = vst [vmem:[#allocation1 + $0x7] ss:$9 sm:$0xff] %v1466_v36 }
 0x859   :  { %v6674_v9 = vld [vmem:[#allocation1] sm:$0xff] }
 0x85a   :  { %1626 = vst [vmem:[#allocation1] ss:$9 sm:$0xff] %v10263_v4  ;;  %v1847_v36 = vsel %vm866_vm0, %v6674_v9, -inf  ;;  %v10306_v4 = vld [vmem:[#allocation79_spill] sm:$0xff] }
 0x85b   :  { %1627 = vst [vmem:[#allocation1 + $0x1] ss:$9 sm:$0xff] %v10264_v17  ;;  %1848 = vmax.xlane.f32.xlu0 %v1847_v36  ;;  %v10313_v9 = vld [vmem:[#allocation99_spill] sm:$0xff]  ;;  %v10347_v36 = vld [vmem:[#allocation178_spill] sm:$0xff] }
 0x85c   :  { %1628 = vst [vmem:[#allocation1 + $0x2] ss:$9 sm:$0xff] %v10265_v1 }
 0x85d   :  { %1629 = vst [vmem:[#allocation1 + $0x3] ss:$9 sm:$0xff] %v10266_v48  ;;  %v10308_v48 = vld [vmem:[#allocation109_spill] sm:$0xff] }
 0x85e   :  { %1630 = vst [vmem:[#allocation1 + $0x4] ss:$9 sm:$0xff] %v10267_v39  ;;  %v10309_v39 = vld [vmem:[#allocation157_spill] sm:$0xff] }
 0x85f   :  { %1631 = vst [vmem:[#allocation1 + $0x5] ss:$9 sm:$0xff] %v10268_v38  ;;  %v10310_v38 = vld [vmem:[#allocation24_spill] sm:$0xff] }
 0x860   :  { %1632 = vst [vmem:[#allocation1 + $0x6] ss:$9 sm:$0xff] %v10269_v62  ;;  %v10311_v62 = vld [vmem:[#allocation39_spill] sm:$0xff] }
 0x861   :  { %1633 = vst [vmem:[#allocation1 + $0x7] ss:$9 sm:$0xff] %v10270_v20  ;;  %v10312_v20 = vld [vmem:[#allocation84_spill] sm:$0xff] }
 0x868   :  { %v1634_v0 = vld [vmem:[#allocation1] sm:$0xff] }
 0x869   :  { %1635 = vst [vmem:[#allocation1] ss:$9 sm:$0xff] %v10271_v21  ;;  %v1850_v17 = vsel %vm866_vm0, %v1634_v0, -inf  ;;  %v10314_v21 = vld [vmem:[#allocation114_spill] sm:$0xff] }
 0x86a   :  { %1636 = vst [vmem:[#allocation1 + $0x1] ss:$9 sm:$0xff] %v10272_v25 }
 0x86b   :  { %1637 = vst [vmem:[#allocation1 + $0x2] ss:$9 sm:$0xff] %v10273_v53  ;;  %v10315_v53 = vld [vmem:[#allocation158_spill] sm:$0xff] }
 0x86c   :  { %1638 = vst [vmem:[#allocation1 + $0x3] ss:$9 sm:$0xff] %v10274_v15 }
 0x86d   :  { %1639 = vst [vmem:[#allocation1 + $0x4] ss:$9 sm:$0xff] %v10275_v24  ;;  %v10316_v24 = vld [vmem:[#allocation161_spill] sm:$0xff] }
 0x86e   :  { %1640 = vst [vmem:[#allocation1 + $0x5] ss:$9 sm:$0xff] %v10276_v31  ;;  %v10317_v31 = vld [vmem:[#allocation170_spill] sm:$0xff] }
 0x86f   :  { %1641 = vst [vmem:[#allocation1 + $0x6] ss:$9 sm:$0xff] %v10277_v14  ;;  %v10318_v14 = vld [vmem:[#allocation177_spill] sm:$0xff] }
 0x870   :  { %1642 = vst [vmem:[#allocation1 + $0x7] ss:$9 sm:$0xff] %v10278_v45  ;;  %v10319_v45 = vld [vmem:[#allocation180_spill] sm:$0xff] }
 0x877   :  { %v1643_v3 = vld [vmem:[#allocation1] sm:$0xff] }
 0x878   :  { %1644 = vst [vmem:[#allocation1] ss:$9 sm:$0xff] %v10279_v51  ;;  %v1853_v25 = vsel %vm866_vm0, %v1643_v3, -inf  ;;  %v10320_v51 = vld [vmem:[#allocation189_spill] sm:$0xff]  ;;  %v1470_v3 = vpop.permute.xlu0 %1469 }
 0x879   :  { %1645 = vst [vmem:[#allocation1 + $0x1] ss:$9 sm:$0xff] %v10280_v52  ;;  %1854 = vmax.xlane.f32.xlu1 %v1853_v25  ;;  %v10355_v25 = vld [vmem:[#allocation136_spill] sm:$0xff] }
 0x87a   :  { %1646 = vst [vmem:[#allocation1 + $0x2] ss:$9 sm:$0xff] %v10281_v56 }
 0x87b   :  { %1647 = vst [vmem:[#allocation1 + $0x3] ss:$9 sm:$0xff] %v10282_v2  ;;  %v10321_v2 = vld [vmem:[#allocation153_spill] sm:$0xff] }
 0x87c   :  { %1648 = vst [vmem:[#allocation1 + $0x4] ss:$9 sm:$0xff] %v10283_v10  ;;  %v10322_v10 = vld [vmem:[#allocation30_spill] sm:$0xff] }
 0x87d   :  { %1649 = vst [vmem:[#allocation1 + $0x5] ss:$9 sm:$0xff] %v10284_v63  ;;  %v10323_v63 = vld [vmem:[#allocation53_spill] sm:$0xff] }
 0x87e   :  { %1650 = vst [vmem:[#allocation1 + $0x6] ss:$9 sm:$0xff] %v10285_v26  ;;  %v10324_v26 = vld [vmem:[#allocation91_spill] sm:$0xff] }
 0x87f   :  { %1651 = vst [vmem:[#allocation1 + $0x7] ss:$9 sm:$0xff] %v10286_v33  ;;  %v10326_v33 = vld [vmem:[#allocation126_spill] sm:$0xff] }
 0x886   :  { %v1652_v11 = vld [vmem:[#allocation1] sm:$0xff] }
 0x887   :  { %1653 = vst [vmem:[#allocation1] ss:$9 sm:$0xff] %v10287_v41  ;;  %v1856_v15 = vsel %vm866_vm0, %v1652_v11, -inf  ;;  %v10328_v11 = vld [vmem:[#allocation36_spill] sm:$0xff] }
 0x888   :  { %1654 = vst [vmem:[#allocation1 + $0x1] ss:$9 sm:$0xff] %v10288_v54  ;;  %1857 = vmax.xlane.f32.xlu0 %v1856_v15 }
 0x889   :  { %1655 = vst [vmem:[#allocation1 + $0x2] ss:$9 sm:$0xff] %v10289_v18  ;;  %v10329_v18 = vld [vmem:[#allocation58_spill] sm:$0xff] }
 0x88a   :  { %1656 = vst [vmem:[#allocation1 + $0x3] ss:$9 sm:$0xff] %v10290_v5  ;;  %v10330_v5 = vld [vmem:[#allocation97_spill] sm:$0xff] }
 0x88b   :  { %1657 = vst [vmem:[#allocation1 + $0x4] ss:$9 sm:$0xff] %v10291_v61  ;;  %v10331_v61 = vld [vmem:[#allocation112_spill] sm:$0xff] }
 0x88c   :  { %1658 = vst [vmem:[#allocation1 + $0x5] ss:$9 sm:$0xff] %v6542_v42  ;;  %v1841_v42 = vsel %vm866_vm0, %v6655_v50, -inf  ;;  %v10304_v50 = vld [vmem:[#allocation19_spill] sm:$0xff] }
 0x88d   :  { %1659 = vst [vmem:[#allocation1 + $0x6] ss:$9 sm:$0xff] %v6614_v19  ;;  %v10297_v19 = vld [vmem:[#allocation144_spill] sm:$0xff]  ;;  %1842 = vmax.xlane.f32.xlu2 %v1841_v42 }
 0x88e   :  { %1660 = vst [vmem:[#allocation1 + $0x7] ss:$9 sm:$0xff] %v1468_v29  ;;  %v10332_v29 = vld [vmem:[#allocation133_spill] sm:$0xff]  ;;  %v10338_v42 = vld [vmem:[#allocation140_spill] sm:$0xff] }
 0x895   :  { %v1661_v47 = vld [vmem:[#allocation1] sm:$0xff]  ;;  %1851 = vmax.xlane.f32.xlu2 %v1850_v17  ;;  %v10349_v17 = vld [vmem:[#allocation187_spill] sm:$0xff] }
 0x896   :  { %1662 = vst [vmem:[#allocation1] ss:$9 sm:$0xff] %v10292_v44  ;;  %v1859_v52 = vsel %vm866_vm0, %v1661_v47, -inf  ;;  %v10334_v47 = vld [vmem:[#allocation42_spill] sm:$0xff]  ;;  %v10335_v44 = vld [vmem:[#allocation64_spill] sm:$0xff] }
 0x897   :  { %1663 = vst [vmem:[#allocation1 + $0x1] ss:$9 sm:$0xff] %v10293_v60  ;;  %v10336_v60 = vld [vmem:[#allocation102_spill] sm:$0xff] }
 0x898   :  { %1664 = vst [vmem:[#allocation1 + $0x2] ss:$9 sm:$0xff] %v10294_v23 }
 0x899   :  { %1665 = vst [vmem:[#allocation1 + $0x3] ss:$9 sm:$0xff] %v10295_v46 }
 0x89a   :  { %1666 = vst [vmem:[#allocation1 + $0x4] ss:$9 sm:$0xff] %v10296_v58  ;;  %v10337_v58 = vld [vmem:[#allocation117_spill] sm:$0xff] }
 0x89b   :  { %1667 = vst [vmem:[#allocation1 + $0x5] ss:$9 sm:$0xff] %v10297_v19  ;;  %v10339_v19 = vld [vmem:[#allocation33_spill] sm:$0xff] }
 0x89c   :  { %1668 = vst [vmem:[#allocation1 + $0x6] ss:$9 sm:$0xff] %v10298_v28 }
 0x89d   :  { %1669 = vst [vmem:[#allocation1 + $0x7] ss:$9 sm:$0xff] %v10299_v37  ;;  %1860 = vmax.xlane.f32.xlu2 %v1859_v52  ;;  %v10340_v37 = vld [vmem:[#allocation48_spill] sm:$0xff]  ;;  %v10365_v52 = vld [vmem:[#allocation87_spill] sm:$0xff] }
 0x8a4   :  { %v1670_v30 = vld [vmem:[#allocation1] sm:$0xff] }
 0x8a5   :  { %1671 = vst [vmem:[#allocation1] ss:$9 sm:$0xff] %v10300_v43  ;;  %v1862_v59 = vsel %vm866_vm0, %v1670_v30, -inf  ;;  %v10342_v30 = vld [vmem:[#allocation108_spill] sm:$0xff]  ;;  %v10343_v43 = vld [vmem:[#allocation121_spill] sm:$0xff] }
 0x8a6   :  { %1672 = vst [vmem:[#allocation1 + $0x1] ss:$9 sm:$0xff] %v10301_v34  ;;  %1863 = vmax.xlane.f32.xlu1 %v1862_v59  ;;  %v10344_v34 = vld [vmem:[#allocation159_spill] sm:$0xff] }
 0x8a7   :  { %1673 = vst [vmem:[#allocation1 + $0x2] ss:$9 sm:$0xff] %v10302_v40 }
 0x8a8   :  { %1674 = vst [vmem:[#allocation1 + $0x3] ss:$9 sm:$0xff] %v10303_v57 }
 0x8a9   :  { %1675 = vst [vmem:[#allocation1 + $0x4] ss:$9 sm:$0xff] %v10304_v50  ;;  %v10345_v50 = vld [vmem:[#allocation164_spill] sm:$0xff] }
 0x8aa   :  { %1676 = vst [vmem:[#allocation1 + $0x5] ss:$9 sm:$0xff] %v10305_v7  ;;  %v10346_v7 = vld [vmem:[#allocation168_spill] sm:$0xff] }
 0x8ab   :  { %1677 = vst [vmem:[#allocation1 + $0x6] ss:$9 sm:$0xff] %v10306_v4  ;;  %v10348_v4 = vld [vmem:[#allocation183_spill] sm:$0xff] }
 0x8ac   :  { %1678 = vst [vmem:[#allocation1 + $0x7] ss:$9 sm:$0xff] %v10307_v27 }
 0x8b3   :  { %v1679_v1 = vld [vmem:[#allocation1] sm:$0xff] }
 0x8b4   :  { %1680 = vst [vmem:[#allocation1] ss:$9 sm:$0xff] %v10308_v48  ;;  %v1865_v41 = vsel %vm866_vm0, %v1679_v1, -inf  ;;  %v1472_v1 = vpop.permute.xlu2 %1471 }
 0x8b5   :  { %1681 = vst [vmem:[#allocation1 + $0x1] ss:$9 sm:$0xff] %v10309_v39  ;;  %1866 = vmax.xlane.f32.xlu0 %v1865_v41  ;;  %v10350_v39 = vld [vmem:[#allocation135_spill] sm:$0xff] }
 0x8b6   :  { %1682 = vst [vmem:[#allocation1 + $0x2] ss:$9 sm:$0xff] %v10310_v38 }
 0x8b7   :  { %1683 = vst [vmem:[#allocation1 + $0x3] ss:$9 sm:$0xff] %v10311_v62  ;;  %v10351_v62 = vld [vmem:[#allocation45_spill] sm:$0xff] }
 0x8b8   :  { %1684 = vst [vmem:[#allocation1 + $0x4] ss:$9 sm:$0xff] %v10312_v20  ;;  %v10352_v20 = vld [vmem:[#allocation60_spill] sm:$0xff] }
 0x8b9   :  { %1685 = vst [vmem:[#allocation1 + $0x5] ss:$9 sm:$0xff] %v10313_v9  ;;  %v10353_v9 = vld [vmem:[#allocation75_spill] sm:$0xff] }
 0x8ba   :  { %1686 = vst [vmem:[#allocation1 + $0x6] ss:$9 sm:$0xff] %v10314_v21  ;;  %v10354_v21 = vld [vmem:[#allocation119_spill] sm:$0xff] }
 0x8bb   :  { %1687 = vst [vmem:[#allocation1 + $0x7] ss:$9 sm:$0xff] %v10315_v53 }
 0x8c2   :  { %v1688_v0 = vld [vmem:[#allocation1] sm:$0xff] }
 0x8c3   :  { %1689 = vst [vmem:[#allocation1] ss:$9 sm:$0xff] %v10316_v24  ;;  %v1868_v12 = vsel %vm866_vm0, %v1688_v0, -inf  ;;  %v10358_v0 = vld [vmem:[#allocation66_spill] sm:$0xff]  ;;  %v10359_v24 = vld [vmem:[#allocation81_spill] sm:$0xff] }
 0x8c4   :  { %1690 = vst [vmem:[#allocation1 + $0x1] ss:$9 sm:$0xff] %v10317_v31  ;;  %1869 = vmax.xlane.f32.xlu2 %v1868_v12  ;;  %v10360_v31 = vld [vmem:[#allocation125_spill] sm:$0xff]  ;;  %v10376_v12 = vld [vmem:[#allocation176_spill] sm:$0xff] }
 0x8c5   :  { %1691 = vst [vmem:[#allocation1 + $0x2] ss:$9 sm:$0xff] %v10318_v14  ;;  %v10361_v14 = vld [vmem:[#allocation143_spill] sm:$0xff] }
 0x8c6   :  { %1692 = vst [vmem:[#allocation1 + $0x3] ss:$9 sm:$0xff] %v10319_v45  ;;  %v10362_v45 = vld [vmem:[#allocation12_spill] sm:$0xff] }
 0x8c7   :  { %1693 = vst [vmem:[#allocation1 + $0x4] ss:$9 sm:$0xff] %v10320_v51  ;;  %v10363_v51 = vld [vmem:[#allocation57_spill] sm:$0xff] }
 0x8c8   :  { %1694 = vst [vmem:[#allocation1 + $0x5] ss:$9 sm:$0xff] %v6548_v22  ;;  %v10325_v22 = vld [vmem:[#allocation106_spill] sm:$0xff] }
 0x8c9   :  { %1695 = vst [vmem:[#allocation1 + $0x6] ss:$9 sm:$0xff] %v6552_v6  ;;  %v10327_v6 = vld [vmem:[#allocation21_spill] sm:$0xff] }
 0x8ca   :  { %1696 = vst [vmem:[#allocation1 + $0x7] ss:$9 sm:$0xff] %v1470_v3  ;;  %v10364_v3 = vld [vmem:[#allocation72_spill] sm:$0xff] }
 0x8d1   :  { %v1697_v56 = vld [vmem:[#allocation1] sm:$0xff] }
 0x8d2   :  { %1698 = vst [vmem:[#allocation1] ss:$9 sm:$0xff] %v10321_v2  ;;  %v1871_v23 = vsel %vm866_vm0, %v1697_v56, -inf  ;;  %v10366_v2 = vld [vmem:[#allocation132_spill] sm:$0xff] }
 0x8d3   :  { %1699 = vst [vmem:[#allocation1 + $0x1] ss:$9 sm:$0xff] %v10322_v10  ;;  %1872 = vmax.xlane.f32.xlu1 %v1871_v23  ;;  %v10367_v10 = vld [vmem:[#allocation150_spill] sm:$0xff]  ;;  %v6849_v23 = vld [vmem:[#allocation2 + $0xa] sm:$0x1] }
 0x8d4   :  { %1700 = vst [vmem:[#allocation1 + $0x2] ss:$9 sm:$0xff] %v10323_v63  ;;  %v10368_v63 = vld [vmem:[#allocation18_spill] sm:$0xff] }
 0x8d5   :  { %1701 = vst [vmem:[#allocation1 + $0x3] ss:$9 sm:$0xff] %v10324_v26  ;;  %v10369_v26 = vld [vmem:[#allocation63_spill] sm:$0xff] }
 0x8d6   :  { %1702 = vst [vmem:[#allocation1 + $0x4] ss:$9 sm:$0xff] %v10325_v22  ;;  %v10370_v22 = vld [vmem:[#allocation78_spill] sm:$0xff] }
 0x8d7   :  { %1703 = vst [vmem:[#allocation1 + $0x5] ss:$9 sm:$0xff] %v10326_v33  ;;  %v10371_v33 = vld [vmem:[#allocation93_spill] sm:$0xff] }
 0x8d8   :  { %1704 = vst [vmem:[#allocation1 + $0x6] ss:$9 sm:$0xff] %v10327_v6  ;;  %v10372_v6 = vld [vmem:[#allocation134_spill] sm:$0xff] }
 0x8d9   :  { %1705 = vst [vmem:[#allocation1 + $0x7] ss:$9 sm:$0xff] %v10328_v11  ;;  %v10373_v11 = vld [vmem:[#allocation156_spill] sm:$0xff] }
 0x8e0   :  { %v1706_v54 = vld [vmem:[#allocation1] sm:$0xff] }
 0x8e1   :  { %1707 = vst [vmem:[#allocation1] ss:$9 sm:$0xff] %v10329_v18  ;;  %v1874_v28 = vsel %vm866_vm0, %v1706_v54, -inf  ;;  %v10374_v54 = vld [vmem:[#allocation165_spill] sm:$0xff] }
 0x8e2   :  { %1708 = vst [vmem:[#allocation1 + $0x1] ss:$9 sm:$0xff] %v10330_v5  ;;  %1875 = vmax.xlane.f32.xlu0 %v1874_v28  ;;  %v10375_v5 = vld [vmem:[#allocation171_spill] sm:$0xff]  ;;  %v6871_v28 = vpop.xlane.xlu2 %1806 }
 0x8e3   :  { %1709 = vst [vmem:[#allocation1 + $0x2] ss:$9 sm:$0xff] %v10331_v61  ;;  %v10377_v61 = vld [vmem:[#allocation184_spill] sm:$0xff] }
 0x8e4   :  { %1710 = vst [vmem:[#allocation1 + $0x3] ss:$9 sm:$0xff] %v10332_v29  ;;  %v1474_v29 = vpop.permute.xlu1 %1473 }
 0x8e5   :  { %1711 = vst [vmem:[#allocation1 + $0x4] ss:$9 sm:$0xff] %v10333_v8  ;;  %v6827_v8 = vld [vmem:[#allocation2 + $0x2] sm:$0x1] }
 0x8e6   :  { %1712 = vst [vmem:[#allocation1 + $0x5] ss:$9 sm:$0xff] %v10334_v47 }
 0x8e7   :  { %1713 = vst [vmem:[#allocation1 + $0x6] ss:$9 sm:$0xff] %v10335_v44 }
 0x8e8   :  { %1714 = vst [vmem:[#allocation1 + $0x7] ss:$9 sm:$0xff] %v10336_v60  ;;  %v6833_v60 = vld [vmem:[#allocation2 + $0x12] sm:$0x1] }
 0x8e9   :  { %10378 = vst [vmem:[#allocation146_spill] sm:$0xff] %v6833_v60 }
 0x8ea   :  { %10385 = vst [vmem:[#allocation8_spill] sm:$0xff] %v6871_v28 }
 0x8ef   :  { %v1715_v46 = vld [vmem:[#allocation1] sm:$0xff] }
 0x8f0   :  { %1716 = vst [vmem:[#allocation1] ss:$9 sm:$0xff] %v10337_v58  ;;  %v1877_v40 = vsel %vm866_vm0, %v1715_v46, -inf  ;;  %v6851_v46 = vld [vmem:[#allocation2 + $0x1a] sm:$0x1] }
 0x8f1   :  { %1717 = vst [vmem:[#allocation1 + $0x1] ss:$9 sm:$0xff] %v10338_v42  ;;  %1878 = vmax.xlane.f32.xlu2 %v1877_v40  ;;  %v6859_v58 = vld [vmem:[#allocation2 + $0x16] sm:$0x1]  ;;  %v6863_v42 = vpop.xlane.xlu1 %1809 }
 0x8f2   :  { %1718 = vst [vmem:[#allocation1 + $0x2] ss:$9 sm:$0xff] %v10339_v19  ;;  %v6867_v19 = vpop.xlane.xlu0 %1803 }
 0x8f3   :  { %1719 = vst [vmem:[#allocation1 + $0x3] ss:$9 sm:$0xff] %v10340_v37 }
 0x8f4   :  { %1720 = vst [vmem:[#allocation1 + $0x4] ss:$9 sm:$0xff] %v10341_v55 }
 0x8f5   :  { %1721 = vst [vmem:[#allocation1 + $0x5] ss:$9 sm:$0xff] %v10342_v30  ;;  %v6883_v30 = vpop.xlane.xlu2 %1815 }
 0x8f6   :  { %1722 = vst [vmem:[#allocation1 + $0x6] ss:$9 sm:$0xff] %v10343_v43 }
 0x8f7   :  { %1723 = vst [vmem:[#allocation1 + $0x7] ss:$9 sm:$0xff] %v10344_v34 }
 0x8f8   :  { %10381 = vst [vmem:[#allocation173_spill] sm:$0xff] %v6851_v46 }
 0x8f9   :  { %10382 = vst [vmem:[#allocation179_spill] sm:$0xff] %v6859_v58  ;;  %v6875_v37 = vpop.xlane.xlu1 %1818 }
 0x8fa   :  { %10383 = vst [vmem:[#allocation186_spill] sm:$0xff] %v6863_v42  ;;  %v6879_v55 = vpop.xlane.xlu0 %1812 }
 0x8fb   :  { %10384 = vst [vmem:[#allocation174_spill] sm:$0xff] %v6867_v19 }
 0x8fc   :  { %10386 = vst [vmem:[#allocation35_spill] sm:$0xff] %v6875_v37 }
 0x8fd   :  { %10387 = vst [vmem:[#allocation80_spill] sm:$0xff] %v6879_v55  ;;  %v6895_v40 = vpop.xlane.xlu2 %1824 }
 0x8fe   :  { %v1724_v57 = vld [vmem:[#allocation1] sm:$0xff]  ;;  %10388 = vst [vmem:[#allocation95_spill] sm:$0xff] %v6883_v30 }
 0x8ff   :  { %1725 = vst [vmem:[#allocation1] ss:$9 sm:$0xff] %v10345_v50  ;;  %v1880_v27 = vsel %vm866_vm0, %v1724_v57, -inf }
 0x900   :  { %1726 = vst [vmem:[#allocation1 + $0x1] ss:$9 sm:$0xff] %v10346_v7  ;;  %1881 = vmax.xlane.f32.xlu1 %v1880_v27 }
 0x901   :  { %1727 = vst [vmem:[#allocation1 + $0x2] ss:$9 sm:$0xff] %v10347_v36  ;;  %v6887_v43 = vpop.xlane.xlu1 %1827 }
 0x902   :  { %1728 = vst [vmem:[#allocation1 + $0x3] ss:$9 sm:$0xff] %v10348_v4  ;;  %v6891_v34 = vpop.xlane.xlu0 %1821 }
 0x903   :  { %1729 = vst [vmem:[#allocation1 + $0x4] ss:$9 sm:$0xff] %v10349_v17 }
 0x904   :  { %1730 = vst [vmem:[#allocation1 + $0x5] ss:$9 sm:$0xff] %v6582_v16  ;;  %v10356_v16 = vld [vmem:[#allocation154_spill] sm:$0xff] }
 0x905   :  { %1731 = vst [vmem:[#allocation1 + $0x6] ss:$9 sm:$0xff] %v6587_v35  ;;  %v10357_v35 = vld [vmem:[#allocation51_spill] sm:$0xff]  ;;  %v6907_v7 = vpop.xlane.xlu2 %1833 }
 0x906   :  { %1732 = vst [vmem:[#allocation1 + $0x7] ss:$9 sm:$0xff] %v1472_v1 }
 0x907   :  { %10389 = vst [vmem:[#allocation110_spill] sm:$0xff] %v6887_v43 }
 0x908   :  { %10390 = vst [vmem:[#allocation14_spill] sm:$0xff] %v6891_v34 }
 0x909   :  { %10391 = vst [vmem:[#allocation26_spill] sm:$0xff] %v6895_v40  ;;  %v6899_v57 = vpop.xlane.xlu1 %1836 }
 0x90a   :  { %10392 = vst [vmem:[#allocation41_spill] sm:$0xff] %v6899_v57  ;;  %v6903_v50 = vpop.xlane.xlu0 %1830 }
 0x90b   :  { %10393 = vst [vmem:[#allocation85_spill] sm:$0xff] %v6903_v50 }
 0x90c   :  { %10394 = vst [vmem:[#allocation100_spill] sm:$0xff] %v6907_v7 }
 0x90d   :  { %v1733_v48 = vld [vmem:[#allocation1] sm:$0xff]  ;;  %v6919_v27 = vpop.xlane.xlu2 %1842 }
 0x90e   :  { %1734 = vst [vmem:[#allocation1] ss:$9 sm:$0xff] %v10350_v39  ;;  %v1883_v38 = vsel %vm866_vm0, %v1733_v48, -inf }
 0x90f   :  { %1735 = vst [vmem:[#allocation1 + $0x1] ss:$9 sm:$0xff] %v10351_v62  ;;  %1884 = vmax.xlane.f32.xlu0 %v1883_v38 }
 0x910   :  { %1736 = vst [vmem:[#allocation1 + $0x2] ss:$9 sm:$0xff] %v10352_v20 }
 0x911   :  { %1737 = vst [vmem:[#allocation1 + $0x3] ss:$9 sm:$0xff] %v10353_v9  ;;  %v6911_v36 = vpop.xlane.xlu1 %1845 }
 0x912   :  { %1738 = vst [vmem:[#allocation1 + $0x4] ss:$9 sm:$0xff] %v10354_v21  ;;  %v6915_v4 = vpop.xlane.xlu0 %1839 }
 0x913   :  { %1739 = vst [vmem:[#allocation1 + $0x5] ss:$9 sm:$0xff] %v10355_v25 }
 0x914   :  { %1740 = vst [vmem:[#allocation1 + $0x6] ss:$9 sm:$0xff] %v10356_v16 }
 0x915   :  { %1741 = vst [vmem:[#allocation1 + $0x7] ss:$9 sm:$0xff] %v10357_v35  ;;  %v6931_v48 = vpop.xlane.xlu2 %1851 }
 0x916   :  { %10395 = vst [vmem:[#allocation115_spill] sm:$0xff] %v6911_v36 }
 0x917   :  { %10396 = vst [vmem:[#allocation17_spill] sm:$0xff] %v6915_v4 }
 0x918   :  { %10397 = vst [vmem:[#allocation31_spill] sm:$0xff] %v6919_v27 }
 0x919   :  { %v6923_v17 = vpop.xlane.xlu1 %1854  ;;  %10400 = vst [vmem:[#allocation105_spill] sm:$0xff] %v6931_v48 }
 0x91a   :  { %10398 = vst [vmem:[#allocation46_spill] sm:$0xff] %v6923_v17  ;;  %v6927_v1 = vpop.xlane.xlu0 %1848 }
 0x91b   :  { %10399 = vst [vmem:[#allocation90_spill] sm:$0xff] %v6927_v1 }
 0x91c   :  { %v1742_v53 = vld [vmem:[#allocation1] sm:$0xff] }
 0x91d   :  { %1743 = vst [vmem:[#allocation1] ss:$9 sm:$0xff] %v10358_v0  ;;  %v1886_v15 = vsel %vm866_vm0, %v1742_v53, -inf  ;;  %v6943_v62 = vpop.xlane.xlu2 %1860 }
 0x91e   :  { %1744 = vst [vmem:[#allocation1 + $0x1] ss:$9 sm:$0xff] %v10359_v24  ;;  %1887 = vmax.xlane.f32.xlu2 %v1886_v15 }
 0x91f   :  { %1745 = vst [vmem:[#allocation1 + $0x2] ss:$9 sm:$0xff] %v10360_v31 }
 0x920   :  { %1746 = vst [vmem:[#allocation1 + $0x3] ss:$9 sm:$0xff] %v10361_v14 }
 0x921   :  { %1747 = vst [vmem:[#allocation1 + $0x4] ss:$9 sm:$0xff] %v10362_v45  ;;  %v6935_v39 = vpop.xlane.xlu1 %1863 }
 0x922   :  { %1748 = vst [vmem:[#allocation1 + $0x5] ss:$9 sm:$0xff] %v10363_v51  ;;  %v6939_v38 = vpop.xlane.xlu0 %1857 }
 0x923   :  { %1749 = vst [vmem:[#allocation1 + $0x6] ss:$9 sm:$0xff] %v10364_v3 }
 0x924   :  { %1750 = vst [vmem:[#allocation1 + $0x7] ss:$9 sm:$0xff] %v10365_v52 }
 0x925   :  { %10401 = vst [vmem:[#allocation127_spill] sm:$0xff] %v6935_v39 }
 0x926   :  { %10402 = vst [vmem:[#allocation22_spill] sm:$0xff] %v6939_v38 }
 0x927   :  { %10403 = vst [vmem:[#allocation37_spill] sm:$0xff] %v6943_v62 }
 0x92a   :  { %v6951_v9 = vpop.xlane.xlu0 %1866 }
 0x92b   :  { %v1751_v56 = vld [vmem:[#allocation1] sm:$0xff]  ;;  %10405 = vst [vmem:[#allocation96_spill] sm:$0xff] %v6951_v9 }
 0x92c   :  { %1752 = vst [vmem:[#allocation1] ss:$9 sm:$0xff] %v10366_v2  ;;  %v1889_v59 = vsel %vm866_vm0, %v1751_v56, -inf }
 0x92d   :  { %1753 = vst [vmem:[#allocation1 + $0x1] ss:$9 sm:$0xff] %v10367_v10  ;;  %1890 = vmax.xlane.f32.xlu1 %v1889_v59 }
 0x92e   :  { %1754 = vst [vmem:[#allocation1 + $0x2] ss:$9 sm:$0xff] %v10368_v63 }
 0x92f   :  { %1755 = vst [vmem:[#allocation1 + $0x3] ss:$9 sm:$0xff] %v10369_v26 }
 0x930   :  { %1756 = vst [vmem:[#allocation1 + $0x4] ss:$9 sm:$0xff] %v10370_v22 }
 0x931   :  { %1757 = vst [vmem:[#allocation1 + $0x5] ss:$9 sm:$0xff] %v10371_v33 }
 0x932   :  { %1758 = vst [vmem:[#allocation1 + $0x6] ss:$9 sm:$0xff] %v10372_v6 }
 0x933   :  { %1759 = vst [vmem:[#allocation1 + $0x7] ss:$9 sm:$0xff] %v10373_v11 }
 0x937   :  { %v6955_v21 = vpop.xlane.xlu2 %1869 }
 0x938   :  { %10406 = vst [vmem:[#allocation111_spill] sm:$0xff] %v6955_v21 }
 0x93a   :  { %v1760_v41 = vld [vmem:[#allocation1] sm:$0xff] }
 0x93b   :  { %1761 = vst [vmem:[#allocation1] ss:$9 sm:$0xff] %v10374_v54  ;;  %v1892_v18 = vsel %vm866_vm0, %v1760_v41, -inf }
 0x93c   :  { %1762 = vst [vmem:[#allocation1 + $0x1] ss:$9 sm:$0xff] %v10375_v5  ;;  %1893 = vmax.xlane.f32.xlu0 %v1892_v18 }
 0x93d   :  { %1763 = vst [vmem:[#allocation1 + $0x2] ss:$9 sm:$0xff] %v10376_v12 }
 0x93e   :  { %1764 = vst [vmem:[#allocation1 + $0x3] ss:$9 sm:$0xff] %v10377_v61 }
 0x93f   :  { %1765 = vst [vmem:[#allocation1 + $0x4] ss:$9 sm:$0xff] %v6540_v32  ;;  %v6835_v32 = vld [vmem:[#allocation2 + $0x6] sm:$0x1] }
 0x940   :  { %1766 = vst [vmem:[#allocation1 + $0x5] ss:$9 sm:$0xff] %v6546_v49  ;;  %v6841_v49 = vld [vmem:[#allocation2 + $0x1e] sm:$0x1] }
 0x941   :  { %1767 = vst [vmem:[#allocation1 + $0x6] ss:$9 sm:$0xff] %v6623_v13  ;;  %v6843_v13 = vld [vmem:[#allocation2 + $0xe] sm:$0x1] }
 0x942   :  { %1768 = vst [vmem:[#allocation1 + $0x7] ss:$9 sm:$0xff] %v1474_v29 }
 0x943   :  { %10379 = vst [vmem:[#allocation160_spill] sm:$0xff] %v6841_v49 }
 0x944   :  { %10380 = vst [vmem:[#allocation167_spill] sm:$0xff] %v6843_v13 }
 0x946   :  { %1914 = vrot.lane.b32.xlu1 %v6827_v8, %s4306_s13  ;;  %v6947_v20 = vpop.xlane.xlu1 %1872 }
 0x947   :  { %10404 = vst [vmem:[#allocation52_spill] sm:$0xff] %v6947_v20 }
 0x949   :  { %v1769_v47 = vld [vmem:[#allocation1] sm:$0xff] }
 0x94a   :  { %v1895_v44 = vsel %vm866_vm0, %v1769_v47, -inf  ;;  %2410 = vst [vmem:[#allocation1] ss:$9 sm:$0xff] %v6827_v8 }
 0x94b   :  { %1896 = vmax.xlane.f32.xlu2 %v1895_v44 }
 0x94e   :  { %1922 = vrot.lane.b32.xlu1 %v6833_v60, %s4306_s13 }
 0x950   :  { %1916 = vrot.lane.b32.xlu0 %v6835_v32, %s4306_s13 }
 0x955   :  { %v6963_v16 = vpop.xlane.xlu0 %1875 }
 0x956   :  { %1928 = vrot.lane.b32.xlu1 %v6841_v49, %s4306_s13  ;;  %10408 = vst [vmem:[#allocation162_spill] sm:$0xff] %v6963_v16 }
 0x958   :  { %1920 = vrot.lane.b32.xlu0 %v6843_v13, %s4306_s13 }
 0x95e   :  { %1934 = vrot.lane.b32.xlu1 %v6849_v23, %s4307_s0 }
 0x960   :  { %1926 = vrot.lane.b32.xlu0 %v6851_v46, %s4306_s13 }
 0x963   :  { %1918 = vrot.lane.b32.xlu2 %v6849_v23, %s4306_s13 }
 0x964   :  { %v6967_v35 = vpop.xlane.xlu2 %1878 }
 0x965   :  { %10409 = vst [vmem:[#allocation166_spill] sm:$0xff] %v6967_v35 }
 0x966   :  { %1940 = vrot.lane.b32.xlu1 %v6859_v58, %s4307_s0 }
 0x968   :  { %1932 = vrot.lane.b32.xlu0 %v6835_v32, %s4307_s0 }
 0x96b   :  { %1924 = vrot.lane.b32.xlu2 %v6859_v58, %s4306_s13 }
 0x96e   :  { %1946 = vrot.lane.b32.xlu1 %v6827_v8, %s4308_s14 }
 0x970   :  { %1938 = vrot.lane.b32.xlu0 %v6833_v60, %s4307_s0 }
 0x973   :  { %1930 = vrot.lane.b32.xlu2 %v6827_v8, %s4307_s0  ;;  %v6959_v25 = vpop.xlane.xlu1 %1881 }
 0x974   :  { %10407 = vst [vmem:[#allocation152_spill] sm:$0xff] %v6959_v25 }
 0x976   :  { %1952 = vrot.lane.b32.xlu1 %v6843_v13, %s4308_s14 }
 0x978   :  { %1944 = vrot.lane.b32.xlu0 %v6841_v49, %s4307_s0 }
 0x97b   :  { %1936 = vrot.lane.b32.xlu2 %v6843_v13, %s4307_s0 }
 0x97e   :  { %1958 = vrot.lane.b32.xlu1 %v6851_v46, %s4308_s14 }
 0x980   :  { %1950 = vrot.lane.b32.xlu0 %v6849_v23, %s4308_s14 }
 0x982   :  { %v6975_v0 = vpop.xlane.xlu0 %1884 }
 0x983   :  { %1942 = vrot.lane.b32.xlu2 %v6851_v46, %s4307_s0  ;;  %10411 = vst [vmem:[#allocation181_spill] sm:$0xff] %v6975_v0 }
 0x986   :  { %1964 = vrot.lane.b32.xlu1 %v6835_v32, %s4309_s15 }
 0x988   :  { %1956 = vrot.lane.b32.xlu0 %v6859_v58, %s4308_s14 }
 0x98b   :  { %1948 = vrot.lane.b32.xlu2 %v6835_v32, %s4308_s14 }
 0x98e   :  { %1970 = vrot.lane.b32.xlu1 %v6833_v60, %s4309_s15 }
 0x990   :  { %1962 = vrot.lane.b32.xlu0 %v6827_v8, %s4309_s15 }
 0x991   :  { %v6979_v15 = vpop.xlane.xlu2 %1887 }
 0x992   :  { %10412 = vst [vmem:[#allocation185_spill] sm:$0xff] %v6979_v15 }
 0x993   :  { %1954 = vrot.lane.b32.xlu2 %v6833_v60, %s4308_s14 }
 0x996   :  { %1976 = vrot.lane.b32.xlu1 %v6841_v49, %s4309_s15 }
 0x998   :  { %1968 = vrot.lane.b32.xlu0 %v6843_v13, %s4309_s15 }
 0x99b   :  { %1960 = vrot.lane.b32.xlu2 %v6841_v49, %s4308_s14 }
 0x99e   :  { %1982 = vrot.lane.b32.xlu1 %v6849_v23, %s4310_s16 }
 0x9a0   :  { %1974 = vrot.lane.b32.xlu0 %v6851_v46, %s4309_s15  ;;  %v6971_v53 = vpop.xlane.xlu1 %1890 }
 0x9a1   :  { %10410 = vst [vmem:[#allocation175_spill] sm:$0xff] %v6971_v53 }
 0x9a3   :  { %1966 = vrot.lane.b32.xlu2 %v6849_v23, %s4309_s15 }
 0x9a6   :  { %1988 = vrot.lane.b32.xlu1 %v6859_v58, %s4310_s16 }
 0x9a8   :  { %1980 = vrot.lane.b32.xlu0 %v6835_v32, %s4310_s16 }
 0x9ab   :  { %1972 = vrot.lane.b32.xlu2 %v6859_v58, %s4309_s15 }
 0x9ae   :  { %1994 = vrot.lane.b32.xlu1 %v6827_v8, %s4311_s17 }
 0x9af   :  { %v6985_v31 = vpop.xlane.xlu0 %1893 }
 0x9b0   :  { %1986 = vrot.lane.b32.xlu0 %v6833_v60, %s4310_s16  ;;  %10413 = vst [vmem:[#allocation130_spill] sm:$0xff] %v6985_v31 }
 0x9b3   :  { %1978 = vrot.lane.b32.xlu2 %v6827_v8, %s4310_s16 }
 0x9b6   :  { %2000 = vrot.lane.b32.xlu1 %v6843_v13, %s4311_s17 }
 0x9b8   :  { %1992 = vrot.lane.b32.xlu0 %v6841_v49, %s4310_s16  ;;  %v1915_v24 = vpop.permute.xlu1 %1914 }
 0x9b9   :  { %2412 = vst [vmem:[#allocation1 + $0x1] ss:$9 sm:$0xff] %v1915_v24 }
 0x9bb   :  { %1984 = vrot.lane.b32.xlu2 %v6843_v13, %s4310_s16 }
 0x9be   :  { %v6989_v14 = vpop.xlane.xlu2 %1896  ;;  %2006 = vrot.lane.b32.xlu1 %v6851_v46, %s4311_s17 }
 0x9bf   :  { %10414 = vst [vmem:[#allocation38_spill] sm:$0xff] %v6989_v14 }
 0x9c0   :  { %1998 = vrot.lane.b32.xlu0 %v6849_v23, %s4311_s17  ;;  %v6995_v45 = vpop.permute.xlu1 %1922 }
 0x9c1   :  { %10415 = vst [vmem:[#allocation50_spill] sm:$0xff] %v6995_v45 }
 0x9c2   :  { %v6997_v51 = vpop.permute.xlu0 %1916 }
 0x9c3   :  { %1990 = vrot.lane.b32.xlu2 %v6851_v46, %s4310_s16 }
 0x9c6   :  { %v7001_v3 = vpop.permute.xlu2 %1918  ;;  %2012 = vrot.lane.b32.xlu1 %v6835_v32, %s4312_s18 }
 0x9c8   :  { %2004 = vrot.lane.b32.xlu0 %v6859_v58, %s4311_s17  ;;  %v7007_v52 = vpop.permute.xlu1 %1928 }
 0x9c9   :  { %10416 = vst [vmem:[#allocation65_spill] sm:$0xff] %v7007_v52 }
 0x9ca   :  { %v7009_v56 = vpop.permute.xlu0 %1920 }
 0x9cb   :  { %10417 = vst [vmem:[#allocation113_spill] sm:$0xff] %v7009_v56  ;;  %1996 = vrot.lane.b32.xlu2 %v6835_v32, %s4311_s17 }
 0x9ce   :  { %v7013_v2 = vpop.permute.xlu2 %1924  ;;  %2018 = vrot.lane.b32.xlu1 %v6833_v60, %s4312_s18 }
 0x9cf   :  { %10418 = vst [vmem:[#allocation131_spill] sm:$0xff] %v7013_v2 }
 0x9d0   :  { %2010 = vrot.lane.b32.xlu0 %v6827_v8, %s4312_s18  ;;  %v7019_v59 = vpop.permute.xlu1 %1934 }
 0x9d2   :  { %v7021_v10 = vpop.permute.xlu0 %1926 }
 0x9d3   :  { %10419 = vst [vmem:[#allocation149_spill] sm:$0xff] %v7021_v10  ;;  %2002 = vrot.lane.b32.xlu2 %v6833_v60, %s4311_s17 }
 0x9d6   :  { %v1931_v63 = vpop.permute.xlu2 %1930  ;;  %2024 = vrot.lane.b32.xlu1 %v6841_v49, %s4312_s18 }
 0x9d7   :  { %2414 = vst [vmem:[#allocation1 + $0x2] ss:$9 sm:$0xff] %v1931_v63 }
 0x9d8   :  { %2016 = vrot.lane.b32.xlu0 %v6843_v13, %s4312_s18  ;;  %v7029_v26 = vpop.permute.xlu1 %1940 }
 0x9d9   :  { %10420 = vst [vmem:[#allocation43_spill] sm:$0xff] %v7029_v26 }
 0x9da   :  { %v7031_v22 = vpop.permute.xlu0 %1932 }
 0x9db   :  { %2008 = vrot.lane.b32.xlu2 %v6841_v49, %s4311_s17 }
 0x9de   :  { %v7035_v33 = vpop.permute.xlu2 %1936  ;;  %2030 = vrot.lane.b32.xlu1 %v6849_v23, %s4313_s19 }
 0x9df   :  { %10421 = vst [vmem:[#allocation56_spill] sm:$0xff] %v7035_v33 }
 0x9e0   :  { %2022 = vrot.lane.b32.xlu0 %v6851_v46, %s4312_s18  ;;  %v1947_v6 = vpop.permute.xlu1 %1946 }
 0x9e1   :  { %2416 = vst [vmem:[#allocation1 + $0x3] ss:$9 sm:$0xff] %v1947_v6 }
 0x9e2   :  { %v7041_v11 = vpop.permute.xlu0 %1938 }
 0x9e3   :  { %10422 = vst [vmem:[#allocation71_spill] sm:$0xff] %v7041_v11  ;;  %2014 = vrot.lane.b32.xlu2 %v6849_v23, %s4312_s18 }
 0x9e6   :  { %v7045_v41 = vpop.permute.xlu2 %1942  ;;  %2036 = vrot.lane.b32.xlu1 %v6859_v58, %s4313_s19 }
 0x9e7   :  { %10423 = vst [vmem:[#allocation118_spill] sm:$0xff] %v7045_v41 }
 0x9e8   :  { %2028 = vrot.lane.b32.xlu0 %v6835_v32, %s4313_s19  ;;  %v7051_v54 = vpop.permute.xlu1 %1952 }
 0x9e9   :  { %10424 = vst [vmem:[#allocation138_spill] sm:$0xff] %v7051_v54 }
 0x9ea   :  { %v7053_v18 = vpop.permute.xlu0 %1944 }
 0x9eb   :  { %10425 = vst [vmem:[#allocation155_spill] sm:$0xff] %v7053_v18  ;;  %2020 = vrot.lane.b32.xlu2 %v6859_v58, %s4312_s18 }
 0x9ee   :  { %v7057_v5 = vpop.permute.xlu2 %1948  ;;  %2042 = vrot.lane.b32.xlu1 %v6827_v8, %s4314_s20 }
 0x9f0   :  { %2034 = vrot.lane.b32.xlu0 %v6833_v60, %s4313_s19  ;;  %v7063_v12 = vpop.permute.xlu1 %1958 }
 0x9f1   :  { %10426 = vst [vmem:[#allocation49_spill] sm:$0xff] %v7063_v12 }
 0x9f2   :  { %v7065_v61 = vpop.permute.xlu0 %1950 }
 0x9f3   :  { %2026 = vrot.lane.b32.xlu2 %v6827_v8, %s4313_s19 }
 0x9f6   :  { %v7069_v29 = vpop.permute.xlu2 %1954  ;;  %2048 = vrot.lane.b32.xlu1 %v6843_v13, %s4314_s20 }
 0x9f7   :  { %10427 = vst [vmem:[#allocation61_spill] sm:$0xff] %v7069_v29 }
 0x9f8   :  { %2040 = vrot.lane.b32.xlu0 %v6841_v49, %s4313_s19  ;;  %v7075_v47 = vpop.permute.xlu1 %1964 }
 0x9fa   :  { %v7077_v44 = vpop.permute.xlu0 %1956 }
 0x9fb   :  { %10428 = vst [vmem:[#allocation76_spill] sm:$0xff] %v7077_v44  ;;  %2032 = vrot.lane.b32.xlu2 %v6843_v13, %s4313_s19 }
 0x9fe   :  { %v7081_v24 = vpop.permute.xlu2 %1960  ;;  %2054 = vrot.lane.b32.xlu1 %v6851_v46, %s4314_s20 }
 0x9ff   :  { %10429 = vst [vmem:[#allocation122_spill] sm:$0xff] %v7081_v24 }
 0xa00   :  { %2046 = vrot.lane.b32.xlu0 %v6849_v23, %s4314_s20  ;;  %v7087_v63 = vpop.permute.xlu1 %1970 }
 0xa01   :  { %10430 = vst [vmem:[#allocation145_spill] sm:$0xff] %v7087_v63 }
 0xa02   :  { %v1963_v6 = vpop.permute.xlu0 %1962 }
 0xa03   :  { %2038 = vrot.lane.b32.xlu2 %v6851_v46, %s4313_s19  ;;  %2418 = vst [vmem:[#allocation1 + $0x4] ss:$9 sm:$0xff] %v1963_v6 }
 0xa06   :  { %v7091_v14 = vpop.permute.xlu2 %1966  ;;  %2060 = vrot.lane.b32.xlu1 %v6835_v32, %s4315_s21 }
 0xa08   :  { %2052 = vrot.lane.b32.xlu0 %v6859_v58, %s4314_s20  ;;  %v7097_v31 = vpop.permute.xlu1 %1976 }
 0xa09   :  { %10431 = vst [vmem:[#allocation11_spill] sm:$0xff] %v7097_v31 }
 0xa0a   :  { %v7099_v15 = vpop.permute.xlu0 %1968 }
 0xa0b   :  { %10432 = vst [vmem:[#allocation54_spill] sm:$0xff] %v7099_v15  ;;  %2044 = vrot.lane.b32.xlu2 %v6835_v32, %s4314_s20 }
 0xa0e   :  { %v7103_v53 = vpop.permute.xlu2 %1972  ;;  %2066 = vrot.lane.b32.xlu1 %v6833_v60, %s4315_s21 }
 0xa0f   :  { %10433 = vst [vmem:[#allocation67_spill] sm:$0xff] %v7103_v53 }
 0xa10   :  { %2058 = vrot.lane.b32.xlu0 %v6827_v8, %s4315_s21  ;;  %v7109_v6 = vpop.permute.xlu1 %1982 }
 0xa12   :  { %v7111_v0 = vpop.permute.xlu0 %1974 }
 0xa13   :  { %10434 = vst [vmem:[#allocation82_spill] sm:$0xff] %v7111_v0  ;;  %2050 = vrot.lane.b32.xlu2 %v6833_v60, %s4314_s20 }
 0xa16   :  { %v1979_v16 = vpop.permute.xlu2 %1978  ;;  %2072 = vrot.lane.b32.xlu1 %v6841_v49, %s4315_s21 }
 0xa17   :  { %2420 = vst [vmem:[#allocation1 + $0x5] ss:$9 sm:$0xff] %v1979_v16 }
 0xa18   :  { %2064 = vrot.lane.b32.xlu0 %v6843_v13, %s4315_s21  ;;  %v7119_v25 = vpop.permute.xlu1 %1988 }
 0xa19   :  { %10435 = vst [vmem:[#allocation128_spill] sm:$0xff] %v7119_v25 }
 0xa1a   :  { %v7121_v35 = vpop.permute.xlu0 %1980 }
 0xa1b   :  { %2056 = vrot.lane.b32.xlu2 %v6841_v49, %s4314_s20 }
 0xa1e   :  { %v7125_v20 = vpop.permute.xlu2 %1984  ;;  %2078 = vrot.lane.b32.xlu1 %v6849_v23, %s4316_s22 }
 0xa1f   :  { %10436 = vst [vmem:[#allocation139_spill] sm:$0xff] %v7125_v20 }
 0xa20   :  { %2070 = vrot.lane.b32.xlu0 %v6851_v46, %s4315_s21  ;;  %v1995_v39 = vpop.permute.xlu1 %1994 }
 0xa21   :  { %2422 = vst [vmem:[#allocation1 + $0x6] ss:$9 sm:$0xff] %v1995_v39 }
 0xa22   :  { %v7131_v16 = vpop.permute.xlu0 %1986 }
 0xa23   :  { %10437 = vst [vmem:[#allocation163_spill] sm:$0xff] %v7131_v16  ;;  %2062 = vrot.lane.b32.xlu2 %v6849_v23, %s4315_s21 }
 0xa26   :  { %v7135_v21 = vpop.permute.xlu2 %1990  ;;  %2084 = vrot.lane.b32.xlu1 %v6859_v58, %s4316_s22 }
 0xa27   :  { %10438 = vst [vmem:[#allocation169_spill] sm:$0xff] %v7135_v21 }
 0xa28   :  { %2076 = vrot.lane.b32.xlu0 %v6835_v32, %s4316_s22  ;;  %v7141_v62 = vpop.permute.xlu1 %2000 }
 0xa29   :  { %10439 = vst [vmem:[#allocation172_spill] sm:$0xff] %v7141_v62 }
 0xa2a   :  { %v7143_v48 = vpop.permute.xlu0 %1992 }
 0xa2b   :  { %10440 = vst [vmem:[#allocation182_spill] sm:$0xff] %v7143_v48  ;;  %2068 = vrot.lane.b32.xlu2 %v6859_v58, %s4315_s21 }
 0xa2e   :  { %v7147_v39 = vpop.permute.xlu2 %1996  ;;  %2090 = vrot.lane.b32.xlu1 %v6827_v8, %s4317_s23 }
 0xa30   :  { %2082 = vrot.lane.b32.xlu0 %v6833_v60, %s4316_s22  ;;  %v7153_v9 = vpop.permute.xlu1 %2006 }
 0xa31   :  { %10441 = vst [vmem:[#allocation188_spill] sm:$0xff] %v7153_v9 }
 0xa32   :  { %v7155_v38 = vpop.permute.xlu0 %1998 }
 0xa33   :  { %2074 = vrot.lane.b32.xlu2 %v6827_v8, %s4316_s22 }
 0xa36   :  { %v7159_v17 = vpop.permute.xlu2 %2002  ;;  %2096 = vrot.lane.b32.xlu1 %v6843_v13, %s4317_s23 }
 0xa37   :  { %10442 = vst [vmem:[#allocation123_spill] sm:$0xff] %v7159_v17 }
 0xa38   :  { %2088 = vrot.lane.b32.xlu0 %v6841_v49, %s4316_s22  ;;  %v7165_v1 = vpop.permute.xlu1 %2012 }
 0xa3a   :  { %v7167_v4 = vpop.permute.xlu0 %2004 }
 0xa3b   :  { %10443 = vst [vmem:[#allocation20_spill] sm:$0xff] %v7167_v4  ;;  %2080 = vrot.lane.b32.xlu2 %v6843_v13, %s4316_s22 }
 0xa3e   :  { %v7171_v36 = vpop.permute.xlu2 %2008  ;;  %2102 = vrot.lane.b32.xlu1 %v6851_v46, %s4317_s23 }
 0xa3f   :  { %10444 = vst [vmem:[#allocation68_spill] sm:$0xff] %v7171_v36 }
 0xa40   :  { %2094 = vrot.lane.b32.xlu0 %v6849_v23, %s4317_s23  ;;  %v7177_v27 = vpop.permute.xlu1 %2018 }
 0xa41   :  { %10445 = vst [vmem:[#allocation83_spill] sm:$0xff] %v7177_v27 }
 0xa42   :  { %v2011_v55 = vpop.permute.xlu0 %2010 }
 0xa43   :  { %2086 = vrot.lane.b32.xlu2 %v6851_v46, %s4316_s22  ;;  %2424 = vst [vmem:[#allocation1 + $0x7] ss:$9 sm:$0xff] %v2011_v55 }
 0xa46   :  { %v7181_v57 = vpop.permute.xlu2 %2014  ;;  %2108 = vrot.lane.b32.xlu1 %v6835_v32, %s4318_s24 }
 0xa48   :  { %2100 = vrot.lane.b32.xlu0 %v6859_v58, %s4317_s23  ;;  %v7187_v43 = vpop.permute.xlu1 %2024 }
 0xa49   :  { %10446 = vst [vmem:[#allocation98_spill] sm:$0xff] %v7187_v43 }
 0xa4a   :  { %v7189_v40 = vpop.permute.xlu0 %2016  ;;  %v7205_v50 = vld [vmem:[#allocation1] sm:$0xff] }
 0xa4b   :  { %10447 = vst [vmem:[#allocation144_spill] sm:$0xff] %v7189_v40  ;;  %2092 = vrot.lane.b32.xlu2 %v6835_v32, %s4317_s23 }
 0xa4e   :  { %v7193_v7 = vpop.permute.xlu2 %2020  ;;  %2114 = vrot.lane.b32.xlu1 %v6833_v60, %s4318_s24 }
 0xa4f   :  { %10448 = vst [vmem:[#allocation9_spill] sm:$0xff] %v7193_v7 }
 0xa50   :  { %2106 = vrot.lane.b32.xlu0 %v6827_v8, %s4318_s24  ;;  %v7199_v55 = vpop.permute.xlu1 %2030 }
 0xa52   :  { %v7201_v30 = vpop.permute.xlu0 %2022 }
 0xa53   :  { %10449 = vst [vmem:[#allocation28_spill] sm:$0xff] %v7201_v30  ;;  %2098 = vrot.lane.b32.xlu2 %v6833_v60, %s4317_s23 }
 0xa56   :  { %v2027_v34 = vpop.permute.xlu2 %2026  ;;  %2120 = vrot.lane.b32.xlu1 %v6841_v49, %s4318_s24 }
 0xa57   :  { %2426 = vst [vmem:[#allocation1] ss:$9 sm:$0xff] %v2027_v34 }
 0xa58   :  { %2112 = vrot.lane.b32.xlu0 %v6843_v13, %s4318_s24  ;;  %v7211_v37 = vpop.permute.xlu1 %2036 }
 0xa59   :  { %10450 = vst [vmem:[#allocation73_spill] sm:$0xff] %v7211_v37 }
 0xa5a   :  { %v7213_v42 = vpop.permute.xlu0 %2028 }
 0xa5b   :  { %2104 = vrot.lane.b32.xlu2 %v6841_v49, %s4317_s23 }
 0xa5e   :  { %v7217_v19 = vpop.permute.xlu2 %2032  ;;  %2126 = vrot.lane.b32.xlu1 %v6849_v23, %s4319_s25 }
 0xa5f   :  { %10451 = vst [vmem:[#allocation88_spill] sm:$0xff] %v7217_v19 }
 0xa60   :  { %2118 = vrot.lane.b32.xlu0 %v6851_v46, %s4318_s24  ;;  %v2043_v28 = vpop.permute.xlu1 %2042 }
 0xa61   :  { %2427 = vst [vmem:[#allocation1 + $0x1] ss:$9 sm:$0xff] %v2043_v28 }
 0xa62   :  { %v7223_v34 = vpop.permute.xlu0 %2034 }
 0xa63   :  { %10452 = vst [vmem:[#allocation103_spill] sm:$0xff] %v7223_v34  ;;  %2110 = vrot.lane.b32.xlu2 %v6849_v23, %s4318_s24 }
 0xa66   :  { %v7227_v43 = vpop.permute.xlu2 %2038  ;;  %2132 = vrot.lane.b32.xlu1 %v6859_v58, %s4319_s25 }
 0xa67   :  { %10453 = vst [vmem:[#allocation151_spill] sm:$0xff] %v7227_v43 }
 0xa68   :  { %2124 = vrot.lane.b32.xlu0 %v6835_v32, %s4319_s25  ;;  %v7233_v36 = vpop.permute.xlu1 %2048 }
 0xa69   :  { %10454 = vst [vmem:[#allocation19_spill] sm:$0xff] %v7233_v36 }
 0xa6a   :  { %v7235_v48 = vpop.permute.xlu0 %2040 }
 0xa6b   :  { %10455 = vst [vmem:[#allocation34_spill] sm:$0xff] %v7235_v48  ;;  %2116 = vrot.lane.b32.xlu2 %v6859_v58, %s4318_s24 }
 0xa6e   :  { %v7239_v28 = vpop.permute.xlu2 %2044  ;;  %2138 = vrot.lane.b32.xlu1 %v6827_v8, %s4320_s26 }
 0xa70   :  { %2130 = vrot.lane.b32.xlu0 %v6833_v60, %s4319_s25  ;;  %v7245_v31 = vpop.permute.xlu1 %2054 }
 0xa71   :  { %10456 = vst [vmem:[#allocation79_spill] sm:$0xff] %v7245_v31 }
 0xa72   :  { %v7247_v24 = vpop.permute.xlu0 %2046 }
 0xa73   :  { %2122 = vrot.lane.b32.xlu2 %v6827_v8, %s4319_s25 }
 0xa76   :  { %v7251_v18 = vpop.permute.xlu2 %2050  ;;  %2144 = vrot.lane.b32.xlu1 %v6843_v13, %s4320_s26 }
 0xa77   :  { %10457 = vst [vmem:[#allocation94_spill] sm:$0xff] %v7251_v18 }
 0xa78   :  { %2136 = vrot.lane.b32.xlu0 %v6841_v49, %s4319_s25  ;;  %v7257_v48 = vpop.permute.xlu1 %2060 }
 0xa7a   :  { %v7259_v52 = vpop.permute.xlu0 %2052 }
 0xa7b   :  { %10458 = vst [vmem:[#allocation109_spill] sm:$0xff] %v7259_v52  ;;  %2128 = vrot.lane.b32.xlu2 %v6843_v13, %s4319_s25 }
 0xa7e   :  { %v7263_v31 = vpop.permute.xlu2 %2056  ;;  %2150 = vrot.lane.b32.xlu1 %v6851_v46, %s4320_s26 }
 0xa7f   :  { %10459 = vst [vmem:[#allocation157_spill] sm:$0xff] %v7263_v31 }
 0xa80   :  { %2142 = vrot.lane.b32.xlu0 %v6849_v23, %s4320_s26  ;;  %v7269_v43 = vpop.permute.xlu1 %2066 }
 0xa81   :  { %10460 = vst [vmem:[#allocation24_spill] sm:$0xff] %v7269_v43 }
 0xa82   :  { %v2059_v30 = vpop.permute.xlu0 %2058 }
 0xa83   :  { %2134 = vrot.lane.b32.xlu2 %v6851_v46, %s4319_s25  ;;  %2428 = vst [vmem:[#allocation1 + $0x2] ss:$9 sm:$0xff] %v2059_v30 }
 0xa86   :  { %v7273_v9 = vpop.permute.xlu2 %2062  ;;  %2156 = vrot.lane.b32.xlu1 %v6835_v32, %s4304_s11 }
 0xa88   :  { %2148 = vrot.lane.b32.xlu0 %v6859_v58, %s4320_s26  ;;  %v7279_v31 = vpop.permute.xlu1 %2072 }
 0xa89   :  { %10461 = vst [vmem:[#allocation39_spill] sm:$0xff] %v7279_v31 }
 0xa8a   :  { %v7281_v21 = vpop.permute.xlu0 %2064 }
 0xa8b   :  { %10462 = vst [vmem:[#allocation84_spill] sm:$0xff] %v7281_v21  ;;  %2140 = vrot.lane.b32.xlu2 %v6835_v32, %s4320_s26 }
 0xa8e   :  { %v7285_v0 = vpop.permute.xlu2 %2068  ;;  %2162 = vrot.lane.b32.xlu1 %v6833_v60, %s4304_s11 }
 0xa8f   :  { %10463 = vst [vmem:[#allocation99_spill] sm:$0xff] %v7285_v0 }
 0xa90   :  { %2154 = vrot.lane.b32.xlu0 %v6827_v8, %s4304_s11  ;;  %v7291_v30 = vpop.permute.xlu1 %2078 }
 0xa92   :  { %v7293_v12 = vpop.permute.xlu0 %2070 }
 0xa93   :  { %10464 = vst [vmem:[#allocation114_spill] sm:$0xff] %v7293_v12  ;;  %2146 = vrot.lane.b32.xlu2 %v6833_v60, %s4320_s26 }
 0xa96   :  { %v2075_v31 = vpop.permute.xlu2 %2074  ;;  %2168 = vrot.lane.b32.xlu1 %v6841_v49, %s4304_s11 }
 0xa97   :  { %2429 = vst [vmem:[#allocation1 + $0x3] ss:$9 sm:$0xff] %v2075_v31 }
 0xa98   :  { %2160 = vrot.lane.b32.xlu0 %v6843_v13, %s4304_s11  ;;  %v7301_v41 = vpop.permute.xlu1 %2084 }
 0xa99   :  { %10465 = vst [vmem:[#allocation158_spill] sm:$0xff] %v7301_v41 }
 0xa9a   :  { %v7303_v10 = vpop.permute.xlu0 %2076 }
 0xa9b   :  { %2152 = vrot.lane.b32.xlu2 %v6841_v49, %s4320_s26 }
 0xa9e   :  { %v7307_v0 = vpop.permute.xlu2 %2080  ;;  %2174 = vrot.lane.b32.xlu1 %v6849_v23, %s4321_s27 }
 0xa9f   :  { %10466 = vst [vmem:[#allocation161_spill] sm:$0xff] %v7307_v0 }
 0xaa0   :  { %2166 = vrot.lane.b32.xlu0 %v6851_v46, %s4304_s11  ;;  %v2091_v12 = vpop.permute.xlu1 %2090 }
 0xaa1   :  { %2430 = vst [vmem:[#allocation1 + $0x4] ss:$9 sm:$0xff] %v2091_v12 }
 0xaa2   :  { %v7313_v31 = vpop.permute.xlu0 %2082 }
 0xaa3   :  { %10467 = vst [vmem:[#allocation170_spill] sm:$0xff] %v7313_v31  ;;  %2158 = vrot.lane.b32.xlu2 %v6849_v23, %s4304_s11 }
 0xaa6   :  { %v7317_v41 = vpop.permute.xlu2 %2086  ;;  %2180 = vrot.lane.b32.xlu1 %v6859_v58, %s4321_s27 }
 0xaa7   :  { %10468 = vst [vmem:[#allocation177_spill] sm:$0xff] %v7317_v41 }
 0xaa8   :  { %2172 = vrot.lane.b32.xlu0 %v6835_v32, %s4321_s27  ;;  %v7323_v52 = vpop.permute.xlu1 %2096 }
 0xaa9   :  { %10469 = vst [vmem:[#allocation180_spill] sm:$0xff] %v7323_v52 }
 0xaaa   :  { %v7325_v37 = vpop.permute.xlu0 %2088 }
 0xaab   :  { %10470 = vst [vmem:[#allocation189_spill] sm:$0xff] %v7325_v37  ;;  %2164 = vrot.lane.b32.xlu2 %v6859_v58, %s4304_s11 }
 0xaae   :  { %v7329_v12 = vpop.permute.xlu2 %2092  ;;  %2186 = vrot.lane.b32.xlu1 %v6827_v8, %s4322_s28 }
 0xab0   :  { %2178 = vrot.lane.b32.xlu0 %v6833_v60, %s4321_s27  ;;  %v7335_v41 = vpop.permute.xlu1 %2102 }
 0xab1   :  { %10471 = vst [vmem:[#allocation153_spill] sm:$0xff] %v7335_v41 }
 0xab2   :  { %v7337_v7 = vpop.permute.xlu0 %2094 }
 0xab3   :  { %2170 = vrot.lane.b32.xlu2 %v6827_v8, %s4321_s27 }
 0xab6   :  { %v7341_v4 = vpop.permute.xlu2 %2098  ;;  %2192 = vrot.lane.b32.xlu1 %v6843_v13, %s4322_s28 }
 0xab7   :  { %10472 = vst [vmem:[#allocation30_spill] sm:$0xff] %v7341_v4 }
 0xab8   :  { %2184 = vrot.lane.b32.xlu0 %v6841_v49, %s4321_s27  ;;  %v7347_v37 = vpop.permute.xlu1 %2108 }
 0xaba   :  { %v7349_v25 = vpop.permute.xlu0 %2100 }
 0xabb   :  { %10473 = vst [vmem:[#allocation53_spill] sm:$0xff] %v7349_v25  ;;  %2176 = vrot.lane.b32.xlu2 %v6843_v13, %s4321_s27 }
 0xabe   :  { %v7353_v41 = vpop.permute.xlu2 %2104  ;;  %2198 = vrot.lane.b32.xlu1 %v6851_v46, %s4322_s28 }
 0xabf   :  { %10474 = vst [vmem:[#allocation91_spill] sm:$0xff] %v7353_v41 }
 0xac0   :  { %2190 = vrot.lane.b32.xlu0 %v6849_v23, %s4322_s28  ;;  %v7359_v53 = vpop.permute.xlu1 %2114 }
 0xac1   :  { %10475 = vst [vmem:[#allocation106_spill] sm:$0xff] %v7359_v53 }
 0xac2   :  { %v2107_v44 = vpop.permute.xlu0 %2106 }
 0xac3   :  { %2182 = vrot.lane.b32.xlu2 %v6851_v46, %s4321_s27  ;;  %2431 = vst [vmem:[#allocation1 + $0x5] ss:$9 sm:$0xff] %v2107_v44 }
 0xac6   :  { %v7363_v26 = vpop.permute.xlu2 %2110  ;;  %2204 = vrot.lane.b32.xlu1 %v6835_v32, %s4323_s29 }
 0xac8   :  { %2196 = vrot.lane.b32.xlu0 %v6859_v58, %s4322_s28  ;;  %v7369_v41 = vpop.permute.xlu1 %2120 }
 0xac9   :  { %10476 = vst [vmem:[#allocation126_spill] sm:$0xff] %v7369_v41 }
 0xaca   :  { %v7371_v25 = vpop.permute.xlu0 %2112 }
 0xacb   :  { %10477 = vst [vmem:[#allocation21_spill] sm:$0xff] %v7371_v25  ;;  %2188 = vrot.lane.b32.xlu2 %v6835_v32, %s4322_s28 }
 0xace   :  { %v7375_v2 = vpop.permute.xlu2 %2116  ;;  %2210 = vrot.lane.b32.xlu1 %v6833_v60, %s4323_s29 }
 0xacf   :  { %10478 = vst [vmem:[#allocation36_spill] sm:$0xff] %v7375_v2 }
 0xad0   :  { %2202 = vrot.lane.b32.xlu0 %v6827_v8, %s4323_s29  ;;  %v7381_v44 = vpop.permute.xlu1 %2126 }
 0xad2   :  { %v7383_v53 = vpop.permute.xlu0 %2118 }
 0xad3   :  { %10479 = vst [vmem:[#allocation58_spill] sm:$0xff] %v7383_v53  ;;  %2194 = vrot.lane.b32.xlu2 %v6833_v60, %s4322_s28 }
 0xad6   :  { %v2123_v41 = vpop.permute.xlu2 %2122  ;;  %2216 = vrot.lane.b32.xlu1 %v6841_v49, %s4323_s29 }
 0xad7   :  { %2432 = vst [vmem:[#allocation1 + $0x6] ss:$9 sm:$0xff] %v2123_v41 }
 0xad8   :  { %2208 = vrot.lane.b32.xlu0 %v6843_v13, %s4323_s29  ;;  %v7391_v2 = vpop.permute.xlu1 %2132 }
 0xad9   :  { %10480 = vst [vmem:[#allocation97_spill] sm:$0xff] %v7391_v2 }
 0xada   :  { %v7393_v4 = vpop.permute.xlu0 %2124 }
 0xadb   :  { %2200 = vrot.lane.b32.xlu2 %v6841_v49, %s4322_s28 }
 0xade   :  { %v7397_v31 = vpop.permute.xlu2 %2128  ;;  %2222 = vrot.lane.b32.xlu1 %v6849_v23, %s4324_s30 }
 0xadf   :  { %10481 = vst [vmem:[#allocation112_spill] sm:$0xff] %v7397_v31 }
 0xae0   :  { %2214 = vrot.lane.b32.xlu0 %v6851_v46, %s4323_s29  ;;  %v2139_v53 = vpop.permute.xlu1 %2138 }
 0xae1   :  { %2433 = vst [vmem:[#allocation1 + $0x7] ss:$9 sm:$0xff] %v2139_v53 }
 0xae2   :  { %v7403_v41 = vpop.permute.xlu0 %2130 }
 0xae3   :  { %10482 = vst [vmem:[#allocation133_spill] sm:$0xff] %v7403_v41  ;;  %2206 = vrot.lane.b32.xlu2 %v6849_v23, %s4323_s29 }
 0xae6   :  { %v7407_v2 = vpop.permute.xlu2 %2134  ;;  %2228 = vrot.lane.b32.xlu1 %v6859_v58, %s4324_s30 }
 0xae7   :  { %10483 = vst [vmem:[#allocation27_spill] sm:$0xff] %v7407_v2 }
 0xae8   :  { %2220 = vrot.lane.b32.xlu0 %v6835_v32, %s4324_s30  ;;  %v7421_v53 = vpop.permute.xlu1 %2144 }
 0xae9   :  { %10485 = vst [vmem:[#allocation64_spill] sm:$0xff] %v7421_v53 }
 0xaea   :  { %v7413_v43 = vpop.permute.xlu0 %2136 }
 0xaeb   :  { %10484 = vst [vmem:[#allocation42_spill] sm:$0xff] %v7413_v43  ;;  %2212 = vrot.lane.b32.xlu2 %v6859_v58, %s4323_s29 }
 0xaee   :  { %v7417_v18 = vpop.permute.xlu2 %2140  ;;  %2234 = vrot.lane.b32.xlu1 %v6827_v8, %s4325_s2 }
 0xaf0   :  { %2226 = vrot.lane.b32.xlu0 %v6833_v60, %s4324_s30  ;;  %v7433_v43 = vpop.permute.xlu1 %2150 }
 0xaf1   :  { %10487 = vst [vmem:[#allocation117_spill] sm:$0xff] %v7433_v43 }
 0xaf2   :  { %v7425_v2 = vpop.permute.xlu0 %2142 }
 0xaf3   :  { %2218 = vrot.lane.b32.xlu2 %v6827_v8, %s4324_s30 }
 0xaf6   :  { %v7429_v41 = vpop.permute.xlu2 %2146  ;;  %2240 = vrot.lane.b32.xlu1 %v6843_v13, %s4325_s2 }
 0xaf7   :  { %10486 = vst [vmem:[#allocation102_spill] sm:$0xff] %v7429_v41  ;;  %v7449_v41 = vld [vmem:[#allocation1] sm:$0xff] }
 0xaf8   :  { %2232 = vrot.lane.b32.xlu0 %v6841_v49, %s4324_s30  ;;  %v7445_v17 = vpop.permute.xlu1 %2156 }
 0xafa   :  { %v7437_v34 = vpop.permute.xlu0 %2148 }
 0xafb   :  { %10488 = vst [vmem:[#allocation140_spill] sm:$0xff] %v7437_v34  ;;  %2224 = vrot.lane.b32.xlu2 %v6843_v13, %s4324_s30 }
 0xafe   :  { %v7441_v27 = vpop.permute.xlu2 %2152  ;;  %2246 = vrot.lane.b32.xlu1 %v6851_v46, %s4325_s2 }
 0xaff   :  { %10489 = vst [vmem:[#allocation33_spill] sm:$0xff] %v7441_v27 }
 0xb00   :  { %2238 = vrot.lane.b32.xlu0 %v6849_v23, %s4325_s2  ;;  %v7457_v27 = vpop.permute.xlu1 %2162 }
 0xb01   :  { %10490 = vst [vmem:[#allocation48_spill] sm:$0xff] %v7457_v27 }
 0xb02   :  { %v2155_v43 = vpop.permute.xlu0 %2154 }
 0xb03   :  { %2230 = vrot.lane.b32.xlu2 %v6851_v46, %s4324_s30  ;;  %2435 = vst [vmem:[#allocation1] ss:$9 sm:$0xff] %v2155_v43 }
 0xb06   :  { %v7453_v34 = vpop.permute.xlu2 %2158  ;;  %2252 = vrot.lane.b32.xlu1 %v6835_v32, %s9738_s3 }
 0xb08   :  { %2244 = vrot.lane.b32.xlu0 %v6859_v58, %s4325_s2  ;;  %v7469_v43 = vpop.permute.xlu1 %2168 }
 0xb09   :  { %10493 = vst [vmem:[#allocation121_spill] sm:$0xff] %v7469_v43 }
 0xb0a   :  { %v7461_v16 = vpop.permute.xlu0 %2160 }
 0xb0b   :  { %10491 = vst [vmem:[#allocation69_spill] sm:$0xff] %v7461_v16  ;;  %2236 = vrot.lane.b32.xlu2 %v6835_v32, %s4325_s2 }
 0xb0e   :  { %v7465_v63 = vpop.permute.xlu2 %2164  ;;  %2258 = vrot.lane.b32.xlu1 %v6833_v60, %s9738_s3 }
 0xb0f   :  { %10492 = vst [vmem:[#allocation108_spill] sm:$0xff] %v7465_v63 }
 0xb10   :  { %2250 = vrot.lane.b32.xlu0 %v6827_v8, %s9738_s3  ;;  %v7479_v11 = vpop.permute.xlu1 %2174 }
 0xb12   :  { %v7473_v29 = vpop.permute.xlu0 %2166 }
 0xb13   :  { %10494 = vst [vmem:[#allocation159_spill] sm:$0xff] %v7473_v29  ;;  %2242 = vrot.lane.b32.xlu2 %v6833_v60, %s4325_s2 }
 0xb16   :  { %v2171_v27 = vpop.permute.xlu2 %2170  ;;  %2264 = vrot.lane.b32.xlu1 %v6841_v49, %s9738_s3 }
 0xb17   :  { %2436 = vst [vmem:[#allocation1 + $0x1] ss:$9 sm:$0xff] %v2171_v27 }
 0xb18   :  { %2256 = vrot.lane.b32.xlu0 %v6843_v13, %s9738_s3  ;;  %v7491_v29 = vpop.permute.xlu1 %2180 }
 0xb19   :  { %10496 = vst [vmem:[#allocation168_spill] sm:$0xff] %v7491_v29 }
 0xb1a   :  { %v7483_v63 = vpop.permute.xlu0 %2172 }
 0xb1b   :  { %2248 = vrot.lane.b32.xlu2 %v6841_v49, %s4325_s2 }
 0xb1e   :  { %v7487_v43 = vpop.permute.xlu2 %2176  ;;  %2270 = vrot.lane.b32.xlu1 %v6849_v23, %s4327_s4 }
 0xb1f   :  { %10495 = vst [vmem:[#allocation164_spill] sm:$0xff] %v7487_v43 }
 0xb20   :  { %2262 = vrot.lane.b32.xlu0 %v6851_v46, %s9738_s3  ;;  %v2187_v16 = vpop.permute.xlu1 %2186 }
 0xb21   :  { %2437 = vst [vmem:[#allocation1 + $0x2] ss:$9 sm:$0xff] %v2187_v16 }
 0xb22   :  { %v7495_v27 = vpop.permute.xlu0 %2178 }
 0xb23   :  { %10497 = vst [vmem:[#allocation178_spill] sm:$0xff] %v7495_v27  ;;  %2254 = vrot.lane.b32.xlu2 %v6849_v23, %s9738_s3 }
 0xb26   :  { %v7499_v45 = vpop.permute.xlu2 %2182  ;;  %2276 = vrot.lane.b32.xlu1 %v6859_v58, %s4327_s4 }
 0xb27   :  { %10498 = vst [vmem:[#allocation183_spill] sm:$0xff] %v7499_v45 }
 0xb28   :  { %2268 = vrot.lane.b32.xlu0 %v6835_v32, %s4327_s4  ;;  %v7513_v27 = vpop.permute.xlu1 %2192 }
 0xb29   :  { %10500 = vst [vmem:[#allocation135_spill] sm:$0xff] %v7513_v27 }
 0xb2a   :  { %v7505_v43 = vpop.permute.xlu0 %2184 }
 0xb2b   :  { %10499 = vst [vmem:[#allocation187_spill] sm:$0xff] %v7505_v43  ;;  %2260 = vrot.lane.b32.xlu2 %v6859_v58, %s9738_s3  ;;  %s10505_s3 = smov 28  }
 0xb2e   :  { %v7509_v29 = vpop.permute.xlu2 %2188  ;;  %2282 = vrot.lane.b32.xlu1 %v6827_v8, %s4328_s5 }
 0xb30   :  { %2274 = vrot.lane.b32.xlu0 %v6833_v60, %s4327_s4  ;;  %v7525_v43 = vpop.permute.xlu1 %2198 }
 0xb31   :  { %10502 = vst [vmem:[#allocation60_spill] sm:$0xff] %v7525_v43 }
 0xb32   :  { %v7517_v45 = vpop.permute.xlu0 %2190 }
 0xb33   :  { %2266 = vrot.lane.b32.xlu2 %v6827_v8, %s4327_s4 }
 0xb36   :  { %v7521_v16 = vpop.permute.xlu2 %2194  ;;  %2288 = vrot.lane.b32.xlu1 %v6843_v13, %s4328_s5 }
 0xb37   :  { %10501 = vst [vmem:[#allocation45_spill] sm:$0xff] %v7521_v16 }
 0xb38   :  { %2280 = vrot.lane.b32.xlu0 %v6841_v49, %s4327_s4  ;;  %v7537_v31 = vpop.permute.xlu1 %2204 }
 0xb3a   :  { %v7529_v53 = vpop.permute.xlu0 %2196 }
 0xb3b   :  { %10503 = vst [vmem:[#allocation75_spill] sm:$0xff] %v7529_v53  ;;  %2272 = vrot.lane.b32.xlu2 %v6843_v13, %s4327_s4 }
 0xb3e   :  { %v7533_v27 = vpop.permute.xlu2 %2200  ;;  %2294 = vrot.lane.b32.xlu1 %v6851_v46, %s4328_s5 }
 0xb3f   :  { %10504 = vst [vmem:[#allocation119_spill] sm:$0xff] %v7533_v27 }
 0xb40   :  { %2286 = vrot.lane.b32.xlu0 %v6849_v23, %s4328_s5  ;;  %v7547_v53 = vpop.permute.xlu1 %2210 }
 0xb41   :  { %10506 = vst [vmem:[#allocation136_spill] sm:$0xff] %v7547_v53 }
 0xb42   :  { %v2203_v16 = vpop.permute.xlu0 %2202 }
 0xb43   :  { %2278 = vrot.lane.b32.xlu2 %v6851_v46, %s4327_s4  ;;  %2438 = vst [vmem:[#allocation1 + $0x3] ss:$9 sm:$0xff] %v2203_v16 }
 0xb46   :  { %v7543_v43 = vpop.permute.xlu2 %2206  ;;  %2300 = vrot.lane.b32.xlu1 %v6835_v32, %s10505_s3 }
 0xb48   :  { %2292 = vrot.lane.b32.xlu0 %v6859_v58, %s4328_s5  ;;  %v7559_v16 = vpop.permute.xlu1 %2216 }
 0xb49   :  { %10509 = vst [vmem:[#allocation66_spill] sm:$0xff] %v7559_v16 }
 0xb4a   :  { %v7551_v27 = vpop.permute.xlu0 %2208 }
 0xb4b   :  { %10507 = vst [vmem:[#allocation154_spill] sm:$0xff] %v7551_v27  ;;  %2284 = vrot.lane.b32.xlu2 %v6835_v32, %s4328_s5 }
 0xb4e   :  { %v7555_v25 = vpop.permute.xlu2 %2212  ;;  %2306 = vrot.lane.b32.xlu1 %v6833_v60, %s10505_s3 }
 0xb4f   :  { %10508 = vst [vmem:[#allocation51_spill] sm:$0xff] %v7555_v25 }
 0xb50   :  { %2298 = vrot.lane.b32.xlu0 %v6827_v8, %s10505_s3  ;;  %v7569_v27 = vpop.permute.xlu1 %2222 }
 0xb52   :  { %v7563_v52 = vpop.permute.xlu0 %2214 }
 0xb53   :  { %10510 = vst [vmem:[#allocation81_spill] sm:$0xff] %v7563_v52  ;;  %2290 = vrot.lane.b32.xlu2 %v6833_v60, %s4328_s5 }
 0xb56   :  { %v2219_v53 = vpop.permute.xlu2 %2218  ;;  %2312 = vrot.lane.b32.xlu1 %v6841_v49, %s10505_s3 }
 0xb57   :  { %2439 = vst [vmem:[#allocation1 + $0x4] ss:$9 sm:$0xff] %v2219_v53 }
 0xb58   :  { %2304 = vrot.lane.b32.xlu0 %v6843_v13, %s10505_s3  ;;  %v7581_v52 = vpop.permute.xlu1 %2228 }
 0xb59   :  { %10512 = vst [vmem:[#allocation143_spill] sm:$0xff] %v7581_v52 }
 0xb5a   :  { %v7573_v25 = vpop.permute.xlu0 %2220 }
 0xb5b   :  { %2296 = vrot.lane.b32.xlu2 %v6841_v49, %s4328_s5 }
 0xb5e   :  { %v7577_v16 = vpop.permute.xlu2 %2224  ;;  %2318 = vrot.lane.b32.xlu1 %v6849_v23, %s4330_s7 }
 0xb5f   :  { %10511 = vst [vmem:[#allocation125_spill] sm:$0xff] %v7577_v16 }
 0xb60   :  { %2310 = vrot.lane.b32.xlu0 %v6851_v46, %s10505_s3  ;;  %v2235_v21 = vpop.permute.xlu1 %2234 }
 0xb61   :  { %2440 = vst [vmem:[#allocation1 + $0x5] ss:$9 sm:$0xff] %v2235_v21 }
 0xb62   :  { %v7585_v53 = vpop.permute.xlu0 %2226 }
 0xb63   :  { %10513 = vst [vmem:[#allocation12_spill] sm:$0xff] %v7585_v53  ;;  %2302 = vrot.lane.b32.xlu2 %v6849_v23, %s10505_s3 }
 0xb66   :  { %v7589_v0 = vpop.permute.xlu2 %2230  ;;  %2324 = vrot.lane.b32.xlu1 %v6859_v58, %s4330_s7 }
 0xb67   :  { %10514 = vst [vmem:[#allocation57_spill] sm:$0xff] %v7589_v0 }
 0xb68   :  { %2316 = vrot.lane.b32.xlu0 %v6835_v32, %s4330_s7  ;;  %v7603_v53 = vpop.permute.xlu1 %2240 }
 0xb69   :  { %10516 = vst [vmem:[#allocation87_spill] sm:$0xff] %v7603_v53 }
 0xb6a   :  { %v7595_v16 = vpop.permute.xlu0 %2232 }
 0xb6b   :  { %10515 = vst [vmem:[#allocation72_spill] sm:$0xff] %v7595_v16  ;;  %2308 = vrot.lane.b32.xlu2 %v6859_v58, %s10505_s3 }
 0xb6e   :  { %v7599_v52 = vpop.permute.xlu2 %2236  ;;  %2330 = vrot.lane.b32.xlu1 %v6827_v8, %s4331_s8 }
 0xb70   :  { %2322 = vrot.lane.b32.xlu0 %v6833_v60, %s4330_s7  ;;  %v7617_v16 = vpop.permute.xlu1 %2246 }
 0xb71   :  { %10518 = vst [vmem:[#allocation150_spill] sm:$0xff] %v7617_v16 }
 0xb72   :  { %v7607_v0 = vpop.permute.xlu0 %2238 }
 0xb73   :  { %2314 = vrot.lane.b32.xlu2 %v6827_v8, %s4330_s7 }
 0xb76   :  { %v7611_v21 = vpop.permute.xlu2 %2242  ;;  %2336 = vrot.lane.b32.xlu1 %v6843_v13, %s4331_s8 }
 0xb77   :  { %10517 = vst [vmem:[#allocation132_spill] sm:$0xff] %v7611_v21 }
 0xb78   :  { %2328 = vrot.lane.b32.xlu0 %v6841_v49, %s4330_s7  ;;  %v7629_v21 = vpop.permute.xlu1 %2252 }
 0xb7a   :  { %v7619_v36 = vpop.permute.xlu0 %2244 }
 0xb7b   :  { %10519 = vst [vmem:[#allocation18_spill] sm:$0xff] %v7619_v36  ;;  %2320 = vrot.lane.b32.xlu2 %v6843_v13, %s4330_s7 }
 0xb7e   :  { %v7623_v53 = vpop.permute.xlu2 %2248  ;;  %2342 = vrot.lane.b32.xlu1 %v6851_v46, %s4331_s8 }
 0xb7f   :  { %10520 = vst [vmem:[#allocation63_spill] sm:$0xff] %v7623_v53 }
 0xb80   :  { %2334 = vrot.lane.b32.xlu0 %v6849_v23, %s4331_s8  ;;  %v7639_v53 = vpop.permute.xlu1 %2258 }
 0xb81   :  { %10521 = vst [vmem:[#allocation78_spill] sm:$0xff] %v7639_v53 }
 0xb82   :  { %v2251_v19 = vpop.permute.xlu0 %2250 }
 0xb83   :  { %2326 = vrot.lane.b32.xlu2 %v6851_v46, %s4330_s7  ;;  %2441 = vst [vmem:[#allocation1 + $0x6] ss:$9 sm:$0xff] %v2251_v19 }
 0xb86   :  { %v7633_v16 = vpop.permute.xlu2 %2254  ;;  %2348 = vrot.lane.b32.xlu1 %v6835_v32, %s10188_s6 }
 0xb88   :  { %2340 = vrot.lane.b32.xlu0 %v6859_v58, %s4331_s8  ;;  %v7651_v19 = vpop.permute.xlu1 %2264 }
 0xb89   :  { %10524 = vst [vmem:[#allocation156_spill] sm:$0xff] %v7651_v19 }
 0xb8a   :  { %v7641_v36 = vpop.permute.xlu0 %2256 }
 0xb8b   :  { %10522 = vst [vmem:[#allocation93_spill] sm:$0xff] %v7641_v36  ;;  %2332 = vrot.lane.b32.xlu2 %v6835_v32, %s4331_s8 }
 0xb8e   :  { %v7645_v40 = vpop.permute.xlu2 %2260  ;;  %2354 = vrot.lane.b32.xlu1 %v6833_v60, %s10188_s6 }
 0xb8f   :  { %10523 = vst [vmem:[#allocation134_spill] sm:$0xff] %v7645_v40 }
 0xb90   :  { %2346 = vrot.lane.b32.xlu0 %v6827_v8, %s10188_s6  ;;  %v7661_v40 = vpop.permute.xlu1 %2270 }
 0xb91   :  { %10526 = vst [vmem:[#allocation171_spill] sm:$0xff] %v7661_v40 }
 0xb92   :  { %v7653_v62 = vpop.permute.xlu0 %2262 }
 0xb93   :  { %10525 = vst [vmem:[#allocation165_spill] sm:$0xff] %v7653_v62  ;;  %2338 = vrot.lane.b32.xlu2 %v6833_v60, %s4331_s8 }
 0xb96   :  { %v2267_v53 = vpop.permute.xlu2 %2266  ;;  %2360 = vrot.lane.b32.xlu1 %v6841_v49, %s10188_s6 }
 0xb97   :  { %2442 = vst [vmem:[#allocation1 + $0x7] ss:$9 sm:$0xff] %v2267_v53 }
 0xb98   :  { %2352 = vrot.lane.b32.xlu0 %v6843_v13, %s10188_s6  ;;  %v7671_v19 = vpop.permute.xlu1 %2276 }
 0xb99   :  { %10527 = vst [vmem:[#allocation176_spill] sm:$0xff] %v7671_v19 }
 0xb9a   :  { %v7663_v36 = vpop.permute.xlu0 %2268 }
 0xb9b   :  { %2344 = vrot.lane.b32.xlu2 %v6841_v49, %s4331_s8 }
 0xb9e   :  { %2366 = vrot.lane.b32.xlu1 %v6849_v23, %s4333_s10  ;;  %v2443_v53 = vld [vmem:[#allocation1] sm:$0xff]  ;;  %v7685_v19 = vpop.permute.xlu2 %2272 }
 0xb9f   :  { %10530 = vst [vmem:[#allocation191_spill] sm:$0xff] %v7685_v19 }
 0xba0   :  { %2358 = vrot.lane.b32.xlu0 %v6851_v46, %s10188_s6  ;;  %v2283_v20 = vpop.permute.xlu1 %2282 }
 0xba1   :  { %2444 = vst [vmem:[#allocation1] ss:$9 sm:$0xff] %v2283_v20 }
 0xba2   :  { %v7673_v62 = vpop.permute.xlu0 %2274 }
 0xba3   :  { %10528 = vst [vmem:[#allocation184_spill] sm:$0xff] %v7673_v62  ;;  %2350 = vrot.lane.b32.xlu2 %v6849_v23, %s10188_s6 }
 0xba6   :  { %2372 = vrot.lane.b32.xlu1 %v6859_v58, %s4333_s10 }
 0xba8   :  { %2364 = vrot.lane.b32.xlu0 %v6835_v32, %s4333_s10  ;;  %v7691_v62 = vpop.permute.xlu1 %2288 }
 0xba9   :  { %10531 = vst [vmem:[#allocation192_spill] sm:$0xff] %v7691_v62 }
 0xbaa   :  { %v7681_v15 = vpop.permute.xlu0 %2280 }
 0xbab   :  { %10529 = vst [vmem:[#allocation190_spill] sm:$0xff] %v7681_v15  ;;  %2356 = vrot.lane.b32.xlu2 %v6859_v58, %s10188_s6  ;;  %v7697_v15 = vpop.permute.xlu2 %2278 }
 0xbac   :  { %10533 = vst [vmem:[#allocation194_spill] sm:$0xff] %v7697_v15 }
 0xbae   :  { %2378 = vrot.lane.b32.xlu1 %v6827_v8, %s4334_s9 }
 0xbb0   :  { %2370 = vrot.lane.b32.xlu0 %v6833_v60, %s4333_s10  ;;  %v7703_v20 = vpop.permute.xlu1 %2294 }
 0xbb1   :  { %10534 = vst [vmem:[#allocation195_spill] sm:$0xff] %v7703_v20 }
 0xbb2   :  { %v7693_v54 = vpop.permute.xlu0 %2286 }
 0xbb3   :  { %10532 = vst [vmem:[#allocation193_spill] sm:$0xff] %v7693_v54  ;;  %2362 = vrot.lane.b32.xlu2 %v6827_v8, %s4333_s10  ;;  %v7709_v62 = vpop.permute.xlu2 %2284 }
 0xbb6   :  { %2384 = vrot.lane.b32.xlu1 %v6843_v13, %s4334_s9 }
 0xbb8   :  { %2376 = vrot.lane.b32.xlu0 %v6841_v49, %s4333_s10  ;;  %v7715_v15 = vpop.permute.xlu1 %2300 }
 0xbba   :  { %v7705_v19 = vpop.permute.xlu0 %2292 }
 0xbbb   :  { %10535 = vst [vmem:[#allocation196_spill] sm:$0xff] %v7705_v19  ;;  %2368 = vrot.lane.b32.xlu2 %v6843_v13, %s4333_s10  ;;  %v7719_v20 = vpop.permute.xlu2 %2290 }
 0xbbc   :  { %10536 = vst [vmem:[#allocation197_spill] sm:$0xff] %v7719_v20 }
 0xbbe   :  { %2390 = vrot.lane.b32.xlu1 %v6851_v46, %s4334_s9 }
 0xbc0   :  { %2382 = vrot.lane.b32.xlu0 %v6849_v23, %s4334_s9  ;;  %v7725_v19 = vpop.permute.xlu1 %2306 }
 0xbc1   :  { %10537 = vst [vmem:[#allocation198_spill] sm:$0xff] %v7725_v19 }
 0xbc2   :  { %v2299_v33 = vpop.permute.xlu0 %2298 }
 0xbc3   :  { %2374 = vrot.lane.b32.xlu2 %v6851_v46, %s4333_s10  ;;  %2445 = vst [vmem:[#allocation1 + $0x1] ss:$9 sm:$0xff] %v2299_v33  ;;  %v7731_v54 = vpop.permute.xlu2 %2296 }
 0xbc4   :  { %10539 = vst [vmem:[#allocation200_spill] sm:$0xff] %v7731_v54 }
 0xbc6   :  { %2396 = vrot.lane.b32.xlu1 %v6835_v32, %s4305_s12 }
 0xbc8   :  { %2388 = vrot.lane.b32.xlu0 %v6859_v58, %s4334_s9  ;;  %v7737_v33 = vpop.permute.xlu1 %2312 }
 0xbc9   :  { %10540 = vst [vmem:[#allocation201_spill] sm:$0xff] %v7737_v33 }
 0xbca   :  { %v7727_v56 = vpop.permute.xlu0 %2304 }
 0xbcb   :  { %10538 = vst [vmem:[#allocation199_spill] sm:$0xff] %v7727_v56  ;;  %2380 = vrot.lane.b32.xlu2 %v6835_v32, %s4334_s9  ;;  %v7743_v19 = vpop.permute.xlu2 %2302 }
 0xbcc   :  { %10542 = vst [vmem:[#allocation203_spill] sm:$0xff] %v7743_v19 }
 0xbce   :  { %2402 = vrot.lane.b32.xlu1 %v6833_v60, %s4305_s12 }
 0xbd0   :  { %2394 = vrot.lane.b32.xlu0 %v6827_v8, %s4305_s12  ;;  %v7749_v54 = vpop.permute.xlu1 %2318 }
 0xbd1   :  { %10543 = vst [vmem:[#allocation204_spill] sm:$0xff] %v7749_v54 }
 0xbd2   :  { %v7739_v20 = vpop.permute.xlu0 %2310 }
 0xbd3   :  { %10541 = vst [vmem:[#allocation202_spill] sm:$0xff] %v7739_v20  ;;  %2386 = vrot.lane.b32.xlu2 %v6833_v60, %s4334_s9  ;;  %v7755_v8 = vpop.permute.xlu2 %2308 }
 0xbd4   :  { %10544 = vst [vmem:[#allocation205_spill] sm:$0xff] %v7755_v8 }
 0xbd6   :  { %2408 = vrot.lane.b32.xlu1 %v6841_v49, %s4305_s12 }
 0xbd8   :  { %2400 = vrot.lane.b32.xlu0 %v6843_v13, %s4305_s12  ;;  %v7759_v33 = vpop.permute.xlu1 %2324 }
 0xbd9   :  { %10545 = vst [vmem:[#allocation206_spill] sm:$0xff] %v7759_v33 }
 0xbda   :  { %v7751_v56 = vpop.permute.xlu0 %2316 }
 0xbdb   :  { %2392 = vrot.lane.b32.xlu2 %v6841_v49, %s4334_s9  ;;  %v2315_v60 = vpop.permute.xlu2 %2314 }
 0xbdc   :  { %2446 = vst [vmem:[#allocation1 + $0x2] ss:$9 sm:$0xff] %v2315_v60 }
 0xbe0   :  { %2406 = vrot.lane.b32.xlu0 %v6851_v46, %s4305_s12  ;;  %v2331_v13 = vpop.permute.xlu1 %2330 }
 0xbe1   :  { %2447 = vst [vmem:[#allocation1 + $0x3] ss:$9 sm:$0xff] %v2331_v13 }
 0xbe2   :  { %v7761_v20 = vpop.permute.xlu0 %2322 }
 0xbe3   :  { %10546 = vst [vmem:[#allocation207_spill] sm:$0xff] %v7761_v20  ;;  %2398 = vrot.lane.b32.xlu2 %v6849_v23, %s4305_s12  ;;  %v7769_v49 = vpop.permute.xlu2 %2320 }
 0xbe4   :  { %10548 = vst [vmem:[#allocation209_spill] sm:$0xff] %v7769_v49 }
 0xbe8   :  { %v7771_v8 = vpop.permute.xlu1 %2336 }
 0xbe9   :  { %10549 = vst [vmem:[#allocation210_spill] sm:$0xff] %v7771_v8  ;;  %v2740_v8 = vsel %vm866_vm0, %v7449_v41, -inf }
 0xbea   :  { %v7765_v54 = vpop.permute.xlu0 %2328 }
 0xbeb   :  { %10547 = vst [vmem:[#allocation208_spill] sm:$0xff] %v7765_v54  ;;  %2404 = vrot.lane.b32.xlu2 %v6859_v58, %s4305_s12  ;;  %v7775_v33 = vpop.permute.xlu2 %2326  ;;  %v2743_v54 = vsel %vm866_vm0, %v2443_v53, -inf }
 0xbec   :  { %10551 = vst [vmem:[#allocation212_spill] sm:$0xff] %v7775_v33 }
 0xbf0   :  { %v7777_v20 = vpop.permute.xlu1 %2342 }
 0xbf1   :  { %10552 = vst [vmem:[#allocation213_spill] sm:$0xff] %v7777_v20 }
 0xbf2   :  { %v7773_v46 = vpop.permute.xlu0 %2334 }
 0xbf3   :  { %10550 = vst [vmem:[#allocation211_spill] sm:$0xff] %v7773_v46  ;;  %v7781_v60 = vpop.permute.xlu2 %2332 }
 0xbf8   :  { %v7784_v13 = vpop.permute.xlu1 %2348 }
 0xbfa   :  { %v7779_v19 = vpop.permute.xlu0 %2340 }
 0xbfb   :  { %10553 = vst [vmem:[#allocation214_spill] sm:$0xff] %v7779_v19  ;;  %v7786_v49 = vpop.permute.xlu2 %2338 }
 0xbfc   :  { %10554 = vst [vmem:[#allocation215_spill] sm:$0xff] %v7786_v49 }
 0xc00   :  { %2744 = vmax.xlane.f32.xlu1 %v2743_v54  ;;  %v7790_v46 = vpop.permute.xlu1 %2354  ;;  %v2737_v54 = vsel %vm866_vm0, %v7205_v50, -inf }
 0xc01   :  { %10555 = vst [vmem:[#allocation216_spill] sm:$0xff] %v7790_v46 }
 0xc02   :  { %v2347_v58 = vpop.permute.xlu0 %2346 }
 0xc03   :  { %2448 = vst [vmem:[#allocation1 + $0x4] ss:$9 sm:$0xff] %v2347_v58  ;;  %v7794_v20 = vpop.permute.xlu2 %2344 }
 0xc04   :  { %10557 = vst [vmem:[#allocation218_spill] sm:$0xff] %v7794_v20 }
 0xc08   :  { %v7796_v19 = vpop.permute.xlu1 %2360 }
 0xc09   :  { %10558 = vst [vmem:[#allocation219_spill] sm:$0xff] %v7796_v19 }
 0xc0a   :  { %v7792_v33 = vpop.permute.xlu0 %2352  ;;  %2741 = vmax.xlane.f32.xlu0 %v2740_v8 }
 0xc0b   :  { %10556 = vst [vmem:[#allocation217_spill] sm:$0xff] %v7792_v33  ;;  %v7802_v58 = vpop.permute.xlu2 %2350 }
 0xc10   :  { %v7804_v49 = vpop.permute.xlu1 %2366 }
 0xc11   :  { %10560 = vst [vmem:[#allocation221_spill] sm:$0xff] %v7804_v49 }
 0xc12   :  { %v7798_v53 = vpop.permute.xlu0 %2358 }
 0xc13   :  { %10559 = vst [vmem:[#allocation220_spill] sm:$0xff] %v7798_v53  ;;  %v7806_v40 = vpop.permute.xlu2 %2356 }
 0xc14   :  { %2738 = vmax.xlane.f32.xlu2 %v2737_v54  ;;  %10561 = vst [vmem:[#allocation222_spill] sm:$0xff] %v7806_v40 }
 0xc18   :  { %v7808_v46 = vpop.permute.xlu1 %2372 }
 0xc1a   :  { %v2365_v41 = vpop.permute.xlu0 %2364 }
 0xc1b   :  { %v2363_v20 = vpop.permute.xlu2 %2362 }
 0xc1c   :  { %2449 = vst [vmem:[#allocation1 + $0x5] ss:$9 sm:$0xff] %v2363_v20  ;;  %v10591_v20 = vld [vmem:[#allocation191_spill] sm:$0xff] }
 0xc20   :  { %v2379_v19 = vpop.permute.xlu1 %2378 }
 0xc21   :  { %2450 = vst [vmem:[#allocation1 + $0x6] ss:$9 sm:$0xff] %v2379_v19 }
 0xc22   :  { %v7810_v8 = vpop.permute.xlu0 %2370 }
 0xc2a   :  { %v7812_v33 = vpop.permute.xlu0 %2376 }
 0xc32   :  { %v7814_v53 = vpop.permute.xlu0 %2382 }
 0xc3a   :  { %v7816_v50 = vpop.permute.xlu0 %2388 }
 0xc42   :  { %v2395_v54 = vpop.permute.xlu0 %2394 }
 0xc43   :  { %2451 = vst [vmem:[#allocation1 + $0x7] ss:$9 sm:$0xff] %v2395_v54  ;;  %v10596_v54 = vld [vmem:[#allocation217_spill] sm:$0xff] }
 0xc4a   :  { %v2452_v49 = vld [vmem:[#allocation1] sm:$0xff] }
 0xc4b   :  { %2453 = vst [vmem:[#allocation1] ss:$9 sm:$0xff] %v6835_v32  ;;  %v2746_v40 = vsel %vm866_vm0, %v2452_v49, -inf  ;;  %v7836_v49 = vpop.permute.xlu2 %2368 }
 0xc4c   :  { %2454 = vst [vmem:[#allocation1 + $0x1] ss:$9 sm:$0xff] %v6997_v51  ;;  %2747 = vmax.xlane.f32.xlu2 %v2746_v40  ;;  %v7838_v40 = vpop.permute.xlu1 %2384 }
 0xc4d   :  { %2455 = vst [vmem:[#allocation1 + $0x2] ss:$9 sm:$0xff] %v7031_v22  ;;  %v10571_v22 = vld [vmem:[#allocation138_spill] sm:$0xff] }
 0xc4e   :  { %2456 = vst [vmem:[#allocation1 + $0x3] ss:$9 sm:$0xff] %v7057_v5  ;;  %v10574_v5 = vld [vmem:[#allocation172_spill] sm:$0xff] }
 0xc4f   :  { %2457 = vst [vmem:[#allocation1 + $0x4] ss:$9 sm:$0xff] %v7075_v47  ;;  %v10576_v47 = vld [vmem:[#allocation88_spill] sm:$0xff] }
 0xc50   :  { %2458 = vst [vmem:[#allocation1 + $0x5] ss:$9 sm:$0xff] %v7121_v35 }
 0xc51   :  { %2459 = vst [vmem:[#allocation1 + $0x6] ss:$9 sm:$0xff] %v7147_v39  ;;  %v10580_v39 = vld [vmem:[#allocation180_spill] sm:$0xff] }
 0xc52   :  { %2460 = vst [vmem:[#allocation1 + $0x7] ss:$9 sm:$0xff] %v7165_v1 }
 0xc59   :  { %v2461_v19 = vld [vmem:[#allocation1] sm:$0xff] }
 0xc5a   :  { %2462 = vst [vmem:[#allocation1] ss:$9 sm:$0xff] %v7213_v42  ;;  %v2749_v32 = vsel %vm866_vm0, %v2461_v19, -inf  ;;  %v2401_v19 = vpop.permute.xlu0 %2400 }
 0xc5b   :  { %2463 = vst [vmem:[#allocation1 + $0x1] ss:$9 sm:$0xff] %v7239_v28  ;;  %2750 = vmax.xlane.f32.xlu0 %v2749_v32  ;;  %v10583_v28 = vld [vmem:[#allocation64_spill] sm:$0xff] }
 0xc5c   :  { %2464 = vst [vmem:[#allocation1 + $0x2] ss:$9 sm:$0xff] %v7257_v48 }
 0xc5d   :  { %2465 = vst [vmem:[#allocation1 + $0x3] ss:$9 sm:$0xff] %v7303_v10  ;;  %v10569_v10 = vld [vmem:[#allocation113_spill] sm:$0xff] }
 0xc5e   :  { %2466 = vst [vmem:[#allocation1 + $0x4] ss:$9 sm:$0xff] %v7329_v12  ;;  %v10585_v12 = vld [vmem:[#allocation164_spill] sm:$0xff] }
 0xc5f   :  { %2467 = vst [vmem:[#allocation1 + $0x5] ss:$9 sm:$0xff] %v7347_v37  ;;  %v7846_v37 = vpop.permute.xlu2 %2374 }
 0xc60   :  { %2468 = vst [vmem:[#allocation1 + $0x6] ss:$9 sm:$0xff] %v7393_v4  ;;  %v7851_v4 = vpop.permute.xlu1 %2390 }
 0xc61   :  { %2469 = vst [vmem:[#allocation1 + $0x7] ss:$9 sm:$0xff] %v7417_v18  ;;  %v10573_v18 = vld [vmem:[#allocation139_spill] sm:$0xff] }
 0xc67   :  { %v2381_v48 = vpop.permute.xlu2 %2380 }
 0xc68   :  { %v2470_v42 = vld [vmem:[#allocation1] sm:$0xff] }
 0xc69   :  { %2471 = vst [vmem:[#allocation1] ss:$9 sm:$0xff] %v7445_v17  ;;  %v2752_v1 = vsel %vm866_vm0, %v2470_v42, -inf  ;;  %v10597_v42 = vld [vmem:[#allocation146_spill] sm:$0xff] }
 0xc6a   :  { %2472 = vst [vmem:[#allocation1 + $0x1] ss:$9 sm:$0xff] %v7483_v63  ;;  %2753 = vmax.xlane.f32.xlu1 %v2752_v1  ;;  %v10578_v63 = vld [vmem:[#allocation84_spill] sm:$0xff]  ;;  %v10598_v1 = vld [vmem:[#allocation50_spill] sm:$0xff] }
 0xc6b   :  { %2473 = vst [vmem:[#allocation1 + $0x2] ss:$9 sm:$0xff] %v7509_v29 }
 0xc6c   :  { %2474 = vst [vmem:[#allocation1 + $0x3] ss:$9 sm:$0xff] %v7537_v31  ;;  %v10584_v31 = vld [vmem:[#allocation69_spill] sm:$0xff] }
 0xc6d   :  { %2475 = vst [vmem:[#allocation1 + $0x4] ss:$9 sm:$0xff] %v7573_v25  ;;  %v2397_v25 = vpop.permute.xlu1 %2396 }
 0xc6e   :  { %2476 = vst [vmem:[#allocation1 + $0x5] ss:$9 sm:$0xff] %v7599_v52  ;;  %v10567_v52 = vld [vmem:[#allocation221_spill] sm:$0xff] }
 0xc6f   :  { %2477 = vst [vmem:[#allocation1 + $0x6] ss:$9 sm:$0xff] %v7629_v21  ;;  %v10590_v21 = vld [vmem:[#allocation93_spill] sm:$0xff] }
 0xc70   :  { %2478 = vst [vmem:[#allocation1 + $0x7] ss:$9 sm:$0xff] %v7663_v36 }
 0xc77   :  { %v2479_v17 = vld [vmem:[#allocation1] sm:$0xff] }
 0xc78   :  { %2486 = vst [vmem:[#allocation1 + $0x6] ss:$9 sm:$0xff] %v2381_v48  ;;  %v2755_v35 = vsel %vm866_vm0, %v2479_v17, -inf  ;;  %v10599_v17 = vld [vmem:[#allocation71_spill] sm:$0xff]  ;;  %v10600_v48 = vld [vmem:[#allocation61_spill] sm:$0xff] }
 0xc79   :  { %2480 = vst [vmem:[#allocation1] ss:$9 sm:$0xff] %v7709_v62  ;;  %2756 = vmax.xlane.f32.xlu2 %v2755_v35  ;;  %v10601_v35 = vld [vmem:[#allocation145_spill] sm:$0xff] }
 0xc7a   :  { %2481 = vst [vmem:[#allocation1 + $0x1] ss:$9 sm:$0xff] %v7715_v15  ;;  %v10563_v15 = vld [vmem:[#allocation193_spill] sm:$0xff] }
 0xc7b   :  { %2482 = vst [vmem:[#allocation1 + $0x2] ss:$9 sm:$0xff] %v7751_v56 }
 0xc7c   :  { %2483 = vst [vmem:[#allocation1 + $0x3] ss:$9 sm:$0xff] %v7781_v60 }
 0xc7d   :  { %2484 = vst [vmem:[#allocation1 + $0x4] ss:$9 sm:$0xff] %v7784_v13  ;;  %v10592_v13 = vld [vmem:[#allocation192_spill] sm:$0xff] }
 0xc7e   :  { %2485 = vst [vmem:[#allocation1 + $0x5] ss:$9 sm:$0xff] %v2365_v41  ;;  %v10595_v41 = vld [vmem:[#allocation210_spill] sm:$0xff] }
 0xc7f   :  { %2487 = vst [vmem:[#allocation1 + $0x7] ss:$9 sm:$0xff] %v2397_v25  ;;  %v10602_v25 = vld [vmem:[#allocation163_spill] sm:$0xff] }
 0xc86   :  { %v2488_v36 = vld [vmem:[#allocation1] sm:$0xff] }
 0xc87   :  { %2489 = vst [vmem:[#allocation1] ss:$9 sm:$0xff] %v6849_v23  ;;  %v2758_v51 = vsel %vm866_vm0, %v2488_v36, -inf  ;;  %v10603_v36 = vld [vmem:[#allocation123_spill] sm:$0xff] }
 0xc88   :  { %2490 = vst [vmem:[#allocation1 + $0x1] ss:$9 sm:$0xff] %v7001_v3  ;;  %2759 = vmax.xlane.f32.xlu0 %v2758_v51  ;;  %v10565_v3 = vld [vmem:[#allocation204_spill] sm:$0xff]  ;;  %v10605_v51 = vld [vmem:[#allocation103_spill] sm:$0xff] }
 0xc89   :  { %2491 = vst [vmem:[#allocation1 + $0x2] ss:$9 sm:$0xff] %v7019_v59  ;;  %v10568_v59 = vld [vmem:[#allocation167_spill] sm:$0xff] }
 0xc8a   :  { %2492 = vst [vmem:[#allocation1 + $0x3] ss:$9 sm:$0xff] %v7065_v61  ;;  %v10575_v61 = vld [vmem:[#allocation144_spill] sm:$0xff] }
 0xc8b   :  { %2493 = vst [vmem:[#allocation1 + $0x4] ss:$9 sm:$0xff] %v7091_v14  ;;  %v10564_v14 = vld [vmem:[#allocation203_spill] sm:$0xff] }
 0xc8c   :  { %2494 = vst [vmem:[#allocation1 + $0x5] ss:$9 sm:$0xff] %v7109_v6  ;;  %v10579_v6 = vld [vmem:[#allocation161_spill] sm:$0xff] }
 0xc8d   :  { %2495 = vst [vmem:[#allocation1 + $0x6] ss:$9 sm:$0xff] %v7155_v38 }
 0xc8e   :  { %2496 = vst [vmem:[#allocation1 + $0x7] ss:$9 sm:$0xff] %v7181_v57  ;;  %v7879_v57 = vpop.permute.xlu2 %2386 }
 0xc95   :  { %v2497_v62 = vld [vmem:[#allocation1] sm:$0xff] }
 0xc96   :  { %2498 = vst [vmem:[#allocation1] ss:$9 sm:$0xff] %v7199_v55  ;;  %v7888_v38 = vpop.permute.xlu2 %2392  ;;  %v2761_v56 = vsel %vm866_vm0, %v2497_v62, -inf  ;;  %v10581_v55 = vld [vmem:[#allocation21_spill] sm:$0xff]  ;;  %v10606_v62 = vld [vmem:[#allocation94_spill] sm:$0xff] }
 0xc97   :  { %2499 = vst [vmem:[#allocation1 + $0x1] ss:$9 sm:$0xff] %v7247_v24  ;;  %2762 = vmax.xlane.f32.xlu1 %v2761_v56  ;;  %v10577_v24 = vld [vmem:[#allocation19_spill] sm:$0xff]  ;;  %v10613_v56 = vld [vmem:[#allocation48_spill] sm:$0xff] }
 0xc98   :  { %2500 = vst [vmem:[#allocation1 + $0x2] ss:$9 sm:$0xff] %v7273_v9 }
 0xc99   :  { %2501 = vst [vmem:[#allocation1 + $0x3] ss:$9 sm:$0xff] %v7291_v30 }
 0xc9a   :  { %2502 = vst [vmem:[#allocation1 + $0x4] ss:$9 sm:$0xff] %v7337_v7  ;;  %v10562_v7 = vld [vmem:[#allocation171_spill] sm:$0xff] }
 0xc9b   :  { %2503 = vst [vmem:[#allocation1 + $0x5] ss:$9 sm:$0xff] %v7363_v26  ;;  %v10570_v26 = vld [vmem:[#allocation56_spill] sm:$0xff] }
 0xc9c   :  { %2504 = vst [vmem:[#allocation1 + $0x6] ss:$9 sm:$0xff] %v7381_v44  ;;  %v10586_v44 = vld [vmem:[#allocation135_spill] sm:$0xff] }
 0xc9d   :  { %2505 = vst [vmem:[#allocation1 + $0x7] ss:$9 sm:$0xff] %v7425_v2 }
 0xca4   :  { %v7876_v23 = vld [vmem:[#allocation1] sm:$0xff] }
 0xca5   :  { %2507 = vst [vmem:[#allocation1] ss:$9 sm:$0xff] %v7453_v34  ;;  %v10582_v34 = vld [vmem:[#allocation112_spill] sm:$0xff] }
 0xca6   :  { %2508 = vst [vmem:[#allocation1 + $0x1] ss:$9 sm:$0xff] %v7479_v11  ;;  %v10572_v11 = vld [vmem:[#allocation54_spill] sm:$0xff] }
 0xca7   :  { %2509 = vst [vmem:[#allocation1 + $0x2] ss:$9 sm:$0xff] %v7517_v45  ;;  %v10566_v45 = vld [vmem:[#allocation211_spill] sm:$0xff] }
 0xca8   :  { %2510 = vst [vmem:[#allocation1 + $0x3] ss:$9 sm:$0xff] %v7543_v43  ;;  %v10587_v43 = vld [vmem:[#allocation154_spill] sm:$0xff] }
 0xca9   :  { %2511 = vst [vmem:[#allocation1 + $0x4] ss:$9 sm:$0xff] %v7569_v27  ;;  %v10588_v27 = vld [vmem:[#allocation125_spill] sm:$0xff] }
 0xcaa   :  { %2512 = vst [vmem:[#allocation1 + $0x5] ss:$9 sm:$0xff] %v7607_v0  ;;  %v2399_v0 = vpop.permute.xlu2 %2398 }
 0xcab   :  { %2513 = vst [vmem:[#allocation1 + $0x6] ss:$9 sm:$0xff] %v7633_v16  ;;  %v10589_v16 = vld [vmem:[#allocation87_spill] sm:$0xff] }
 0xcac   :  { %2514 = vst [vmem:[#allocation1 + $0x7] ss:$9 sm:$0xff] %v10562_v7  ;;  %v10607_v7 = vld [vmem:[#allocation24_spill] sm:$0xff] }
 0xcb3   :  { %v7890_v9 = vld [vmem:[#allocation1] sm:$0xff] }
 0xcb4   :  { %2516 = vst [vmem:[#allocation1] ss:$9 sm:$0xff] %v10563_v15  ;;  %v10608_v15 = vld [vmem:[#allocation170_spill] sm:$0xff] }
 0xcb5   :  { %2517 = vst [vmem:[#allocation1 + $0x1] ss:$9 sm:$0xff] %v10564_v14  ;;  %v10609_v14 = vld [vmem:[#allocation30_spill] sm:$0xff] }
 0xcb6   :  { %2518 = vst [vmem:[#allocation1 + $0x2] ss:$9 sm:$0xff] %v10565_v3  ;;  %v10610_v3 = vld [vmem:[#allocation106_spill] sm:$0xff] }
 0xcb7   :  { %2519 = vst [vmem:[#allocation1 + $0x3] ss:$9 sm:$0xff] %v10566_v45  ;;  %v10611_v45 = vld [vmem:[#allocation133_spill] sm:$0xff] }
 0xcb8   :  { %2520 = vst [vmem:[#allocation1 + $0x4] ss:$9 sm:$0xff] %v7802_v58  ;;  %v10594_v58 = vld [vmem:[#allocation209_spill] sm:$0xff] }
 0xcb9   :  { %2521 = vst [vmem:[#allocation1 + $0x5] ss:$9 sm:$0xff] %v10567_v52  ;;  %v10612_v52 = vld [vmem:[#allocation102_spill] sm:$0xff] }
 0xcba   :  { %2522 = vst [vmem:[#allocation1 + $0x6] ss:$9 sm:$0xff] %v7814_v53  ;;  %v10593_v53 = vld [vmem:[#allocation199_spill] sm:$0xff] }
 0xcbb   :  { %2523 = vst [vmem:[#allocation1 + $0x7] ss:$9 sm:$0xff] %v2399_v0 }
 0xcc2   :  { %v7900_v2 = vld [vmem:[#allocation1] sm:$0xff] }
 0xcc3   :  { %2525 = vst [vmem:[#allocation1] ss:$9 sm:$0xff] %v10568_v59  ;;  %v10614_v59 = vld [vmem:[#allocation178_spill] sm:$0xff] }
 0xcc4   :  { %2526 = vst [vmem:[#allocation1 + $0x1] ss:$9 sm:$0xff] %v10569_v10  ;;  %v10615_v10 = vld [vmem:[#allocation45_spill] sm:$0xff] }
 0xcc5   :  { %2527 = vst [vmem:[#allocation1 + $0x2] ss:$9 sm:$0xff] %v10570_v26  ;;  %v2764_v26 = vsel %vm866_vm0, %v7876_v23, -inf  ;;  %v10623_v23 = vld [vmem:[#allocation207_spill] sm:$0xff] }
 0xcc6   :  { %2528 = vst [vmem:[#allocation1 + $0x3] ss:$9 sm:$0xff] %v10571_v22  ;;  %v10616_v22 = vld [vmem:[#allocation136_spill] sm:$0xff]  ;;  %2765 = vmax.xlane.f32.xlu2 %v2764_v26  ;;  %v10655_v26 = vld [vmem:[#allocation173_spill] sm:$0xff] }
 0xcc7   :  { %2529 = vst [vmem:[#allocation1 + $0x4] ss:$9 sm:$0xff] %v10572_v11  ;;  %v10617_v11 = vld [vmem:[#allocation12_spill] sm:$0xff] }
 0xcc8   :  { %2530 = vst [vmem:[#allocation1 + $0x5] ss:$9 sm:$0xff] %v10573_v18  ;;  %v10618_v18 = vld [vmem:[#allocation132_spill] sm:$0xff] }
 0xcc9   :  { %2531 = vst [vmem:[#allocation1 + $0x6] ss:$9 sm:$0xff] %v10574_v5  ;;  %v10619_v5 = vld [vmem:[#allocation78_spill] sm:$0xff] }
 0xcca   :  { %2532 = vst [vmem:[#allocation1 + $0x7] ss:$9 sm:$0xff] %v10575_v61  ;;  %v10620_v61 = vld [vmem:[#allocation184_spill] sm:$0xff] }
 0xcd1   :  { %v7910_v29 = vld [vmem:[#allocation1] sm:$0xff] }
 0xcd2   :  { %2534 = vst [vmem:[#allocation1] ss:$9 sm:$0xff] %v10576_v47  ;;  %v2767_v47 = vsel %vm866_vm0, %v7890_v9, -inf  ;;  %v2773_v9 = vsel %vm866_vm0, %v7910_v29, -inf  ;;  %v10633_v29 = vld [vmem:[#allocation9_spill] sm:$0xff] }
 0xcd3   :  { %2535 = vst [vmem:[#allocation1 + $0x1] ss:$9 sm:$0xff] %v10577_v24  ;;  %2768 = vmax.xlane.f32.xlu0 %v2767_v47  ;;  %2774 = vmax.xlane.f32.xlu2 %v2773_v9  ;;  %v10662_v47 = vld [vmem:[#allocation28_spill] sm:$0xff]  ;;  %v10668_v9 = vld [vmem:[#allocation58_spill] sm:$0xff] }
 0xcd4   :  { %2536 = vst [vmem:[#allocation1 + $0x2] ss:$9 sm:$0xff] %v10578_v63  ;;  %v10621_v63 = vld [vmem:[#allocation197_spill] sm:$0xff] }
 0xcd5   :  { %2537 = vst [vmem:[#allocation1 + $0x3] ss:$9 sm:$0xff] %v10579_v6  ;;  %v10622_v6 = vld [vmem:[#allocation198_spill] sm:$0xff] }
 0xcd6   :  { %2538 = vst [vmem:[#allocation1 + $0x4] ss:$9 sm:$0xff] %v10580_v39  ;;  %v10624_v39 = vld [vmem:[#allocation215_spill] sm:$0xff] }
 0xcd7   :  { %2539 = vst [vmem:[#allocation1 + $0x5] ss:$9 sm:$0xff] %v10581_v55  ;;  %v2770_v55 = vsel %vm866_vm0, %v7900_v2, -inf  ;;  %v10629_v2 = vld [vmem:[#allocation76_spill] sm:$0xff] }
 0xcd8   :  { %2540 = vst [vmem:[#allocation1 + $0x6] ss:$9 sm:$0xff] %v10582_v34  ;;  %v10625_v34 = vld [vmem:[#allocation216_spill] sm:$0xff]  ;;  %2771 = vmax.xlane.f32.xlu1 %v2770_v55  ;;  %v10665_v55 = vld [vmem:[#allocation114_spill] sm:$0xff] }
 0xcd9   :  { %2541 = vst [vmem:[#allocation1 + $0x7] ss:$9 sm:$0xff] %v10583_v28  ;;  %v2403_v28 = vpop.permute.xlu1 %2402 }
 0xce0   :  { %v7920_v30 = vld [vmem:[#allocation1] sm:$0xff] }
 0xce1   :  { %2543 = vst [vmem:[#allocation1] ss:$9 sm:$0xff] %v10584_v31 }
 0xce2   :  { %2544 = vst [vmem:[#allocation1 + $0x1] ss:$9 sm:$0xff] %v10585_v12  ;;  %v10626_v12 = vld [vmem:[#allocation179_spill] sm:$0xff] }
 0xce3   :  { %2545 = vst [vmem:[#allocation1 + $0x2] ss:$9 sm:$0xff] %v10586_v44  ;;  %v10627_v44 = vld [vmem:[#allocation131_spill] sm:$0xff] }
 0xce4   :  { %2546 = vst [vmem:[#allocation1 + $0x3] ss:$9 sm:$0xff] %v10587_v43  ;;  %v10628_v43 = vld [vmem:[#allocation43_spill] sm:$0xff] }
 0xce5   :  { %2547 = vst [vmem:[#allocation1 + $0x4] ss:$9 sm:$0xff] %v10588_v27  ;;  %v10630_v27 = vld [vmem:[#allocation67_spill] sm:$0xff] }
 0xce6   :  { %2548 = vst [vmem:[#allocation1 + $0x5] ss:$9 sm:$0xff] %v10589_v16  ;;  %v10632_v16 = vld [vmem:[#allocation20_spill] sm:$0xff] }
 0xce7   :  { %2549 = vst [vmem:[#allocation1 + $0x6] ss:$9 sm:$0xff] %v10590_v21 }
 0xce8   :  { %2550 = vst [vmem:[#allocation1 + $0x7] ss:$9 sm:$0xff] %v10591_v20 }
 0xcef   :  { %v7930_v60 = vld [vmem:[#allocation1] sm:$0xff] }
 0xcf0   :  { %2552 = vst [vmem:[#allocation1] ss:$9 sm:$0xff] %v10592_v13  ;;  %v2779_v21 = vsel %vm866_vm0, %v7930_v60, -inf  ;;  %v10634_v13 = vld [vmem:[#allocation73_spill] sm:$0xff]  ;;  %v10641_v60 = vld [vmem:[#allocation140_spill] sm:$0xff] }
 0xcf1   :  { %2553 = vst [vmem:[#allocation1 + $0x1] ss:$9 sm:$0xff] %v10593_v53  ;;  %2780 = vmax.xlane.f32.xlu1 %v2779_v21  ;;  %v10635_v53 = vld [vmem:[#allocation109_spill] sm:$0xff]  ;;  %v10676_v21 = vld [vmem:[#allocation150_spill] sm:$0xff] }
 0xcf2   :  { %2554 = vst [vmem:[#allocation1 + $0x2] ss:$9 sm:$0xff] %v10594_v58  ;;  %v10636_v58 = vld [vmem:[#allocation99_spill] sm:$0xff] }
 0xcf3   :  { %2555 = vst [vmem:[#allocation1 + $0x3] ss:$9 sm:$0xff] %v10595_v41  ;;  %v10637_v41 = vld [vmem:[#allocation158_spill] sm:$0xff] }
 0xcf4   :  { %2556 = vst [vmem:[#allocation1 + $0x4] ss:$9 sm:$0xff] %v10596_v54  ;;  %v10639_v54 = vld [vmem:[#allocation36_spill] sm:$0xff] }
 0xcf5   :  { %2557 = vst [vmem:[#allocation1 + $0x5] ss:$9 sm:$0xff] %v7836_v49  ;;  %v10604_v49 = vld [vmem:[#allocation83_spill] sm:$0xff] }
 0xcf6   :  { %2558 = vst [vmem:[#allocation1 + $0x6] ss:$9 sm:$0xff] %v7838_v40 }
 0xcf7   :  { %2559 = vst [vmem:[#allocation1 + $0x7] ss:$9 sm:$0xff] %v2401_v19 }
 0xcfe   :  { %v7939_v32 = vld [vmem:[#allocation1] sm:$0xff] }
 0xcff   :  { %2561 = vst [vmem:[#allocation1] ss:$9 sm:$0xff] %v10597_v42  ;;  %v2782_v19 = vsel %vm866_vm0, %v7939_v32, -inf  ;;  %v10640_v42 = vld [vmem:[#allocation97_spill] sm:$0xff]  ;;  %v10647_v32 = vld [vmem:[#allocation18_spill] sm:$0xff] }
 0xd00   :  { %2562 = vst [vmem:[#allocation1 + $0x1] ss:$9 sm:$0xff] %v10598_v1  ;;  %2783 = vmax.xlane.f32.xlu2 %v2782_v19  ;;  %v10682_v19 = vld [vmem:[#allocation213_spill] sm:$0xff] }
 0xd01   :  { %2563 = vst [vmem:[#allocation1 + $0x2] ss:$9 sm:$0xff] %v10599_v17 }
 0xd02   :  { %2564 = vst [vmem:[#allocation1 + $0x3] ss:$9 sm:$0xff] %v10600_v48  ;;  %v10642_v48 = vld [vmem:[#allocation108_spill] sm:$0xff] }
 0xd03   :  { %2565 = vst [vmem:[#allocation1 + $0x4] ss:$9 sm:$0xff] %v10601_v35  ;;  %v10643_v35 = vld [vmem:[#allocation168_spill] sm:$0xff] }
 0xd04   :  { %2566 = vst [vmem:[#allocation1 + $0x5] ss:$9 sm:$0xff] %v10602_v25  ;;  %v10644_v25 = vld [vmem:[#allocation75_spill] sm:$0xff] }
 0xd05   :  { %2567 = vst [vmem:[#allocation1 + $0x6] ss:$9 sm:$0xff] %v10603_v36  ;;  %v10645_v36 = vld [vmem:[#allocation51_spill] sm:$0xff] }
 0xd06   :  { %2568 = vst [vmem:[#allocation1 + $0x7] ss:$9 sm:$0xff] %v10604_v49  ;;  %v10646_v49 = vld [vmem:[#allocation143_spill] sm:$0xff] }
 0xd0d   :  { %v2569_v40 = vld [vmem:[#allocation1] sm:$0xff] }
 0xd0e   :  { %2570 = vst [vmem:[#allocation1] ss:$9 sm:$0xff] %v10605_v51  ;;  %v2785_v1 = vsel %vm866_vm0, %v2569_v40, -inf  ;;  %v10648_v51 = vld [vmem:[#allocation134_spill] sm:$0xff] }
 0xd0f   :  { %2571 = vst [vmem:[#allocation1 + $0x1] ss:$9 sm:$0xff] %v10606_v62 }
 0xd10   :  { %2572 = vst [vmem:[#allocation1 + $0x2] ss:$9 sm:$0xff] %v10607_v7  ;;  %v10649_v7 = vld [vmem:[#allocation176_spill] sm:$0xff] }
 0xd11   :  { %2573 = vst [vmem:[#allocation1 + $0x3] ss:$9 sm:$0xff] %v10608_v15 }
 0xd12   :  { %2574 = vst [vmem:[#allocation1 + $0x4] ss:$9 sm:$0xff] %v10609_v14  ;;  %v10650_v14 = vld [vmem:[#allocation196_spill] sm:$0xff] }
 0xd13   :  { %2575 = vst [vmem:[#allocation1 + $0x5] ss:$9 sm:$0xff] %v10610_v3  ;;  %v10651_v3 = vld [vmem:[#allocation205_spill] sm:$0xff] }
 0xd14   :  { %2576 = vst [vmem:[#allocation1 + $0x6] ss:$9 sm:$0xff] %v10611_v45  ;;  %v10652_v45 = vld [vmem:[#allocation206_spill] sm:$0xff] }
 0xd15   :  { %2577 = vst [vmem:[#allocation1 + $0x7] ss:$9 sm:$0xff] %v10612_v52  ;;  %v10653_v52 = vld [vmem:[#allocation214_spill] sm:$0xff] }
 0xd1c   :  { %v2578_v0 = vld [vmem:[#allocation1] sm:$0xff] }
 0xd1d   :  { %2579 = vst [vmem:[#allocation1] ss:$9 sm:$0xff] %v10613_v56  ;;  %v2788_v62 = vsel %vm866_vm0, %v2578_v0, -inf  ;;  %v10654_v56 = vld [vmem:[#allocation222_spill] sm:$0xff]  ;;  %v2405_v0 = vpop.permute.xlu2 %2404 }
 0xd1e   :  { %2580 = vst [vmem:[#allocation1 + $0x1] ss:$9 sm:$0xff] %v10614_v59  ;;  %2789 = vmax.xlane.f32.xlu1 %v2788_v62 }
 0xd1f   :  { %2581 = vst [vmem:[#allocation1 + $0x2] ss:$9 sm:$0xff] %v10615_v10 }
 0xd20   :  { %2582 = vst [vmem:[#allocation1 + $0x3] ss:$9 sm:$0xff] %v10616_v22 }
 0xd21   :  { %2583 = vst [vmem:[#allocation1 + $0x4] ss:$9 sm:$0xff] %v10617_v11  ;;  %v10656_v11 = vld [vmem:[#allocation149_spill] sm:$0xff] }
 0xd22   :  { %2584 = vst [vmem:[#allocation1 + $0x5] ss:$9 sm:$0xff] %v10618_v18  ;;  %v10657_v18 = vld [vmem:[#allocation118_spill] sm:$0xff] }
 0xd23   :  { %2585 = vst [vmem:[#allocation1 + $0x6] ss:$9 sm:$0xff] %v10619_v5  ;;  %v10658_v5 = vld [vmem:[#allocation49_spill] sm:$0xff] }
 0xd24   :  { %2586 = vst [vmem:[#allocation1 + $0x7] ss:$9 sm:$0xff] %v10620_v61  ;;  %v10661_v61 = vld [vmem:[#allocation188_spill] sm:$0xff] }
 0xd2b   :  { %v2587_v24 = vld [vmem:[#allocation1] sm:$0xff] }
 0xd2c   :  { %2588 = vst [vmem:[#allocation1] ss:$9 sm:$0xff] %v10621_v63  ;;  %v2791_v15 = vsel %vm866_vm0, %v2587_v24, -inf }
 0xd2d   :  { %2589 = vst [vmem:[#allocation1 + $0x1] ss:$9 sm:$0xff] %v10622_v6  ;;  %2792 = vmax.xlane.f32.xlu2 %v2791_v15  ;;  %v10663_v6 = vld [vmem:[#allocation151_spill] sm:$0xff]  ;;  %v10693_v15 = vld [vmem:[#allocation157_spill] sm:$0xff] }
 0xd2e   :  { %2590 = vst [vmem:[#allocation1 + $0x2] ss:$9 sm:$0xff] %v10623_v23  ;;  %v10664_v23 = vld [vmem:[#allocation79_spill] sm:$0xff] }
 0xd2f   :  { %2591 = vst [vmem:[#allocation1 + $0x3] ss:$9 sm:$0xff] %v10624_v39 }
 0xd30   :  { %2592 = vst [vmem:[#allocation1 + $0x4] ss:$9 sm:$0xff] %v10625_v34  ;;  %v10666_v34 = vld [vmem:[#allocation177_spill] sm:$0xff] }
 0xd31   :  { %2593 = vst [vmem:[#allocation1 + $0x5] ss:$9 sm:$0xff] %v7810_v8  ;;  %v2776_v8 = vsel %vm866_vm0, %v7920_v30, -inf  ;;  %v10638_v30 = vld [vmem:[#allocation53_spill] sm:$0xff] }
 0xd32   :  { %2594 = vst [vmem:[#allocation1 + $0x6] ss:$9 sm:$0xff] %v7879_v57  ;;  %v10631_v57 = vld [vmem:[#allocation128_spill] sm:$0xff]  ;;  %2777 = vmax.xlane.f32.xlu0 %v2776_v8 }
 0xd33   :  { %2595 = vst [vmem:[#allocation1 + $0x7] ss:$9 sm:$0xff] %v2403_v28  ;;  %v10667_v28 = vld [vmem:[#allocation153_spill] sm:$0xff]  ;;  %v10673_v8 = vld [vmem:[#allocation60_spill] sm:$0xff] }
 0xd3a   :  { %v2596_v31 = vld [vmem:[#allocation1] sm:$0xff]  ;;  %2786 = vmax.xlane.f32.xlu0 %v2785_v1  ;;  %v2407_v1 = vpop.permute.xlu0 %2406 }
 0xd3b   :  { %2597 = vst [vmem:[#allocation1] ss:$9 sm:$0xff] %v10626_v12  ;;  %v2794_v59 = vsel %vm866_vm0, %v2596_v31, -inf  ;;  %v10669_v31 = vld [vmem:[#allocation27_spill] sm:$0xff]  ;;  %v10670_v12 = vld [vmem:[#allocation117_spill] sm:$0xff] }
 0xd3c   :  { %2598 = vst [vmem:[#allocation1 + $0x1] ss:$9 sm:$0xff] %v10627_v44 }
 0xd3d   :  { %2599 = vst [vmem:[#allocation1 + $0x2] ss:$9 sm:$0xff] %v10628_v43 }
 0xd3e   :  { %2600 = vst [vmem:[#allocation1 + $0x3] ss:$9 sm:$0xff] %v10629_v2  ;;  %v10671_v2 = vld [vmem:[#allocation159_spill] sm:$0xff] }
 0xd3f   :  { %2601 = vst [vmem:[#allocation1 + $0x4] ss:$9 sm:$0xff] %v10630_v27  ;;  %v10672_v27 = vld [vmem:[#allocation183_spill] sm:$0xff] }
 0xd40   :  { %2602 = vst [vmem:[#allocation1 + $0x5] ss:$9 sm:$0xff] %v10631_v57 }
 0xd41   :  { %2603 = vst [vmem:[#allocation1 + $0x6] ss:$9 sm:$0xff] %v10632_v16  ;;  %v10674_v16 = vld [vmem:[#allocation81_spill] sm:$0xff] }
 0xd42   :  { %2604 = vst [vmem:[#allocation1 + $0x7] ss:$9 sm:$0xff] %v10633_v29  ;;  %2795 = vmax.xlane.f32.xlu0 %v2794_v59  ;;  %v10675_v29 = vld [vmem:[#allocation57_spill] sm:$0xff] }
 0xd49   :  { %v2605_v20 = vld [vmem:[#allocation1] sm:$0xff] }
 0xd4a   :  { %2606 = vst [vmem:[#allocation1] ss:$9 sm:$0xff] %v10634_v13  ;;  %v2797_v22 = vsel %vm866_vm0, %v2605_v20, -inf  ;;  %v10677_v20 = vld [vmem:[#allocation165_spill] sm:$0xff]  ;;  %v10678_v13 = vld [vmem:[#allocation194_spill] sm:$0xff] }
 0xd4b   :  { %2607 = vst [vmem:[#allocation1 + $0x1] ss:$9 sm:$0xff] %v10635_v53  ;;  %2798 = vmax.xlane.f32.xlu1 %v2797_v22  ;;  %v10701_v22 = vld [vmem:[#allocation187_spill] sm:$0xff] }
 0xd4c   :  { %2608 = vst [vmem:[#allocation1 + $0x2] ss:$9 sm:$0xff] %v10636_v58 }
 0xd4d   :  { %2609 = vst [vmem:[#allocation1 + $0x3] ss:$9 sm:$0xff] %v10637_v41  ;;  %v10679_v41 = vld [vmem:[#allocation195_spill] sm:$0xff] }
 0xd4e   :  { %2610 = vst [vmem:[#allocation1 + $0x4] ss:$9 sm:$0xff] %v10638_v30  ;;  %v10680_v30 = vld [vmem:[#allocation202_spill] sm:$0xff] }
 0xd4f   :  { %2611 = vst [vmem:[#allocation1 + $0x5] ss:$9 sm:$0xff] %v10639_v54  ;;  %v10681_v54 = vld [vmem:[#allocation212_spill] sm:$0xff] }
 0xd50   :  { %2612 = vst [vmem:[#allocation1 + $0x6] ss:$9 sm:$0xff] %v10640_v42 }
 0xd51   :  { %2613 = vst [vmem:[#allocation1 + $0x7] ss:$9 sm:$0xff] %v10641_v60  ;;  %v10683_v60 = vld [vmem:[#allocation220_spill] sm:$0xff] }
 0xd58   :  { %v2614_v17 = vld [vmem:[#allocation1] sm:$0xff] }
 0xd59   :  { %2615 = vst [vmem:[#allocation1] ss:$9 sm:$0xff] %v10642_v48  ;;  %v2800_v24 = vsel %vm866_vm0, %v2614_v17, -inf  ;;  %v10684_v48 = vld [vmem:[#allocation160_spill] sm:$0xff] }
 0xd5a   :  { %2616 = vst [vmem:[#allocation1 + $0x1] ss:$9 sm:$0xff] %v10643_v35  ;;  %2801 = vmax.xlane.f32.xlu2 %v2800_v24  ;;  %v10708_v24 = vld [vmem:[#allocation200_spill] sm:$0xff] }
 0xd5b   :  { %2617 = vst [vmem:[#allocation1 + $0x2] ss:$9 sm:$0xff] %v10644_v25  ;;  %v10685_v25 = vld [vmem:[#allocation65_spill] sm:$0xff] }
 0xd5c   :  { %2618 = vst [vmem:[#allocation1 + $0x3] ss:$9 sm:$0xff] %v10645_v36  ;;  %v10686_v36 = vld [vmem:[#allocation155_spill] sm:$0xff] }
 0xd5d   :  { %2619 = vst [vmem:[#allocation1 + $0x4] ss:$9 sm:$0xff] %v10646_v49  ;;  %v10687_v49 = vld [vmem:[#allocation122_spill] sm:$0xff] }
 0xd5e   :  { %2620 = vst [vmem:[#allocation1 + $0x5] ss:$9 sm:$0xff] %v10647_v32  ;;  %v10688_v32 = vld [vmem:[#allocation11_spill] sm:$0xff] }
 0xd5f   :  { %2621 = vst [vmem:[#allocation1 + $0x6] ss:$9 sm:$0xff] %v10648_v51  ;;  %v10689_v51 = vld [vmem:[#allocation182_spill] sm:$0xff] }
 0xd60   :  { %2622 = vst [vmem:[#allocation1 + $0x7] ss:$9 sm:$0xff] %v10649_v7  ;;  %v10692_v7 = vld [vmem:[#allocation34_spill] sm:$0xff] }
 0xd67   :  { %v2623_v40 = vld [vmem:[#allocation1] sm:$0xff] }
 0xd68   :  { %2624 = vst [vmem:[#allocation1] ss:$9 sm:$0xff] %v10650_v14  ;;  %v2803_v39 = vsel %vm866_vm0, %v2623_v40, -inf  ;;  %v10694_v14 = vld [vmem:[#allocation39_spill] sm:$0xff] }
 0xd69   :  { %2625 = vst [vmem:[#allocation1 + $0x1] ss:$9 sm:$0xff] %v10651_v3  ;;  %2804 = vmax.xlane.f32.xlu0 %v2803_v39  ;;  %v10695_v3 = vld [vmem:[#allocation189_spill] sm:$0xff]  ;;  %v10711_v39 = vld [vmem:[#allocation218_spill] sm:$0xff] }
 0xd6a   :  { %2626 = vst [vmem:[#allocation1 + $0x2] ss:$9 sm:$0xff] %v10652_v45  ;;  %v10696_v45 = vld [vmem:[#allocation91_spill] sm:$0xff] }
 0xd6b   :  { %2627 = vst [vmem:[#allocation1 + $0x3] ss:$9 sm:$0xff] %v10653_v52  ;;  %v10697_v52 = vld [vmem:[#allocation126_spill] sm:$0xff] }
 0xd6c   :  { %2628 = vst [vmem:[#allocation1 + $0x4] ss:$9 sm:$0xff] %v10654_v56  ;;  %v10698_v56 = vld [vmem:[#allocation42_spill] sm:$0xff] }
 0xd6d   :  { %2629 = vst [vmem:[#allocation1 + $0x5] ss:$9 sm:$0xff] %v7808_v46  ;;  %v10659_v46 = vld [vmem:[#allocation82_spill] sm:$0xff] }
 0xd6e   :  { %2630 = vst [vmem:[#allocation1 + $0x6] ss:$9 sm:$0xff] %v7816_v50  ;;  %v10660_v50 = vld [vmem:[#allocation169_spill] sm:$0xff] }
 0xd6f   :  { %2631 = vst [vmem:[#allocation1 + $0x7] ss:$9 sm:$0xff] %v2405_v0  ;;  %v10699_v0 = vld [vmem:[#allocation33_spill] sm:$0xff] }
 0xd76   :  { %v2632_v10 = vld [vmem:[#allocation1] sm:$0xff] }
 0xd77   :  { %2633 = vst [vmem:[#allocation1] ss:$9 sm:$0xff] %v10655_v26  ;;  %v2806_v44 = vsel %vm866_vm0, %v2632_v10, -inf  ;;  %v10700_v10 = vld [vmem:[#allocation121_spill] sm:$0xff] }
 0xd78   :  { %2634 = vst [vmem:[#allocation1 + $0x1] ss:$9 sm:$0xff] %v10656_v11  ;;  %2807 = vmax.xlane.f32.xlu1 %v2806_v44  ;;  %v10702_v11 = vld [vmem:[#allocation119_spill] sm:$0xff]  ;;  %v8112_v44 = vld [vmem:[#allocation2 + $0x17] sm:$0x1] }
 0xd79   :  { %2635 = vst [vmem:[#allocation1 + $0x2] ss:$9 sm:$0xff] %v10657_v18  ;;  %v10703_v18 = vld [vmem:[#allocation66_spill] sm:$0xff] }
 0xd7a   :  { %2636 = vst [vmem:[#allocation1 + $0x3] ss:$9 sm:$0xff] %v10658_v5  ;;  %v10704_v5 = vld [vmem:[#allocation72_spill] sm:$0xff] }
 0xd7b   :  { %2637 = vst [vmem:[#allocation1 + $0x4] ss:$9 sm:$0xff] %v10659_v46  ;;  %v10705_v46 = vld [vmem:[#allocation63_spill] sm:$0xff] }
 0xd7c   :  { %2638 = vst [vmem:[#allocation1 + $0x5] ss:$9 sm:$0xff] %v10660_v50  ;;  %v10706_v50 = vld [vmem:[#allocation156_spill] sm:$0xff] }
 0xd7d   :  { %2639 = vst [vmem:[#allocation1 + $0x6] ss:$9 sm:$0xff] %v10661_v61  ;;  %v10707_v61 = vld [vmem:[#allocation190_spill] sm:$0xff] }
 0xd7e   :  { %2640 = vst [vmem:[#allocation1 + $0x7] ss:$9 sm:$0xff] %v10662_v47 }
 0xd85   :  { %v2641_v63 = vld [vmem:[#allocation1] sm:$0xff] }
 0xd86   :  { %2642 = vst [vmem:[#allocation1] ss:$9 sm:$0xff] %v10663_v6  ;;  %v2809_v57 = vsel %vm866_vm0, %v2641_v63, -inf  ;;  %v10709_v6 = vld [vmem:[#allocation201_spill] sm:$0xff] }
 0xd87   :  { %2643 = vst [vmem:[#allocation1 + $0x1] ss:$9 sm:$0xff] %v10664_v23  ;;  %2810 = vmax.xlane.f32.xlu2 %v2809_v57  ;;  %v10710_v23 = vld [vmem:[#allocation208_spill] sm:$0xff] }
 0xd88   :  { %2644 = vst [vmem:[#allocation1 + $0x2] ss:$9 sm:$0xff] %v10665_v55  ;;  %v10712_v55 = vld [vmem:[#allocation219_spill] sm:$0xff] }
 0xd89   :  { %2645 = vst [vmem:[#allocation1 + $0x3] ss:$9 sm:$0xff] %v10666_v34  ;;  %v2409_v34 = vpop.permute.xlu1 %2408 }
 0xd8a   :  { %2646 = vst [vmem:[#allocation1 + $0x4] ss:$9 sm:$0xff] %v10667_v28  ;;  %v8094_v28 = vld [vmem:[#allocation2 + $0x3] sm:$0x1] }
 0xd8b   :  { %2647 = vst [vmem:[#allocation1 + $0x5] ss:$9 sm:$0xff] %v10668_v9 }
 0xd8c   :  { %2648 = vst [vmem:[#allocation1 + $0x6] ss:$9 sm:$0xff] %v10669_v31 }
 0xd8d   :  { %2649 = vst [vmem:[#allocation1 + $0x7] ss:$9 sm:$0xff] %v10670_v12  ;;  %v8100_v12 = vld [vmem:[#allocation2 + $0xf] sm:$0x1] }
 0xd91   :  { %v8134_v57 = vpop.xlane.xlu1 %2744 }
 0xd92   :  { %10715 = vst [vmem:[#allocation203_spill] sm:$0xff] %v8134_v57 }
 0xd94   :  { %v2650_v43 = vld [vmem:[#allocation1] sm:$0xff] }
 0xd95   :  { %2651 = vst [vmem:[#allocation1] ss:$9 sm:$0xff] %v10671_v2  ;;  %v2812_v53 = vsel %vm866_vm0, %v2650_v43, -inf  ;;  %v8114_v43 = vld [vmem:[#allocation2 + $0xb] sm:$0x1]  ;;  %v8120_v2 = vpop.xlane.xlu2 %2738 }
 0xd96   :  { %2652 = vst [vmem:[#allocation1 + $0x1] ss:$9 sm:$0xff] %v10672_v27  ;;  %2813 = vmax.xlane.f32.xlu0 %v2812_v53  ;;  %v8124_v27 = vld [vmem:[#allocation2 + $0x13] sm:$0x1]  ;;  %v8158_v53 = vpop.xlane.xlu0 %2741 }
 0xd97   :  { %2653 = vst [vmem:[#allocation1 + $0x2] ss:$9 sm:$0xff] %v10673_v8 }
 0xd98   :  { %2654 = vst [vmem:[#allocation1 + $0x3] ss:$9 sm:$0xff] %v10674_v16  ;;  %v8136_v16 = vld [vmem:[#allocation2 + $0x1f] sm:$0x1] }
 0xd99   :  { %2655 = vst [vmem:[#allocation1 + $0x4] ss:$9 sm:$0xff] %v10675_v29 }
 0xd9a   :  { %2656 = vst [vmem:[#allocation1 + $0x5] ss:$9 sm:$0xff] %v10676_v21  ;;  %v8146_v21 = vpop.xlane.xlu1 %2753 }
 0xd9b   :  { %2657 = vst [vmem:[#allocation1 + $0x6] ss:$9 sm:$0xff] %v10677_v20 }
 0xd9c   :  { %2658 = vst [vmem:[#allocation1 + $0x7] ss:$9 sm:$0xff] %v10678_v13 }
 0xd9d   :  { %10713 = vst [vmem:[#allocation171_spill] sm:$0xff] %v8120_v2  ;;  %v8130_v8 = vpop.xlane.xlu2 %2747 }
 0xd9e   :  { %10714 = vst [vmem:[#allocation193_spill] sm:$0xff] %v8130_v8 }
 0xd9f   :  { %10717 = vst [vmem:[#allocation211_spill] sm:$0xff] %v8146_v21 }
 0xda0   :  { %10720 = vst [vmem:[#allocation113_spill] sm:$0xff] %v8158_v53 }
 0xda2   :  { %v8156_v13 = vpop.xlane.xlu1 %2762 }
 0xda3   :  { %v2659_v58 = vld [vmem:[#allocation1] sm:$0xff]  ;;  %10719 = vst [vmem:[#allocation167_spill] sm:$0xff] %v8156_v13 }
 0xda4   :  { %2660 = vst [vmem:[#allocation1] ss:$9 sm:$0xff] %v10679_v41  ;;  %v2815_v42 = vsel %vm866_vm0, %v2659_v58, -inf }
 0xda5   :  { %2661 = vst [vmem:[#allocation1 + $0x1] ss:$9 sm:$0xff] %v10680_v30  ;;  %2816 = vmax.xlane.f32.xlu1 %v2815_v42  ;;  %v8142_v29 = vpop.xlane.xlu2 %2756  ;;  %v8170_v30 = vpop.xlane.xlu0 %2750 }
 0xda6   :  { %2662 = vst [vmem:[#allocation1 + $0x2] ss:$9 sm:$0xff] %v10681_v54 }
 0xda7   :  { %2663 = vst [vmem:[#allocation1 + $0x3] ss:$9 sm:$0xff] %v10682_v19 }
 0xda8   :  { %2664 = vst [vmem:[#allocation1 + $0x4] ss:$9 sm:$0xff] %v10683_v60 }
 0xda9   :  { %2665 = vst [vmem:[#allocation1 + $0x5] ss:$9 sm:$0xff] %v7846_v37  ;;  %v10690_v37 = vld [vmem:[#allocation68_spill] sm:$0xff] }
 0xdaa   :  { %2666 = vst [vmem:[#allocation1 + $0x6] ss:$9 sm:$0xff] %v7851_v4  ;;  %v10691_v4 = vld [vmem:[#allocation98_spill] sm:$0xff]  ;;  %v8168_v41 = vpop.xlane.xlu1 %2771 }
 0xdab   :  { %2667 = vst [vmem:[#allocation1 + $0x7] ss:$9 sm:$0xff] %v2407_v1 }
 0xdac   :  { %10716 = vst [vmem:[#allocation204_spill] sm:$0xff] %v8142_v29 }
 0xdad   :  { %v8152_v20 = vpop.xlane.xlu2 %2765  ;;  %10722 = vst [vmem:[#allocation138_spill] sm:$0xff] %v8168_v41  ;;  %v8182_v42 = vpop.xlane.xlu0 %2759 }
 0xdae   :  { %10718 = vst [vmem:[#allocation221_spill] sm:$0xff] %v8152_v20 }
 0xdaf   :  { %10723 = vst [vmem:[#allocation54_spill] sm:$0xff] %v8170_v30 }
 0xdb0   :  { %10726 = vst [vmem:[#allocation144_spill] sm:$0xff] %v8182_v42 }
 0xdb2   :  { %v2668_v17 = vld [vmem:[#allocation1] sm:$0xff]  ;;  %v8180_v19 = vpop.xlane.xlu1 %2780 }
 0xdb3   :  { %2669 = vst [vmem:[#allocation1] ss:$9 sm:$0xff] %v10684_v48  ;;  %v2818_v35 = vsel %vm866_vm0, %v2668_v17, -inf }
 0xdb4   :  { %2670 = vst [vmem:[#allocation1 + $0x1] ss:$9 sm:$0xff] %v10685_v25  ;;  %2819 = vmax.xlane.f32.xlu2 %v2818_v35 }
 0xdb5   :  { %2671 = vst [vmem:[#allocation1 + $0x2] ss:$9 sm:$0xff] %v10686_v36  ;;  %v8164_v58 = vpop.xlane.xlu2 %2774  ;;  %v8194_v17 = vpop.xlane.xlu0 %2768 }
 0xdb6   :  { %2672 = vst [vmem:[#allocation1 + $0x3] ss:$9 sm:$0xff] %v10687_v49 }
 0xdb7   :  { %2673 = vst [vmem:[#allocation1 + $0x4] ss:$9 sm:$0xff] %v10688_v32 }
 0xdb8   :  { %2674 = vst [vmem:[#allocation1 + $0x5] ss:$9 sm:$0xff] %v10689_v51 }
 0xdb9   :  { %2675 = vst [vmem:[#allocation1 + $0x6] ss:$9 sm:$0xff] %v10690_v37 }
 0xdba   :  { %2676 = vst [vmem:[#allocation1 + $0x7] ss:$9 sm:$0xff] %v10691_v4  ;;  %v8192_v1 = vpop.xlane.xlu1 %2789 }
 0xdbb   :  { %10721 = vst [vmem:[#allocation56_spill] sm:$0xff] %v8164_v58 }
 0xdbc   :  { %10725 = vst [vmem:[#allocation172_spill] sm:$0xff] %v8180_v19 }
 0xdbd   :  { %v8176_v54 = vpop.xlane.xlu2 %2783  ;;  %10728 = vst [vmem:[#allocation19_spill] sm:$0xff] %v8192_v1  ;;  %v8206_v25 = vpop.xlane.xlu0 %2777 }
 0xdbe   :  { %10724 = vst [vmem:[#allocation139_spill] sm:$0xff] %v8176_v54 }
 0xdbf   :  { %10729 = vst [vmem:[#allocation84_spill] sm:$0xff] %v8194_v17 }
 0xdc0   :  { %10732 = vst [vmem:[#allocation21_spill] sm:$0xff] %v8206_v25 }
 0xdc1   :  { %v2677_v62 = vld [vmem:[#allocation1] sm:$0xff] }
 0xdc2   :  { %2678 = vst [vmem:[#allocation1] ss:$9 sm:$0xff] %v10692_v7  ;;  %v2821_v40 = vsel %vm866_vm0, %v2677_v62, -inf  ;;  %v8204_v35 = vpop.xlane.xlu1 %2798 }
 0xdc3   :  { %2679 = vst [vmem:[#allocation1 + $0x1] ss:$9 sm:$0xff] %v10693_v15  ;;  %2822 = vmax.xlane.f32.xlu0 %v2821_v40 }
 0xdc4   :  { %2680 = vst [vmem:[#allocation1 + $0x2] ss:$9 sm:$0xff] %v10694_v14 }
 0xdc5   :  { %2681 = vst [vmem:[#allocation1 + $0x3] ss:$9 sm:$0xff] %v10695_v3  ;;  %v8188_v60 = vpop.xlane.xlu2 %2792  ;;  %v8218_v32 = vpop.xlane.xlu0 %2786 }
 0xdc6   :  { %2682 = vst [vmem:[#allocation1 + $0x4] ss:$9 sm:$0xff] %v10696_v45 }
 0xdc7   :  { %2683 = vst [vmem:[#allocation1 + $0x5] ss:$9 sm:$0xff] %v10697_v52 }
 0xdc8   :  { %2684 = vst [vmem:[#allocation1 + $0x6] ss:$9 sm:$0xff] %v10698_v56 }
 0xdc9   :  { %2685 = vst [vmem:[#allocation1 + $0x7] ss:$9 sm:$0xff] %v10699_v0 }
 0xdca   :  { %10727 = vst [vmem:[#allocation88_spill] sm:$0xff] %v8188_v60 }
 0xdcb   :  { %10731 = vst [vmem:[#allocation180_spill] sm:$0xff] %v8204_v35 }
 0xdcc   :  { %10735 = vst [vmem:[#allocation69_spill] sm:$0xff] %v8218_v32 }
 0xdcd   :  { %v8200_v48 = vpop.xlane.xlu2 %2801  ;;  %v8230_v4 = vpop.xlane.xlu0 %2795 }
 0xdce   :  { %10730 = vst [vmem:[#allocation161_spill] sm:$0xff] %v8200_v48 }
 0xdcf   :  { %10738 = vst [vmem:[#allocation154_spill] sm:$0xff] %v8230_v4 }
 0xdd0   :  { %v2686_v59 = vld [vmem:[#allocation1] sm:$0xff] }
 0xdd1   :  { %2687 = vst [vmem:[#allocation1] ss:$9 sm:$0xff] %v10700_v10  ;;  %v2824_v26 = vsel %vm866_vm0, %v2686_v59, -inf }
 0xdd2   :  { %2688 = vst [vmem:[#allocation1 + $0x1] ss:$9 sm:$0xff] %v10701_v22  ;;  %2825 = vmax.xlane.f32.xlu1 %v2824_v26 }
 0xdd3   :  { %2689 = vst [vmem:[#allocation1 + $0x2] ss:$9 sm:$0xff] %v10702_v11 }
 0xdd4   :  { %2690 = vst [vmem:[#allocation1 + $0x3] ss:$9 sm:$0xff] %v10703_v18 }
 0xdd5   :  { %2691 = vst [vmem:[#allocation1 + $0x4] ss:$9 sm:$0xff] %v10704_v5 }
 0xdd6   :  { %2692 = vst [vmem:[#allocation1 + $0x5] ss:$9 sm:$0xff] %v10705_v46 }
 0xdd7   :  { %2693 = vst [vmem:[#allocation1 + $0x6] ss:$9 sm:$0xff] %v10706_v50 }
 0xdd8   :  { %2694 = vst [vmem:[#allocation1 + $0x7] ss:$9 sm:$0xff] %v10707_v61 }
 0xddc   :  { %v8242_v40 = vpop.xlane.xlu0 %2804 }
 0xddd   :  { %10741 = vst [vmem:[#allocation93_spill] sm:$0xff] %v8242_v40 }
 0xddf   :  { %v2695_v47 = vld [vmem:[#allocation1] sm:$0xff] }
 0xde0   :  { %2696 = vst [vmem:[#allocation1] ss:$9 sm:$0xff] %v10708_v24  ;;  %v2827_v63 = vsel %vm866_vm0, %v2695_v47, -inf }
 0xde1   :  { %2697 = vst [vmem:[#allocation1 + $0x1] ss:$9 sm:$0xff] %v10709_v6  ;;  %2828 = vmax.xlane.f32.xlu2 %v2827_v63 }
 0xde2   :  { %2698 = vst [vmem:[#allocation1 + $0x2] ss:$9 sm:$0xff] %v10710_v23 }
 0xde3   :  { %2699 = vst [vmem:[#allocation1 + $0x3] ss:$9 sm:$0xff] %v10711_v39 }
 0xde4   :  { %2700 = vst [vmem:[#allocation1 + $0x4] ss:$9 sm:$0xff] %v10712_v55 }
 0xde5   :  { %2701 = vst [vmem:[#allocation1 + $0x5] ss:$9 sm:$0xff] %v7812_v33  ;;  %v8104_v33 = vld [vmem:[#allocation2 + $0x7] sm:$0x1] }
 0xde6   :  { %2702 = vst [vmem:[#allocation1 + $0x6] ss:$9 sm:$0xff] %v7888_v38  ;;  %v8106_v38 = vld [vmem:[#allocation2 + $0x1b] sm:$0x1] }
 0xde7   :  { %2703 = vst [vmem:[#allocation1 + $0x7] ss:$9 sm:$0xff] %v2409_v34 }
 0xdeb   :  { %2849 = vrot.lane.b32.xlu1 %v8094_v28, %s4306_s13  ;;  %v8216_v49 = vpop.xlane.xlu1 %2807 }
 0xdec   :  { %10734 = vst [vmem:[#allocation64_spill] sm:$0xff] %v8216_v49 }
 0xdee   :  { %v2704_v9 = vld [vmem:[#allocation1] sm:$0xff] }
 0xdef   :  { %v2830_v31 = vsel %vm866_vm0, %v2704_v9, -inf  ;;  %3345 = vst [vmem:[#allocation1] ss:$9 sm:$0xff] %v8094_v28 }
 0xdf0   :  { %2831 = vmax.xlane.f32.xlu0 %v2830_v31 }
 0xdf3   :  { %2855 = vrot.lane.b32.xlu1 %v8100_v12, %s4306_s13 }
 0xdf9   :  { %2851 = vrot.lane.b32.xlu2 %v8104_v33, %s4306_s13 }
 0xdfa   :  { %v8212_v36 = vpop.xlane.xlu2 %2810 }
 0xdfb   :  { %2861 = vrot.lane.b32.xlu1 %v8106_v38, %s4306_s13  ;;  %10733 = vst [vmem:[#allocation112_spill] sm:$0xff] %v8212_v36 }
 0xe01   :  { %2859 = vrot.lane.b32.xlu2 %v8112_v44, %s4306_s13 }
 0xe03   :  { %2867 = vrot.lane.b32.xlu1 %v8104_v33, %s4307_s0 }
 0xe04   :  { %2853 = vrot.lane.b32.xlu0 %v8114_v43, %s4306_s13 }
 0xe09   :  { %2865 = vrot.lane.b32.xlu2 %v8094_v28, %s4307_s0  ;;  %v8252_v3 = vpop.xlane.xlu0 %2813 }
 0xe0a   :  { %10742 = vst [vmem:[#allocation191_spill] sm:$0xff] %v8252_v3 }
 0xe0b   :  { %2873 = vrot.lane.b32.xlu1 %v8124_v27, %s4307_s0 }
 0xe0c   :  { %2857 = vrot.lane.b32.xlu0 %v8124_v27, %s4306_s13 }
 0xe11   :  { %2871 = vrot.lane.b32.xlu2 %v8100_v12, %s4307_s0 }
 0xe13   :  { %2879 = vrot.lane.b32.xlu1 %v8136_v16, %s4307_s0 }
 0xe14   :  { %2863 = vrot.lane.b32.xlu0 %v8136_v16, %s4306_s13 }
 0xe18   :  { %v8228_v37 = vpop.xlane.xlu1 %2816 }
 0xe19   :  { %2877 = vrot.lane.b32.xlu2 %v8106_v38, %s4307_s0  ;;  %10737 = vst [vmem:[#allocation135_spill] sm:$0xff] %v8228_v37 }
 0xe1b   :  { %2885 = vrot.lane.b32.xlu1 %v8114_v43, %s4308_s14 }
 0xe1c   :  { %2869 = vrot.lane.b32.xlu0 %v8114_v43, %s4307_s0 }
 0xe21   :  { %2883 = vrot.lane.b32.xlu2 %v8104_v33, %s4308_s14 }
 0xe23   :  { %2891 = vrot.lane.b32.xlu1 %v8112_v44, %s4308_s14 }
 0xe24   :  { %2875 = vrot.lane.b32.xlu0 %v8112_v44, %s4307_s0 }
 0xe27   :  { %v8224_v51 = vpop.xlane.xlu2 %2819 }
 0xe28   :  { %10736 = vst [vmem:[#allocation164_spill] sm:$0xff] %v8224_v51 }
 0xe29   :  { %2889 = vrot.lane.b32.xlu2 %v8124_v27, %s4308_s14 }
 0xe2b   :  { %2897 = vrot.lane.b32.xlu1 %v8094_v28, %s4309_s15 }
 0xe2c   :  { %2881 = vrot.lane.b32.xlu0 %v8094_v28, %s4308_s14 }
 0xe31   :  { %2895 = vrot.lane.b32.xlu2 %v8136_v16, %s4308_s14 }
 0xe33   :  { %2903 = vrot.lane.b32.xlu1 %v8100_v12, %s4309_s15 }
 0xe34   :  { %2887 = vrot.lane.b32.xlu0 %v8100_v12, %s4308_s14 }
 0xe36   :  { %v8264_v56 = vpop.xlane.xlu0 %2822 }
 0xe37   :  { %10744 = vst [vmem:[#allocation199_spill] sm:$0xff] %v8264_v56 }
 0xe39   :  { %2901 = vrot.lane.b32.xlu2 %v8114_v43, %s4309_s15 }
 0xe3b   :  { %2909 = vrot.lane.b32.xlu1 %v8106_v38, %s4309_s15 }
 0xe3c   :  { %2893 = vrot.lane.b32.xlu0 %v8106_v38, %s4308_s14 }
 0xe41   :  { %2907 = vrot.lane.b32.xlu2 %v8112_v44, %s4309_s15 }
 0xe43   :  { %2915 = vrot.lane.b32.xlu1 %v8104_v33, %s4310_s16 }
 0xe44   :  { %2899 = vrot.lane.b32.xlu0 %v8104_v33, %s4309_s15 }
 0xe45   :  { %v8240_v7 = vpop.xlane.xlu1 %2825 }
 0xe46   :  { %10740 = vst [vmem:[#allocation87_spill] sm:$0xff] %v8240_v7 }
 0xe49   :  { %2913 = vrot.lane.b32.xlu2 %v8094_v28, %s4310_s16 }
 0xe4b   :  { %2921 = vrot.lane.b32.xlu1 %v8124_v27, %s4310_s16 }
 0xe4c   :  { %2905 = vrot.lane.b32.xlu0 %v8124_v27, %s4309_s15 }
 0xe51   :  { %2919 = vrot.lane.b32.xlu2 %v8100_v12, %s4310_s16 }
 0xe53   :  { %2927 = vrot.lane.b32.xlu1 %v8136_v16, %s4310_s16 }
 0xe54   :  { %2911 = vrot.lane.b32.xlu0 %v8136_v16, %s4309_s15  ;;  %v8238_v62 = vpop.xlane.xlu2 %2828 }
 0xe55   :  { %10739 = vst [vmem:[#allocation125_spill] sm:$0xff] %v8238_v62 }
 0xe59   :  { %2925 = vrot.lane.b32.xlu2 %v8106_v38, %s4310_s16 }
 0xe5b   :  { %2933 = vrot.lane.b32.xlu1 %v8114_v43, %s4311_s17 }
 0xe5c   :  { %2917 = vrot.lane.b32.xlu0 %v8114_v43, %s4310_s16  ;;  %v8250_v15 = vpop.permute.xlu2 %2851 }
 0xe5d   :  { %v2850_v14 = vpop.permute.xlu1 %2849 }
 0xe5e   :  { %3347 = vst [vmem:[#allocation1 + $0x1] ss:$9 sm:$0xff] %v2850_v14 }
 0xe61   :  { %2931 = vrot.lane.b32.xlu2 %v8104_v33, %s4311_s17 }
 0xe63   :  { %2939 = vrot.lane.b32.xlu1 %v8112_v44, %s4311_s17  ;;  %v8274_v10 = vpop.xlane.xlu0 %2831 }
 0xe64   :  { %2923 = vrot.lane.b32.xlu0 %v8112_v44, %s4310_s16  ;;  %v8260_v45 = vpop.permute.xlu2 %2859  ;;  %10746 = vst [vmem:[#allocation210_spill] sm:$0xff] %v8274_v10 }
 0xe65   :  { %10743 = vst [vmem:[#allocation192_spill] sm:$0xff] %v8260_v45  ;;  %v8262_v52 = vpop.permute.xlu1 %2855 }
 0xe69   :  { %2937 = vrot.lane.b32.xlu2 %v8124_v27, %s4311_s17 }
 0xe6b   :  { %2945 = vrot.lane.b32.xlu1 %v8094_v28, %s4312_s18 }
 0xe6c   :  { %2929 = vrot.lane.b32.xlu0 %v8094_v28, %s4311_s17  ;;  %v2866_v0 = vpop.permute.xlu2 %2865 }
 0xe6d   :  { %3349 = vst [vmem:[#allocation1 + $0x2] ss:$9 sm:$0xff] %v2866_v0  ;;  %v8272_v59 = vpop.permute.xlu1 %2861 }
 0xe6e   :  { %10745 = vst [vmem:[#allocation209_spill] sm:$0xff] %v8272_v59 }
 0xe71   :  { %2943 = vrot.lane.b32.xlu2 %v8136_v16, %s4311_s17 }
 0xe73   :  { %2951 = vrot.lane.b32.xlu1 %v8100_v12, %s4312_s18 }
 0xe74   :  { %2935 = vrot.lane.b32.xlu0 %v8100_v12, %s4311_s17  ;;  %v8282_v26 = vpop.permute.xlu2 %2871 }
 0xe75   :  { %v8284_v22 = vpop.permute.xlu1 %2867 }
 0xe76   :  { %v8286_v11 = vpop.permute.xlu0 %2853 }
 0xe79   :  { %2949 = vrot.lane.b32.xlu2 %v8114_v43, %s4312_s18 }
 0xe7b   :  { %2957 = vrot.lane.b32.xlu1 %v8106_v38, %s4312_s18 }
 0xe7c   :  { %2941 = vrot.lane.b32.xlu0 %v8106_v38, %s4311_s17  ;;  %v8294_v18 = vpop.permute.xlu2 %2877 }
 0xe7d   :  { %10747 = vst [vmem:[#allocation217_spill] sm:$0xff] %v8294_v18  ;;  %v8296_v5 = vpop.permute.xlu1 %2873 }
 0xe7e   :  { %10748 = vst [vmem:[#allocation146_spill] sm:$0xff] %v8296_v5  ;;  %v8298_v46 = vpop.permute.xlu0 %2857 }
 0xe7f   :  { %10749 = vst [vmem:[#allocation50_spill] sm:$0xff] %v8298_v46 }
 0xe81   :  { %2955 = vrot.lane.b32.xlu2 %v8112_v44, %s4312_s18 }
 0xe83   :  { %2963 = vrot.lane.b32.xlu1 %v8104_v33, %s4313_s19 }
 0xe84   :  { %2947 = vrot.lane.b32.xlu0 %v8104_v33, %s4312_s18  ;;  %v8306_v50 = vpop.permute.xlu2 %2883 }
 0xe85   :  { %v8308_v61 = vpop.permute.xlu1 %2879 }
 0xe86   :  { %10750 = vst [vmem:[#allocation71_spill] sm:$0xff] %v8308_v61  ;;  %v8310_v47 = vpop.permute.xlu0 %2863 }
 0xe87   :  { %10751 = vst [vmem:[#allocation61_spill] sm:$0xff] %v8310_v47 }
 0xe89   :  { %2961 = vrot.lane.b32.xlu2 %v8094_v28, %s4313_s19 }
 0xe8b   :  { %2969 = vrot.lane.b32.xlu1 %v8124_v27, %s4313_s19 }
 0xe8c   :  { %2953 = vrot.lane.b32.xlu0 %v8124_v27, %s4312_s18  ;;  %v8318_v24 = vpop.permute.xlu2 %2889 }
 0xe8d   :  { %10752 = vst [vmem:[#allocation145_spill] sm:$0xff] %v8318_v24  ;;  %v8320_v63 = vpop.permute.xlu1 %2885 }
 0xe8e   :  { %v8322_v6 = vpop.permute.xlu0 %2869 }
 0xe91   :  { %2967 = vrot.lane.b32.xlu2 %v8100_v12, %s4313_s19 }
 0xe93   :  { %2975 = vrot.lane.b32.xlu1 %v8136_v16, %s4313_s19 }
 0xe94   :  { %2959 = vrot.lane.b32.xlu0 %v8136_v16, %s4312_s18  ;;  %v8330_v23 = vpop.permute.xlu2 %2895 }
 0xe95   :  { %10753 = vst [vmem:[#allocation163_spill] sm:$0xff] %v8330_v23  ;;  %v8332_v39 = vpop.permute.xlu1 %2891 }
 0xe96   :  { %10754 = vst [vmem:[#allocation123_spill] sm:$0xff] %v8332_v39  ;;  %v8334_v55 = vpop.permute.xlu0 %2875 }
 0xe97   :  { %10755 = vst [vmem:[#allocation83_spill] sm:$0xff] %v8334_v55 }
 0xe99   :  { %2973 = vrot.lane.b32.xlu2 %v8106_v38, %s4313_s19 }
 0xe9b   :  { %2981 = vrot.lane.b32.xlu1 %v8114_v43, %s4314_s20 }
 0xe9c   :  { %2965 = vrot.lane.b32.xlu0 %v8114_v43, %s4313_s19  ;;  %v8342_v34 = vpop.permute.xlu2 %2901 }
 0xe9d   :  { %v2898_v9 = vpop.permute.xlu1 %2897 }
 0xe9e   :  { %v2882_v31 = vpop.permute.xlu0 %2881  ;;  %3353 = vst [vmem:[#allocation1 + $0x4] ss:$9 sm:$0xff] %v2898_v9 }
 0xe9f   :  { %3351 = vst [vmem:[#allocation1 + $0x3] ss:$9 sm:$0xff] %v2882_v31 }
 0xea1   :  { %2979 = vrot.lane.b32.xlu2 %v8104_v33, %s4314_s20 }
 0xea3   :  { %2987 = vrot.lane.b32.xlu1 %v8112_v44, %s4314_s20 }
 0xea4   :  { %2971 = vrot.lane.b32.xlu0 %v8112_v44, %s4313_s19  ;;  %v8350_v14 = vpop.permute.xlu2 %2907 }
 0xea5   :  { %10756 = vst [vmem:[#allocation103_spill] sm:$0xff] %v8350_v14  ;;  %v8352_v0 = vpop.permute.xlu1 %2903 }
 0xea6   :  { %10757 = vst [vmem:[#allocation94_spill] sm:$0xff] %v8352_v0  ;;  %v8354_v10 = vpop.permute.xlu0 %2887 }
 0xea9   :  { %2985 = vrot.lane.b32.xlu2 %v8124_v27, %s4314_s20 }
 0xeab   :  { %2993 = vrot.lane.b32.xlu1 %v8094_v28, %s4315_s21 }
 0xeac   :  { %2977 = vrot.lane.b32.xlu0 %v8094_v28, %s4314_s20  ;;  %v2914_v9 = vpop.permute.xlu2 %2913 }
 0xead   :  { %3355 = vst [vmem:[#allocation1 + $0x5] ss:$9 sm:$0xff] %v2914_v9  ;;  %v8362_v31 = vpop.permute.xlu1 %2909 }
 0xeae   :  { %10758 = vst [vmem:[#allocation24_spill] sm:$0xff] %v8362_v31  ;;  %v8364_v62 = vpop.permute.xlu0 %2893 }
 0xeaf   :  { %10759 = vst [vmem:[#allocation170_spill] sm:$0xff] %v8364_v62 }
 0xeb1   :  { %2991 = vrot.lane.b32.xlu2 %v8136_v16, %s4314_s20 }
 0xeb3   :  { %2999 = vrot.lane.b32.xlu1 %v8100_v12, %s4315_s21 }
 0xeb4   :  { %2983 = vrot.lane.b32.xlu0 %v8100_v12, %s4314_s20  ;;  %v8372_v56 = vpop.permute.xlu2 %2919 }
 0xeb5   :  { %10760 = vst [vmem:[#allocation30_spill] sm:$0xff] %v8372_v56  ;;  %v8374_v7 = vpop.permute.xlu1 %2915 }
 0xeb6   :  { %v8376_v51 = vpop.permute.xlu0 %2899 }
 0xeb9   :  { %2997 = vrot.lane.b32.xlu2 %v8114_v43, %s4315_s21 }
 0xebb   :  { %3005 = vrot.lane.b32.xlu1 %v8106_v38, %s4315_s21 }
 0xebc   :  { %2989 = vrot.lane.b32.xlu0 %v8106_v38, %s4314_s20  ;;  %v8384_v9 = vpop.permute.xlu2 %2925 }
 0xebd   :  { %10761 = vst [vmem:[#allocation106_spill] sm:$0xff] %v8384_v9  ;;  %v8386_v36 = vpop.permute.xlu1 %2921 }
 0xebe   :  { %10762 = vst [vmem:[#allocation133_spill] sm:$0xff] %v8386_v36  ;;  %v8388_v37 = vpop.permute.xlu0 %2905 }
 0xebf   :  { %10763 = vst [vmem:[#allocation102_spill] sm:$0xff] %v8388_v37 }
 0xec1   :  { %3003 = vrot.lane.b32.xlu2 %v8112_v44, %s4315_s21 }
 0xec3   :  { %3011 = vrot.lane.b32.xlu1 %v8104_v33, %s4316_s22 }
 0xec4   :  { %2995 = vrot.lane.b32.xlu0 %v8104_v33, %s4315_s21  ;;  %v8396_v3 = vpop.permute.xlu2 %2931 }
 0xec5   :  { %v8398_v49 = vpop.permute.xlu1 %2927 }
 0xec6   :  { %10764 = vst [vmem:[#allocation48_spill] sm:$0xff] %v8398_v49  ;;  %v8400_v35 = vpop.permute.xlu0 %2911 }
 0xec7   :  { %10765 = vst [vmem:[#allocation178_spill] sm:$0xff] %v8400_v35 }
 0xec9   :  { %3009 = vrot.lane.b32.xlu2 %v8094_v28, %s4316_s22 }
 0xecb   :  { %3017 = vrot.lane.b32.xlu1 %v8124_v27, %s4316_s22 }
 0xecc   :  { %3001 = vrot.lane.b32.xlu0 %v8124_v27, %s4315_s21  ;;  %v8408_v40 = vpop.permute.xlu2 %2937 }
 0xecd   :  { %10766 = vst [vmem:[#allocation45_spill] sm:$0xff] %v8408_v40  ;;  %v8410_v48 = vpop.permute.xlu1 %2933 }
 0xece   :  { %v8412_v4 = vpop.permute.xlu0 %2917 }
 0xed1   :  { %3015 = vrot.lane.b32.xlu2 %v8100_v12, %s4316_s22 }
 0xed3   :  { %3023 = vrot.lane.b32.xlu1 %v8136_v16, %s4316_s22 }
 0xed4   :  { %3007 = vrot.lane.b32.xlu0 %v8136_v16, %s4315_s21  ;;  %v8420_v32 = vpop.permute.xlu2 %2943 }
 0xed5   :  { %10767 = vst [vmem:[#allocation136_spill] sm:$0xff] %v8420_v32  ;;  %v8422_v60 = vpop.permute.xlu1 %2939 }
 0xed6   :  { %10768 = vst [vmem:[#allocation12_spill] sm:$0xff] %v8422_v60  ;;  %v8424_v54 = vpop.permute.xlu0 %2923 }
 0xed7   :  { %10769 = vst [vmem:[#allocation132_spill] sm:$0xff] %v8424_v54 }
 0xed9   :  { %3021 = vrot.lane.b32.xlu2 %v8106_v38, %s4316_s22 }
 0xedb   :  { %3029 = vrot.lane.b32.xlu1 %v8114_v43, %s4317_s23 }
 0xedc   :  { %3013 = vrot.lane.b32.xlu0 %v8114_v43, %s4316_s22  ;;  %v8432_v58 = vpop.permute.xlu2 %2949 }
 0xedd   :  { %v2946_v1 = vpop.permute.xlu1 %2945 }
 0xede   :  { %v2930_v19 = vpop.permute.xlu0 %2929  ;;  %3359 = vst [vmem:[#allocation1 + $0x7] ss:$9 sm:$0xff] %v2946_v1 }
 0xedf   :  { %3357 = vst [vmem:[#allocation1 + $0x6] ss:$9 sm:$0xff] %v2930_v19 }
 0xee1   :  { %3027 = vrot.lane.b32.xlu2 %v8104_v33, %s4317_s23 }
 0xee3   :  { %3035 = vrot.lane.b32.xlu1 %v8112_v44, %s4317_s23 }
 0xee4   :  { %3019 = vrot.lane.b32.xlu0 %v8112_v44, %s4316_s22  ;;  %v8440_v25 = vpop.permute.xlu2 %2955 }
 0xee5   :  { %10770 = vst [vmem:[#allocation78_spill] sm:$0xff] %v8440_v25  ;;  %v8442_v41 = vpop.permute.xlu1 %2951 }
 0xee6   :  { %10771 = vst [vmem:[#allocation184_spill] sm:$0xff] %v8442_v41  ;;  %v8444_v13 = vpop.permute.xlu0 %2935  ;;  %v8450_v19 = vld [vmem:[#allocation1] sm:$0xff] }
 0xee7   :  { %10772 = vst [vmem:[#allocation197_spill] sm:$0xff] %v8444_v13 }
 0xee9   :  { %3033 = vrot.lane.b32.xlu2 %v8124_v27, %s4317_s23 }
 0xeeb   :  { %3041 = vrot.lane.b32.xlu1 %v8094_v28, %s4318_s24 }
 0xeec   :  { %3025 = vrot.lane.b32.xlu0 %v8094_v28, %s4317_s23  ;;  %v2962_v1 = vpop.permute.xlu2 %2961 }
 0xeed   :  { %3361 = vst [vmem:[#allocation1] ss:$9 sm:$0xff] %v2962_v1  ;;  %v8454_v42 = vpop.permute.xlu1 %2957 }
 0xeee   :  { %10773 = vst [vmem:[#allocation198_spill] sm:$0xff] %v8454_v42  ;;  %v8456_v17 = vpop.permute.xlu0 %2941 }
 0xeef   :  { %10774 = vst [vmem:[#allocation207_spill] sm:$0xff] %v8456_v17 }
 0xef1   :  { %3039 = vrot.lane.b32.xlu2 %v8136_v16, %s4317_s23 }
 0xef3   :  { %3047 = vrot.lane.b32.xlu1 %v8100_v12, %s4318_s24 }
 0xef4   :  { %3031 = vrot.lane.b32.xlu0 %v8100_v12, %s4317_s23  ;;  %v8464_v8 = vpop.permute.xlu2 %2967 }
 0xef5   :  { %10775 = vst [vmem:[#allocation215_spill] sm:$0xff] %v8464_v8  ;;  %v8466_v20 = vpop.permute.xlu1 %2963 }
 0xef6   :  { %v8468_v29 = vpop.permute.xlu0 %2947 }
 0xef9   :  { %3045 = vrot.lane.b32.xlu2 %v8114_v43, %s4318_s24 }
 0xefb   :  { %3053 = vrot.lane.b32.xlu1 %v8106_v38, %s4318_s24 }
 0xefc   :  { %3037 = vrot.lane.b32.xlu0 %v8106_v38, %s4317_s23  ;;  %v8476_v1 = vpop.permute.xlu2 %2973 }
 0xefd   :  { %10776 = vst [vmem:[#allocation216_spill] sm:$0xff] %v8476_v1  ;;  %v8478_v30 = vpop.permute.xlu1 %2969 }
 0xefe   :  { %10777 = vst [vmem:[#allocation179_spill] sm:$0xff] %v8478_v30  ;;  %v8480_v57 = vpop.permute.xlu0 %2953 }
 0xeff   :  { %10778 = vst [vmem:[#allocation131_spill] sm:$0xff] %v8480_v57 }
 0xf01   :  { %3051 = vrot.lane.b32.xlu2 %v8112_v44, %s4318_s24 }
 0xf03   :  { %3059 = vrot.lane.b32.xlu1 %v8104_v33, %s4319_s25 }
 0xf04   :  { %3043 = vrot.lane.b32.xlu0 %v8104_v33, %s4318_s24  ;;  %v8488_v21 = vpop.permute.xlu2 %2979 }
 0xf05   :  { %v8490_v53 = vpop.permute.xlu1 %2975 }
 0xf06   :  { %10779 = vst [vmem:[#allocation43_spill] sm:$0xff] %v8490_v53  ;;  %v8492_v2 = vpop.permute.xlu0 %2959 }
 0xf07   :  { %10780 = vst [vmem:[#allocation76_spill] sm:$0xff] %v8492_v2 }
 0xf09   :  { %3057 = vrot.lane.b32.xlu2 %v8094_v28, %s4319_s25 }
 0xf0b   :  { %3065 = vrot.lane.b32.xlu1 %v8124_v27, %s4319_s25 }
 0xf0c   :  { %3049 = vrot.lane.b32.xlu0 %v8124_v27, %s4318_s24  ;;  %v8500_v32 = vpop.permute.xlu2 %2985 }
 0xf0d   :  { %10781 = vst [vmem:[#allocation67_spill] sm:$0xff] %v8500_v32  ;;  %v8502_v49 = vpop.permute.xlu1 %2981 }
 0xf0e   :  { %v8504_v35 = vpop.permute.xlu0 %2965 }
 0xf11   :  { %3063 = vrot.lane.b32.xlu2 %v8100_v12, %s4319_s25 }
 0xf13   :  { %3071 = vrot.lane.b32.xlu1 %v8136_v16, %s4319_s25 }
 0xf14   :  { %3055 = vrot.lane.b32.xlu0 %v8136_v16, %s4318_s24  ;;  %v8512_v53 = vpop.permute.xlu2 %2991 }
 0xf15   :  { %10782 = vst [vmem:[#allocation128_spill] sm:$0xff] %v8512_v53  ;;  %v8514_v2 = vpop.permute.xlu1 %2987 }
 0xf16   :  { %10783 = vst [vmem:[#allocation20_spill] sm:$0xff] %v8514_v2  ;;  %v8516_v23 = vpop.permute.xlu0 %2971 }
 0xf17   :  { %10784 = vst [vmem:[#allocation9_spill] sm:$0xff] %v8516_v23 }
 0xf19   :  { %3069 = vrot.lane.b32.xlu2 %v8106_v38, %s4319_s25 }
 0xf1b   :  { %3077 = vrot.lane.b32.xlu1 %v8114_v43, %s4320_s26 }
 0xf1c   :  { %3061 = vrot.lane.b32.xlu0 %v8114_v43, %s4319_s25  ;;  %v8524_v61 = vpop.permute.xlu2 %2997 }
 0xf1d   :  { %v2994_v47 = vpop.permute.xlu1 %2993 }
 0xf1e   :  { %v2978_v1 = vpop.permute.xlu0 %2977  ;;  %3363 = vst [vmem:[#allocation1 + $0x2] ss:$9 sm:$0xff] %v2994_v47 }
 0xf1f   :  { %3362 = vst [vmem:[#allocation1 + $0x1] ss:$9 sm:$0xff] %v2978_v1 }
 0xf21   :  { %3075 = vrot.lane.b32.xlu2 %v8104_v33, %s4320_s26 }
 0xf23   :  { %3083 = vrot.lane.b32.xlu1 %v8112_v44, %s4320_s26 }
 0xf24   :  { %3067 = vrot.lane.b32.xlu0 %v8112_v44, %s4319_s25  ;;  %v8532_v53 = vpop.permute.xlu2 %3003 }
 0xf25   :  { %10785 = vst [vmem:[#allocation73_spill] sm:$0xff] %v8532_v53  ;;  %v8534_v42 = vpop.permute.xlu1 %2999 }
 0xf26   :  { %10786 = vst [vmem:[#allocation109_spill] sm:$0xff] %v8534_v42  ;;  %v8536_v17 = vpop.permute.xlu0 %2983 }
 0xf27   :  { %10787 = vst [vmem:[#allocation99_spill] sm:$0xff] %v8536_v17 }
 0xf29   :  { %3081 = vrot.lane.b32.xlu2 %v8124_v27, %s4320_s26 }
 0xf2b   :  { %3089 = vrot.lane.b32.xlu1 %v8094_v28, %s4304_s11 }
 0xf2c   :  { %3073 = vrot.lane.b32.xlu0 %v8094_v28, %s4320_s26  ;;  %v3010_v47 = vpop.permute.xlu2 %3009 }
 0xf2d   :  { %3364 = vst [vmem:[#allocation1 + $0x3] ss:$9 sm:$0xff] %v3010_v47  ;;  %v8544_v1 = vpop.permute.xlu1 %3005 }
 0xf2e   :  { %10788 = vst [vmem:[#allocation158_spill] sm:$0xff] %v8544_v1  ;;  %v8546_v9 = vpop.permute.xlu0 %2989 }
 0xf2f   :  { %10789 = vst [vmem:[#allocation53_spill] sm:$0xff] %v8546_v9 }
 0xf31   :  { %3087 = vrot.lane.b32.xlu2 %v8136_v16, %s4320_s26 }
 0xf33   :  { %3095 = vrot.lane.b32.xlu1 %v8100_v12, %s4304_s11 }
 0xf34   :  { %3079 = vrot.lane.b32.xlu0 %v8100_v12, %s4320_s26  ;;  %v8554_v31 = vpop.permute.xlu2 %3015 }
 0xf35   :  { %10790 = vst [vmem:[#allocation36_spill] sm:$0xff] %v8554_v31  ;;  %v8556_v62 = vpop.permute.xlu1 %3011 }
 0xf36   :  { %v8558_v18 = vpop.permute.xlu0 %2995 }
 0xf39   :  { %3093 = vrot.lane.b32.xlu2 %v8114_v43, %s4304_s11 }
 0xf3b   :  { %3101 = vrot.lane.b32.xlu1 %v8106_v38, %s4304_s11 }
 0xf3c   :  { %3085 = vrot.lane.b32.xlu0 %v8106_v38, %s4320_s26  ;;  %v8566_v47 = vpop.permute.xlu2 %3021 }
 0xf3d   :  { %10791 = vst [vmem:[#allocation97_spill] sm:$0xff] %v8566_v47  ;;  %v8568_v1 = vpop.permute.xlu1 %3017 }
 0xf3e   :  { %10792 = vst [vmem:[#allocation140_spill] sm:$0xff] %v8568_v1  ;;  %v8570_v9 = vpop.permute.xlu0 %3001 }
 0xf3f   :  { %10793 = vst [vmem:[#allocation108_spill] sm:$0xff] %v8570_v9 }
 0xf41   :  { %3099 = vrot.lane.b32.xlu2 %v8112_v44, %s4304_s11 }
 0xf43   :  { %3107 = vrot.lane.b32.xlu1 %v8104_v33, %s4321_s27 }
 0xf44   :  { %3091 = vrot.lane.b32.xlu0 %v8104_v33, %s4304_s11  ;;  %v8578_v59 = vpop.permute.xlu2 %3027 }
 0xf45   :  { %v8580_v53 = vpop.permute.xlu1 %3023 }
 0xf46   :  { %10794 = vst [vmem:[#allocation168_spill] sm:$0xff] %v8580_v53  ;;  %v8582_v2 = vpop.permute.xlu0 %3007 }
 0xf47   :  { %10795 = vst [vmem:[#allocation75_spill] sm:$0xff] %v8582_v2 }
 0xf49   :  { %3105 = vrot.lane.b32.xlu2 %v8094_v28, %s4321_s27 }
 0xf4b   :  { %3113 = vrot.lane.b32.xlu1 %v8124_v27, %s4321_s27 }
 0xf4c   :  { %3097 = vrot.lane.b32.xlu0 %v8124_v27, %s4304_s11  ;;  %v8590_v47 = vpop.permute.xlu2 %3033 }
 0xf4d   :  { %10796 = vst [vmem:[#allocation51_spill] sm:$0xff] %v8590_v47  ;;  %v8592_v23 = vpop.permute.xlu1 %3029 }
 0xf4e   :  { %v8594_v25 = vpop.permute.xlu0 %3013 }
 0xf51   :  { %3111 = vrot.lane.b32.xlu2 %v8100_v12, %s4321_s27 }
 0xf53   :  { %3119 = vrot.lane.b32.xlu1 %v8136_v16, %s4321_s27 }
 0xf54   :  { %3103 = vrot.lane.b32.xlu0 %v8136_v16, %s4304_s11  ;;  %v8602_v53 = vpop.permute.xlu2 %3039  ;;  %s10818_s11 = smov 40  }
 0xf55   :  { %10797 = vst [vmem:[#allocation143_spill] sm:$0xff] %v8602_v53  ;;  %v8604_v2 = vpop.permute.xlu1 %3035 }
 0xf56   :  { %10798 = vst [vmem:[#allocation18_spill] sm:$0xff] %v8604_v2  ;;  %v8606_v60 = vpop.permute.xlu0 %3019 }
 0xf57   :  { %10799 = vst [vmem:[#allocation134_spill] sm:$0xff] %v8606_v60 }
 0xf59   :  { %3117 = vrot.lane.b32.xlu2 %v8106_v38, %s4321_s27 }
 0xf5b   :  { %3125 = vrot.lane.b32.xlu1 %v8114_v43, %s4322_s28 }
 0xf5c   :  { %3109 = vrot.lane.b32.xlu0 %v8114_v43, %s4321_s27  ;;  %v8614_v54 = vpop.permute.xlu2 %3045 }
 0xf5d   :  { %v3042_v14 = vpop.permute.xlu1 %3041 }
 0xf5e   :  { %v3026_v39 = vpop.permute.xlu0 %3025  ;;  %3366 = vst [vmem:[#allocation1 + $0x5] ss:$9 sm:$0xff] %v3042_v14 }
 0xf5f   :  { %3365 = vst [vmem:[#allocation1 + $0x4] ss:$9 sm:$0xff] %v3026_v39 }
 0xf61   :  { %3123 = vrot.lane.b32.xlu2 %v8104_v33, %s4322_s28 }
 0xf63   :  { %3131 = vrot.lane.b32.xlu1 %v8112_v44, %s4322_s28 }
 0xf64   :  { %3115 = vrot.lane.b32.xlu0 %v8112_v44, %s4321_s27  ;;  %v8622_v53 = vpop.permute.xlu2 %3051 }
 0xf65   :  { %10800 = vst [vmem:[#allocation176_spill] sm:$0xff] %v8622_v53  ;;  %v8624_v2 = vpop.permute.xlu1 %3047 }
 0xf66   :  { %10801 = vst [vmem:[#allocation196_spill] sm:$0xff] %v8624_v2  ;;  %v8626_v60 = vpop.permute.xlu0 %3031 }
 0xf67   :  { %10802 = vst [vmem:[#allocation205_spill] sm:$0xff] %v8626_v60 }
 0xf69   :  { %3129 = vrot.lane.b32.xlu2 %v8124_v27, %s4322_s28 }
 0xf6b   :  { %3137 = vrot.lane.b32.xlu1 %v8094_v28, %s4323_s29 }
 0xf6c   :  { %3121 = vrot.lane.b32.xlu0 %v8094_v28, %s4322_s28  ;;  %v3058_v39 = vpop.permute.xlu2 %3057 }
 0xf6d   :  { %3367 = vst [vmem:[#allocation1 + $0x6] ss:$9 sm:$0xff] %v3058_v39  ;;  %v8634_v14 = vpop.permute.xlu1 %3053 }
 0xf6e   :  { %10803 = vst [vmem:[#allocation206_spill] sm:$0xff] %v8634_v14  ;;  %v8636_v55 = vpop.permute.xlu0 %3037 }
 0xf6f   :  { %10804 = vst [vmem:[#allocation214_spill] sm:$0xff] %v8636_v55 }
 0xf71   :  { %3135 = vrot.lane.b32.xlu2 %v8136_v16, %s4322_s28 }
 0xf73   :  { %3143 = vrot.lane.b32.xlu1 %v8100_v12, %s4323_s29 }
 0xf74   :  { %3127 = vrot.lane.b32.xlu0 %v8100_v12, %s4322_s28  ;;  %v8644_v53 = vpop.permute.xlu2 %3063 }
 0xf75   :  { %10805 = vst [vmem:[#allocation222_spill] sm:$0xff] %v8644_v53  ;;  %v8646_v45 = vpop.permute.xlu1 %3059 }
 0xf76   :  { %v8648_v47 = vpop.permute.xlu0 %3043 }
 0xf79   :  { %3141 = vrot.lane.b32.xlu2 %v8114_v43, %s4323_s29 }
 0xf7b   :  { %3149 = vrot.lane.b32.xlu1 %v8106_v38, %s4323_s29 }
 0xf7c   :  { %3133 = vrot.lane.b32.xlu0 %v8106_v38, %s4322_s28  ;;  %v8656_v39 = vpop.permute.xlu2 %3069 }
 0xf7d   :  { %10806 = vst [vmem:[#allocation173_spill] sm:$0xff] %v8656_v39  ;;  %v8658_v14 = vpop.permute.xlu1 %3065 }
 0xf7e   :  { %10807 = vst [vmem:[#allocation149_spill] sm:$0xff] %v8658_v14  ;;  %v8660_v55 = vpop.permute.xlu0 %3049 }
 0xf7f   :  { %10808 = vst [vmem:[#allocation118_spill] sm:$0xff] %v8660_v55 }
 0xf81   :  { %3147 = vrot.lane.b32.xlu2 %v8112_v44, %s4323_s29 }
 0xf83   :  { %3155 = vrot.lane.b32.xlu1 %v8104_v33, %s4324_s30 }
 0xf84   :  { %3139 = vrot.lane.b32.xlu0 %v8104_v33, %s4323_s29  ;;  %v8668_v1 = vpop.permute.xlu2 %3075 }
 0xf85   :  { %v8670_v9 = vpop.permute.xlu1 %3071 }
 0xf86   :  { %10809 = vst [vmem:[#allocation49_spill] sm:$0xff] %v8670_v9  ;;  %v8672_v32 = vpop.permute.xlu0 %3055 }
 0xf87   :  { %10810 = vst [vmem:[#allocation82_spill] sm:$0xff] %v8672_v32 }
 0xf89   :  { %3153 = vrot.lane.b32.xlu2 %v8094_v28, %s4324_s30 }
 0xf8b   :  { %3161 = vrot.lane.b32.xlu1 %v8124_v27, %s4324_s30 }
 0xf8c   :  { %3145 = vrot.lane.b32.xlu0 %v8124_v27, %s4323_s29  ;;  %v8680_v39 = vpop.permute.xlu2 %3081 }
 0xf8d   :  { %10811 = vst [vmem:[#allocation169_spill] sm:$0xff] %v8680_v39  ;;  %v8682_v14 = vpop.permute.xlu1 %3077 }
 0xf8e   :  { %v8684_v55 = vpop.permute.xlu0 %3061 }
 0xf91   :  { %3159 = vrot.lane.b32.xlu2 %v8100_v12, %s4324_s30 }
 0xf93   :  { %3167 = vrot.lane.b32.xlu1 %v8136_v16, %s4324_s30 }
 0xf94   :  { %3151 = vrot.lane.b32.xlu0 %v8136_v16, %s4323_s29  ;;  %v8692_v9 = vpop.permute.xlu2 %3087 }
 0xf95   :  { %10812 = vst [vmem:[#allocation188_spill] sm:$0xff] %v8692_v9  ;;  %v8694_v32 = vpop.permute.xlu1 %3083 }
 0xf96   :  { %10813 = vst [vmem:[#allocation28_spill] sm:$0xff] %v8694_v32  ;;  %v8696_v30 = vpop.permute.xlu0 %3067 }
 0xf97   :  { %10814 = vst [vmem:[#allocation151_spill] sm:$0xff] %v8696_v30 }
 0xf99   :  { %3165 = vrot.lane.b32.xlu2 %v8106_v38, %s4324_s30 }
 0xf9b   :  { %3173 = vrot.lane.b32.xlu1 %v8114_v43, %s4325_s2 }
 0xf9c   :  { %3157 = vrot.lane.b32.xlu0 %v8114_v43, %s4324_s30  ;;  %v8704_v39 = vpop.permute.xlu2 %3093 }
 0xf9d   :  { %v3090_v57 = vpop.permute.xlu1 %3089 }
 0xf9e   :  { %v3074_v40 = vpop.permute.xlu0 %3073 }
 0xf9f   :  { %3368 = vst [vmem:[#allocation1 + $0x7] ss:$9 sm:$0xff] %v3074_v40 }
 0xfa1   :  { %3171 = vrot.lane.b32.xlu2 %v8104_v33, %s4325_s2 }
 0xfa3   :  { %3179 = vrot.lane.b32.xlu1 %v8112_v44, %s4325_s2 }
 0xfa4   :  { %3163 = vrot.lane.b32.xlu0 %v8112_v44, %s4324_s30  ;;  %v8712_v9 = vpop.permute.xlu2 %3099 }
 0xfa5   :  { %10815 = vst [vmem:[#allocation79_spill] sm:$0xff] %v8712_v9  ;;  %v8714_v32 = vpop.permute.xlu1 %3095 }
 0xfa6   :  { %10816 = vst [vmem:[#allocation114_spill] sm:$0xff] %v8714_v32  ;;  %v8716_v30 = vld [vmem:[#allocation1] sm:$0xff]  ;;  %v8718_v36 = vpop.permute.xlu0 %3079 }
 0xfa7   :  { %10817 = vst [vmem:[#allocation177_spill] sm:$0xff] %v8718_v36 }
 0xfa8   :  { %3370 = vst [vmem:[#allocation1] ss:$9 sm:$0xff] %v3090_v57 }
 0xfa9   :  { %3177 = vrot.lane.b32.xlu2 %v8124_v27, %s4325_s2 }
 0xfab   :  { %3185 = vrot.lane.b32.xlu1 %v8094_v28, %s10818_s11 }
 0xfac   :  { %3169 = vrot.lane.b32.xlu0 %v8094_v28, %s4325_s2  ;;  %v3106_v40 = vpop.permute.xlu2 %3105 }
 0xfad   :  { %3371 = vst [vmem:[#allocation1 + $0x1] ss:$9 sm:$0xff] %v3106_v40  ;;  %v8726_v37 = vpop.permute.xlu1 %3101 }
 0xfae   :  { %10819 = vst [vmem:[#allocation153_spill] sm:$0xff] %v8726_v37  ;;  %v8728_v9 = vpop.permute.xlu0 %3085 }
 0xfaf   :  { %10820 = vst [vmem:[#allocation58_spill] sm:$0xff] %v8728_v9 }
 0xfb1   :  { %3183 = vrot.lane.b32.xlu2 %v8136_v16, %s4325_s2 }
 0xfb3   :  { %3191 = vrot.lane.b32.xlu1 %v8100_v12, %s10818_s11 }
 0xfb4   :  { %3175 = vrot.lane.b32.xlu0 %v8100_v12, %s4325_s2  ;;  %v8736_v57 = vpop.permute.xlu2 %3111 }
 0xfb5   :  { %10821 = vst [vmem:[#allocation27_spill] sm:$0xff] %v8736_v57  ;;  %v8738_v24 = vpop.permute.xlu1 %3107 }
 0xfb6   :  { %v8740_v5 = vpop.permute.xlu0 %3091 }
 0xfb9   :  { %3189 = vrot.lane.b32.xlu2 %v8114_v43, %s10818_s11 }
 0xfbb   :  { %3197 = vrot.lane.b32.xlu1 %v8106_v38, %s10818_s11 }
 0xfbc   :  { %3181 = vrot.lane.b32.xlu0 %v8106_v38, %s4325_s2  ;;  %v8748_v40 = vpop.permute.xlu2 %3117 }
 0xfbd   :  { %10822 = vst [vmem:[#allocation117_spill] sm:$0xff] %v8748_v40  ;;  %v8750_v37 = vpop.permute.xlu1 %3113 }
 0xfbe   :  { %10823 = vst [vmem:[#allocation159_spill] sm:$0xff] %v8750_v37  ;;  %v8752_v9 = vpop.permute.xlu0 %3097 }
 0xfbf   :  { %10824 = vst [vmem:[#allocation183_spill] sm:$0xff] %v8752_v9 }
 0xfc1   :  { %3195 = vrot.lane.b32.xlu2 %v8112_v44, %s10818_s11 }
 0xfc3   :  { %3203 = vrot.lane.b32.xlu1 %v8104_v33, %s4327_s4 }
 0xfc4   :  { %3187 = vrot.lane.b32.xlu0 %v8104_v33, %s10818_s11  ;;  %v8760_v46 = vpop.permute.xlu2 %3123 }
 0xfc5   :  { %v8762_v57 = vpop.permute.xlu1 %3119 }
 0xfc6   :  { %10825 = vst [vmem:[#allocation60_spill] sm:$0xff] %v8762_v57  ;;  %v8764_v32 = vpop.permute.xlu0 %3103 }
 0xfc7   :  { %10826 = vst [vmem:[#allocation81_spill] sm:$0xff] %v8764_v32 }
 0xfc9   :  { %3201 = vrot.lane.b32.xlu2 %v8094_v28, %s4327_s4 }
 0xfcb   :  { %3249 = vrot.lane.b32.xlu1 %v8094_v28, %s4330_s7 }
 0xfcc   :  { %3193 = vrot.lane.b32.xlu0 %v8124_v27, %s10818_s11  ;;  %v8772_v40 = vpop.permute.xlu2 %3129 }
 0xfcd   :  { %10827 = vst [vmem:[#allocation57_spill] sm:$0xff] %v8772_v40  ;;  %v8774_v37 = vpop.permute.xlu1 %3125 }
 0xfce   :  { %v8776_v9 = vpop.permute.xlu0 %3109 }
 0xfd1   :  { %3233 = vrot.lane.b32.xlu2 %v8094_v28, %s10505_s3 }
 0xfd3   :  { %3297 = vrot.lane.b32.xlu1 %v8094_v28, %s4333_s10 }
 0xfd4   :  { %3199 = vrot.lane.b32.xlu0 %v8136_v16, %s10818_s11  ;;  %v8784_v57 = vpop.permute.xlu2 %3135 }
 0xfd5   :  { %10828 = vst [vmem:[#allocation150_spill] sm:$0xff] %v8784_v57  ;;  %v8786_v32 = vpop.permute.xlu1 %3131 }
 0xfd6   :  { %10829 = vst [vmem:[#allocation165_spill] sm:$0xff] %v8786_v32  ;;  %v8788_v36 = vpop.permute.xlu0 %3115 }
 0xfd7   :  { %10830 = vst [vmem:[#allocation194_spill] sm:$0xff] %v8788_v36 }
 0xfd9   :  { %3281 = vrot.lane.b32.xlu2 %v8094_v28, %s10188_s6 }
 0xfdb   :  { %3205 = vrot.lane.b32.xlu1 %v8114_v43, %s4327_s4 }
 0xfdc   :  { %3217 = vrot.lane.b32.xlu0 %v8094_v28, %s4328_s5  ;;  %v8796_v40 = vpop.permute.xlu2 %3141 }
 0xfdd   :  { %v3138_v2 = vpop.permute.xlu1 %3137 }
 0xfde   :  { %v3122_v60 = vpop.permute.xlu0 %3121  ;;  %3373 = vst [vmem:[#allocation1 + $0x3] ss:$9 sm:$0xff] %v3138_v2 }
 0xfdf   :  { %3372 = vst [vmem:[#allocation1 + $0x2] ss:$9 sm:$0xff] %v3122_v60 }
 0xfe1   :  { %3329 = vrot.lane.b32.xlu2 %v8094_v28, %s4305_s12 }
 0xfe3   :  { %3219 = vrot.lane.b32.xlu1 %v8104_v33, %s4328_s5 }
 0xfe4   :  { %3265 = vrot.lane.b32.xlu0 %v8094_v28, %s4331_s8  ;;  %v8804_v57 = vpop.permute.xlu2 %3147 }
 0xfe5   :  { %10831 = vst [vmem:[#allocation195_spill] sm:$0xff] %v8804_v57  ;;  %v8806_v32 = vpop.permute.xlu1 %3143 }
 0xfe6   :  { %10832 = vst [vmem:[#allocation202_spill] sm:$0xff] %v8806_v32  ;;  %v8808_v36 = vpop.permute.xlu0 %3127 }
 0xfe7   :  { %10833 = vst [vmem:[#allocation212_spill] sm:$0xff] %v8808_v36 }
 0xfe9   :  { %3209 = vrot.lane.b32.xlu2 %v8124_v27, %s4327_s4 }
 0xfeb   :  { %3267 = vrot.lane.b32.xlu1 %v8104_v33, %s4331_s8 }
 0xfec   :  { %3313 = vrot.lane.b32.xlu0 %v8094_v28, %s4334_s9  ;;  %v3154_v2 = vpop.permute.xlu2 %3153 }
 0xfed   :  { %3374 = vst [vmem:[#allocation1 + $0x4] ss:$9 sm:$0xff] %v3154_v2  ;;  %v8816_v60 = vpop.permute.xlu1 %3149 }
 0xfee   :  { %10834 = vst [vmem:[#allocation213_spill] sm:$0xff] %v8816_v60  ;;  %v8818_v31 = vpop.permute.xlu0 %3133 }
 0xfef   :  { %10835 = vst [vmem:[#allocation220_spill] sm:$0xff] %v8818_v31 }
 0xff1   :  { %3251 = vrot.lane.b32.xlu2 %v8104_v33, %s4330_s7 }
 0xff3   :  { %3315 = vrot.lane.b32.xlu1 %v8104_v33, %s4334_s9 }
 0xff4   :  { %3207 = vrot.lane.b32.xlu0 %v8100_v12, %s4327_s4  ;;  %v8826_v57 = vpop.permute.xlu2 %3159 }
 0xff5   :  { %10836 = vst [vmem:[#allocation160_spill] sm:$0xff] %v8826_v57  ;;  %v8828_v32 = vpop.permute.xlu1 %3155 }
 0xff6   :  { %v8830_v28 = vpop.permute.xlu0 %3139 }
 0xff9   :  { %3299 = vrot.lane.b32.xlu2 %v8104_v33, %s4333_s10 }
 0xffb   :  { %3213 = vrot.lane.b32.xlu1 %v8106_v38, %s4327_s4 }
 0xffc   :  { %3235 = vrot.lane.b32.xlu0 %v8104_v33, %s10505_s3  ;;  %v8838_v2 = vpop.permute.xlu2 %3165 }
 0xffd   :  { %10837 = vst [vmem:[#allocation65_spill] sm:$0xff] %v8838_v2  ;;  %v8840_v60 = vpop.permute.xlu1 %3161 }
 0xffe   :  { %10838 = vst [vmem:[#allocation155_spill] sm:$0xff] %v8840_v60  ;;  %v8842_v31 = vpop.permute.xlu0 %3145 }
 0xfff   :  { %10839 = vst [vmem:[#allocation122_spill] sm:$0xff] %v8842_v31 }
0x1001   :  { %3211 = vrot.lane.b32.xlu2 %v8112_v44, %s4327_s4 }
0x1003   :  { %3237 = vrot.lane.b32.xlu1 %v8114_v43, %s10505_s3 }
0x1004   :  { %3283 = vrot.lane.b32.xlu0 %v8104_v33, %s10188_s6  ;;  %v8850_v57 = vpop.permute.xlu2 %3171 }
0x1005   :  { %v8852_v36 = vpop.permute.xlu1 %3167 }
0x1006   :  { %10840 = vst [vmem:[#allocation11_spill] sm:$0xff] %v8852_v36  ;;  %v8854_v42 = vpop.permute.xlu0 %3151 }
0x1007   :  { %10841 = vst [vmem:[#allocation182_spill] sm:$0xff] %v8854_v42 }
0x1009   :  { %3221 = vrot.lane.b32.xlu2 %v8114_v43, %s4328_s5 }
0x100b   :  { %3285 = vrot.lane.b32.xlu1 %v8114_v43, %s10188_s6 }
0x100c   :  { %3331 = vrot.lane.b32.xlu0 %v8104_v33, %s4305_s12  ;;  %v8862_v2 = vpop.permute.xlu2 %3177 }
0x100d   :  { %10842 = vst [vmem:[#allocation68_spill] sm:$0xff] %v8862_v2  ;;  %v8864_v60 = vpop.permute.xlu1 %3173 }
0x100e   :  { %v8866_v31 = vpop.permute.xlu0 %3157 }
0x1011   :  { %3269 = vrot.lane.b32.xlu2 %v8114_v43, %s4331_s8 }
0x1013   :  { %3333 = vrot.lane.b32.xlu1 %v8114_v43, %s4305_s12 }
0x1014   :  { %3215 = vrot.lane.b32.xlu0 %v8136_v16, %s4327_s4  ;;  %v8874_v36 = vpop.permute.xlu2 %3183 }
0x1015   :  { %10843 = vst [vmem:[#allocation98_spill] sm:$0xff] %v8874_v36  ;;  %v8876_v42 = vpop.permute.xlu1 %3179 }
0x1016   :  { %10844 = vst [vmem:[#allocation34_spill] sm:$0xff] %v8876_v42  ;;  %v8878_v17 = vpop.permute.xlu0 %3163 }
0x1017   :  { %10845 = vst [vmem:[#allocation157_spill] sm:$0xff] %v8878_v17 }
0x1019   :  { %3317 = vrot.lane.b32.xlu2 %v8114_v43, %s4334_s9 }
0x101b   :  { %3239 = vrot.lane.b32.xlu1 %v8100_v12, %s10505_s3 }
0x101c   :  { %3253 = vrot.lane.b32.xlu0 %v8114_v43, %s4330_s7  ;;  %v8886_v2 = vpop.permute.xlu2 %3189 }
0x101d   :  { %v3186_v8 = vpop.permute.xlu1 %3185 }
0x101e   :  { %v3170_v53 = vpop.permute.xlu0 %3169  ;;  %3376 = vst [vmem:[#allocation1 + $0x6] ss:$9 sm:$0xff] %v3186_v8 }
0x101f   :  { %3375 = vst [vmem:[#allocation1 + $0x5] ss:$9 sm:$0xff] %v3170_v53 }
0x1021   :  { %3225 = vrot.lane.b32.xlu2 %v8124_v27, %s4328_s5 }
0x1023   :  { %3287 = vrot.lane.b32.xlu1 %v8100_v12, %s10188_s6 }
0x1024   :  { %3301 = vrot.lane.b32.xlu0 %v8114_v43, %s4333_s10  ;;  %v8894_v36 = vpop.permute.xlu2 %3195 }
0x1025   :  { %10846 = vst [vmem:[#allocation39_spill] sm:$0xff] %v8894_v36  ;;  %v8896_v42 = vpop.permute.xlu1 %3191 }
0x1026   :  { %10847 = vst [vmem:[#allocation189_spill] sm:$0xff] %v8896_v42  ;;  %v8898_v17 = vpop.permute.xlu0 %3175 }
0x1027   :  { %10848 = vst [vmem:[#allocation91_spill] sm:$0xff] %v8898_v17 }
0x1029   :  { %3271 = vrot.lane.b32.xlu2 %v8100_v12, %s4331_s8 }
0x102b   :  { %3335 = vrot.lane.b32.xlu1 %v8100_v12, %s4305_s12 }
0x102c   :  { %3223 = vrot.lane.b32.xlu0 %v8100_v12, %s4328_s5  ;;  %v3202_v8 = vpop.permute.xlu2 %3201 }
0x102d   :  { %3377 = vst [vmem:[#allocation1 + $0x7] ss:$9 sm:$0xff] %v3202_v8  ;;  %v8906_v53 = vpop.permute.xlu1 %3197 }
0x102e   :  { %10849 = vst [vmem:[#allocation126_spill] sm:$0xff] %v8906_v53  ;;  %v8908_v41 = vpop.permute.xlu0 %3181 }
0x102f   :  { %10850 = vst [vmem:[#allocation42_spill] sm:$0xff] %v8908_v41 }
0x1031   :  { %3319 = vrot.lane.b32.xlu2 %v8100_v12, %s4334_s9 }
0x1033   :  { %3231 = vrot.lane.b32.xlu1 %v8136_v16, %s4328_s5 }
0x1034   :  { %v8914_v36 = vld [vmem:[#allocation1] sm:$0xff]  ;;  %3255 = vrot.lane.b32.xlu0 %v8100_v12, %s4330_s7  ;;  %v3234_v42 = vpop.permute.xlu2 %3233 }
0x1035   :  { %v8918_v17 = vpop.permute.xlu1 %3203  ;;  %3380 = vst [vmem:[#allocation1 + $0x1] ss:$9 sm:$0xff] %v3234_v42 }
0x1036   :  { %v8920_v8 = vpop.permute.xlu0 %3187 }
0x1039   :  { %3229 = vrot.lane.b32.xlu2 %v8106_v38, %s4328_s5 }
0x103b   :  { %3273 = vrot.lane.b32.xlu1 %v8124_v27, %s4331_s8 }
0x103c   :  { %3303 = vrot.lane.b32.xlu0 %v8100_v12, %s4333_s10  ;;  %v3282_v53 = vpop.permute.xlu2 %3281 }
0x103d   :  { %v3250_v41 = vpop.permute.xlu1 %3249  ;;  %3383 = vst [vmem:[#allocation1 + $0x4] ss:$9 sm:$0xff] %v3282_v53 }
0x103e   :  { %v8928_v13 = vpop.permute.xlu0 %3193  ;;  %3381 = vst [vmem:[#allocation1 + $0x2] ss:$9 sm:$0xff] %v3250_v41 }
0x1041   :  { %3257 = vrot.lane.b32.xlu2 %v8124_v27, %s4330_s7 }
0x1043   :  { %3321 = vrot.lane.b32.xlu1 %v8124_v27, %s4334_s9 }
0x1044   :  { %3227 = vrot.lane.b32.xlu0 %v8112_v44, %s4328_s5  ;;  %v3330_v42 = vpop.permute.xlu2 %3329 }
0x1045   :  { %v3298_v56 = vpop.permute.xlu1 %3297  ;;  %3386 = vst [vmem:[#allocation1 + $0x7] ss:$9 sm:$0xff] %v3330_v42 }
0x1046   :  { %v8936_v0 = vpop.permute.xlu0 %3199  ;;  %3384 = vst [vmem:[#allocation1 + $0x5] ss:$9 sm:$0xff] %v3298_v56 }
0x1049   :  { %3305 = vrot.lane.b32.xlu2 %v8124_v27, %s4333_s10 }
0x104b   :  { %3245 = vrot.lane.b32.xlu1 %v8106_v38, %s10505_s3 }
0x104c   :  { %3241 = vrot.lane.b32.xlu0 %v8124_v27, %s10505_s3 }
0x104e   :  { %v3218_v41 = vpop.permute.xlu0 %3217 }
0x104f   :  { %3379 = vst [vmem:[#allocation1] ss:$9 sm:$0xff] %v3218_v41  ;;  %v10861_v41 = vld [vmem:[#allocation196_spill] sm:$0xff] }
0x1051   :  { %3243 = vrot.lane.b32.xlu2 %v8112_v44, %s10505_s3 }
0x1053   :  { %3261 = vrot.lane.b32.xlu1 %v8106_v38, %s4330_s7 }
0x1054   :  { %3289 = vrot.lane.b32.xlu0 %v8124_v27, %s10188_s6 }
0x1056   :  { %v3266_v56 = vpop.permute.xlu0 %3265 }
0x1057   :  { %3382 = vst [vmem:[#allocation1 + $0x3] ss:$9 sm:$0xff] %v3266_v56  ;;  %v10862_v56 = vld [vmem:[#allocation177_spill] sm:$0xff] }
0x1059   :  { %3259 = vrot.lane.b32.xlu2 %v8112_v44, %s4330_s7 }
0x105b   :  { %3307 = vrot.lane.b32.xlu1 %v8112_v44, %s4333_s10 }
0x105c   :  { %3337 = vrot.lane.b32.xlu0 %v8124_v27, %s4305_s12 }
0x105e   :  { %v3314_v53 = vpop.permute.xlu0 %3313 }
0x105f   :  { %3385 = vst [vmem:[#allocation1 + $0x6] ss:$9 sm:$0xff] %v3314_v53 }
0x1061   :  { %3291 = vrot.lane.b32.xlu2 %v8112_v44, %s10188_s6 }
0x1063   :  { %3263 = vrot.lane.b32.xlu1 %v8136_v16, %s4330_s7 }
0x1064   :  { %3247 = vrot.lane.b32.xlu0 %v8136_v16, %s10505_s3 }
0x1066   :  { %v8962_v42 = vld [vmem:[#allocation1] sm:$0xff] }
0x1067   :  { %3388 = vst [vmem:[#allocation1] ss:$9 sm:$0xff] %v8104_v33 }
0x1068   :  { %3389 = vst [vmem:[#allocation1 + $0x1] ss:$9 sm:$0xff] %v8250_v15 }
0x1069   :  { %3390 = vst [vmem:[#allocation1 + $0x2] ss:$9 sm:$0xff] %v8284_v22  ;;  %3339 = vrot.lane.b32.xlu2 %v8112_v44, %s4305_s12 }
0x106a   :  { %3391 = vst [vmem:[#allocation1 + $0x3] ss:$9 sm:$0xff] %v8306_v50 }
0x106b   :  { %3392 = vst [vmem:[#allocation1 + $0x4] ss:$9 sm:$0xff] %v8376_v51  ;;  %3293 = vrot.lane.b32.xlu1 %v8106_v38, %s10188_s6  ;;  %v8987_v51 = vpop.permute.xlu1 %3205 }
0x106c   :  { %3393 = vst [vmem:[#allocation1 + $0x5] ss:$9 sm:$0xff] %v8374_v7  ;;  %3275 = vrot.lane.b32.xlu0 %v8112_v44, %s4331_s8  ;;  %v8992_v7 = vld [vmem:[#allocation2 + $0x1b] sm:$0x1] }
0x106d   :  { %3394 = vst [vmem:[#allocation1 + $0x6] ss:$9 sm:$0xff] %v8396_v3 }
0x106e   :  { %3395 = vst [vmem:[#allocation1 + $0x7] ss:$9 sm:$0xff] %v8468_v29  ;;  %v8990_v29 = vpop.permute.xlu0 %3207 }
0x1071   :  { %3279 = vrot.lane.b32.xlu2 %v8136_v16, %s4331_s8 }
0x1073   :  { %3325 = vrot.lane.b32.xlu1 %v8106_v38, %s4334_s9  ;;  %v3220_v38 = vpop.permute.xlu1 %3219 }
0x1074   :  { %3323 = vrot.lane.b32.xlu0 %v8112_v44, %s4334_s9 }
0x1075   :  { %v3396_v33 = vld [vmem:[#allocation1] sm:$0xff] }
0x1076   :  { %3397 = vst [vmem:[#allocation1] ss:$9 sm:$0xff] %v8466_v20 }
0x1077   :  { %3398 = vst [vmem:[#allocation1 + $0x1] ss:$9 sm:$0xff] %v8488_v21  ;;  %v3236_v21 = vpop.permute.xlu0 %3235 }
0x1078   :  { %3399 = vst [vmem:[#allocation1 + $0x2] ss:$9 sm:$0xff] %v8558_v18 }
0x1079   :  { %3400 = vst [vmem:[#allocation1 + $0x3] ss:$9 sm:$0xff] %v8556_v62  ;;  %3309 = vrot.lane.b32.xlu2 %v8992_v7, %s4333_s10  ;;  %v9008_v62 = vpop.permute.xlu2 %3209 }
0x107a   :  { %3401 = vst [vmem:[#allocation1 + $0x4] ss:$9 sm:$0xff] %v8578_v59  ;;  %v9022_v59 = vld [vmem:[#allocation2 + $0x1f] sm:$0x1] }
0x107b   :  { %3402 = vst [vmem:[#allocation1 + $0x5] ss:$9 sm:$0xff] %v8648_v47  ;;  %3327 = vrot.lane.b32.xlu1 %v8136_v16, %s4334_s9  ;;  %v3268_v15 = vpop.permute.xlu1 %3267 }
0x107c   :  { %3403 = vst [vmem:[#allocation1 + $0x6] ss:$9 sm:$0xff] %v8646_v45  ;;  %3277 = vrot.lane.b32.xlu0 %v8992_v7, %s4331_s8 }
0x107d   :  { %3404 = vst [vmem:[#allocation1 + $0x7] ss:$9 sm:$0xff] %v8668_v1 }
0x1081   :  { %3311 = vrot.lane.b32.xlu2 %v8136_v16, %s4333_s10  ;;  %v3252_v3 = vpop.permute.xlu2 %3251 }
0x1084   :  { %v9006_v20 = vld [vmem:[#allocation1] sm:$0xff]  ;;  %3295 = vrot.lane.b32.xlu0 %v8136_v16, %s10188_s6  ;;  %v3284_v16 = vpop.permute.xlu0 %3283 }
0x1085   :  { %3406 = vst [vmem:[#allocation1] ss:$9 sm:$0xff] %v8740_v5  ;;  %v3675_v5 = vsel %vm866_vm0, %v8716_v30, -inf }
0x1086   :  { %3407 = vst [vmem:[#allocation1 + $0x1] ss:$9 sm:$0xff] %v8738_v24 }
0x1087   :  { %3408 = vst [vmem:[#allocation1 + $0x2] ss:$9 sm:$0xff] %v8760_v46  ;;  %v3672_v46 = vsel %vm866_vm0, %v8450_v19, -inf }
0x1088   :  { %3409 = vst [vmem:[#allocation1 + $0x3] ss:$9 sm:$0xff] %v8830_v28  ;;  %v10855_v28 = vld [vmem:[#allocation222_spill] sm:$0xff] }
0x1089   :  { %3410 = vst [vmem:[#allocation1 + $0x4] ss:$9 sm:$0xff] %v8828_v32  ;;  %v3316_v32 = vpop.permute.xlu1 %3315 }
0x108a   :  { %3411 = vst [vmem:[#allocation1 + $0x5] ss:$9 sm:$0xff] %v8850_v57  ;;  %v10853_v57 = vld [vmem:[#allocation197_spill] sm:$0xff] }
0x108b   :  { %3412 = vst [vmem:[#allocation1 + $0x6] ss:$9 sm:$0xff] %v8920_v8  ;;  %v10860_v8 = vld [vmem:[#allocation205_spill] sm:$0xff] }
0x108c   :  { %3413 = vst [vmem:[#allocation1 + $0x7] ss:$9 sm:$0xff] %v8918_v17  ;;  %3341 = vrot.lane.b32.xlu0 %v8992_v7, %s4305_s12  ;;  %v3332_v22 = vpop.permute.xlu0 %3331  ;;  %v3300_v17 = vpop.permute.xlu2 %3299 }
0x1093   :  { %v3414_v45 = vld [vmem:[#allocation1] sm:$0xff] }
0x1094   :  { %3415 = vst [vmem:[#allocation1] ss:$9 sm:$0xff] %v3220_v38  ;;  %3343 = vrot.lane.b32.xlu0 %v9022_v59, %s4305_s12  ;;  %v9056_v50 = vpop.permute.xlu0 %3215  ;;  %v10863_v38 = vld [vmem:[#allocation114_spill] sm:$0xff] }
0x1095   :  { %3416 = vst [vmem:[#allocation1 + $0x1] ss:$9 sm:$0xff] %v3236_v21 }
0x1096   :  { %3418 = vst [vmem:[#allocation1 + $0x3] ss:$9 sm:$0xff] %v3268_v15  ;;  %v10865_v15 = vld [vmem:[#allocation212_spill] sm:$0xff] }
0x1097   :  { %3419 = vst [vmem:[#allocation1 + $0x4] ss:$9 sm:$0xff] %v3284_v16  ;;  %v10866_v16 = vld [vmem:[#allocation202_spill] sm:$0xff] }
0x1098   :  { %3417 = vst [vmem:[#allocation1 + $0x2] ss:$9 sm:$0xff] %v3252_v3  ;;  %v10867_v3 = vld [vmem:[#allocation160_spill] sm:$0xff] }
0x1099   :  { %3421 = vst [vmem:[#allocation1 + $0x6] ss:$9 sm:$0xff] %v3316_v32  ;;  %v10869_v32 = vld [vmem:[#allocation189_spill] sm:$0xff] }
0x109a   :  { %3422 = vst [vmem:[#allocation1 + $0x7] ss:$9 sm:$0xff] %v3332_v22 }
0x109b   :  { %3420 = vst [vmem:[#allocation1 + $0x5] ss:$9 sm:$0xff] %v3300_v17 }
0x10a2   :  { %v3423_v18 = vld [vmem:[#allocation1] sm:$0xff] }
0x10a3   :  { %3424 = vst [vmem:[#allocation1] ss:$9 sm:$0xff] %v8114_v43  ;;  %v3684_v43 = vsel %vm866_vm0, %v3396_v33, -inf }
0x10a4   :  { %3425 = vst [vmem:[#allocation1 + $0x1] ss:$9 sm:$0xff] %v8286_v11  ;;  %v3681_v11 = vsel %vm866_vm0, %v8962_v42, -inf }
0x10a5   :  { %3426 = vst [vmem:[#allocation1 + $0x2] ss:$9 sm:$0xff] %v8322_v6  ;;  %3676 = vmax.xlane.f32.xlu1 %v3675_v5 }
0x10a6   :  { %3427 = vst [vmem:[#allocation1 + $0x3] ss:$9 sm:$0xff] %v8320_v63  ;;  %v3254_v63 = vpop.permute.xlu0 %3253 }
0x10a7   :  { %3428 = vst [vmem:[#allocation1 + $0x4] ss:$9 sm:$0xff] %v8342_v34 }
0x10a8   :  { %3429 = vst [vmem:[#allocation1 + $0x5] ss:$9 sm:$0xff] %v8412_v4 }
0x10a9   :  { %3430 = vst [vmem:[#allocation1 + $0x6] ss:$9 sm:$0xff] %v8410_v48  ;;  %v9044_v48 = vpop.permute.xlu1 %3213 }
0x10aa   :  { %3431 = vst [vmem:[#allocation1 + $0x7] ss:$9 sm:$0xff] %v8432_v58  ;;  %3673 = vmax.xlane.f32.xlu2 %v3672_v46  ;;  %v9048_v58 = vpop.permute.xlu2 %3211 }
0x10ad   :  { %3685 = vmax.xlane.f32.xlu1 %v3684_v43 }
0x10b1   :  { %v3432_v30 = vld [vmem:[#allocation1] sm:$0xff]  ;;  %v3238_v4 = vpop.permute.xlu1 %3237 }
0x10b2   :  { %3433 = vst [vmem:[#allocation1] ss:$9 sm:$0xff] %v8504_v35  ;;  %3682 = vmax.xlane.f32.xlu2 %v3681_v11  ;;  %v3690_v35 = vsel %vm866_vm0, %v3414_v45, -inf  ;;  %v10868_v45 = vld [vmem:[#allocation91_spill] sm:$0xff] }
0x10b3   :  { %3434 = vst [vmem:[#allocation1 + $0x1] ss:$9 sm:$0xff] %v8502_v49  ;;  %v3678_v49 = vsel %vm866_vm0, %v8914_v36, -inf  ;;  %v3687_v36 = vsel %vm866_vm0, %v9006_v20, -inf  ;;  %v10864_v20 = vld [vmem:[#allocation27_spill] sm:$0xff] }
0x10b4   :  { %3435 = vst [vmem:[#allocation1 + $0x2] ss:$9 sm:$0xff] %v8524_v61  ;;  %v3222_v61 = vpop.permute.xlu2 %3221 }
0x10b5   :  { %3436 = vst [vmem:[#allocation1 + $0x3] ss:$9 sm:$0xff] %v8594_v25 }
0x10b6   :  { %3437 = vst [vmem:[#allocation1 + $0x4] ss:$9 sm:$0xff] %v8592_v23 }
0x10b7   :  { %3438 = vst [vmem:[#allocation1 + $0x5] ss:$9 sm:$0xff] %v8614_v54  ;;  %v3693_v54 = vsel %vm866_vm0, %v3423_v18, -inf }
0x10b8   :  { %3439 = vst [vmem:[#allocation1 + $0x6] ss:$9 sm:$0xff] %v8684_v55  ;;  %3694 = vmax.xlane.f32.xlu1 %v3693_v54  ;;  %v10874_v54 = vld [vmem:[#allocation133_spill] sm:$0xff] }
0x10b9   :  { %3440 = vst [vmem:[#allocation1 + $0x7] ss:$9 sm:$0xff] %v8682_v14  ;;  %v3286_v24 = vpop.permute.xlu1 %3285  ;;  %v10851_v14 = vld [vmem:[#allocation94_spill] sm:$0xff] }
0x10ba   :  { %3691 = vmax.xlane.f32.xlu2 %v3690_v35 }
0x10bc   :  { %v3270_v6 = vpop.permute.xlu2 %3269 }
0x10be   :  { %3679 = vmax.xlane.f32.xlu0 %v3678_v49  ;;  %v10870_v49 = vld [vmem:[#allocation50_spill] sm:$0xff] }
0x10c0   :  { %v3441_v25 = vld [vmem:[#allocation1] sm:$0xff] }
0x10c1   :  { %3442 = vst [vmem:[#allocation1] ss:$9 sm:$0xff] %v8704_v39  ;;  %v3334_v55 = vpop.permute.xlu1 %3333  ;;  %v3699_v34 = vsel %vm866_vm0, %v3441_v25, -inf  ;;  %v10852_v39 = vld [vmem:[#allocation30_spill] sm:$0xff]  ;;  %v10872_v25 = vld [vmem:[#allocation145_spill] sm:$0xff] }
0x10c2   :  { %3443 = vst [vmem:[#allocation1 + $0x1] ss:$9 sm:$0xff] %v8776_v9  ;;  %3700 = vmax.xlane.f32.xlu2 %v3699_v34 }
0x10c3   :  { %3444 = vst [vmem:[#allocation1 + $0x2] ss:$9 sm:$0xff] %v8774_v37  ;;  %v3696_v37 = vsel %vm866_vm0, %v3432_v30, -inf }
0x10c4   :  { %3445 = vst [vmem:[#allocation1 + $0x3] ss:$9 sm:$0xff] %v8796_v40  ;;  %v3318_v9 = vpop.permute.xlu2 %3317  ;;  %v10854_v40 = vld [vmem:[#allocation184_spill] sm:$0xff] }
0x10c5   :  { %3446 = vst [vmem:[#allocation1 + $0x4] ss:$9 sm:$0xff] %v8866_v31  ;;  %v3302_v31 = vpop.permute.xlu0 %3301 }
0x10c6   :  { %3447 = vst [vmem:[#allocation1 + $0x5] ss:$9 sm:$0xff] %v8864_v60  ;;  %3688 = vmax.xlane.f32.xlu0 %v3687_v36  ;;  %v10875_v36 = vld [vmem:[#allocation45_spill] sm:$0xff] }
0x10c7   :  { %3448 = vst [vmem:[#allocation1 + $0x6] ss:$9 sm:$0xff] %v8886_v2  ;;  %v10859_v2 = vld [vmem:[#allocation36_spill] sm:$0xff] }
0x10c8   :  { %3449 = vst [vmem:[#allocation1 + $0x7] ss:$9 sm:$0xff] %v8987_v51 }
0x10c9   :  { %v3240_v53 = vpop.permute.xlu1 %3239 }
0x10cc   :  { %v9090_v51 = vpop.permute.xlu2 %3225 }
0x10cd   :  { %v3224_v42 = vpop.permute.xlu0 %3223 }
0x10ce   :  { %3697 = vmax.xlane.f32.xlu0 %v3696_v37  ;;  %v10878_v37 = vld [vmem:[#allocation67_spill] sm:$0xff] }
0x10cf   :  { %v3450_v23 = vld [vmem:[#allocation1] sm:$0xff] }
0x10d0   :  { %3452 = vst [vmem:[#allocation1 + $0x1] ss:$9 sm:$0xff] %v3238_v4  ;;  %v3702_v19 = vsel %vm866_vm0, %v3450_v23, -inf  ;;  %v10871_v4 = vld [vmem:[#allocation146_spill] sm:$0xff]  ;;  %v10879_v23 = vld [vmem:[#allocation108_spill] sm:$0xff] }
0x10d1   :  { %3451 = vst [vmem:[#allocation1] ss:$9 sm:$0xff] %v3222_v61  ;;  %3703 = vmax.xlane.f32.xlu1 %v3702_v19  ;;  %v3288_v22 = vpop.permute.xlu1 %3287  ;;  %v10873_v61 = vld [vmem:[#allocation102_spill] sm:$0xff]  ;;  %v10883_v19 = vld [vmem:[#allocation149_spill] sm:$0xff] }
0x10d2   :  { %3455 = vst [vmem:[#allocation1 + $0x4] ss:$9 sm:$0xff] %v3286_v24  ;;  %v10876_v24 = vld [vmem:[#allocation131_spill] sm:$0xff] }
0x10d3   :  { %3453 = vst [vmem:[#allocation1 + $0x2] ss:$9 sm:$0xff] %v3254_v63 }
0x10d4   :  { %3454 = vst [vmem:[#allocation1 + $0x3] ss:$9 sm:$0xff] %v3270_v6  ;;  %v3272_v18 = vpop.permute.xlu2 %3271  ;;  %v10877_v6 = vld [vmem:[#allocation179_spill] sm:$0xff] }
0x10d5   :  { %3458 = vst [vmem:[#allocation1 + $0x7] ss:$9 sm:$0xff] %v3334_v55  ;;  %v3256_v17 = vpop.permute.xlu0 %3255  ;;  %v10880_v55 = vld [vmem:[#allocation140_spill] sm:$0xff] }
0x10d6   :  { %3456 = vst [vmem:[#allocation1 + $0x5] ss:$9 sm:$0xff] %v3302_v31  ;;  %v10881_v31 = vld [vmem:[#allocation51_spill] sm:$0xff] }
0x10d7   :  { %3457 = vst [vmem:[#allocation1 + $0x6] ss:$9 sm:$0xff] %v3318_v9  ;;  %v10882_v9 = vld [vmem:[#allocation118_spill] sm:$0xff] }
0x10d9   :  { %v3336_v43 = vpop.permute.xlu1 %3335 }
0x10dc   :  { %v3320_v11 = vpop.permute.xlu2 %3319 }
0x10dd   :  { %v3304_v30 = vpop.permute.xlu0 %3303 }
0x10de   :  { %v3459_v1 = vld [vmem:[#allocation1] sm:$0xff] }
0x10df   :  { %3460 = vst [vmem:[#allocation1] ss:$9 sm:$0xff] %v8100_v12  ;;  %v3705_v47 = vsel %vm866_vm0, %v3459_v1, -inf  ;;  %v10884_v1 = vld [vmem:[#allocation169_spill] sm:$0xff] }
0x10e0   :  { %3461 = vst [vmem:[#allocation1 + $0x1] ss:$9 sm:$0xff] %v8262_v52  ;;  %3706 = vmax.xlane.f32.xlu0 %v3705_v47  ;;  %v10856_v52 = vld [vmem:[#allocation215_spill] sm:$0xff] }
0x10e1   :  { %3462 = vst [vmem:[#allocation1 + $0x2] ss:$9 sm:$0xff] %v8282_v26  ;;  %v10858_v26 = vld [vmem:[#allocation109_spill] sm:$0xff] }
0x10e2   :  { %3463 = vst [vmem:[#allocation1 + $0x3] ss:$9 sm:$0xff] %v8354_v10  ;;  %v10857_v10 = vld [vmem:[#allocation99_spill] sm:$0xff] }
0x10e3   :  { %3464 = vst [vmem:[#allocation1 + $0x4] ss:$9 sm:$0xff] %v10851_v14  ;;  %v9124_v14 = vpop.permute.xlu1 %3231 }
0x10e4   :  { %3465 = vst [vmem:[#allocation1 + $0x5] ss:$9 sm:$0xff] %v10852_v39  ;;  %v9122_v47 = vpop.permute.xlu2 %3229 }
0x10e5   :  { %3466 = vst [vmem:[#allocation1 + $0x6] ss:$9 sm:$0xff] %v10853_v57  ;;  %v9116_v34 = vpop.permute.xlu0 %3227 }
0x10e6   :  { %3467 = vst [vmem:[#allocation1 + $0x7] ss:$9 sm:$0xff] %v10854_v40  ;;  %v10885_v40 = vld [vmem:[#allocation183_spill] sm:$0xff] }
0x10ed   :  { %v3468_v60 = vld [vmem:[#allocation1] sm:$0xff]  ;;  %v3242_v39 = vpop.permute.xlu0 %3241 }
0x10ee   :  { %3475 = vst [vmem:[#allocation1 + $0x6] ss:$9 sm:$0xff] %v10855_v28  ;;  %v3708_v12 = vsel %vm866_vm0, %v3468_v60, -inf  ;;  %v10886_v28 = vld [vmem:[#allocation159_spill] sm:$0xff] }
0x10ef   :  { %3469 = vst [vmem:[#allocation1] ss:$9 sm:$0xff] %v10856_v52  ;;  %3709 = vmax.xlane.f32.xlu2 %v3708_v12  ;;  %v10887_v12 = vld [vmem:[#allocation57_spill] sm:$0xff]  ;;  %v10888_v52 = vld [vmem:[#allocation122_spill] sm:$0xff] }
0x10f0   :  { %3470 = vst [vmem:[#allocation1 + $0x1] ss:$9 sm:$0xff] %v10857_v10  ;;  %v10889_v10 = vld [vmem:[#allocation155_spill] sm:$0xff] }
0x10f1   :  { %3471 = vst [vmem:[#allocation1 + $0x2] ss:$9 sm:$0xff] %v10858_v26  ;;  %v10890_v26 = vld [vmem:[#allocation68_spill] sm:$0xff] }
0x10f2   :  { %3472 = vst [vmem:[#allocation1 + $0x3] ss:$9 sm:$0xff] %v10859_v2  ;;  %v3258_v2 = vpop.permute.xlu2 %3257 }
0x10f3   :  { %3473 = vst [vmem:[#allocation1 + $0x4] ss:$9 sm:$0xff] %v10860_v8  ;;  %v3274_v8 = vpop.permute.xlu1 %3273 }
0x10f4   :  { %3474 = vst [vmem:[#allocation1 + $0x5] ss:$9 sm:$0xff] %v10861_v41 }
0x10f5   :  { %3476 = vst [vmem:[#allocation1 + $0x7] ss:$9 sm:$0xff] %v10862_v56  ;;  %v3290_v41 = vpop.permute.xlu0 %3289 }
0x10fc   :  { %v3477_v33 = vld [vmem:[#allocation1] sm:$0xff] }
0x10fd   :  { %3478 = vst [vmem:[#allocation1] ss:$9 sm:$0xff] %v10863_v38  ;;  %v3711_v21 = vsel %vm866_vm0, %v3477_v33, -inf  ;;  %v3322_v33 = vpop.permute.xlu1 %3321  ;;  %v3338_v38 = vpop.permute.xlu0 %3337 }
0x10fe   :  { %3479 = vst [vmem:[#allocation1 + $0x1] ss:$9 sm:$0xff] %v10864_v20  ;;  %3712 = vmax.xlane.f32.xlu1 %v3711_v21  ;;  %v10891_v21 = vld [vmem:[#allocation192_spill] sm:$0xff]  ;;  %v10893_v20 = vld [vmem:[#allocation123_spill] sm:$0xff] }
0x10ff   :  { %3480 = vst [vmem:[#allocation1 + $0x2] ss:$9 sm:$0xff] %v10865_v15  ;;  %v10894_v15 = vld [vmem:[#allocation103_spill] sm:$0xff] }
0x1100   :  { %3481 = vst [vmem:[#allocation1 + $0x3] ss:$9 sm:$0xff] %v10866_v16  ;;  %v10895_v16 = vld [vmem:[#allocation132_spill] sm:$0xff] }
0x1101   :  { %3482 = vst [vmem:[#allocation1 + $0x4] ss:$9 sm:$0xff] %v10867_v3  ;;  %v10896_v3 = vld [vmem:[#allocation12_spill] sm:$0xff] }
0x1102   :  { %3483 = vst [vmem:[#allocation1 + $0x5] ss:$9 sm:$0xff] %v10868_v45  ;;  %v10897_v45 = vld [vmem:[#allocation78_spill] sm:$0xff] }
0x1103   :  { %3484 = vst [vmem:[#allocation1 + $0x6] ss:$9 sm:$0xff] %v10869_v32 }
0x1104   :  { %3485 = vst [vmem:[#allocation1 + $0x7] ss:$9 sm:$0xff] %v8990_v29 }
0x1105   :  { %v9146_v32 = vpop.permute.xlu1 %3245 }
0x110b   :  { %v3486_v5 = vld [vmem:[#allocation1] sm:$0xff] }
0x110c   :  { %3488 = vst [vmem:[#allocation1 + $0x1] ss:$9 sm:$0xff] %v3240_v53  ;;  %v3714_v46 = vsel %vm866_vm0, %v3486_v5, -inf  ;;  %v10899_v5 = vld [vmem:[#allocation20_spill] sm:$0xff] }
0x110d   :  { %3487 = vst [vmem:[#allocation1] ss:$9 sm:$0xff] %v3224_v42  ;;  %3715 = vmax.xlane.f32.xlu0 %v3714_v46  ;;  %v3306_v42 = vpop.permute.xlu2 %3305  ;;  %v10900_v46 = vld [vmem:[#allocation73_spill] sm:$0xff] }
0x110e   :  { %3491 = vst [vmem:[#allocation1 + $0x4] ss:$9 sm:$0xff] %v3288_v22 }
0x110f   :  { %3489 = vst [vmem:[#allocation1 + $0x2] ss:$9 sm:$0xff] %v3256_v17 }
0x1110   :  { %3490 = vst [vmem:[#allocation1 + $0x3] ss:$9 sm:$0xff] %v3272_v18  ;;  %v10898_v18 = vld [vmem:[#allocation9_spill] sm:$0xff] }
0x1111   :  { %3494 = vst [vmem:[#allocation1 + $0x7] ss:$9 sm:$0xff] %v3336_v43  ;;  %v10901_v43 = vld [vmem:[#allocation134_spill] sm:$0xff] }
0x1112   :  { %3492 = vst [vmem:[#allocation1 + $0x5] ss:$9 sm:$0xff] %v3304_v30  ;;  %v10902_v30 = vld [vmem:[#allocation18_spill] sm:$0xff] }
0x1113   :  { %3493 = vst [vmem:[#allocation1 + $0x6] ss:$9 sm:$0xff] %v3320_v11  ;;  %v10903_v11 = vld [vmem:[#allocation176_spill] sm:$0xff] }
0x1115   :  { %v3244_v22 = vpop.permute.xlu2 %3243 }
0x111a   :  { %v3495_v35 = vld [vmem:[#allocation1] sm:$0xff] }
0x111b   :  { %3496 = vst [vmem:[#allocation1] ss:$9 sm:$0xff] %v8124_v27  ;;  %v3717_v29 = vsel %vm866_vm0, %v3495_v35, -inf  ;;  %v9155_v35 = vpop.permute.xlu1 %3261 }
0x111c   :  { %3497 = vst [vmem:[#allocation1 + $0x1] ss:$9 sm:$0xff] %v10870_v49  ;;  %3718 = vmax.xlane.f32.xlu2 %v3717_v29  ;;  %v10904_v29 = vld [vmem:[#allocation151_spill] sm:$0xff] }
0x111d   :  { %3498 = vst [vmem:[#allocation1 + $0x2] ss:$9 sm:$0xff] %v10871_v4  ;;  %v3260_v49 = vpop.permute.xlu2 %3259  ;;  %v10905_v4 = vld [vmem:[#allocation28_spill] sm:$0xff] }
0x111e   :  { %3499 = vst [vmem:[#allocation1 + $0x3] ss:$9 sm:$0xff] %v10872_v25  ;;  %v9159_v25 = vpop.permute.xlu0 %3247 }
0x111f   :  { %3500 = vst [vmem:[#allocation1 + $0x4] ss:$9 sm:$0xff] %v10873_v61 }
0x1120   :  { %3501 = vst [vmem:[#allocation1 + $0x5] ss:$9 sm:$0xff] %v10874_v54 }
0x1121   :  { %3502 = vst [vmem:[#allocation1 + $0x6] ss:$9 sm:$0xff] %v10875_v36  ;;  %v10906_v36 = vld [vmem:[#allocation79_spill] sm:$0xff] }
0x1122   :  { %3503 = vst [vmem:[#allocation1 + $0x7] ss:$9 sm:$0xff] %v10876_v24 }
0x1123   :  { %v3308_v24 = vpop.permute.xlu1 %3307 }
0x1129   :  { %v3504_v63 = vld [vmem:[#allocation1] sm:$0xff] }
0x112a   :  { %v3720_v27 = vsel %vm866_vm0, %v3504_v63, -inf  ;;  %3505 = vst [vmem:[#allocation1] ss:$9 sm:$0xff] %v10877_v6  ;;  %v10907_v63 = vld [vmem:[#allocation194_spill] sm:$0xff]  ;;  %v10908_v6 = vld [vmem:[#allocation165_spill] sm:$0xff] }
0x112b   :  { %3721 = vmax.xlane.f32.xlu1 %v3720_v27  ;;  %3506 = vst [vmem:[#allocation1 + $0x1] ss:$9 sm:$0xff] %v10878_v37  ;;  %v3292_v27 = vpop.permute.xlu2 %3291  ;;  %v10909_v37 = vld [vmem:[#allocation195_spill] sm:$0xff] }
0x112c   :  { %3507 = vst [vmem:[#allocation1 + $0x2] ss:$9 sm:$0xff] %v10879_v23  ;;  %v10910_v23 = vld [vmem:[#allocation157_spill] sm:$0xff] }
0x112d   :  { %3508 = vst [vmem:[#allocation1 + $0x3] ss:$9 sm:$0xff] %v10880_v55  ;;  %v10911_v55 = vld [vmem:[#allocation34_spill] sm:$0xff] }
0x112e   :  { %3509 = vst [vmem:[#allocation1 + $0x4] ss:$9 sm:$0xff] %v10881_v31  ;;  %v10912_v31 = vld [vmem:[#allocation39_spill] sm:$0xff] }
0x112f   :  { %3510 = vst [vmem:[#allocation1 + $0x5] ss:$9 sm:$0xff] %v10882_v9  ;;  %v3276_v9 = vpop.permute.xlu0 %3275 }
0x1130   :  { %3511 = vst [vmem:[#allocation1 + $0x6] ss:$9 sm:$0xff] %v10883_v19  ;;  %v9170_v19 = vpop.permute.xlu1 %3263 }
0x1131   :  { %3512 = vst [vmem:[#allocation1 + $0x7] ss:$9 sm:$0xff] %v10884_v1 }
0x1133   :  { %v3340_v1 = vpop.permute.xlu2 %3339 }
0x1138   :  { %v3513_v57 = vld [vmem:[#allocation1] sm:$0xff] }
0x1139   :  { %3514 = vst [vmem:[#allocation1] ss:$9 sm:$0xff] %v10885_v40  ;;  %v3723_v60 = vsel %vm866_vm0, %v3513_v57, -inf  ;;  %v3324_v40 = vpop.permute.xlu0 %3323 }
0x113a   :  { %3515 = vst [vmem:[#allocation1 + $0x1] ss:$9 sm:$0xff] %v10886_v28  ;;  %3724 = vmax.xlane.f32.xlu0 %v3723_v60  ;;  %v3294_v28 = vpop.permute.xlu1 %3293 }
0x113b   :  { %3516 = vst [vmem:[#allocation1 + $0x2] ss:$9 sm:$0xff] %v10887_v12  ;;  %v9174_v60 = vpop.permute.xlu2 %3279 }
0x113c   :  { %3517 = vst [vmem:[#allocation1 + $0x3] ss:$9 sm:$0xff] %v10888_v52 }
0x113d   :  { %3518 = vst [vmem:[#allocation1 + $0x4] ss:$9 sm:$0xff] %v10889_v10 }
0x113e   :  { %3519 = vst [vmem:[#allocation1 + $0x5] ss:$9 sm:$0xff] %v10890_v26  ;;  %v10914_v26 = vld [vmem:[#allocation217_spill] sm:$0xff] }
0x113f   :  { %3520 = vst [vmem:[#allocation1 + $0x6] ss:$9 sm:$0xff] %v8928_v13 }
0x1140   :  { %3521 = vst [vmem:[#allocation1 + $0x7] ss:$9 sm:$0xff] %v9008_v62 }
0x1142   :  { %v3326_v10 = vpop.permute.xlu1 %3325 }
0x1143   :  { %v3310_v52 = vpop.permute.xlu2 %3309 }
0x1147   :  { %v3522_v56 = vld [vmem:[#allocation1] sm:$0xff] }
0x1148   :  { %v3726_v53 = vsel %vm866_vm0, %v3522_v56, -inf  ;;  %3523 = vst [vmem:[#allocation1] ss:$9 sm:$0xff] %v9090_v51  ;;  %v10892_v51 = vld [vmem:[#allocation83_spill] sm:$0xff] }
0x1149   :  { %3727 = vmax.xlane.f32.xlu2 %v3726_v53  ;;  %3524 = vst [vmem:[#allocation1 + $0x1] ss:$9 sm:$0xff] %v3242_v39  ;;  %v10918_v56 = vld [vmem:[#allocation207_spill] sm:$0xff]  ;;  %v10919_v53 = vld [vmem:[#allocation198_spill] sm:$0xff] }
0x114a   :  { %3525 = vst [vmem:[#allocation1 + $0x2] ss:$9 sm:$0xff] %v3258_v2  ;;  %v10915_v2 = vld [vmem:[#allocation170_spill] sm:$0xff] }
0x114b   :  { %3526 = vst [vmem:[#allocation1 + $0x3] ss:$9 sm:$0xff] %v3274_v8  ;;  %v10916_v8 = vld [vmem:[#allocation24_spill] sm:$0xff] }
0x114c   :  { %3527 = vst [vmem:[#allocation1 + $0x4] ss:$9 sm:$0xff] %v3290_v41  ;;  %v10917_v41 = vld [vmem:[#allocation106_spill] sm:$0xff] }
0x114d   :  { %3528 = vst [vmem:[#allocation1 + $0x5] ss:$9 sm:$0xff] %v3306_v42  ;;  %v9185_v42 = vpop.permute.xlu2 %3311 }
0x114e   :  { %3529 = vst [vmem:[#allocation1 + $0x6] ss:$9 sm:$0xff] %v3322_v33  ;;  %v3278_v33 = vpop.permute.xlu0 %3277 }
0x114f   :  { %3530 = vst [vmem:[#allocation1 + $0x7] ss:$9 sm:$0xff] %v3338_v38  ;;  %v3800_v38 = vlaneseq }
0x1156   :  { %v3531_v13 = vld [vmem:[#allocation1] sm:$0xff] }
0x1157   :  { %v3729_v62 = vsel %vm866_vm0, %v3531_v13, -inf  ;;  %3532 = vst [vmem:[#allocation1] ss:$9 sm:$0xff] %v8112_v44 }
0x1158   :  { %3730 = vmax.xlane.f32.xlu2 %v3729_v62  ;;  %3533 = vst [vmem:[#allocation1 + $0x1] ss:$9 sm:$0xff] %v10891_v21  ;;  %v10920_v21 = vld [vmem:[#allocation216_spill] sm:$0xff] }
0x1159   :  { %3534 = vst [vmem:[#allocation1 + $0x2] ss:$9 sm:$0xff] %v10892_v51  ;;  %v10921_v51 = vld [vmem:[#allocation53_spill] sm:$0xff] }
0x115a   :  { %3535 = vst [vmem:[#allocation1 + $0x3] ss:$9 sm:$0xff] %v10893_v20  ;;  %v10922_v20 = vld [vmem:[#allocation158_spill] sm:$0xff] }
0x115b   :  { %3536 = vst [vmem:[#allocation1 + $0x4] ss:$9 sm:$0xff] %v10894_v15  ;;  %v9193_v15 = vand.u32 127, %v3800_v38 }
0x115c   :  { %3537 = vst [vmem:[#allocation1 + $0x5] ss:$9 sm:$0xff] %v10895_v16  ;;  %v10923_v16 = vld [vmem:[#allocation97_spill] sm:$0xff] }
0x115d   :  { %3538 = vst [vmem:[#allocation1 + $0x6] ss:$9 sm:$0xff] %v10896_v3  ;;  %v10924_v3 = vld [vmem:[#allocation214_spill] sm:$0xff] }
0x115e   :  { %3539 = vst [vmem:[#allocation1 + $0x7] ss:$9 sm:$0xff] %v10897_v45  ;;  %v10925_v45 = vld [vmem:[#allocation206_spill] sm:$0xff] }
0x1165   :  { %v3540_v17 = vld [vmem:[#allocation1] sm:$0xff] }
0x1166   :  { %v3732_v44 = vsel %vm866_vm0, %v3540_v17, -inf  ;;  %3541 = vst [vmem:[#allocation1] ss:$9 sm:$0xff] %v10898_v18  ;;  %v3674_v17 = vpop.xlane.xlu2 %3673 }
0x1167   :  { %3733 = vmax.xlane.f32.xlu1 %v3732_v44  ;;  %3542 = vst [vmem:[#allocation1 + $0x1] ss:$9 sm:$0xff] %v10899_v5  ;;  %v9202_v44 = vadd.s32 4294967192, %v9193_v15  ;;  %v10926_v5 = vld [vmem:[#allocation173_spill] sm:$0xff] }
0x1168   :  { %3543 = vst [vmem:[#allocation1 + $0x2] ss:$9 sm:$0xff] %v10900_v46  ;;  %v10927_v46 = vld [vmem:[#allocation58_spill] sm:$0xff] }
0x1169   :  { %3544 = vst [vmem:[#allocation1 + $0x3] ss:$9 sm:$0xff] %v10901_v43  ;;  %v9206_v43 = vpop.permute.xlu0 %3295 }
0x116a   :  { %3545 = vst [vmem:[#allocation1 + $0x4] ss:$9 sm:$0xff] %v10902_v30 }
0x116b   :  { %3546 = vst [vmem:[#allocation1 + $0x5] ss:$9 sm:$0xff] %v10903_v11 }
0x116c   :  { %3547 = vst [vmem:[#allocation1 + $0x6] ss:$9 sm:$0xff] %v10904_v29 }
0x116d   :  { %3548 = vst [vmem:[#allocation1 + $0x7] ss:$9 sm:$0xff] %v10905_v4 }
0x1174   :  { %v3549_v61 = vld [vmem:[#allocation1] sm:$0xff] }
0x1175   :  { %v3735_v54 = vsel %vm866_vm0, %v3549_v61, -inf  ;;  %3550 = vst [vmem:[#allocation1] ss:$9 sm:$0xff] %v10906_v36  ;;  %v10928_v61 = vld [vmem:[#allocation153_spill] sm:$0xff]  ;;  %v10930_v36 = vld [vmem:[#allocation220_spill] sm:$0xff] }
0x1176   :  { %3736 = vmax.xlane.f32.xlu0 %v3735_v54  ;;  %3551 = vst [vmem:[#allocation1 + $0x1] ss:$9 sm:$0xff] %v10907_v63  ;;  %v10929_v54 = vld [vmem:[#allocation117_spill] sm:$0xff] }
0x1177   :  { %3552 = vst [vmem:[#allocation1 + $0x2] ss:$9 sm:$0xff] %v10908_v6  ;;  %v10931_v63 = vld [vmem:[#allocation213_spill] sm:$0xff]  ;;  %v10933_v6 = vld [vmem:[#allocation42_spill] sm:$0xff] }
0x1178   :  { %3553 = vst [vmem:[#allocation1 + $0x3] ss:$9 sm:$0xff] %v10909_v37  ;;  %v10934_v37 = vld [vmem:[#allocation126_spill] sm:$0xff] }
0x1179   :  { %3554 = vst [vmem:[#allocation1 + $0x4] ss:$9 sm:$0xff] %v10910_v23 }
0x117a   :  { %3555 = vst [vmem:[#allocation1 + $0x5] ss:$9 sm:$0xff] %v10911_v55 }
0x117b   :  { %3556 = vst [vmem:[#allocation1 + $0x6] ss:$9 sm:$0xff] %v10912_v31 }
0x117c   :  { %3557 = vst [vmem:[#allocation1 + $0x7] ss:$9 sm:$0xff] %v9048_v58 }
0x1183   :  { %v3558_v39 = vld [vmem:[#allocation1] sm:$0xff] }
0x1184   :  { %v3738_v57 = vsel %vm866_vm0, %v3558_v39, -inf  ;;  %3559 = vst [vmem:[#allocation1] ss:$9 sm:$0xff] %v9116_v34  ;;  %v10913_v34 = vld [vmem:[#allocation209_spill] sm:$0xff] }
0x1185   :  { %3739 = vmax.xlane.f32.xlu1 %v3738_v57  ;;  %3560 = vst [vmem:[#allocation1 + $0x1] ss:$9 sm:$0xff] %v3244_v22  ;;  %v9199_v22 = vadd.s32 4294967200, %v9193_v15 }
0x1186   :  { %3561 = vst [vmem:[#allocation1 + $0x2] ss:$9 sm:$0xff] %v3260_v49 }
0x1187   :  { %3562 = vst [vmem:[#allocation1 + $0x3] ss:$9 sm:$0xff] %v3276_v9  ;;  %v4118_v30 = vperm.slane %v3674_v17, %v9199_v22  ;;  %v9227_v9 = vadd.s32 4294967176, %v9193_v15 }
0x1188   :  { %3563 = vst [vmem:[#allocation1 + $0x4] ss:$9 sm:$0xff] %v3292_v27  ;;  %v10932_v27 = vld [vmem:[#allocation65_spill] sm:$0xff] }
0x1189   :  { %3564 = vst [vmem:[#allocation1 + $0x5] ss:$9 sm:$0xff] %v3308_v24  ;;  %v3342_v24 = vpop.permute.xlu0 %3341 }
0x118a   :  { %3565 = vst [vmem:[#allocation1 + $0x6] ss:$9 sm:$0xff] %v3324_v40 }
0x118b   :  { %3566 = vst [vmem:[#allocation1 + $0x7] ss:$9 sm:$0xff] %v3340_v1  ;;  %v3683_v1 = vpop.xlane.xlu2 %3682 }
0x1191   :  { %v9220_v23 = vpop.permute.xlu0 %3343 }
0x1192   :  { %v3567_v58 = vld [vmem:[#allocation1] sm:$0xff] }
0x1193   :  { %v3741_v12 = vsel %vm866_vm0, %v3567_v58, -inf  ;;  %3568 = vst [vmem:[#allocation1] ss:$9 sm:$0xff] %v8992_v7  ;;  %v9187_v7 = vpop.permute.xlu1 %3327  ;;  %v10935_v58 = vld [vmem:[#allocation61_spill] sm:$0xff] }
0x1194   :  { %3742 = vmax.xlane.f32.xlu1 %v3741_v12  ;;  %3569 = vst [vmem:[#allocation1 + $0x1] ss:$9 sm:$0xff] %v10913_v34  ;;  %v10936_v12 = vld [vmem:[#allocation71_spill] sm:$0xff]  ;;  %v10938_v34 = vld [vmem:[#allocation178_spill] sm:$0xff] }
0x1195   :  { %3570 = vst [vmem:[#allocation1 + $0x2] ss:$9 sm:$0xff] %v10914_v26  ;;  %v10939_v26 = vld [vmem:[#allocation48_spill] sm:$0xff] }
0x1196   :  { %3571 = vst [vmem:[#allocation1 + $0x3] ss:$9 sm:$0xff] %v10915_v2 }
0x1197   :  { %3572 = vst [vmem:[#allocation1 + $0x4] ss:$9 sm:$0xff] %v10916_v8  ;;  %v10940_v8 = vld [vmem:[#allocation136_spill] sm:$0xff] }
0x1198   :  { %3573 = vst [vmem:[#allocation1 + $0x5] ss:$9 sm:$0xff] %v10917_v41  ;;  %v10941_v41 = vld [vmem:[#allocation76_spill] sm:$0xff] }
0x1199   :  { %3574 = vst [vmem:[#allocation1 + $0x6] ss:$9 sm:$0xff] %v10918_v56  ;;  %v3680_v39 = vpop.xlane.xlu0 %3679 }
0x119a   :  { %3575 = vst [vmem:[#allocation1 + $0x7] ss:$9 sm:$0xff] %v10919_v53  ;;  %v3692_v53 = vpop.xlane.xlu2 %3691 }
0x119b   :  { %v3677_v18 = vpop.xlane.xlu1 %3676 }
0x119c   :  { %v4120_v11 = vperm.slane %v3677_v18, %v9202_v44  ;;  %v10945_v18 = vld [vmem:[#allocation168_spill] sm:$0xff] }
0x119e   :  { %v4122_v29 = vsel %vm4121_vm1, %v4120_v11, %v4118_v30  ;;  %v10948_v11 = vld [vmem:[#allocation49_spill] sm:$0xff] }
0x11a1   :  { %v3576_v13 = vld [vmem:[#allocation1] sm:$0xff]  ;;  %v3689_v2 = vpop.xlane.xlu0 %3688 }
0x11a2   :  { %v3744_v62 = vsel %vm866_vm0, %v3576_v13, -inf  ;;  %3577 = vst [vmem:[#allocation1] ss:$9 sm:$0xff] %v10920_v21  ;;  %v4132_v56 = vperm.slane %v3689_v2, %v9202_v44 }
0x11a3   :  { %3745 = vmax.xlane.f32.xlu0 %v3744_v62  ;;  %3578 = vst [vmem:[#allocation1 + $0x1] ss:$9 sm:$0xff] %v10921_v51 }
0x11a4   :  { %3579 = vst [vmem:[#allocation1 + $0x2] ss:$9 sm:$0xff] %v10922_v20  ;;  %v10942_v20 = vld [vmem:[#allocation43_spill] sm:$0xff] }
0x11a5   :  { %3580 = vst [vmem:[#allocation1 + $0x3] ss:$9 sm:$0xff] %v10923_v16 }
0x11a6   :  { %3581 = vst [vmem:[#allocation1 + $0x4] ss:$9 sm:$0xff] %v10924_v3  ;;  %v10943_v3 = vld [vmem:[#allocation128_spill] sm:$0xff] }
0x11a7   :  { %3582 = vst [vmem:[#allocation1 + $0x5] ss:$9 sm:$0xff] %v10925_v45  ;;  %v10944_v45 = vld [vmem:[#allocation75_spill] sm:$0xff] }
0x11a8   :  { %3583 = vst [vmem:[#allocation1 + $0x6] ss:$9 sm:$0xff] %v10926_v5  ;;  %v10946_v5 = vld [vmem:[#allocation143_spill] sm:$0xff] }
0x11a9   :  { %3584 = vst [vmem:[#allocation1 + $0x7] ss:$9 sm:$0xff] %v10927_v46  ;;  %v10947_v46 = vld [vmem:[#allocation82_spill] sm:$0xff] }
0x11b0   :  { %v3585_v49 = vld [vmem:[#allocation1] sm:$0xff] }
0x11b1   :  { %v3747_v4 = vsel %vm866_vm0, %v3585_v49, -inf  ;;  %3586 = vst [vmem:[#allocation1] ss:$9 sm:$0xff] %v10928_v61  ;;  %v10950_v61 = vld [vmem:[#allocation81_spill] sm:$0xff] }
0x11b2   :  { %3748 = vmax.xlane.f32.xlu2 %v3747_v4  ;;  %3587 = vst [vmem:[#allocation1 + $0x1] ss:$9 sm:$0xff] %v10929_v54  ;;  %v10951_v54 = vld [vmem:[#allocation60_spill] sm:$0xff] }
0x11b3   :  { %3588 = vst [vmem:[#allocation1 + $0x2] ss:$9 sm:$0xff] %v10930_v36  ;;  %v10952_v36 = vld [vmem:[#allocation150_spill] sm:$0xff] }
0x11b4   :  { %3589 = vst [vmem:[#allocation1 + $0x3] ss:$9 sm:$0xff] %v10931_v63  ;;  %v10954_v63 = vld [vmem:[#allocation11_spill] sm:$0xff] }
0x11b5   :  { %3590 = vst [vmem:[#allocation1 + $0x4] ss:$9 sm:$0xff] %v10932_v27  ;;  %v10955_v27 = vld [vmem:[#allocation98_spill] sm:$0xff] }
0x11b6   :  { %3591 = vst [vmem:[#allocation1 + $0x5] ss:$9 sm:$0xff] %v10933_v6 }
0x11b7   :  { %3592 = vst [vmem:[#allocation1 + $0x6] ss:$9 sm:$0xff] %v10934_v37 }
0x11b8   :  { %3593 = vst [vmem:[#allocation1 + $0x7] ss:$9 sm:$0xff] %v9044_v48  ;;  %v9230_v48 = vadd.s32 4294967184, %v9193_v15 }
0x11ba   :  { %v4134_v38 = vperm.slane %v3692_v53, %v9230_v48  ;;  %v10966_v53 = vld [vmem:[#allocation15_spill] sm:$0xff] }
0x11bf   :  { %v3594_v55 = vld [vmem:[#allocation1] sm:$0xff] }
0x11c0   :  { %v3750_v31 = vsel %vm866_vm0, %v3594_v55, -inf  ;;  %3595 = vst [vmem:[#allocation1] ss:$9 sm:$0xff] %v9122_v47  ;;  %v4124_v47 = vperm.slane %v3680_v39, %v9230_v48  ;;  %v10959_v39 = vld [vmem:[#allocation47_spill] sm:$0xff] }
0x11c1   :  { %3751 = vmax.xlane.f32.xlu0 %v3750_v31  ;;  %3596 = vst [vmem:[#allocation1 + $0x1] ss:$9 sm:$0xff] %v9146_v32  ;;  %v4128_v32 = vperm.slane %v3683_v1, %v9227_v9  ;;  %v10958_v31 = vld [vmem:[#allocation148_spill] sm:$0xff] }
0x11c2   :  { %3597 = vst [vmem:[#allocation1 + $0x2] ss:$9 sm:$0xff] %v9155_v35  ;;  %v4126_v35 = vsel %vm4125_vm2, %v4124_v47, %v4122_v29  ;;  %v10949_v29 = vld [vmem:[#allocation188_spill] sm:$0xff]  ;;  %v3802_v1 = vperm.slane %v10958_v31, %v9193_v15 }
0x11c3   :  { %3598 = vst [vmem:[#allocation1 + $0x3] ss:$9 sm:$0xff] %v3278_v33  ;;  %v4130_v57 = vsel %vm4129_vm3, %v4128_v32, %v4126_v35  ;;  %v10960_v32 = vld [vmem:[#allocation32_spill] sm:$0xff] }
0x11c4   :  { %3599 = vst [vmem:[#allocation1 + $0x4] ss:$9 sm:$0xff] %v3294_v28 }
0x11c5   :  { %3600 = vst [vmem:[#allocation1 + $0x5] ss:$9 sm:$0xff] %v3310_v52  ;;  %v3686_v52 = vpop.xlane.xlu1 %3685 }
0x11c6   :  { %3601 = vst [vmem:[#allocation1 + $0x6] ss:$9 sm:$0xff] %v3326_v10  ;;  %v10937_v10 = vld [vmem:[#allocation163_spill] sm:$0xff] }
0x11c7   :  { %3602 = vst [vmem:[#allocation1 + $0x7] ss:$9 sm:$0xff] %v3342_v24  ;;  %v10953_v24 = vld [vmem:[#allocation182_spill] sm:$0xff] }
0x11cd   :  { %v3695_v13 = vpop.xlane.xlu1 %3694 }
0x11ce   :  { %v3603_v40 = vld [vmem:[#allocation1] sm:$0xff]  ;;  %v4136_v16 = vperm.slane %v3695_v13, %v9227_v9 }
0x11cf   :  { %v3753_v28 = vsel %vm866_vm0, %v3603_v40, -inf  ;;  %3604 = vst [vmem:[#allocation1] ss:$9 sm:$0xff] %v9022_v59  ;;  %v4131_v59 = vperm.slane %v3686_v52, %v9199_v22 }
0x11d0   :  { %3754 = vmax.xlane.f32.xlu0 %v3753_v28  ;;  %3605 = vst [vmem:[#allocation1 + $0x1] ss:$9 sm:$0xff] %v10935_v58  ;;  %v10962_v28 = vld [vmem:[#allocation40_spill] sm:$0xff] }
0x11d1   :  { %3606 = vst [vmem:[#allocation1 + $0x2] ss:$9 sm:$0xff] %v10936_v12  ;;  %v4133_v33 = vsel %vm4121_vm1, %v4132_v56, %v4131_v59  ;;  %v10963_v12 = vld [vmem:[#allocation62_spill] sm:$0xff] }
0x11d2   :  { %3607 = vst [vmem:[#allocation1 + $0x3] ss:$9 sm:$0xff] %v10937_v10  ;;  %v4135_v21 = vsel %vm4125_vm2, %v4134_v38, %v4133_v33  ;;  %v3822_v33 = vperm.slane %v10966_v53, %v9193_v15  ;;  %v10967_v38 = vld [vmem:[#allocation29_spill] sm:$0xff]  ;;  %v10981_v53 = vld [vmem:[#allocation104_spill] sm:$0xff] }
0x11d3   :  { %3608 = vst [vmem:[#allocation1 + $0x4] ss:$9 sm:$0xff] %v10938_v34  ;;  %v4137_v17 = vsel %vm4129_vm3, %v4136_v16, %v4135_v21 }
0x11d4   :  { %3609 = vst [vmem:[#allocation1 + $0x5] ss:$9 sm:$0xff] %v10939_v26  ;;  %v9260_v30 = vsel %vm3864_vm4, %v4137_v17, %v4130_v57  ;;  %v10961_v57 = vld [vmem:[#allocation25_spill] sm:$0xff]  ;;  %v10964_v26 = vld [vmem:[#allocation16_spill] sm:$0xff] }
0x11d5   :  { %3610 = vst [vmem:[#allocation1 + $0x6] ss:$9 sm:$0xff] %v10940_v8  ;;  %v3815_v40 = vperm.slane %v10961_v57, %v9193_v15  ;;  %v9312_v10 = vpop.xlane.xlu1 %3703  ;;  %v10965_v8 = vld [vmem:[#allocation55_spill] sm:$0xff] }
0x11d6   :  { %3611 = vst [vmem:[#allocation1 + $0x7] ss:$9 sm:$0xff] %v10941_v41 }
0x11dd   :  { %v3612_v62 = vld [vmem:[#allocation1] sm:$0xff] }
0x11de   :  { %v3756_v51 = vsel %vm866_vm0, %v3612_v62, -inf  ;;  %3613 = vst [vmem:[#allocation1] ss:$9 sm:$0xff] %v10942_v20 }
0x11df   :  { %3757 = vmax.xlane.f32.xlu2 %v3756_v51  ;;  %3614 = vst [vmem:[#allocation1 + $0x1] ss:$9 sm:$0xff] %v10943_v3  ;;  %v10968_v3 = vld [vmem:[#allocation70_spill] sm:$0xff] }
0x11e0   :  { %3615 = vst [vmem:[#allocation1 + $0x2] ss:$9 sm:$0xff] %v10944_v45 }
0x11e1   :  { %3616 = vst [vmem:[#allocation1 + $0x3] ss:$9 sm:$0xff] %v10945_v18 }
0x11e2   :  { %3617 = vst [vmem:[#allocation1 + $0x4] ss:$9 sm:$0xff] %v10946_v5  ;;  %v10969_v5 = vld [vmem:[#allocation44_spill] sm:$0xff] }
0x11e3   :  { %3618 = vst [vmem:[#allocation1 + $0x5] ss:$9 sm:$0xff] %v10947_v46 }
0x11e4   :  { %3619 = vst [vmem:[#allocation1 + $0x6] ss:$9 sm:$0xff] %v10948_v11 }
0x11e5   :  { %3620 = vst [vmem:[#allocation1 + $0x7] ss:$9 sm:$0xff] %v10949_v29  ;;  %v10970_v29 = vld [vmem:[#allocation77_spill] sm:$0xff] }
0x11ec   :  { %v3621_v49 = vld [vmem:[#allocation1] sm:$0xff] }
0x11ed   :  { %v3759_v4 = vsel %vm866_vm0, %v3621_v49, -inf  ;;  %3622 = vst [vmem:[#allocation1] ss:$9 sm:$0xff] %v10950_v61  ;;  %v3829_v49 = vperm.slane %v10970_v29, %v9193_v15 }
0x11ee   :  { %3760 = vmax.xlane.f32.xlu1 %v3759_v4  ;;  %3623 = vst [vmem:[#allocation1 + $0x1] ss:$9 sm:$0xff] %v10951_v54  ;;  %v10971_v4 = vld [vmem:[#allocation92_spill] sm:$0xff]  ;;  %v10972_v54 = vld [vmem:[#allocation59_spill] sm:$0xff] }
0x11ef   :  { %3624 = vst [vmem:[#allocation1 + $0x2] ss:$9 sm:$0xff] %v10952_v36 }
0x11f0   :  { %3625 = vst [vmem:[#allocation1 + $0x3] ss:$9 sm:$0xff] %v10953_v24 }
0x11f1   :  { %3626 = vst [vmem:[#allocation1 + $0x4] ss:$9 sm:$0xff] %v10954_v63  ;;  %v10973_v63 = vld [vmem:[#allocation107_spill] sm:$0xff] }
0x11f2   :  { %3627 = vst [vmem:[#allocation1 + $0x5] ss:$9 sm:$0xff] %v10955_v27 }
0x11f3   :  { %3628 = vst [vmem:[#allocation1 + $0x6] ss:$9 sm:$0xff] %v8936_v0 }
0x11f4   :  { %3629 = vst [vmem:[#allocation1 + $0x7] ss:$9 sm:$0xff] %v9056_v50 }
0x11fb   :  { %v3630_v6 = vld [vmem:[#allocation1] sm:$0xff] }
0x11fc   :  { %v3762_v37 = vsel %vm866_vm0, %v3630_v6, -inf  ;;  %3631 = vst [vmem:[#allocation1] ss:$9 sm:$0xff] %v9124_v14  ;;  %v9283_v14 = vpop.xlane.xlu0 %3697  ;;  %v10974_v6 = vld [vmem:[#allocation120_spill] sm:$0xff] }
0x11fd   :  { %3763 = vmax.xlane.f32.xlu2 %v3762_v37  ;;  %3632 = vst [vmem:[#allocation1 + $0x1] ss:$9 sm:$0xff] %v9159_v25  ;;  %v9286_v25 = vadd.s32 4294967288, %v9193_v15 }
0x11fe   :  { %3633 = vst [vmem:[#allocation1 + $0x2] ss:$9 sm:$0xff] %v9170_v19  ;;  %v9288_v19 = vpop.xlane.xlu2 %3700 }
0x11ff   :  { %3634 = vst [vmem:[#allocation1 + $0x3] ss:$9 sm:$0xff] %v9174_v60  ;;  %v9291_v60 = vadd.s32 4294967280, %v9193_v15  ;;  %v3823_v52 = vperm.slane %v10963_v12, %v9286_v25  ;;  %v3830_v45 = vperm.slane %v10968_v3, %v9286_v25  ;;  %v3837_v36 = vperm.slane %v10972_v54, %v9286_v25 }
0x1200   :  { %3635 = vst [vmem:[#allocation1 + $0x4] ss:$9 sm:$0xff] %v9206_v43  ;;  %v3844_v37 = vperm.slane %v10974_v6, %v9286_v25  ;;  %v10988_v6 = vld [vmem:[#allocation142_spill] sm:$0xff] }
0x1201   :  { %3636 = vst [vmem:[#allocation1 + $0x5] ss:$9 sm:$0xff] %v9185_v42  ;;  %v10956_v42 = vld [vmem:[#allocation141_spill] sm:$0xff]  ;;  %v3818_v47 = vperm.slane %v10959_v39, %v9291_v60  ;;  %v3808_v35 = vperm.slane %v10960_v32, %v9291_v60  ;;  %v3825_v41 = vperm.slane %v10965_v8, %v9291_v60  ;;  %v3824_v16 = vsel %vm3805_vm5, %v3823_v52, %v3822_v33 }
0x1202   :  { %3637 = vst [vmem:[#allocation1 + $0x6] ss:$9 sm:$0xff] %v9187_v7  ;;  %v3804_v43 = vperm.slane %v10956_v42, %v9286_v25  ;;  %v9296_v7 = vadd.s32 4294967272, %v9193_v15  ;;  %v3832_v46 = vperm.slane %v10969_v5, %v9291_v60  ;;  %v3839_v27 = vperm.slane %v10973_v63, %v9291_v60  ;;  %v10987_v63 = vld [vmem:[#allocation174_spill] sm:$0xff] }
0x1203   :  { %3638 = vst [vmem:[#allocation1 + $0x7] ss:$9 sm:$0xff] %v9220_v23  ;;  %v10957_v23 = vld [vmem:[#allocation10_spill] sm:$0xff]  ;;  %v3826_v18 = vsel %vm3809_vm6, %v3825_v41, %v3824_v16  ;;  %v3853_v33 = vperm.slane %v10981_v53, %v9291_v60  ;;  %v9386_v16 = vadd.s32 4294967264, %v9193_v15 }
0x1204   :  { %v3816_v55 = vperm.slane %v10957_v23, %v9286_v25  ;;  %v3820_v58 = vperm.slane %v10962_v28, %v9296_v7  ;;  %v3806_v34 = vsel %vm3805_vm5, %v3804_v43, %v3802_v1  ;;  %v3812_v2 = vperm.slane %v10964_v26, %v9296_v7  ;;  %v9319_v56 = vpop.xlane.xlu0 %3706  ;;  %v10976_v43 = vld [vmem:[#allocation101_spill] sm:$0xff] }
0x1205   :  { %v3827_v13 = vperm.slane %v10967_v38, %v9296_v7  ;;  %v3810_v51 = vsel %vm3809_vm6, %v3808_v35, %v3806_v34  ;;  %v3834_v61 = vperm.slane %v10971_v4, %v9296_v7  ;;  %v3841_v23 = vperm.slane %v10976_v43, %v9296_v7  ;;  %v10979_v35 = vld [vmem:[#allocation89_spill] sm:$0xff]  ;;  %v10985_v4 = vld [vmem:[#allocation124_spill] sm:$0xff] }
0x1206   :  { %v3817_v59 = vsel %vm3805_vm5, %v3816_v55, %v3815_v40  ;;  %v9327_v21 = vpop.xlane.xlu2 %3709  ;;  %v3814_v17 = vsel %vm3813_vm7, %v3812_v2, %v3810_v51  ;;  %v10977_v55 = vld [vmem:[#allocation116_spill] sm:$0xff]  ;;  %v3848_v57 = vperm.slane %v10979_v35, %v9296_v7  ;;  %v10980_v34 = vld [vmem:[#allocation129_spill] sm:$0xff]  ;;  %v9372_v2 = vadd.s32 4294967256, %v9193_v15  ;;  %v10983_v51 = vld [vmem:[#allocation147_spill] sm:$0xff] }
0x1207   :  { %v3819_v62 = vsel %vm3809_vm6, %v3818_v47, %v3817_v59  ;;  %v3828_v11 = vsel %vm3813_vm7, %v3827_v13, %v3826_v18  ;;  %v3846_v31 = vperm.slane %v10977_v55, %v9291_v60  ;;  %v10978_v47 = vld [vmem:[#allocation74_spill] sm:$0xff]  ;;  %v3851_v26 = vperm.slane %v10980_v34, %v9286_v25  ;;  %v10982_v13 = vld [vmem:[#allocation137_spill] sm:$0xff] }
0x1208   :  { %v3821_v20 = vsel %vm3813_vm7, %v3820_v58, %v3819_v62  ;;  %v3843_v32 = vperm.slane %v10978_v47, %v9193_v15  ;;  %v9365_v58 = vpop.xlane.xlu1 %3712  ;;  %v3850_v62 = vperm.slane %v10982_v13, %v9193_v15  ;;  %v10998_v13 = vld [vmem:[#allocation80_spill] sm:$0xff] }
0x1209   :  { %v3865_v24 = vsel %vm3864_vm4, %v3821_v20, %v3814_v17  ;;  %v3855_v20 = vperm.slane %v10983_v51, %v9296_v7  ;;  %v9392_v17 = vadd.s32 4294967248, %v9193_v15 }
0x120a   :  { %v3639_v0 = vld [vmem:[#allocation1] sm:$0xff]  ;;  %v3867_v1 = vsel %vm3866_vm8, %v3828_v11, %v3865_v24  ;;  %v3845_v52 = vsel %vm3805_vm5, %v3844_v37, %v3843_v32  ;;  %v3852_v5 = vsel %vm3805_vm5, %v3851_v26, %v3850_v62  ;;  %v3857_v37 = vperm.slane %v10988_v6, %v9193_v15  ;;  %v10993_v32 = vld [vmem:[#allocation95_spill] sm:$0xff] }
0x120b   :  { %v3765_v50 = vsel %vm866_vm0, %v3639_v0, -inf  ;;  %v3831_v0 = vsel %vm3805_vm5, %v3830_v45, %v3829_v49  ;;  %v3847_v59 = vsel %vm3809_vm6, %v3846_v31, %v3845_v52  ;;  %v3854_v49 = vsel %vm3809_vm6, %v3853_v33, %v3852_v5  ;;  %v10992_v31 = vld [vmem:[#allocation85_spill] sm:$0xff]  ;;  %v10995_v52 = vld [vmem:[#allocation26_spill] sm:$0xff] }
0x120c   :  { %3766 = vmax.xlane.f32.xlu1 %v3765_v50  ;;  %v10975_v50 = vld [vmem:[#allocation86_spill] sm:$0xff]  ;;  %v3833_v39 = vsel %vm3809_vm6, %v3832_v46, %v3831_v0  ;;  %v9374_v8 = vpop.xlane.xlu0 %3715  ;;  %v3849_v38 = vsel %vm3813_vm7, %v3848_v57, %v3847_v59  ;;  %v10984_v46 = vld [vmem:[#allocation8_spill] sm:$0xff]  ;;  %v3856_v54 = vsel %vm3813_vm7, %v3855_v20, %v3854_v49  ;;  %v3925_v35 = vperm.slane %v10993_v32, %v9386_v16  ;;  %v10997_v59 = vld [vmem:[#allocation41_spill] sm:$0xff] }
0x120d   :  { %v3836_v42 = vperm.slane %v10975_v50, %v9193_v15  ;;  %v3835_v40 = vsel %vm3813_vm7, %v3834_v61, %v3833_v39  ;;  %v3914_v11 = vperm.slane %v10984_v46, %v9372_v2  ;;  %v3858_v61 = vperm.slane %v10985_v4, %v9286_v25  ;;  %v10989_v0 = vld [vmem:[#allocation186_spill] sm:$0xff]  ;;  %v10990_v25 = vld [vmem:[#allocation35_spill] sm:$0xff]  ;;  %v10994_v57 = vld [vmem:[#allocation100_spill] sm:$0xff] }
0x120e   :  { %v9388_v3 = vpop.xlane.xlu2 %3718  ;;  %v3869_v45 = vsel %vm3868_vm9, %v3835_v40, %v3867_v1  ;;  %v3918_v50 = vperm.slane %v10989_v0, %v9392_v17  ;;  %v3926_v43 = vperm.slane %v10990_v25, %v9372_v2  ;;  %v3933_v1 = vperm.slane %v10992_v31, %v9372_v2  ;;  %v10996_v26 = vld [vmem:[#allocation110_spill] sm:$0xff]  ;;  %v10999_v20 = vld [vmem:[#allocation31_spill] sm:$0xff]  ;;  %v11001_v4 = vld [vmem:[#allocation17_spill] sm:$0xff] }
0x120f   :  { %v3838_v28 = vsel %vm3805_vm5, %v3837_v36, %v3836_v42  ;;  %v10986_v36 = vld [vmem:[#allocation23_spill] sm:$0xff]  ;;  %v9412_v42 = vadd.s32 4294967240, %v9193_v15  ;;  %v3859_v47 = vsel %vm3805_vm5, %v3858_v61, %v3857_v37  ;;  %v3935_v40 = vperm.slane %v10994_v57, %v9392_v17  ;;  %v11004_v37 = vld [vmem:[#allocation22_spill] sm:$0xff] }
0x1210   :  { %v3840_v12 = vsel %vm3809_vm6, %v3839_v27, %v3838_v28  ;;  %v3860_v24 = vperm.slane %v10986_v36, %v9291_v60  ;;  %v3912_v27 = vperm.slane %v10987_v63, %v9386_v16  ;;  %v10991_v60 = vld [vmem:[#allocation14_spill] sm:$0xff]  ;;  %v9429_v28 = vpop.xlane.xlu1 %3721  ;;  %v3927_v51 = vsel %vm3915_vm12, %v3926_v43, %v3925_v35  ;;  %v11000_v46 = vld [vmem:[#allocation115_spill] sm:$0xff] }
0x1211   :  { %v3842_v41 = vsel %vm3813_vm7, %v3841_v23, %v3840_v12  ;;  %v3928_v55 = vperm.slane %v10991_v60, %v9392_v17  ;;  %v3930_v34 = vperm.slane %v10995_v52, %v9412_v42  ;;  %v3937_v53 = vperm.slane %v10997_v59, %v9412_v42  ;;  %v11009_v35 = vld [vmem:[#allocation127_spill] sm:$0xff] }
0x1212   :  { %v3871_v18 = vsel %vm3870_vm10, %v3842_v41, %v3869_v45  ;;  %v3916_v23 = vsel %vm3915_vm12, %v3914_v11, %v3912_v27  ;;  %v3861_v12 = vsel %vm3809_vm6, %v3860_v24, %v3859_v47  ;;  %v3932_v41 = vperm.slane %v10996_v26, %v9386_v16  ;;  %v11003_v24 = vld [vmem:[#allocation46_spill] sm:$0xff]  ;;  %v11011_v26 = vld [vmem:[#allocation13_spill] sm:$0xff] }
0x1213   :  { %v3873_v29 = vsel %vm3872_vm11, %v3849_v38, %v3871_v18  ;;  %v3920_v38 = vsel %vm3919_vm14, %v3918_v50, %v3916_v23  ;;  %v3922_v62 = vperm.slane %v10998_v13, %v9412_v42  ;;  %v3940_v45 = vperm.slane %v10999_v20, %v9372_v2  ;;  %v11005_v50 = vld [vmem:[#allocation96_spill] sm:$0xff]  ;;  %v11006_v23 = vld [vmem:[#allocation105_spill] sm:$0xff] }
0x1214   :  { %v9422_v39 = vsel %vm3874_vm13, %v3856_v54, %v3873_v29  ;;  %v9438_v33 = vpop.xlane.xlu0 %3724  ;;  %v3929_v18 = vsel %vm3919_vm14, %v3928_v55, %v3927_v51  ;;  %v3934_v5 = vsel %vm3915_vm12, %v3933_v1, %v3932_v41  ;;  %v3942_v11 = vperm.slane %v11000_v46, %v9392_v17  ;;  %v11002_v54 = vld [vmem:[#allocation90_spill] sm:$0xff]  ;;  %v11007_v55 = vld [vmem:[#allocation37_spill] sm:$0xff]  ;;  %v11008_v1 = vld [vmem:[#allocation111_spill] sm:$0xff] }
0x1215   :  { %v3936_v49 = vsel %vm3919_vm14, %v3935_v40, %v3934_v5  ;;  %v3939_v61 = vperm.slane %v11001_v4, %v9386_v16  ;;  %v3944_v36 = vperm.slane %v11002_v54, %v9412_v42  ;;  %v3947_v63 = vperm.slane %v11003_v24, %v9372_v2  ;;  %v11010_v40 = vld [vmem:[#allocation52_spill] sm:$0xff]  ;;  %v11014_v24 = vld [vmem:[#allocation171_spill] sm:$0xff] }
0x1216   :  { %v9450_v29 = vpop.xlane.xlu2 %3727  ;;  %v3931_v27 = vsel %vm3923_vm15, %v3930_v34, %v3929_v18  ;;  %v3938_v6 = vsel %vm3923_vm15, %v3937_v53, %v3936_v49  ;;  %v3949_v0 = vperm.slane %v11004_v37, %v9392_v17  ;;  %v3954_v25 = vperm.slane %v11005_v50, %v9372_v2  ;;  %v11013_v54 = vld [vmem:[#allocation152_spill] sm:$0xff]  ;;  %v11016_v37 = vld [vmem:[#allocation181_spill] sm:$0xff] }
0x1217   :  { %v3941_v43 = vsel %vm3915_vm12, %v3940_v45, %v3939_v61  ;;  %v3946_v60 = vperm.slane %v11006_v23, %v9386_v16  ;;  %v3951_v31 = vperm.slane %v11007_v55, %v9412_v42  ;;  %v3956_v47 = vperm.slane %v11008_v1, %v9392_v17  ;;  %v11017_v23 = vld [vmem:[#allocation175_spill] sm:$0xff]  ;;  %v11018_v55 = vld [vmem:[#allocation113_spill] sm:$0xff] }
0x1218   :  { %v3943_v32 = vsel %vm3919_vm14, %v3942_v11, %v3941_v43  ;;  %v3953_v57 = vperm.slane %v11009_v35, %v9386_v16  ;;  %v3958_v52 = vperm.slane %v11010_v40, %v9412_v42  ;;  %v9478_v34 = vadd.s32 4294967232, %v9193_v15  ;;  %v9485_v51 = vpop.xlane.xlu1 %3733  ;;  %v11012_v11 = vld [vmem:[#allocation166_spill] sm:$0xff] }
0x1219   :  { %v3862_v41 = vperm.slane %v11011_v26, %v9296_v7  ;;  %v3924_v59 = vsel %vm3923_vm15, %v3922_v62, %v3920_v38  ;;  %v3945_v53 = vsel %vm3923_vm15, %v3944_v36, %v3943_v32  ;;  %v3948_v13 = vsel %vm3915_vm12, %v3947_v63, %v3946_v60 }
0x121a   :  { %v3974_v20 = vsel %vm3864_vm4, %v3931_v27, %v3924_v59  ;;  %v3950_v45 = vsel %vm3919_vm14, %v3949_v0, %v3948_v13  ;;  %v3955_v18 = vsel %vm3915_vm12, %v3954_v25, %v3953_v57  ;;  %v9491_v5 = vadd.s32 4294967224, %v9193_v15  ;;  %v11015_v27 = vld [vmem:[#allocation162_spill] sm:$0xff]  ;;  %v11021_v59 = vld [vmem:[#allocation203_spill] sm:$0xff] }
0x121b   :  { %v3975_v7 = vsel %vm3866_vm8, %v3938_v6, %v3974_v20  ;;  %v3952_v38 = vsel %vm3923_vm15, %v3951_v31, %v3950_v45  ;;  %v3957_v62 = vsel %vm3919_vm14, %v3956_v47, %v3955_v18  ;;  %v3961_v49 = vperm.slane %v11012_v11, %v9372_v2  ;;  %v11022_v13 = vld [vmem:[#allocation54_spill] sm:$0xff]  ;;  %v11023_v20 = vld [vmem:[#allocation204_spill] sm:$0xff] }
0x121c   :  { %v9493_v46 = vpop.xlane.xlu0 %3736  ;;  %v3976_v4 = vsel %vm3868_vm9, %v3945_v53, %v3975_v7  ;;  %v3959_v61 = vsel %vm3923_vm15, %v3958_v52, %v3957_v62  ;;  %v3963_v36 = vperm.slane %v11013_v54, %v9392_v17  ;;  %v4015_v63 = vperm.slane %v11014_v24, %v9478_v34  ;;  %v11025_v62 = vld [vmem:[#allocation38_spill] sm:$0xff] }
0x121d   :  { %v3960_v6 = vperm.slane %v11015_v27, %v9386_v16  ;;  %v3965_v0 = vperm.slane %v11016_v37, %v9412_v42  ;;  %v9511_v50 = vadd.s32 4294967216, %v9193_v15  ;;  %vm4018_vm0 = vcmask 654912   ;;  %v11028_v27 = vld [vmem:[#allocation84_spill] sm:$0xff] }
0x121e   :  { %v9514_v25 = vsel %vm3813_vm7, %v3862_v41, %v3861_v12  ;;  %v3977_v43 = vsel %vm3870_vm10, %v3952_v38, %v3976_v4  ;;  %v3968_v60 = vperm.slane %v11017_v23, %v9372_v2  ;;  %v4017_v31 = vperm.slane %v11018_v55, %v9491_v5  ;;  %v9521_v1 = vpop.xlane.xlu2 %3730  ;;  %v11019_v12 = vld [vmem:[#allocation211_spill] sm:$0xff]  ;;  %v11020_v2 = vld [vmem:[#allocation185_spill] sm:$0xff] }
0x121f   :  { %v9524_v47 = vsel %vm3872_vm11, %v3959_v61, %v3977_v43  ;;  %v3962_v32 = vsel %vm3915_vm12, %v3961_v49, %v3960_v6  ;;  %v9528_v35 = vadd.s32 4294967208, %v9193_v15  ;;  %v4029_v57 = vperm.slane %v11019_v12, %v9491_v5  ;;  %v11026_v49 = vld [vmem:[#allocation221_spill] sm:$0xff]  ;;  %v11031_v43 = vld [vmem:[#allocation138_spill] sm:$0xff] }
0x1220   :  { %v3964_v40 = vsel %vm3919_vm14, %v3963_v36, %v3962_v32  ;;  %v3967_v52 = vperm.slane %v11020_v2, %v9386_v16  ;;  %v4019_v26 = vsel %vm4018_vm0, %v4017_v31, %v4015_v63  ;;  %vm4022_vm5 = vcmask 720512   ;;  %v9543_v18 = vpop.xlane.xlu1 %3739  ;;  %v11024_v16 = vld [vmem:[#allocation130_spill] sm:$0xff]  ;;  %v11027_v36 = vld [vmem:[#allocation193_spill] sm:$0xff]  ;;  %v11033_v32 = vld [vmem:[#allocation172_spill] sm:$0xff] }
0x1221   :  { %v3966_v41 = vsel %vm3923_vm15, %v3965_v0, %v3964_v40  ;;  %v4021_v53 = vperm.slane %v11021_v59, %v9511_v50  ;;  %v4028_v15 = vperm.slane %v11022_v13, %v9478_v34  ;;  %v4031_v45 = vperm.slane %v11023_v20, %v9511_v50  ;;  %v11036_v59 = vld [vmem:[#allocation139_spill] sm:$0xff]  ;;  %v11037_v13 = vld [vmem:[#allocation88_spill] sm:$0xff] }
0x1222   :  { %v3969_v7 = vsel %vm3915_vm12, %v3968_v60, %v3967_v52  ;;  %v3970_v38 = vperm.slane %v11024_v16, %v9392_v17  ;;  %v3972_v11 = vperm.slane %v11025_v62, %v9412_v42  ;;  %v4036_v4 = vperm.slane %v11026_v49, %v9491_v5  ;;  %v11029_v17 = vld [vmem:[#allocation144_spill] sm:$0xff]  ;;  %v11030_v42 = vld [vmem:[#allocation167_spill] sm:$0xff]  ;;  %v11032_v60 = vld [vmem:[#allocation21_spill] sm:$0xff] }
0x1223   :  { %v4023_v54 = vsel %vm4022_vm5, %v4021_v53, %v4019_v26  ;;  %v4025_v24 = vperm.slane %v11027_v36, %v9528_v35  ;;  %v4030_v63 = vsel %vm4018_vm0, %v4029_v57, %v4028_v15  ;;  %v4038_v6 = vperm.slane %v11028_v27, %v9511_v50  ;;  %v11034_v57 = vld [vmem:[#allocation19_spill] sm:$0xff]  ;;  %v11035_v52 = vld [vmem:[#allocation56_spill] sm:$0xff]  ;;  %v11038_v16 = vld [vmem:[#allocation69_spill] sm:$0xff] }
0x1224   :  { %v9552_v61 = vpop.xlane.xlu0 %3745  ;;  %v4033_v37 = vperm.slane %v11029_v17, %v9528_v35  ;;  %v4035_v0 = vperm.slane %v11030_v42, %v9478_v34  ;;  %v4040_v23 = vperm.slane %v11031_v43, %v9528_v35  ;;  %v4043_v55 = vperm.slane %v11032_v60, %v9491_v5  ;;  %v11039_v49 = vld [vmem:[#allocation154_spill] sm:$0xff]  ;;  %v11040_v36 = vld [vmem:[#allocation161_spill] sm:$0xff] }
0x1225   :  { %vm4026_vm6 = vcmask 786112   ;;  %v4032_v31 = vsel %vm4022_vm5, %v4031_v45, %v4030_v63  ;;  %v4045_v12 = vperm.slane %v11033_v32, %v9511_v50  ;;  %v4050_v40 = vperm.slane %v11034_v57, %v9491_v5  ;;  %v11042_v32 = vld [vmem:[#allocation180_spill] sm:$0xff] }
0x1226   :  { %v4037_v2 = vsel %vm4018_vm0, %v4036_v4, %v4035_v0  ;;  %v4042_v26 = vperm.slane %v11035_v52, %v9478_v34  ;;  %v4047_v53 = vperm.slane %v11036_v59, %v9528_v35  ;;  %v4052_v15 = vperm.slane %v11037_v13, %v9511_v50  ;;  %v9580_v20 = vpop.xlane.xlu2 %3748  ;;  %v11041_v0 = vld [vmem:[#allocation93_spill] sm:$0xff]  ;;  %v11044_v13 = vld [vmem:[#allocation191_spill] sm:$0xff] }
0x1227   :  { %vm3876_vm7 = vcmask 1047559   ;;  %v4039_v45 = vsel %vm4022_vm5, %v4038_v6, %v4037_v2  ;;  %v4049_v62 = vperm.slane %v11038_v16, %v9478_v34  ;;  %v4054_v4 = vperm.slane %v11039_v49, %v9528_v35  ;;  %v11043_v2 = vld [vmem:[#allocation64_spill] sm:$0xff] }
0x1228   :  { %v4057_v63 = vperm.slane %v11040_v36, %v9491_v5  ;;  %v4034_v27 = vsel %vm4026_vm6, %v4033_v37, %v4032_v31  ;;  %v4041_v17 = vsel %vm4026_vm6, %v4040_v23, %v4039_v45  ;;  %v4044_v42 = vsel %vm4018_vm0, %v4043_v55, %v4042_v26  ;;  %v9611_v16 = vpop.xlane.xlu1 %3742  ;;  %v11046_v49 = vld [vmem:[#allocation112_spill] sm:$0xff] }
0x1229   :  { %v4059_v43 = vperm.slane %v11041_v0, %v9511_v50  ;;  %v4046_v6 = vsel %vm4022_vm5, %v4045_v12, %v4044_v42  ;;  %v4051_v60 = vsel %vm4018_vm0, %v4050_v40, %v4049_v62  ;;  %v4056_v57 = vperm.slane %v11042_v32, %v9478_v34  ;;  %v11048_v42 = vld [vmem:[#allocation87_spill] sm:$0xff] }
0x122a   :  { %v4061_v52 = vperm.slane %v11043_v2, %v9528_v35  ;;  %v3971_v59 = vsel %vm3919_vm14, %v3970_v38, %v3969_v7  ;;  %v4027_v37 = vsel %vm4026_vm6, %v4025_v24, %v4023_v54  ;;  %v4048_v23 = vsel %vm4026_vm6, %v4047_v53, %v4046_v6  ;;  %v11045_v24 = vld [vmem:[#allocation135_spill] sm:$0xff] }
0x122b   :  { %v4053_v55 = vsel %vm4022_vm5, %v4052_v15, %v4051_v60  ;;  %v4077_v12 = vsel %vm3864_vm4, %v4034_v27, %v4027_v37  ;;  %v4058_v26 = vsel %vm4018_vm0, %v4057_v63, %v4056_v57  ;;  %v4064_v45 = vperm.slane %v11044_v13, %v9491_v5  ;;  %v11047_v27 = vld [vmem:[#allocation164_spill] sm:$0xff] }
0x122c   :  { %v4055_v40 = vsel %vm4026_vm6, %v4054_v4, %v4053_v55  ;;  %v3973_v7 = vsel %vm3923_vm15, %v3972_v11, %v3971_v59  ;;  %v4078_v38 = vsel %vm3866_vm8, %v4041_v17, %v4077_v12  ;;  %v4060_v54 = vsel %vm4022_vm5, %v4059_v43, %v4058_v26  ;;  %v11051_v12 = vld [vmem:[#allocation210_spill] sm:$0xff] }
0x122d   :  { %v4066_v53 = vperm.slane %v11045_v24, %v9511_v50  ;;  %v4079_v15 = vsel %vm3868_vm9, %v4048_v23, %v4078_v38  ;;  %v4062_v62 = vsel %vm4026_vm6, %v4061_v52, %v4060_v54  ;;  %v4063_v4 = vperm.slane %v11046_v49, %v9478_v34  ;;  %v11050_v23 = vld [vmem:[#allocation125_spill] sm:$0xff] }
0x122e   :  { %v4138_v36 = vperm.slane %v9283_v14, %v9199_v22  ;;  %v3979_v11 = vsel %vm3874_vm13, %v3966_v41, %v9524_v47  ;;  %v4080_v63 = vsel %vm3870_vm10, %v4055_v40, %v4079_v15  ;;  %v4068_v17 = vperm.slane %v11047_v27, %v9528_v35 }
0x122f   :  { %v4071_v0 = vperm.slane %v11048_v42, %v9491_v5  ;;  %v4065_v6 = vsel %vm4018_vm0, %v4064_v45, %v4063_v4  ;;  %v4139_v60 = vperm.slane %v9288_v19, %v9202_v44  ;;  %v4146_v14 = vperm.slane %v9365_v58, %v9202_v44  ;;  %v11049_v5 = vld [vmem:[#allocation199_spill] sm:$0xff] }
0x1230   :  { %v4153_v47 = vperm.slane %v9438_v33, %v9202_v44  ;;  %v3980_v41 = vsel %vm3876_vm7, %v3973_v7, %v3979_v11  ;;  %v4081_v32 = vsel %vm3872_vm11, %v4062_v62, %v4080_v63  ;;  %v4067_v57 = vsel %vm4022_vm5, %v4066_v53, %v4065_v6 }
0x1231   :  { %v4070_v2 = vperm.slane %v11049_v5, %v9478_v34  ;;  %v4140_v52 = vsel %vm4121_vm1, %v4139_v60, %v4138_v36  ;;  %v4145_v19 = vperm.slane %v9327_v21, %v9199_v22  ;;  %v4152_v58 = vperm.slane %v9429_v28, %v9199_v22 }
0x1232   :  { %v4148_v33 = vperm.slane %v9374_v8, %v9230_v48  ;;  %v4069_v59 = vsel %vm4026_vm6, %v4068_v17, %v4067_v57  ;;  %v4073_v55 = vperm.slane %v11050_v23, %v9511_v50  ;;  %v4141_v34 = vperm.slane %v9312_v10, %v9230_v48 }
0x1233   :  { %v4072_v37 = vsel %vm4018_vm0, %v4071_v0, %v4070_v2  ;;  %vm4188_vm4 = vcmask 261120   ;;  %v4075_v21 = vperm.slane %v11051_v12, %v9528_v35  ;;  %v4147_v40 = vsel %vm4121_vm1, %v4146_v14, %v4145_v19 }
0x1234   :  { %v9604_v31 = vpop.xlane.xlu0 %3751  ;;  %v4143_v28 = vperm.slane %v9319_v56, %v9227_v9  ;;  %v4154_v8 = vsel %vm4121_vm1, %v4153_v47, %v4152_v58  ;;  %v4142_v13 = vsel %vm4125_vm2, %v4141_v34, %v4140_v52  ;;  %v4150_v50 = vperm.slane %v9388_v3, %v9227_v9 }
0x1235   :  { %v4155_v10 = vperm.slane %v9450_v29, %v9230_v48  ;;  %v4160_v45 = vperm.slane %v9493_v46, %v9202_v44  ;;  %v4149_v7 = vsel %vm4125_vm2, %v4148_v33, %v4147_v40  ;;  %v4157_v56 = vperm.slane %v9521_v1, %v9227_v9 }
0x1236   :  { %v4162_v38 = vperm.slane %v9543_v18, %v9230_v48  ;;  %v4167_v54 = vperm.slane %v9580_v20, %v9202_v44  ;;  %v4159_v29 = vperm.slane %v9485_v51, %v9199_v22  ;;  %v4164_v46 = vperm.slane %v9611_v16, %v9227_v9 }
0x1237   :  { %v4156_v3 = vsel %vm4125_vm2, %v4155_v10, %v4154_v8  ;;  %v4169_v24 = vperm.slane %v9604_v31, %v9230_v48  ;;  %v4074_v1 = vsel %vm4022_vm5, %v4073_v55, %v4072_v37  ;;  %v4144_v15 = vsel %vm4129_vm3, %v4143_v28, %v4142_v13 }
0x1238   :  { %v4166_v18 = vperm.slane %v9552_v61, %v9199_v22  ;;  %v4076_v62 = vsel %vm4026_vm6, %v4075_v21, %v4074_v1  ;;  %v4151_v51 = vsel %vm4129_vm3, %v4150_v50, %v4149_v7  ;;  %v4161_v49 = vsel %vm4121_vm1, %v4160_v45, %v4159_v29 }
0x1239   :  { %v4158_v31 = vsel %vm4129_vm3, %v4157_v56, %v4156_v3  ;;  %v4163_v4 = vsel %vm4125_vm2, %v4162_v38, %v4161_v49  ;;  %v4181_v61 = vsel %vm3866_vm8, %v4144_v15, %v9260_v30  ;;  %v4082_v42 = vsel %vm3874_vm13, %v4069_v59, %v4081_v32 }
0x123a   :  { %v4168_v36 = vsel %vm4121_vm1, %v4167_v54, %v4166_v18  ;;  %v4165_v63 = vsel %vm4129_vm3, %v4164_v46, %v4163_v4  ;;  %vm4190_vm12 = vcmask 523264   ;;  %v4083_v60 = vsel %vm3876_vm7, %v4076_v62, %v4082_v42 }
0x123b   :  { %v4170_v27 = vsel %vm4125_vm2, %v4169_v24, %v4168_v36  ;;  %vm4192_vm8 = vcmask 785408  }
0x1243   :  { %v3755_v35 = vpop.xlane.xlu0 %3754 }
0x1244   :  { %v4171_v20 = vperm.slane %v3755_v35, %v9227_v9 }
0x1246   :  { %v4172_v0 = vsel %vm4129_vm3, %v4171_v20, %v4170_v27 }
0x1252   :  { %v3758_v43 = vpop.xlane.xlu2 %3757 }
0x1253   :  { %v4173_v17 = vperm.slane %v3758_v43, %v9199_v22  ;;  %v3877_v22 = vsel %vm3876_vm7, %v9514_v25, %v9422_v39 }
0x1254   :  { %v4189_v32 = vsel %vm4188_vm4, %v3877_v22, %v3980_v41 }
0x1255   :  { %v4191_v2 = vsel %vm4190_vm12, %v4189_v32, %v4083_v60 }
0x1261   :  { %v3761_v26 = vpop.xlane.xlu1 %3760 }
0x1262   :  { %v4174_v16 = vperm.slane %v3761_v26, %v9202_v44  ;;  %v4182_v44 = vsel %vm3868_vm9, %v4151_v51, %v4181_v61 }
0x1264   :  { %v4175_v30 = vsel %vm4121_vm1, %v4174_v16, %v4173_v17 }
0x1270   :  { %v3764_v53 = vpop.xlane.xlu2 %3763 }
0x1271   :  { %v4176_v11 = vperm.slane %v3764_v53, %v9230_v48  ;;  %v4183_v48 = vsel %vm3870_vm10, %v4158_v31, %v4182_v44 }
0x1272   :  { %v4184_v43 = vsel %vm3872_vm11, %v4165_v63, %v4183_v48 }
0x1273   :  { %v4177_v47 = vsel %vm4125_vm2, %v4176_v11, %v4175_v30  ;;  %v4185_v57 = vsel %vm3874_vm13, %v4172_v0, %v4184_v43 }
0x127f   :  { %v3767_v6 = vpop.xlane.xlu1 %3766 }
0x1280   :  { %v4178_v14 = vperm.slane %v3767_v6, %v9227_v9 }
0x1282   :  { %v4179_v5 = vsel %vm4129_vm3, %v4178_v14, %v4177_v47 }
0x1283   :  { %v4186_v52 = vsel %vm3876_vm7, %v4179_v5, %v4185_v57 }
0x1284   :  { %v4193_v19 = vsel %vm4192_vm8, %v4191_v2, %v4186_v52 }
0x1285   :  { %4194 = vst [vmem:[#allocation5] sm:$0xff] %v4193_v19 }
0x1286   :  { %4198 = vsyncadd [#allocation4], 112  ;;  %s4201_s0 = sshll.u32 %s9723_s1, 4  ;;  %s4335_s14 = smov [#allocation5]   ;;  %s4202_s0 = int_to_ptr.hbm [resolvable:$true] %s4201_s0 }
0x1287   :  { %s4199_s15 = sshll.u32 %s4335_s14, 4  ;;  %s4336_s16 = smov 1   ;;  %s4200_s15 = int_to_ptr.vmem [resolvable:$true] %s4199_s15 }
0x1288   :  { %4207 = dma.vmem_to_hbm [thread:$0]  %s4200_s15, 16, %s4202_s0, [#allocation4], %s10188_s6, %s10188_s6, %s4336_s16  }
0x1289   :  { %4301 = dma.done.wait [#allocation4], 128  }
0x128a   :  { %4302 = vsyncadd [#allocation4], 4294967168 }
0x128b   :  { %4212 = vsyncpa [#allocation3], 1 }
0x128c   :  { %4213 = vsyncpa [#allocation4], 1 }

</bundles_post_ra>
